<compile_context>
chip_gen: v5e
topology: v5e:2x2
jax: 0.10.0
libtpu: 0.0.40
codegen_flags: <defaults>
</compile_context>

<pallas_src>
import jax
import jax.numpy as jnp
import numpy as np
from jax.experimental import pallas as pl
from jax.experimental.pallas import tpu as pltpu

_EPS = 1e-8


def _rup(x, m):
    return ((x + m - 1) // m) * m


def _num_tensorcores():
    """2 on chips with two TensorCores per Pallas device (v4/v5p megacore, v7x)."""
    try:
        kind = jax.devices()[0].device_kind.lower()
    except Exception:
        return 1
    return 2 if any(t in kind for t in ("v4", "v5p", "v7")) else 1


def gbp_message_passing(x_scalar, x_vector, edge_index, edge_scalar, edge_vector,
                        p1, p2, *, S_out, V_out, TE=None, n_parts=None):
    """Pallas implementation of GBPMessagePassing.forward (mean aggregation).

    p1 / p2: dicts with keys wd [C_in,H], ws_s [S_in,S_out], ws_v [H,S_out],
    bs [1,S_out], wu [H,V_out], wg [S_out,V_out], bg [1,V_out].
    """
    f32 = jnp.float32
    bf16 = jnp.bfloat16
    N = x_scalar.shape[0]
    j, i = edge_index[0], edge_index[1]

    # gather + ScalarVector.concat((edge_attr, (s_i, v_i)))  -> order (j, edge, i)
    # TODO(synk): for very large E, assemble the per-edge messages inside the kernel
    # (scalar-prefetched indices + pl.Element row gather) instead of materializing
    # s_msg / v_msg in HBM here.
    s_msg = jnp.concatenate([x_scalar[j], edge_scalar, x_scalar[i]], axis=-1).astype(f32)
    v_msg = jnp.concatenate([x_vector[j], edge_vector, x_vector[i]], axis=1)   # [E, Vm, 3]
    v_msg = jnp.transpose(v_msg, (2, 0, 1)).astype(f32)                        # [3, E, Vm]

    E = s_msg.shape[0]
    Sm = s_msg.shape[-1]
    Vm = v_msg.shape[-1]

    # ---- common hidden width (zero-padding the hidden dim is exact) ----
    H = max(p1['wd'].shape[-1], p2['wd'].shape[-1])

    def padc(w, width):   # pad last dim (columns) with zeros
        return jnp.pad(w.astype(f32), ((0, 0), (0, width - w.shape[-1])))

    def padr(w, rows):    # pad first dim (rows) with zeros
        return jnp.pad(w.astype(f32), ((0, rows - w.shape[0]), (0, 0)))

    wd1 = padc(p1['wd'], H)
    wd2 = padc(p2['wd'], H)
    # fused scalar-path weight: rows = [Ws_s ; Ws_v] matching cat([s, vnorm]) lanes
    ws1 = jnp.concatenate([p1['ws_s'].astype(f32), padr(p1['ws_v'], H)], axis=0)
    ws2 = jnp.concatenate([p2['ws_s'].astype(f32), padr(p2['ws_v'], H)], axis=0)
    wu1 = padr(p1['wu'], H)
    wu2 = padr(p2['wu'], H)

    # ---- pack weights/biases into 3 arrays (grouped by output width) ----
    def pack(blocks):
        offs, rows = [], 0
        for b in blocks:
            offs.append(rows)
            rows += _rup(b.shape[0], 8)
        packed = jnp.zeros((_rup(rows, 8), blocks[0].shape[1]), f32)
        for off, b in zip(offs, blocks):
            packed = packed.at[off:off + b.shape[0]].set(b.astype(f32))
        return packed, offs

    w_d, offs_d = pack([wd1, wd2])                                            # width H
    w_s, offs_s = pack([ws1, p1['bs'], ws2, p2['bs']])                        # width S_out
    w_v, offs_v = pack([wu1, p1['wg'], p1['bg'], wu2, p2['wg'], p2['bg']])    # width V_out

    # ---- per-chip defaults: parts / edge tile ----
    if n_parts is None:
        n_parts = _num_tensorcores()          # 1 on v5e/v6e, 2 on v4/v5p/v7x
    if TE is None:
        TE = 512 if E >= 16 * 512 * n_parts else 256
    TE = max(8, _rup(TE, 8))
    # keep >= 4 grid steps per core so BlockSpec double-buffering can overlap DMA
    while TE > 8 and -(-E // TE) < 4 * n_parts:
        TE = max(8, _rup(TE // 2, 8))

    n_tiles = _rup(max(1, -(-E // TE)), n_parts)
    tiles_per_part = n_tiles // n_parts
    E_pad = n_tiles * TE
    pad = E_pad - E
    s_msg = jnp.pad(s_msg, ((0, pad), (0, 0)))
    v_msg = jnp.pad(v_msg, ((0, 0), (0, pad), (0, 0)))

    N_pad = _rup(N, 8)
    # padded edges point at N_pad -> never hit the one-hot (iota range [0, N_pad))
    idx = jnp.pad(i.astype(jnp.int32), (0, pad), constant_values=N_pad)
    # lane-major index tiles, replicated over 8 sublanes so the (8, TE) block is a
    # single contiguous DMA and the one-hot needs no in-kernel transpose.
    idx = jnp.broadcast_to(idx.reshape(n_tiles, 1, TE), (n_tiles, 8, TE))

    # ---- lane-dense output slab layout: [scalars | vx | vy | vz | count | pad] ----
    D_real = S_out + 3 * V_out + 1
    OUTW = _rup(max(D_real, 128), 128)

    def kernel(idx_ref, s_ref, v_ref, wd_ref, ws_ref, wv_ref, out_ref):
        e = pl.program_id(1)

        @pl.when(e == 0)
        def _():
            out_ref[...] = jnp.zeros_like(out_ref)

        def dot(a, b):
            return jnp.dot(a, b, preferred_element_type=f32)

        # -------- packed weights: static 8-aligned ref slices (row loads only) -----
        wd1_ = wd_ref[offs_d[0]:offs_d[0] + Vm, :]
        wd2_ = wd_ref[offs_d[1]:offs_d[1] + V_out, :]
        ws1_ = ws_ref[offs_s[0]:offs_s[0] + Sm + H, :]
        bs1_ = ws_ref[offs_s[1]:offs_s[1] + 1, :]
        ws2_ = ws_ref[offs_s[2]:offs_s[2] + S_out + H, :]
        bs2_ = ws_ref[offs_s[3]:offs_s[3] + 1, :]
        wu1_ = wv_ref[offs_v[0]:offs_v[0] + H, :]
        wg1_ = wv_ref[offs_v[1]:offs_v[1] + S_out, :]
        bg1_ = wv_ref[offs_v[2]:offs_v[2] + 1, :]
        wu2_ = wv_ref[offs_v[3]:offs_v[3] + H, :]
        wg2_ = wv_ref[offs_v[4]:offs_v[4] + S_out, :]
        bg2_ = wv_ref[offs_v[5]:offs_v[5] + 1, :]

        s = s_ref[...]                                   # [TE, Sm]
        # stack x/y/z planes along sublanes: layout no-op since TE % 8 == 0
        v = v_ref[...].reshape(3 * TE, Vm)

        # -------- GBP layer 1: activations (relu, sigmoid), vector_gate --------
        h = dot(v, wd1_)                                 # [3*TE, H]
        h3 = h.reshape(3, TE, H)
        vnorm1 = jnp.sqrt(jnp.sum(h3 * h3, axis=0)) + _EPS          # safe_norm over xyz
        # scalar_out(cat([s, vnorm])) as ONE MXU call against the stacked weight
        s1 = dot(jnp.concatenate([s, vnorm1], axis=-1), ws1_) + bs1_   # [TE, S_out]
        gate1 = jax.nn.sigmoid(dot(jax.nn.sigmoid(s1), wg1_) + bg1_)   # vector_act=sigmoid
        u3 = dot(h, wu1_).reshape(3, TE, V_out) * gate1[None]          # gated, plane-major
        s1 = jnp.maximum(s1, 0.0)                                       # scalar_act = relu

        # -------- GBP layer 2: activations (None, None), vector_gate --------
        h2 = dot(u3.reshape(3 * TE, V_out), wd2_)        # [3*TE, H]
        h23 = h2.reshape(3, TE, H)
        vnorm2 = jnp.sqrt(jnp.sum(h23 * h23, axis=0)) + _EPS
        s2 = dot(jnp.concatenate([s1, vnorm2], axis=-1), ws2_) + bs2_
        gate2 = jax.nn.sigmoid(dot(s2, wg2_) + bg2_)                    # vector_act = Id
        u23 = dot(h2, wu2_).reshape(3, TE, V_out) * gate2[None]
        # scalar_act = Identity for the last layer

        # -------- fused scatter-add: transpose-free [N_pad,TE] @ [TE,OUTW] bf16 ----
        pieces = [s2, u23[0], u23[1], u23[2], jnp.ones((TE, 1), f32)]  # count column
        if OUTW > D_real:
            pieces.append(jnp.zeros((TE, OUTW - D_real), f32))
        msg = jnp.concatenate(pieces, axis=-1).astype(bf16)            # [TE, OUTW]

        idx_row = idx_ref[...][0:1, :]                                 # [1, TE] int32
        onehot = (jax.lax.broadcasted_iota(jnp.int32, (N_pad, TE), 0)
                  == idx_row).astype(bf16)                             # exact in bf16
        # TODO(synk): for very large N, tile the node dimension (sort edges by dest,
        # scalar-prefetch per-tile node-window offsets) instead of a dense one-hot.
        out_ref[...] += dot(onehot, msg)                               # f32 accumulation

    edge_map = lambda c, e: (c * tiles_per_part + e, 0)
    in_specs = [
        pl.BlockSpec((None, 8, TE), lambda c, e: (c * tiles_per_part + e, 0, 0)),   # idx
        pl.BlockSpec((TE, Sm), edge_map),                                           # scalars
        pl.BlockSpec((3, TE, Vm), lambda c, e: (0, c * tiles_per_part + e, 0)),     # vectors
        pl.BlockSpec(w_d.shape, lambda c, e: (0, 0)),                               # weights
        pl.BlockSpec(w_s.shape, lambda c, e: (0, 0)),
        pl.BlockSpec(w_v.shape, lambda c, e: (0, 0)),
    ]
    out_spec = pl.BlockSpec((None, N_pad, OUTW), lambda c, e: (c, 0, 0))

    # ---- explicit VMEM budget (v7x physical VMEM is only 64 MiB per TensorCore) ----
    lane = lambda w: _rup(max(w, 1), 128)
    est = (2 * 8 * TE * 4                              # idx blocks (double-buffered)
           + 2 * TE * lane(Sm) * 4                     # scalar message blocks
           + 2 * 3 * TE * lane(Vm) * 4                 # vector message blocks
           + 2 * N_pad * OUTW * 4                      # resident accumulator
           + N_pad * lane(TE) * 2                      # bf16 one-hot
           + TE * OUTW * 6                             # msg slab f32 + bf16
           + 8 * 3 * TE * lane(max(H, V_out, S_out)) * 4   # intermediates / spill slack
           + 2 * 4 * (w_d.size + w_s.size + w_v.size)
           + (4 << 20))                                # headroom
    vmem_limit = int(min(64 << 20, max(32 << 20, est)))

    out = pl.pallas_call(
        kernel,
        out_shape=jax.ShapeDtypeStruct((n_parts, N_pad, OUTW), f32),
        grid=(n_parts, tiles_per_part),
        in_specs=in_specs,
        out_specs=out_spec,
        compiler_params=pltpu.CompilerParams(
            dimension_semantics=("parallel", "arbitrary"),
            vmem_limit_bytes=vmem_limit),
    )(idx, s_msg, v_msg, w_d, w_s, w_v)

    # combine per-core partial slabs (only if the grid was actually split) and do the
    # mean division here, since each core only sees partial counts.
    tot = out[0] if n_parts == 1 else jnp.sum(out, axis=0)
    tot = tot[:N]                                                      # [N, OUTW]
    cnt = jnp.maximum(tot[:, S_out + 3 * V_out], 1.0)
    o_s = tot[:, :S_out] / cnt[:, None]
    vx = tot[:, S_out:S_out + V_out]
    vy = tot[:, S_out + V_out:S_out + 2 * V_out]
    vz = tot[:, S_out + 2 * V_out:S_out + 3 * V_out]
    o_v = jnp.stack([vx, vy, vz], axis=-1) / cnt[:, None, None]        # [N, V_out, 3]
    return o_s, o_v


# ------------------------- pure-JAX reference (for checking) -------------------------
def _gbp_layer_ref(s, v, p, scalar_act, vector_act):
    # s: [E, S_in], v: [E, C, 3]
    v_pre = jnp.swapaxes(v, -1, -2)                      # [E, 3, C]
    h = jnp.einsum('eic,ch->eih', v_pre, p['wd'])        # vector_down
    vnorm = jnp.sqrt(jnp.sum(h * h, axis=-2)) + _EPS     # safe_norm(dim=-2)
    sr = s @ p['ws_s'] + vnorm @ p['ws_v'] + p['bs']     # scalar_out(cat([s, vnorm]))
    vr = jnp.einsum('eih,ho->eio', h, p['wu'])           # vector_up
    vr = jnp.swapaxes(vr, -1, -2)                        # [E, V_out, 3]
    gate = jax.nn.sigmoid(vector_act(sr) @ p['wg'] + p['bg'])
    vr = vr * gate[..., None]
    return scalar_act(sr), vr


def _reference(x_s, x_v, edge_index, e_s, e_v, p1, p2, S_out, V_out):
    N = x_s.shape[0]
    j, i = edge_index[0], edge_index[1]
    s = jnp.concatenate([x_s[j], e_s, x_s[i]], axis=-1)
    v = jnp.concatenate([x_v[j], e_v, x_v[i]], axis=1)
    s, v = _gbp_layer_ref(s, v, p1, jax.nn.relu, jax.nn.sigmoid)
    s, v = _gbp_layer_ref(s, v, p2, lambda x: x, lambda x: x)
    msg = jnp.concatenate([s, v.reshape(v.shape[0], 3 * V_out)], axis=-1)   # flatten
    sums = jnp.zeros((N, msg.shape[-1]), jnp.float32).at[i].add(msg)
    cnt = jnp.zeros((N,), jnp.float32).at[i].add(1.0)
    out = sums / jnp.maximum(cnt, 1.0)[:, None]
    return out[:, :S_out], out[:, S_out:].reshape(N, V_out, 3)              # recover


# ------------------------- deterministic parameter init -------------------------
def _linear(key, fan_in, fan_out):
    return jax.random.normal(key, (fan_in, fan_out), jnp.float32) / np.sqrt(fan_in)


if __name__ == "__main__":
    key = jax.random.PRNGKey(0)
    N, E = 64, 1000
    S_in, V_in = 8, 4
    S_out, V_out = 16, 8
    ES, EV = 6, 3

    Sm = 2 * S_in + ES            # 22
    Vm = 2 * V_in + EV            # 11
    H1 = max(Vm, V_out)           # 11   (bottleneck = 1)
    H2 = max(V_out, V_out)        # 8

    ks = jax.random.split(key, 24)
    p1 = dict(wd=_linear(ks[0], Vm, H1),
              ws_s=_linear(ks[1], Sm, S_out), ws_v=_linear(ks[2], H1, S_out),
              bs=0.1 * jax.random.normal(ks[3], (1, S_out), jnp.float32),
              wu=_linear(ks[4], H1, V_out),
              wg=_linear(ks[5], S_out, V_out),
              bg=0.1 * jax.random.normal(ks[6], (1, V_out), jnp.float32))
    p2 = dict(wd=_linear(ks[7], V_out, H2),
              ws_s=_linear(ks[8], S_out, S_out), ws_v=_linear(ks[9], H2, S_out),
              bs=0.1 * jax.random.normal(ks[10], (1, S_out), jnp.float32),
              wu=_linear(ks[11], H2, V_out),
              wg=_linear(ks[12], S_out, V_out),
              bg=0.1 * jax.random.normal(ks[13], (1, V_out), jnp.float32))

    # inputs: x = ScalarVector([N, S_in], [N, V_in, 3]); edge_attr likewise per edge
    x_scalar = jax.random.normal(ks[14], (N, S_in), jnp.float32)
    x_vector = jax.random.normal(ks[15], (N, V_in, 3), jnp.float32)
    edge_scalar = jax.random.normal(ks[16], (E, ES), jnp.float32)
    edge_vector = jax.random.normal(ks[17], (E, EV, 3), jnp.float32)
    edge_index = jax.random.randint(ks[18], (2, E), 0, N, jnp.int32)

    o_s, o_v = gbp_message_passing(x_scalar, x_vector, edge_index,
                                   edge_scalar, edge_vector, p1, p2,
                                   S_out=S_out, V_out=V_out)
    jax.block_until_ready((o_s, o_v))

    r_s, r_v = _reference(x_scalar, x_vector, edge_index, edge_scalar, edge_vector,
                          p1, p2, S_out, V_out)
    # tolerance 2e-2: scatter-matmul operands are bf16 (accumulation stays f32)
    assert np.allclose(np.asarray(o_s), np.asarray(r_s), atol=2e-2, rtol=2e-2)
    assert np.allclose(np.asarray(o_v), np.asarray(r_v), atol=2e-2, rtol=2e-2)

    print("KERNEL_OK")
</pallas_src>

<mosaic_0001>
module attributes {stable_mosaic.version = 11 : i64} {
  func.func @kernel(%arg0: i32, %arg1: i32, %arg2: memref<1x8x256xi32, #tpu.memory_space<vmem>>, %arg3: memref<256x22xf32, #tpu.memory_space<vmem>>, %arg4: memref<3x256x11xf32, #tpu.memory_space<vmem>>, %arg5: memref<24x11xf32, #tpu.memory_space<vmem>>, %arg6: memref<88x16xf32, #tpu.memory_space<vmem>>, %arg7: memref<80x8xf32, #tpu.memory_space<vmem>>, %arg8: memref<1x64x128xf32, #tpu.memory_space<vmem>>) attributes {dimension_semantics = [#tpu.dimension_semantics<parallel>, #tpu.dimension_semantics<arbitrary>], iteration_bounds = array<i64: 1, 4>, scalar_prefetch = 0 : i64, scratch_operands = 0 : i64, tpu.core_type = #tpu.core_type<tc>, window_params = [{transform_indices = @transform_0, window_bounds = array<i64: 1, 8, 256>}, {transform_indices = @transform_1, window_bounds = array<i64: 256, 22>}, {transform_indices = @transform_2, window_bounds = array<i64: 3, 256, 11>}, {pipeline_mode = #tpu.pipeline_mode<synchronous>, transform_indices = @transform_3, window_bounds = array<i64: 24, 11>}, {pipeline_mode = #tpu.pipeline_mode<synchronous>, transform_indices = @transform_4, window_bounds = array<i64: 88, 16>}, {pipeline_mode = #tpu.pipeline_mode<synchronous>, transform_indices = @transform_5, window_bounds = array<i64: 80, 8>}, {transform_indices = @transform_6, window_bounds = array<i64: 1, 64, 128>}]} {
    %c0_i32 = arith.constant 0 : i32
    %0 = arith.cmpi eq, %arg1, %c0_i32 : i32
    %1 = arith.extui %0 : i1 to i32
    %c0_i32_0 = arith.constant 0 : i32
    %2 = arith.cmpi ne, %1, %c0_i32_0 : i32
    scf.if %2 {
      %cst_49 = arith.constant 0.000000e+00 : f32
      %100 = vector.broadcast %cst_49 : f32 to vector<64x128xf32>
      %c0_50 = arith.constant 0 : index
      %c0_51 = arith.constant 0 : index
      %c0_52 = arith.constant 0 : index
      %101 = vector.load %arg8[%c0_50, %c0_51, %c0_52] : memref<1x64x128xf32, #tpu.memory_space<vmem>>, vector<1x64x128xf32>
      %102 = vector.shape_cast %101 : vector<1x64x128xf32> to vector<64x128xf32>
      %103 = vector.shape_cast %100 : vector<64x128xf32> to vector<1x64x128xf32>
      tpu.vector_store %arg8[%c0_50, %c0_51, %c0_52], %103 {strides = array<i32>} : memref<1x64x128xf32, #tpu.memory_space<vmem>>, vector<1x64x128xf32>,
    } else {
    }
    %c0 = arith.constant 0 : index
    %c0_1 = arith.constant 0 : index
    %3 = vector.load %arg5[%c0, %c0_1] : memref<24x11xf32, #tpu.memory_space<vmem>>, vector<11x11xf32>
    %c16 = arith.constant 16 : index
    %c0_2 = arith.constant 0 : index
    %4 = vector.load %arg5[%c16, %c0_2] : memref<24x11xf32, #tpu.memory_space<vmem>>, vector<8x11xf32>
    %c0_3 = arith.constant 0 : index
    %c0_4 = arith.constant 0 : index
    %5 = vector.load %arg6[%c0_3, %c0_4] : memref<88x16xf32, #tpu.memory_space<vmem>>, vector<33x16xf32>
    %c40 = arith.constant 40 : index
    %c0_5 = arith.constant 0 : index
    %6 = vector.load %arg6[%c40, %c0_5] : memref<88x16xf32, #tpu.memory_space<vmem>>, vector<1x16xf32>
    %c48 = arith.constant 48 : index
    %c0_6 = arith.constant 0 : index
    %7 = vector.load %arg6[%c48, %c0_6] : memref<88x16xf32, #tpu.memory_space<vmem>>, vector<27x16xf32>
    %c80 = arith.constant 80 : index
    %c0_7 = arith.constant 0 : index
    %8 = vector.load %arg6[%c80, %c0_7] : memref<88x16xf32, #tpu.memory_space<vmem>>, vector<1x16xf32>
    %c0_8 = arith.constant 0 : index
    %c0_9 = arith.constant 0 : index
    %9 = vector.load %arg7[%c0_8, %c0_9] : memref<80x8xf32, #tpu.memory_space<vmem>>, vector<11x8xf32>
    %c16_10 = arith.constant 16 : index
    %c0_11 = arith.constant 0 : index
    %10 = vector.load %arg7[%c16_10, %c0_11] : memref<80x8xf32, #tpu.memory_space<vmem>>, vector<16x8xf32>
    %c32 = arith.constant 32 : index
    %c0_12 = arith.constant 0 : index
    %11 = vector.load %arg7[%c32, %c0_12] : memref<80x8xf32, #tpu.memory_space<vmem>>, vector<1x8xf32>
    %c40_13 = arith.constant 40 : index
    %c0_14 = arith.constant 0 : index
    %12 = vector.load %arg7[%c40_13, %c0_14] : memref<80x8xf32, #tpu.memory_space<vmem>>, vector<11x8xf32>
    %c56 = arith.constant 56 : index
    %c0_15 = arith.constant 0 : index
    %13 = vector.load %arg7[%c56, %c0_15] : memref<80x8xf32, #tpu.memory_space<vmem>>, vector<16x8xf32>
    %c72 = arith.constant 72 : index
    %c0_16 = arith.constant 0 : index
    %14 = vector.load %arg7[%c72, %c0_16] : memref<80x8xf32, #tpu.memory_space<vmem>>, vector<1x8xf32>
    %c0_17 = arith.constant 0 : index
    %c0_18 = arith.constant 0 : index
    %15 = vector.load %arg3[%c0_17, %c0_18] : memref<256x22xf32, #tpu.memory_space<vmem>>, vector<256x22xf32>
    %c0_19 = arith.constant 0 : index
    %c0_20 = arith.constant 0 : index
    %c0_21 = arith.constant 0 : index
    %16 = vector.load %arg4[%c0_19, %c0_20, %c0_21] : memref<3x256x11xf32, #tpu.memory_space<vmem>>, vector<3x256x11xf32>
    %17 = vector.shape_cast %16 : vector<3x256x11xf32> to vector<768x11xf32>
    %cst = arith.constant dense<0.000000e+00> : vector<768x11xf32>
    %18 = tpu.matmul %17, %3, %cst {dimension_numbers = #tpu.dot_dimension_numbers<[1], [0], [0], [1], [0, 0, 1, 1], [], []>} : vector<768x11xf32>, vector<11x11xf32>, vector<768x11xf32> -> vector<768x11xf32>
    %19 = vector.shape_cast %18 : vector<768x11xf32> to vector<3x256x11xf32>
    %20 = arith.mulf %19, %19 : vector<3x256x11xf32>
    %cst_22 = arith.constant dense<0.000000e+00> : vector<256x11xf32>
    %21 = vector.multi_reduction <add>, %20, %cst_22 [0] : vector<3x256x11xf32> to vector<256x11xf32>
    %22 = math.sqrt %21 : vector<256x11xf32>
    %cst_23 = arith.constant 9.99999993E-9 : f32
    %23 = vector.broadcast %cst_23 : f32 to vector<256x11xf32>
    %24 = arith.addf %22, %23 : vector<256x11xf32>
    %25 = tpu.concatenate %15, %24 in 1 : vector<256x22xf32>, vector<256x11xf32> -> vector<256x33xf32>
    %cst_24 = arith.constant dense<0.000000e+00> : vector<256x16xf32>
    %26 = tpu.matmul %25, %5, %cst_24 {dimension_numbers = #tpu.dot_dimension_numbers<[1], [0], [0], [1], [0, 0, 1, 1], [], []>} : vector<256x33xf32>, vector<33x16xf32>, vector<256x16xf32> -> vector<256x16xf32>
    %27 = vector.broadcast %6 : vector<1x16xf32> to vector<256x16xf32>
    %28 = arith.addf %26, %27 : vector<256x16xf32>
    %29 = arith.negf %28 : vector<256x16xf32>
    %30 = math.exp %29 : vector<256x16xf32>
    %cst_25 = arith.constant 1.000000e+00 : f32
    %31 = vector.broadcast %cst_25 : f32 to vector<256x16xf32>
    %32 = arith.addf %31, %30 : vector<256x16xf32>
    %33 = arith.divf %31, %32 : vector<256x16xf32>
    %cst_26 = arith.constant dense<0.000000e+00> : vector<256x8xf32>
    %34 = tpu.matmul %33, %10, %cst_26 {dimension_numbers = #tpu.dot_dimension_numbers<[1], [0], [0], [1], [0, 0, 1, 1], [], []>} : vector<256x16xf32>, vector<16x8xf32>, vector<256x8xf32> -> vector<256x8xf32>
    %35 = vector.broadcast %11 : vector<1x8xf32> to vector<256x8xf32>
    %36 = arith.addf %34, %35 : vector<256x8xf32>
    %37 = arith.negf %36 : vector<256x8xf32>
    %38 = math.exp %37 : vector<256x8xf32>
    %cst_27 = arith.constant 1.000000e+00 : f32
    %39 = vector.broadcast %cst_27 : f32 to vector<256x8xf32>
    %40 = arith.addf %39, %38 : vector<256x8xf32>
    %41 = arith.divf %39, %40 : vector<256x8xf32>
    %cst_28 = arith.constant dense<0.000000e+00> : vector<768x8xf32>
    %42 = tpu.matmul %18, %9, %cst_28 {dimension_numbers = #tpu.dot_dimension_numbers<[1], [0], [0], [1], [0, 0, 1, 1], [], []>} : vector<768x11xf32>, vector<11x8xf32>, vector<768x8xf32> -> vector<768x8xf32>
    %43 = vector.shape_cast %42 : vector<768x8xf32> to vector<3x256x8xf32>
    %44 = vector.shape_cast %41 : vector<256x8xf32> to vector<1x256x8xf32>
    %45 = vector.broadcast %44 : vector<1x256x8xf32> to vector<3x256x8xf32>
    %46 = arith.mulf %43, %45 : vector<3x256x8xf32>
    %cst_29 = arith.constant 0.000000e+00 : f32
    %47 = vector.broadcast %cst_29 : f32 to vector<256x16xf32>
    %48 = arith.maximumf %28, %47 : vector<256x16xf32>
    %49 = vector.shape_cast %46 : vector<3x256x8xf32> to vector<768x8xf32>
    %cst_30 = arith.constant dense<0.000000e+00> : vector<768x11xf32>
    %50 = tpu.matmul %49, %4, %cst_30 {dimension_numbers = #tpu.dot_dimension_numbers<[1], [0], [0], [1], [0, 0, 1, 1], [], []>} : vector<768x8xf32>, vector<8x11xf32>, vector<768x11xf32> -> vector<768x11xf32>
    %51 = vector.shape_cast %50 : vector<768x11xf32> to vector<3x256x11xf32>
    %52 = arith.mulf %51, %51 : vector<3x256x11xf32>
    %cst_31 = arith.constant dense<0.000000e+00> : vector<256x11xf32>
    %53 = vector.multi_reduction <add>, %52, %cst_31 [0] : vector<3x256x11xf32> to vector<256x11xf32>
    %54 = math.sqrt %53 : vector<256x11xf32>
    %cst_32 = arith.constant 9.99999993E-9 : f32
    %55 = vector.broadcast %cst_32 : f32 to vector<256x11xf32>
    %56 = arith.addf %54, %55 : vector<256x11xf32>
    %57 = tpu.concatenate %48, %56 in 1 : vector<256x16xf32>, vector<256x11xf32> -> vector<256x27xf32>
    %cst_33 = arith.constant dense<0.000000e+00> : vector<256x16xf32>
    %58 = tpu.matmul %57, %7, %cst_33 {dimension_numbers = #tpu.dot_dimension_numbers<[1], [0], [0], [1], [0, 0, 1, 1], [], []>} : vector<256x27xf32>, vector<27x16xf32>, vector<256x16xf32> -> vector<256x16xf32>
    %59 = vector.broadcast %8 : vector<1x16xf32> to vector<256x16xf32>
    %60 = arith.addf %58, %59 : vector<256x16xf32>
    %cst_34 = arith.constant dense<0.000000e+00> : vector<256x8xf32>
    %61 = tpu.matmul %60, %13, %cst_34 {dimension_numbers = #tpu.dot_dimension_numbers<[1], [0], [0], [1], [0, 0, 1, 1], [], []>} : vector<256x16xf32>, vector<16x8xf32>, vector<256x8xf32> -> vector<256x8xf32>
    %62 = vector.broadcast %14 : vector<1x8xf32> to vector<256x8xf32>
    %63 = arith.addf %61, %62 : vector<256x8xf32>
    %64 = arith.negf %63 : vector<256x8xf32>
    %65 = math.exp %64 : vector<256x8xf32>
    %cst_35 = arith.constant 1.000000e+00 : f32
    %66 = vector.broadcast %cst_35 : f32 to vector<256x8xf32>
    %67 = arith.addf %66, %65 : vector<256x8xf32>
    %68 = arith.divf %66, %67 : vector<256x8xf32>
    %cst_36 = arith.constant dense<0.000000e+00> : vector<768x8xf32>
    %69 = tpu.matmul %50, %12, %cst_36 {dimension_numbers = #tpu.dot_dimension_numbers<[1], [0], [0], [1], [0, 0, 1, 1], [], []>} : vector<768x11xf32>, vector<11x8xf32>, vector<768x8xf32> -> vector<768x8xf32>
    %70 = vector.shape_cast %69 : vector<768x8xf32> to vector<3x256x8xf32>
    %71 = vector.shape_cast %68 : vector<256x8xf32> to vector<1x256x8xf32>
    %72 = vector.broadcast %71 : vector<1x256x8xf32> to vector<3x256x8xf32>
    %73 = arith.mulf %70, %72 : vector<3x256x8xf32>
    %74 = vector.extract_strided_slice %73 {offsets = [0, 0, 0], sizes = [1, 256, 8], strides = [1, 1, 1]} : vector<3x256x8xf32> to vector<1x256x8xf32>
    %75 = vector.shape_cast %74 : vector<1x256x8xf32> to vector<256x8xf32>
    %76 = vector.extract_strided_slice %73 {offsets = [1, 0, 0], sizes = [1, 256, 8], strides = [1, 1, 1]} : vector<3x256x8xf32> to vector<1x256x8xf32>
    %77 = vector.shape_cast %76 : vector<1x256x8xf32> to vector<256x8xf32>
    %78 = vector.extract_strided_slice %73 {offsets = [2, 0, 0], sizes = [1, 256, 8], strides = [1, 1, 1]} : vector<3x256x8xf32> to vector<1x256x8xf32>
    %79 = vector.shape_cast %78 : vector<1x256x8xf32> to vector<256x8xf32>
    %cst_37 = arith.constant 1.000000e+00 : f32
    %80 = vector.broadcast %cst_37 : f32 to vector<256x1xf32>
    %cst_38 = arith.constant 0.000000e+00 : f32
    %81 = vector.broadcast %cst_38 : f32 to vector<256x87xf32>
    %82 = tpu.concatenate %60, %75, %77, %79, %80, %81 in 1 : vector<256x16xf32>, vector<256x8xf32>, vector<256x8xf32>, vector<256x8xf32>, vector<256x1xf32>, vector<256x87xf32> -> vector<256x128xf32>
    %83 = arith.truncf %82 : vector<256x128xf32> to vector<256x128xbf16>
    %c0_39 = arith.constant 0 : index
    %c0_40 = arith.constant 0 : index
    %c0_41 = arith.constant 0 : index
    %84 = vector.load %arg2[%c0_39, %c0_40, %c0_41] : memref<1x8x256xi32, #tpu.memory_space<vmem>>, vector<1x8x256xi32>
    %85 = vector.shape_cast %84 : vector<1x8x256xi32> to vector<8x256xi32>
    %86 = vector.extract_strided_slice %85 {offsets = [0, 0], sizes = [1, 256], strides = [1, 1]} : vector<8x256xi32> to vector<1x256xi32>
    %87 = tpu.iota {dimensions = array<i32: 0>} : vector<64x256xi32>
    %88 = vector.broadcast %86 : vector<1x256xi32> to vector<64x256xi32>
    %89 = arith.cmpi eq, %87, %88 : vector<64x256xi32>
    %90 = arith.extui %89 : vector<64x256xi1> to vector<64x256xi32>
    %91 = arith.sitofp %90 : vector<64x256xi32> to vector<64x256xf32>
    %92 = arith.truncf %91 : vector<64x256xf32> to vector<64x256xbf16>
    %c0_42 = arith.constant 0 : index
    %c0_43 = arith.constant 0 : index
    %c0_44 = arith.constant 0 : index
    %93 = vector.load %arg8[%c0_42, %c0_43, %c0_44] : memref<1x64x128xf32, #tpu.memory_space<vmem>>, vector<1x64x128xf32>
    %94 = vector.shape_cast %93 : vector<1x64x128xf32> to vector<64x128xf32>
    %cst_45 = arith.constant dense<0.000000e+00> : vector<64x128xf32>
    %95 = tpu.matmul %92, %83, %cst_45 {dimension_numbers = #tpu.dot_dimension_numbers<[1], [0], [0], [1], [0, 0, 1, 1], [], []>} : vector<64x256xbf16>, vector<256x128xbf16>, vector<64x128xf32> -> vector<64x128xf32>
    %96 = arith.addf %94, %95 : vector<64x128xf32>
    %c0_46 = arith.constant 0 : index
    %c0_47 = arith.constant 0 : index
    %c0_48 = arith.constant 0 : index
    %97 = vector.load %arg8[%c0_46, %c0_47, %c0_48] : memref<1x64x128xf32, #tpu.memory_space<vmem>>, vector<1x64x128xf32>
    %98 = vector.shape_cast %97 : vector<1x64x128xf32> to vector<64x128xf32>
    %99 = vector.shape_cast %96 : vector<64x128xf32> to vector<1x64x128xf32>
    tpu.vector_store %arg8[%c0_46, %c0_47, %c0_48], %99 {strides = array<i32>} : memref<1x64x128xf32, #tpu.memory_space<vmem>>, vector<1x64x128xf32>,
    return
  }
  func.func @transform_0(%arg0: i32, %arg1: i32) -> (i32, i32, i32) {
    %c4_i32 = arith.constant 4 : i32
    %0 = arith.muli %arg0, %c4_i32 : i32
    %1 = arith.addi %0, %arg1 : i32
    %c0_i32 = arith.constant 0 : i32
    %c0_i32_0 = arith.constant 0 : i32
    %c0_i32_1 = arith.constant 0 : i32
    return %1, %c0_i32, %c0_i32_0 : i32, i32, i32
  }
  func.func @transform_1(%arg0: i32, %arg1: i32) -> (i32, i32) {
    %c4_i32 = arith.constant 4 : i32
    %0 = arith.muli %arg0, %c4_i32 : i32
    %1 = arith.addi %0, %arg1 : i32
    %c0_i32 = arith.constant 0 : i32
    %c0_i32_0 = arith.constant 0 : i32
    return %1, %c0_i32 : i32, i32
  }
  func.func @transform_2(%arg0: i32, %arg1: i32) -> (i32, i32, i32) {
    %c4_i32 = arith.constant 4 : i32
    %0 = arith.muli %arg0, %c4_i32 : i32
    %1 = arith.addi %0, %arg1 : i32
    %c0_i32 = arith.constant 0 : i32
    %c0_i32_0 = arith.constant 0 : i32
    %c0_i32_1 = arith.constant 0 : i32
    return %c0_i32, %1, %c0_i32_0 : i32, i32, i32
  }
  func.func @transform_3(%arg0: i32, %arg1: i32) -> (i32, i32) {
    %c0_i32 = arith.constant 0 : i32
    %c0_i32_0 = arith.constant 0 : i32
    %c0_i32_1 = arith.constant 0 : i32
    return %c0_i32, %c0_i32_0 : i32, i32
  }
  func.func @transform_4(%arg0: i32, %arg1: i32) -> (i32, i32) {
    %c0_i32 = arith.constant 0 : i32
    %c0_i32_0 = arith.constant 0 : i32
    %c0_i32_1 = arith.constant 0 : i32
    return %c0_i32, %c0_i32_0 : i32, i32
  }
  func.func @transform_5(%arg0: i32, %arg1: i32) -> (i32, i32) {
    %c0_i32 = arith.constant 0 : i32
    %c0_i32_0 = arith.constant 0 : i32
    %c0_i32_1 = arith.constant 0 : i32
    return %c0_i32, %c0_i32_0 : i32, i32
  }
  func.func @transform_6(%arg0: i32, %arg1: i32) -> (i32, i32, i32) {
    %c0_i32 = arith.constant 0 : i32
    %c0_i32_0 = arith.constant 0 : i32
    %c0_i32_1 = arith.constant 0 : i32
    return %arg0, %c0_i32, %c0_i32_0 : i32, i32, i32
  }
}

</mosaic_0001>

<bundles_post_ra>
// kernel: tpu_custom_call.1
= control target key start
LH: loop header
LB: loop body
LE: loop exit
PB: predicated region body
PF: predicated region fallthrough
CT: control target
= control target key end

     0   :  { %11 = vsyncpa [#allocation4], 0  ;;  %s10323_s21 = smov 0   ;;  %s10325_s22 = smov 0   ;;  %s16057_s0 = inlined_call_operand.vmem [shape: s32[4,8,256], index: 0, kind: input, shape index: {}]   ;;  %s16058_s1 = inlined_call_operand.vmem [shape: f32[1024,22], index: 1, kind: input, shape index: {}]   ;;  %s16059_s2 = inlined_call_operand.vmem [shape: f32[3,1024,11], index: 2, kind: input, shape index: {}]   ;;  %s16060_s3 = inlined_call_operand.vmem [shape: f32[24,11], index: 3, kind: input, shape index: {}]   ;;  %s16061_s4 = inlined_call_operand.vmem [shape: f32[88,16], index: 4, kind: input, shape index: {}]   ;;  %s16062_s5 = inlined_call_operand.vmem [shape: f32[80,8], index: 5, kind: input, shape index: {}]   ;;  %s16063_s6 = inlined_call_operand.hbm [shape: f32[1,64,128], index: 6, kind: output, shape index: {}]  }
   0x1   :  { %s10327_s23 = smov 0   ;;  %s10329_s24 = smov 0  }
   0x2   :  { %s10331_s25 = smov 0  }
   0x3 LB: > { %s8672_s26 = sadd.s32 4294967295, %s10277_s25   ;;  %s26_s27 = sadd.s32 1, %s10273_s24  ;;  %s10277_s25 = sphi %s10331_s25, %s17_s25   ;;  %s10273_s24 = sphi %s10329_s24, %s16787_s24   ;;  %s10269_s23 = sphi %s10327_s23, %s16786_s23   ;;  %s10265_s22 = sphi %s10325_s22, %s16785_s22   ;;  %s10261_s21 = sphi %s10323_s21, %s16784_s21  }
   0x4   : > { %p27_p0 = scmp.ge.s32.totalorder %s26_s27, 4  ;;  %p107_p1 = scmp.ne.s32.totalorder %s10265_s22, %s10261_s21 }
   0x5   : > { %p108_p2 = scmp.eq.s32.totalorder %s10277_s25, 0  ;;  %s100_s29 = sadd.s32 1, %s10265_s22 }
   0x6   : > { %s16789_s27 = smov (%p27_p0, %s26_s27), 0  ;;  %p8674_p5 = scmp.ge.s32.totalorder %s10277_s25, 4 }
   0x7   : > { %p109_p3 = por %p108_p2, %p107_p1  ;;  %s97_s28 = ssub.s32 %s10273_s24, %s16789_s27 }
   0x8   : > { %p98_p4 = scmp.eq.s32.totalorder %s97_s28, 0  ;;  %231 = sbr.rel (%p8674_p5) target bundleno = 113 (0x71), region = 28 }
   0xa   : > { %s10359_s30 = scalar_select %p98_p4, %s10265_s22, %s100_s29  }
   0xd   : > { %259 = sbr.rel (!%p109_p3) target bundleno = 113 (0x71), region = 40  ;;  %s261_s7 = sand.u32 (%p109_p3), 1, %s10265_s22  }
   0xe   : > { %s9380_s8 = sshll.u32 (%p109_p3), %s10273_s24, 8  ;;  %s9391_s9 = smul.u32 (%p109_p3), 768, %s261_s7 }
   0xf   : > { %s10367_s12 = scalar_lea.vmem (%p109_p3), %s16059_s2, %s9380_s8 }
  0x10   : > { %v487_v0 = vld [vmem:[%s10367_s12] sm:$0xff] (%p109_p3)  ;;  %v489_v1 = vld [vmem:[%s10367_s12 + $0x8] sm:$0xff] (%p109_p3)  ;;  %v491_v2 = vld [vmem:[%s10367_s12 + $0x10] sm:$0xff] (%p109_p3)  ;;  %s10372_s13 = scalar_lea.vmem (%p109_p3), [#allocation2], %s9391_s9 }
  0x11   : > { %488 = vst [vmem:[%s10372_s13] sm:$0xff] (%p109_p3), %v487_v0  ;;  %v493_v3 = vld [vmem:[%s10367_s12 + $0x18] sm:$0xff] (%p109_p3)  ;;  %v495_v4 = vld [vmem:[%s10367_s12 + $0x20] sm:$0xff] (%p109_p3)  ;;  %v497_v5 = vld [vmem:[%s10367_s12 + $0x28] sm:$0xff] (%p109_p3) }
  0x12   : > { %490 = vst [vmem:[%s10372_s13 + $0x8] sm:$0xff] %v489_v1  ;;  %v499_v6 = vld [vmem:[%s10367_s12 + $0x30] sm:$0xff]  ;;  %v501_v7 = vld [vmem:[%s10367_s12 + $0x38] sm:$0xff]  ;;  %v503_v8 = vld [vmem:[%s10367_s12 + $0x40] sm:$0xff] }
  0x13   : > { %492 = vst [vmem:[%s10372_s13 + $0x10] sm:$0xff] %v491_v2  ;;  %v505_v9 = vld [vmem:[%s10367_s12 + $0x48] sm:$0xff]  ;;  %v507_v10 = vld [vmem:[%s10367_s12 + $0x50] sm:$0xff]  ;;  %v509_v11 = vld [vmem:[%s10367_s12 + $0x58] sm:$0xff] }
  0x14   : > { %494 = vst [vmem:[%s10372_s13 + $0x18] sm:$0xff] %v493_v3  ;;  %v511_v12 = vld [vmem:[%s10367_s12 + $0x60] sm:$0xff]  ;;  %v513_v13 = vld [vmem:[%s10367_s12 + $0x68] sm:$0xff]  ;;  %v515_v14 = vld [vmem:[%s10367_s12 + $0x70] sm:$0xff] }
  0x15   : > { %496 = vst [vmem:[%s10372_s13 + $0x20] sm:$0xff] %v495_v4  ;;  %v517_v15 = vld [vmem:[%s10367_s12 + $0x78] sm:$0xff]  ;;  %v519_v16 = vld [vmem:[%s10367_s12 + $0x80] sm:$0xff]  ;;  %v521_v17 = vld [vmem:[%s10367_s12 + $0x88] sm:$0xff] }
  0x16   : > { %498 = vst [vmem:[%s10372_s13 + $0x28] sm:$0xff] %v497_v5  ;;  %v523_v18 = vld [vmem:[%s10367_s12 + $0x90] sm:$0xff]  ;;  %v525_v19 = vld [vmem:[%s10367_s12 + $0x98] sm:$0xff]  ;;  %v527_v20 = vld [vmem:[%s10367_s12 + $0xa0] sm:$0xff] }
  0x17   : > { %500 = vst [vmem:[%s10372_s13 + $0x30] sm:$0xff] %v499_v6  ;;  %v529_v21 = vld [vmem:[%s10367_s12 + $0xa8] sm:$0xff]  ;;  %v531_v22 = vld [vmem:[%s10367_s12 + $0xb0] sm:$0xff]  ;;  %v533_v23 = vld [vmem:[%s10367_s12 + $0xb8] sm:$0xff] }
  0x18   : > { %502 = vst [vmem:[%s10372_s13 + $0x38] sm:$0xff] %v501_v7  ;;  %v535_v24 = vld [vmem:[%s10367_s12 + $0xc0] sm:$0xff]  ;;  %v537_v25 = vld [vmem:[%s10367_s12 + $0xc8] sm:$0xff]  ;;  %v539_v26 = vld [vmem:[%s10367_s12 + $0xd0] sm:$0xff] }
  0x19   : > { %504 = vst [vmem:[%s10372_s13 + $0x40] sm:$0xff] %v503_v8  ;;  %v541_v27 = vld [vmem:[%s10367_s12 + $0xd8] sm:$0xff]  ;;  %v543_v28 = vld [vmem:[%s10367_s12 + $0xe0] sm:$0xff]  ;;  %v545_v29 = vld [vmem:[%s10367_s12 + $0xe8] sm:$0xff] }
  0x1a   : > { %506 = vst [vmem:[%s10372_s13 + $0x48] sm:$0xff] %v505_v9  ;;  %v547_v30 = vld [vmem:[%s10367_s12 + $0xf0] sm:$0xff]  ;;  %v549_v31 = vld [vmem:[%s10367_s12 + $0xf8] sm:$0xff]  ;;  %v551_v32 = vld [vmem:[%s10367_s12 + $0x400] sm:$0xff] }
  0x1b   : > { %508 = vst [vmem:[%s10372_s13 + $0x50] sm:$0xff] %v507_v10  ;;  %v553_v33 = vld [vmem:[%s10367_s12 + $0x408] sm:$0xff]  ;;  %v555_v34 = vld [vmem:[%s10367_s12 + $0x410] sm:$0xff]  ;;  %v557_v35 = vld [vmem:[%s10367_s12 + $0x418] sm:$0xff] }
  0x1c   : > { %510 = vst [vmem:[%s10372_s13 + $0x58] sm:$0xff] %v509_v11  ;;  %v559_v36 = vld [vmem:[%s10367_s12 + $0x420] sm:$0xff]  ;;  %v561_v37 = vld [vmem:[%s10367_s12 + $0x428] sm:$0xff]  ;;  %v563_v38 = vld [vmem:[%s10367_s12 + $0x430] sm:$0xff] }
  0x1d   : > { %512 = vst [vmem:[%s10372_s13 + $0x60] sm:$0xff] %v511_v12  ;;  %v565_v39 = vld [vmem:[%s10367_s12 + $0x438] sm:$0xff]  ;;  %v567_v40 = vld [vmem:[%s10367_s12 + $0x440] sm:$0xff]  ;;  %v569_v41 = vld [vmem:[%s10367_s12 + $0x448] sm:$0xff] }
  0x1e   : > { %514 = vst [vmem:[%s10372_s13 + $0x68] sm:$0xff] %v513_v13  ;;  %v571_v42 = vld [vmem:[%s10367_s12 + $0x450] sm:$0xff]  ;;  %v573_v43 = vld [vmem:[%s10367_s12 + $0x458] sm:$0xff]  ;;  %v575_v44 = vld [vmem:[%s10367_s12 + $0x460] sm:$0xff] }
  0x1f   : > { %516 = vst [vmem:[%s10372_s13 + $0x70] sm:$0xff] %v515_v14  ;;  %v577_v45 = vld [vmem:[%s10367_s12 + $0x468] sm:$0xff]  ;;  %v579_v46 = vld [vmem:[%s10367_s12 + $0x470] sm:$0xff]  ;;  %v581_v47 = vld [vmem:[%s10367_s12 + $0x478] sm:$0xff] }
  0x20   : > { %518 = vst [vmem:[%s10372_s13 + $0x78] sm:$0xff] %v517_v15  ;;  %v583_v48 = vld [vmem:[%s10367_s12 + $0x480] sm:$0xff]  ;;  %v585_v49 = vld [vmem:[%s10367_s12 + $0x488] sm:$0xff]  ;;  %v587_v50 = vld [vmem:[%s10367_s12 + $0x490] sm:$0xff] }
  0x21   : > { %520 = vst [vmem:[%s10372_s13 + $0x80] sm:$0xff] %v519_v16  ;;  %v589_v51 = vld [vmem:[%s10367_s12 + $0x498] sm:$0xff]  ;;  %v591_v52 = vld [vmem:[%s10367_s12 + $0x4a0] sm:$0xff]  ;;  %v593_v53 = vld [vmem:[%s10367_s12 + $0x4a8] sm:$0xff] }
  0x22   : > { %522 = vst [vmem:[%s10372_s13 + $0x88] sm:$0xff] %v521_v17  ;;  %v595_v54 = vld [vmem:[%s10367_s12 + $0x4b0] sm:$0xff]  ;;  %v597_v55 = vld [vmem:[%s10367_s12 + $0x4b8] sm:$0xff]  ;;  %v599_v56 = vld [vmem:[%s10367_s12 + $0x4c0] sm:$0xff] }
  0x23   : > { %524 = vst [vmem:[%s10372_s13 + $0x90] sm:$0xff] %v523_v18  ;;  %v601_v57 = vld [vmem:[%s10367_s12 + $0x4c8] sm:$0xff]  ;;  %v603_v58 = vld [vmem:[%s10367_s12 + $0x4d0] sm:$0xff]  ;;  %v605_v59 = vld [vmem:[%s10367_s12 + $0x4d8] sm:$0xff] }
  0x24   : > { %526 = vst [vmem:[%s10372_s13 + $0x98] sm:$0xff] %v525_v19  ;;  %v607_v60 = vld [vmem:[%s10367_s12 + $0x4e0] sm:$0xff]  ;;  %v609_v61 = vld [vmem:[%s10367_s12 + $0x4e8] sm:$0xff]  ;;  %v611_v62 = vld [vmem:[%s10367_s12 + $0x4f0] sm:$0xff] }
  0x25   : > { %528 = vst [vmem:[%s10372_s13 + $0xa0] sm:$0xff] %v527_v20  ;;  %v613_v63 = vld [vmem:[%s10367_s12 + $0x4f8] sm:$0xff]  ;;  %v615_v0 = vld [vmem:[%s10367_s12 + $0x800] sm:$0xff]  ;;  %v617_v1 = vld [vmem:[%s10367_s12 + $0x808] sm:$0xff] }
  0x26   : > { %530 = vst [vmem:[%s10372_s13 + $0xa8] sm:$0xff] %v529_v21  ;;  %v619_v2 = vld [vmem:[%s10367_s12 + $0x810] sm:$0xff]  ;;  %v621_v3 = vld [vmem:[%s10367_s12 + $0x818] sm:$0xff]  ;;  %v623_v4 = vld [vmem:[%s10367_s12 + $0x820] sm:$0xff] }
  0x27   : > { %532 = vst [vmem:[%s10372_s13 + $0xb0] sm:$0xff] %v531_v22  ;;  %v625_v5 = vld [vmem:[%s10367_s12 + $0x828] sm:$0xff]  ;;  %v627_v6 = vld [vmem:[%s10367_s12 + $0x830] sm:$0xff]  ;;  %v629_v7 = vld [vmem:[%s10367_s12 + $0x838] sm:$0xff] }
  0x28   : > { %534 = vst [vmem:[%s10372_s13 + $0xb8] sm:$0xff] %v533_v23  ;;  %v631_v8 = vld [vmem:[%s10367_s12 + $0x840] sm:$0xff]  ;;  %v633_v9 = vld [vmem:[%s10367_s12 + $0x848] sm:$0xff]  ;;  %v635_v10 = vld [vmem:[%s10367_s12 + $0x850] sm:$0xff] }
  0x29   : > { %536 = vst [vmem:[%s10372_s13 + $0xc0] sm:$0xff] %v535_v24  ;;  %v637_v11 = vld [vmem:[%s10367_s12 + $0x858] sm:$0xff]  ;;  %v639_v12 = vld [vmem:[%s10367_s12 + $0x860] sm:$0xff]  ;;  %v641_v13 = vld [vmem:[%s10367_s12 + $0x868] sm:$0xff] }
  0x2a   : > { %538 = vst [vmem:[%s10372_s13 + $0xc8] sm:$0xff] %v537_v25  ;;  %v643_v14 = vld [vmem:[%s10367_s12 + $0x870] sm:$0xff]  ;;  %v645_v15 = vld [vmem:[%s10367_s12 + $0x878] sm:$0xff]  ;;  %v647_v16 = vld [vmem:[%s10367_s12 + $0x880] sm:$0xff] }
  0x2b   : > { %540 = vst [vmem:[%s10372_s13 + $0xd0] sm:$0xff] %v539_v26  ;;  %v649_v17 = vld [vmem:[%s10367_s12 + $0x888] sm:$0xff]  ;;  %v651_v18 = vld [vmem:[%s10367_s12 + $0x890] sm:$0xff]  ;;  %v653_v19 = vld [vmem:[%s10367_s12 + $0x898] sm:$0xff] }
  0x2c   : > { %542 = vst [vmem:[%s10372_s13 + $0xd8] sm:$0xff] %v541_v27  ;;  %v655_v20 = vld [vmem:[%s10367_s12 + $0x8a0] sm:$0xff]  ;;  %v657_v21 = vld [vmem:[%s10367_s12 + $0x8a8] sm:$0xff]  ;;  %v659_v22 = vld [vmem:[%s10367_s12 + $0x8b0] sm:$0xff] }
  0x2d   : > { %544 = vst [vmem:[%s10372_s13 + $0xe0] sm:$0xff] %v543_v28  ;;  %v661_v23 = vld [vmem:[%s10367_s12 + $0x8b8] sm:$0xff]  ;;  %v663_v24 = vld [vmem:[%s10367_s12 + $0x8c0] sm:$0xff]  ;;  %v665_v25 = vld [vmem:[%s10367_s12 + $0x8c8] sm:$0xff] }
  0x2e   : > { %546 = vst [vmem:[%s10372_s13 + $0xe8] sm:$0xff] %v545_v29  ;;  %v667_v26 = vld [vmem:[%s10367_s12 + $0x8d0] sm:$0xff]  ;;  %v669_v27 = vld [vmem:[%s10367_s12 + $0x8d8] sm:$0xff]  ;;  %v671_v28 = vld [vmem:[%s10367_s12 + $0x8e0] sm:$0xff] }
  0x2f   : > { %548 = vst [vmem:[%s10372_s13 + $0xf0] sm:$0xff] %v547_v30  ;;  %v673_v29 = vld [vmem:[%s10367_s12 + $0x8e8] sm:$0xff]  ;;  %v675_v30 = vld [vmem:[%s10367_s12 + $0x8f0] sm:$0xff] }
  0x30   : > { %550 = vst [vmem:[%s10372_s13 + $0xf8] sm:$0xff] %v549_v31  ;;  %v677_v31 = vld [vmem:[%s10367_s12 + $0x8f8] sm:$0xff] }
  0x31   : > { %552 = vst [vmem:[%s10372_s13 + $0x100] sm:$0xff] %v551_v32 }
  0x32   : > { %554 = vst [vmem:[%s10372_s13 + $0x108] sm:$0xff] %v553_v33 }
  0x33   : > { %556 = vst [vmem:[%s10372_s13 + $0x110] sm:$0xff] %v555_v34 }
  0x34   : > { %558 = vst [vmem:[%s10372_s13 + $0x118] sm:$0xff] %v557_v35 }
  0x35   : > { %560 = vst [vmem:[%s10372_s13 + $0x120] sm:$0xff] %v559_v36 }
  0x36   : > { %562 = vst [vmem:[%s10372_s13 + $0x128] sm:$0xff] %v561_v37 }
  0x37   : > { %564 = vst [vmem:[%s10372_s13 + $0x130] sm:$0xff] %v563_v38 }
  0x38   : > { %566 = vst [vmem:[%s10372_s13 + $0x138] sm:$0xff] %v565_v39 }
  0x39   : > { %568 = vst [vmem:[%s10372_s13 + $0x140] sm:$0xff] %v567_v40 }
  0x3a   : > { %570 = vst [vmem:[%s10372_s13 + $0x148] sm:$0xff] %v569_v41 }
  0x3b   : > { %572 = vst [vmem:[%s10372_s13 + $0x150] sm:$0xff] %v571_v42 }
  0x3c   : > { %574 = vst [vmem:[%s10372_s13 + $0x158] sm:$0xff] %v573_v43 }
  0x3d   : > { %576 = vst [vmem:[%s10372_s13 + $0x160] sm:$0xff] %v575_v44 }
  0x3e   : > { %578 = vst [vmem:[%s10372_s13 + $0x168] sm:$0xff] %v577_v45 }
  0x3f   : > { %580 = vst [vmem:[%s10372_s13 + $0x170] sm:$0xff] %v579_v46 }
  0x40   : > { %582 = vst [vmem:[%s10372_s13 + $0x178] sm:$0xff] %v581_v47 }
  0x41   : > { %584 = vst [vmem:[%s10372_s13 + $0x180] sm:$0xff] %v583_v48 }
  0x42   : > { %586 = vst [vmem:[%s10372_s13 + $0x188] sm:$0xff] %v585_v49 }
  0x43   : > { %588 = vst [vmem:[%s10372_s13 + $0x190] sm:$0xff] %v587_v50 }
  0x44   : > { %590 = vst [vmem:[%s10372_s13 + $0x198] sm:$0xff] %v589_v51 }
  0x45   : > { %592 = vst [vmem:[%s10372_s13 + $0x1a0] sm:$0xff] %v591_v52 }
  0x46   : > { %594 = vst [vmem:[%s10372_s13 + $0x1a8] sm:$0xff] %v593_v53 }
  0x47   : > { %596 = vst [vmem:[%s10372_s13 + $0x1b0] sm:$0xff] %v595_v54 }
  0x48   : > { %598 = vst [vmem:[%s10372_s13 + $0x1b8] sm:$0xff] %v597_v55 }
  0x49   : > { %600 = vst [vmem:[%s10372_s13 + $0x1c0] sm:$0xff] %v599_v56 }
  0x4a   : > { %602 = vst [vmem:[%s10372_s13 + $0x1c8] sm:$0xff] %v601_v57 }
  0x4b   : > { %604 = vst [vmem:[%s10372_s13 + $0x1d0] sm:$0xff] %v603_v58 }
  0x4c   : > { %606 = vst [vmem:[%s10372_s13 + $0x1d8] sm:$0xff] %v605_v59 }
  0x4d   : > { %608 = vst [vmem:[%s10372_s13 + $0x1e0] sm:$0xff] %v607_v60 }
  0x4e   : > { %610 = vst [vmem:[%s10372_s13 + $0x1e8] sm:$0xff] %v609_v61 }
  0x4f   : > { %612 = vst [vmem:[%s10372_s13 + $0x1f0] sm:$0xff] %v611_v62 }
  0x50   : > { %614 = vst [vmem:[%s10372_s13 + $0x1f8] sm:$0xff] %v613_v63 }
  0x51   : > { %616 = vst [vmem:[%s10372_s13 + $0x200] sm:$0xff] %v615_v0 }
  0x52   : > { %618 = vst [vmem:[%s10372_s13 + $0x208] sm:$0xff] %v617_v1 }
  0x53   : > { %620 = vst [vmem:[%s10372_s13 + $0x210] sm:$0xff] %v619_v2 }
  0x54   : > { %622 = vst [vmem:[%s10372_s13 + $0x218] sm:$0xff] %v621_v3 }
  0x55   : > { %624 = vst [vmem:[%s10372_s13 + $0x220] sm:$0xff] %v623_v4 }
  0x56   : > { %626 = vst [vmem:[%s10372_s13 + $0x228] sm:$0xff] %v625_v5 }
  0x57   : > { %628 = vst [vmem:[%s10372_s13 + $0x230] sm:$0xff] %v627_v6 }
  0x58   : > { %630 = vst [vmem:[%s10372_s13 + $0x238] sm:$0xff] %v629_v7 }
  0x59   : > { %632 = vst [vmem:[%s10372_s13 + $0x240] sm:$0xff] %v631_v8 }
  0x5a   : > { %634 = vst [vmem:[%s10372_s13 + $0x248] sm:$0xff] %v633_v9 }
  0x5b   : > { %636 = vst [vmem:[%s10372_s13 + $0x250] sm:$0xff] %v635_v10 }
  0x5c   : > { %638 = vst [vmem:[%s10372_s13 + $0x258] sm:$0xff] %v637_v11 }
  0x5d   : > { %640 = vst [vmem:[%s10372_s13 + $0x260] sm:$0xff] %v639_v12 }
  0x5e   : > { %642 = vst [vmem:[%s10372_s13 + $0x268] sm:$0xff] %v641_v13 }
  0x5f   : > { %644 = vst [vmem:[%s10372_s13 + $0x270] sm:$0xff] %v643_v14 }
  0x60   : > { %646 = vst [vmem:[%s10372_s13 + $0x278] sm:$0xff] %v645_v15 }
  0x61   : > { %648 = vst [vmem:[%s10372_s13 + $0x280] sm:$0xff] %v647_v16 }
  0x62   : > { %650 = vst [vmem:[%s10372_s13 + $0x288] sm:$0xff] %v649_v17 }
  0x63   : > { %652 = vst [vmem:[%s10372_s13 + $0x290] sm:$0xff] %v651_v18 }
  0x64   : > { %654 = vst [vmem:[%s10372_s13 + $0x298] sm:$0xff] %v653_v19 }
  0x65   : > { %656 = vst [vmem:[%s10372_s13 + $0x2a0] sm:$0xff] %v655_v20 }
  0x66   : > { %658 = vst [vmem:[%s10372_s13 + $0x2a8] sm:$0xff] %v657_v21 }
  0x67   : > { %660 = vst [vmem:[%s10372_s13 + $0x2b0] sm:$0xff] %v659_v22 }
  0x68   : > { %662 = vst [vmem:[%s10372_s13 + $0x2b8] sm:$0xff] %v661_v23 }
  0x69   : > { %664 = vst [vmem:[%s10372_s13 + $0x2c0] sm:$0xff] %v663_v24 }
  0x6a   : > { %666 = vst [vmem:[%s10372_s13 + $0x2c8] sm:$0xff] %v665_v25 }
  0x6b   : > { %668 = vst [vmem:[%s10372_s13 + $0x2d0] sm:$0xff] %v667_v26 }
  0x6c   : > { %670 = vst [vmem:[%s10372_s13 + $0x2d8] sm:$0xff] %v669_v27 }
  0x6d   : > { %672 = vst [vmem:[%s10372_s13 + $0x2e0] sm:$0xff] %v671_v28 }
  0x6e   : > { %674 = vst [vmem:[%s10372_s13 + $0x2e8] sm:$0xff] %v673_v29 }
  0x6f   : > { %676 = vst [vmem:[%s10372_s13 + $0x2f0] sm:$0xff] %v675_v30 }
  0x70   : > { %678 = vst [vmem:[%s10372_s13 + $0x2f8] sm:$0xff] %v677_v31 }
  0x71 PF: > { %p8677_p6 = scmp.ge.s32.totalorder %s10277_s25, 1  ;;  %p683_p7 = scmp.lt.s32.totalorder %s10277_s25, 5 }
  0x73   : > { %p684_p8 = pnand %p8677_p6, %p683_p7 }
  0x75   : > { %687 = sbr.rel (%p684_p8) target bundleno = 2955 (0xb8b), region = 78 }
  0x7a   : > { %s690_s14 = sand.u32 1, %s10261_s21   ;;  %p730_p9 = scmp.lt.s32.totalorder %s10269_s23, 3 }
  0x7b   : > { %s9392_s15 = smul.u32 768, %s690_s14  ;;  %s8680_s16 = sshll.u32 %s10269_s23, 5 }
  0x7c   : > { %s731_s17 = scalar_select %p730_p9, %s10269_s23, 3 }
  0x7d   : > { %p740_p10 = scmp.lt.s32.totalorder %s8680_s16, 127  ;;  %s10579_s10 = scalar_lea.vmem [#allocation2], %s9392_s15 }
  0x7e   : > { %s9381_s18 = sshll.u32 %s731_s17, 4  ;;  %p8682_p11 = scmp.ne.s32.totalorder %s10269_s23, 0 }
  0x7f   : > { %s10572_s28 = scalar_lea.vmem %s16057_s0, %s9381_s18  ;;  %s16791_s16 = smov (!%p740_p10, %s8680_s16), 127 }
  0x80   : > { %s8681_s29 = sshll.u32 %s16791_s16, 3  ;;  %753 = sbr.rel (%p8682_p11) target bundleno = 142 (0x8e), region = 86 }
  0x81   : > { %s10577_s9 = scalar_lea.vmem %s16058_s1, %s8681_s29 }
  0x85   : > { %v10279_v32 = vmov 0.0  }
  0x86   : > { %754 = vst [vmem:[#allocation3] sm:$0xff] %v10279_v32 }
  0x87   : > { %755 = vst [vmem:[#allocation3 + $0x8] sm:$0xff] %v10279_v32 }
  0x88   : > { %756 = vst [vmem:[#allocation3 + $0x10] sm:$0xff] %v10279_v32 }
  0x89   : > { %757 = vst [vmem:[#allocation3 + $0x18] sm:$0xff] %v10279_v32 }
  0x8a   : > { %758 = vst [vmem:[#allocation3 + $0x20] sm:$0xff] %v10279_v32 }
  0x8b   : > { %759 = vst [vmem:[#allocation3 + $0x28] sm:$0xff] %v10279_v32 }
  0x8c   : > { %760 = vst [vmem:[#allocation3 + $0x30] sm:$0xff] %v10279_v32 }
  0x8d   : > { %761 = vst [vmem:[#allocation3 + $0x38] sm:$0xff] %v10279_v32 }
  0x8e PF: > { %v763_v33 = vld [vmem:[%s16060_s3 + $0x8] sm:$0x7]  ;;  %vm1203_vm0 = vcmask 1042432   ;;  %v762_v34 = vld [vmem:[%s16060_s3] sm:$0xff]  ;;  %vm914_vm1 = vcmask 89088   ;;  %v856_v38 = vld [vmem:[%s10579_s10 + $0x130] sm:$0xff] }
  0x8f   : > { %8683 = vmatpush.msk.msra.mxu0 %vm1203_vm0, %v763_v33  ;;  %9382 = vmatpush.msk.msra.mxu3 %vm1203_vm0, %v763_v33  ;;  %v818_v35 = vld [vmem:[%s10579_s10] sm:$0xff]  ;;  %v855_v36 = vld [vmem:[%s10579_s10 + $0x128] sm:$0xff]  ;;  %v820_v39 = vld [vmem:[%s10579_s10 + $0x10] sm:$0xff]  ;;  %s10280_s13 = smov 22   ;;  %s10282_s14 = smov 24  }
  0x90   : > { %v819_v37 = vld [vmem:[%s10579_s10 + $0x8] sm:$0xff]  ;;  %v857_v40 = vld [vmem:[%s10579_s10 + $0x138] sm:$0xff]  ;;  %v858_v42 = vld [vmem:[%s10579_s10 + $0x140] sm:$0xff]  ;;  %s10283_s15 = smov 32   ;;  %s8586_s19 = sshll.u32 %s16063_s6, 4  ;;  %s8587_s19 = int_to_ptr.hbm [resolvable:$true] %s8586_s19 }
  0x91   : > { %1222 = vmatpush.msra.mxu0 %v762_v34  ;;  %9383 = vmatpush.msra.mxu3 %v762_v34  ;;  %v821_v41 = vld [vmem:[%s10579_s10 + $0x18] sm:$0xff]  ;;  %v822_v43 = vld [vmem:[%s10579_s10 + $0x20] sm:$0xff]  ;;  %v859_v44 = vld [vmem:[%s10579_s10 + $0x148] sm:$0xff]  ;;  %p9397_p12 = scmp.eq.s32.totalorder %s8672_s26, 3  ;;  %s10286_s20 = smov 128  }
  0x92   : > { %8684 = vmatmul.msk.f32.vlgmr.msra.gmra.mxu0 %vm914_vm1, %v818_v35  ;;  %8721 = vmatmul.msk.f32.vlgmr.msra.gmra.mxu3 %vm914_vm1, %v855_v36  ;;  %v823_v45 = vld [vmem:[%s10579_s10 + $0x28] sm:$0xff]  ;;  %v860_v46 = vld [vmem:[%s10579_s10 + $0x150] sm:$0xff]  ;;  %v861_v48 = vld [vmem:[%s10579_s10 + $0x158] sm:$0xff]  ;;  %s10287_s29 = smov 8  }
  0x93   : > { %v824_v47 = vld [vmem:[%s10579_s10 + $0x30] sm:$0xff]  ;;  %v825_v49 = vld [vmem:[%s10579_s10 + $0x38] sm:$0xff]  ;;  %v862_v50 = vld [vmem:[%s10579_s10 + $0x160] sm:$0xff] }
  0x94   : > { %v826_v51 = vld [vmem:[%s10579_s10 + $0x40] sm:$0xff]  ;;  %v863_v52 = vld [vmem:[%s10579_s10 + $0x168] sm:$0xff]  ;;  %v864_v54 = vld [vmem:[%s10579_s10 + $0x170] sm:$0xff] }
  0x95   : > { %v827_v53 = vld [vmem:[%s10579_s10 + $0x48] sm:$0xff]  ;;  %v828_v55 = vld [vmem:[%s10579_s10 + $0x50] sm:$0xff]  ;;  %v865_v56 = vld [vmem:[%s10579_s10 + $0x178] sm:$0xff] }
  0x96   : > { %v829_v57 = vld [vmem:[%s10579_s10 + $0x58] sm:$0xff]  ;;  %v866_v58 = vld [vmem:[%s10579_s10 + $0x180] sm:$0xff]  ;;  %v867_v60 = vld [vmem:[%s10579_s10 + $0x188] sm:$0xff] }
  0x97   : > { %v830_v59 = vld [vmem:[%s10579_s10 + $0x60] sm:$0xff]  ;;  %v831_v61 = vld [vmem:[%s10579_s10 + $0x68] sm:$0xff]  ;;  %v868_v62 = vld [vmem:[%s10579_s10 + $0x190] sm:$0xff] }
  0x98   : > { %v832_v63 = vld [vmem:[%s10579_s10 + $0x70] sm:$0xff]  ;;  %v869_v0 = vld [vmem:[%s10579_s10 + $0x198] sm:$0xff]  ;;  %v870_v2 = vld [vmem:[%s10579_s10 + $0x1a0] sm:$0xff] }
  0x99   : > { %v833_v1 = vld [vmem:[%s10579_s10 + $0x78] sm:$0xff]  ;;  %v834_v4 = vld [vmem:[%s10579_s10 + $0x80] sm:$0xff]  ;;  %v871_v5 = vld [vmem:[%s10579_s10 + $0x1a8] sm:$0xff] }
  0x9a   : > { %8685 = vmatmul.msk.f32.gmra.mxu0 %vm914_vm1, %v819_v37  ;;  %8722 = vmatmul.msk.f32.gmra.mxu3 %vm914_vm1, %v856_v38  ;;  %v835_v8 = vld [vmem:[%s10579_s10 + $0x88] sm:$0xff]  ;;  %v872_v9 = vld [vmem:[%s10579_s10 + $0x1b0] sm:$0xff]  ;;  %v873_v13 = vld [vmem:[%s10579_s10 + $0x1b8] sm:$0xff] }
  0x9b   : > { %v836_v12 = vld [vmem:[%s10579_s10 + $0x90] sm:$0xff]  ;;  %v837_v16 = vld [vmem:[%s10579_s10 + $0x98] sm:$0xff]  ;;  %v874_v17 = vld [vmem:[%s10579_s10 + $0x1c0] sm:$0xff] }
  0x9c   : > { %v838_v20 = vld [vmem:[%s10579_s10 + $0xa0] sm:$0xff]  ;;  %v875_v21 = vld [vmem:[%s10579_s10 + $0x1c8] sm:$0xff]  ;;  %v876_v25 = vld [vmem:[%s10579_s10 + $0x1d0] sm:$0xff] }
  0x9d   : > { %v839_v24 = vld [vmem:[%s10579_s10 + $0xa8] sm:$0xff]  ;;  %v840_v28 = vld [vmem:[%s10579_s10 + $0xb0] sm:$0xff]  ;;  %v877_v29 = vld [vmem:[%s10579_s10 + $0x1d8] sm:$0xff] }
  0x9e   : > { %v841_v32 = vld [vmem:[%s10579_s10 + $0xb8] sm:$0xff]  ;;  %v878_v33 = vld [vmem:[%s10579_s10 + $0x1e0] sm:$0xff]  ;;  %v879_v37 = vld [vmem:[%s10579_s10 + $0x1e8] sm:$0xff] }
  0x9f   : > { %v842_v36 = vld [vmem:[%s10579_s10 + $0xc0] sm:$0xff] }
  0xa2   : > { %8686 = vmatmul.msk.f32.gmra.mxu0 %vm914_vm1, %v820_v39  ;;  %8723 = vmatmul.msk.f32.gmra.mxu3 %vm914_vm1, %v857_v40  ;;  %v843_v40 = vld [vmem:[%s10579_s10 + $0xc8] sm:$0xff] }
  0xaa   : > { %8687 = vmatmul.msk.f32.gmra.mxu0 %vm914_vm1, %v821_v41  ;;  %8724 = vmatmul.msk.f32.gmra.mxu3 %vm914_vm1, %v858_v42  ;;  %v880_v41 = vld [vmem:[%s10579_s10 + $0x1f0] sm:$0xff] }
  0xb2   : > { %8688 = vmatmul.msk.f32.gmra.mxu0 %vm914_vm1, %v822_v43  ;;  %8725 = vmatmul.msk.f32.gmra.mxu3 %vm914_vm1, %v859_v44  ;;  %v844_v44 = vld [vmem:[%s10579_s10 + $0xd0] sm:$0xff] }
  0xba   : > { %8689 = vmatmul.msk.f32.gmra.mxu0 %vm914_vm1, %v823_v45  ;;  %8726 = vmatmul.msk.f32.gmra.mxu3 %vm914_vm1, %v860_v46  ;;  %v881_v45 = vld [vmem:[%s10579_s10 + $0x1f8] sm:$0xff] }
  0xc2   : > { %8690 = vmatmul.msk.f32.gmra.mxu0 %vm914_vm1, %v824_v47  ;;  %8727 = vmatmul.msk.f32.gmra.mxu3 %vm914_vm1, %v861_v48  ;;  %v845_v48 = vld [vmem:[%s10579_s10 + $0xd8] sm:$0xff] }
  0xca   : > { %8691 = vmatmul.msk.f32.gmra.mxu0 %vm914_vm1, %v825_v49  ;;  %8728 = vmatmul.msk.f32.gmra.mxu3 %vm914_vm1, %v862_v50  ;;  %v882_v49 = vld [vmem:[%s10579_s10 + $0x200] sm:$0xff] }
  0xd2   : > { %8692 = vmatmul.msk.f32.gmra.mxu0 %vm914_vm1, %v826_v51  ;;  %8729 = vmatmul.msk.f32.gmra.mxu3 %vm914_vm1, %v863_v52  ;;  %v846_v52 = vld [vmem:[%s10579_s10 + $0xe0] sm:$0xff] }
  0xda   : > { %8693 = vmatmul.msk.f32.gmra.mxu0 %vm914_vm1, %v827_v53  ;;  %8730 = vmatmul.msk.f32.gmra.mxu3 %vm914_vm1, %v864_v54  ;;  %v883_v53 = vld [vmem:[%s10579_s10 + $0x208] sm:$0xff] }
  0xe2   : > { %8694 = vmatmul.msk.f32.gmra.mxu0 %vm914_vm1, %v828_v55  ;;  %8731 = vmatmul.msk.f32.gmra.mxu3 %vm914_vm1, %v865_v56  ;;  %v847_v56 = vld [vmem:[%s10579_s10 + $0xe8] sm:$0xff] }
  0xea   : > { %8695 = vmatmul.msk.f32.gmra.mxu0 %vm914_vm1, %v829_v57  ;;  %8732 = vmatmul.msk.f32.gmra.mxu3 %vm914_vm1, %v866_v58  ;;  %v884_v57 = vld [vmem:[%s10579_s10 + $0x210] sm:$0xff] }
  0xf2   : > { %8696 = vmatmul.msk.f32.gmra.mxu0 %vm914_vm1, %v830_v59  ;;  %8733 = vmatmul.msk.f32.gmra.mxu3 %vm914_vm1, %v867_v60  ;;  %v848_v60 = vld [vmem:[%s10579_s10 + $0xf0] sm:$0xff] }
  0xfa   : > { %8697 = vmatmul.msk.f32.gmra.mxu0 %vm914_vm1, %v831_v61  ;;  %8734 = vmatmul.msk.f32.gmra.mxu3 %vm914_vm1, %v868_v62  ;;  %v885_v61 = vld [vmem:[%s10579_s10 + $0x218] sm:$0xff] }
 0x102   : > { %8698 = vmatmul.msk.f32.gmra.mxu0 %vm914_vm1, %v832_v63  ;;  %8735 = vmatmul.msk.f32.gmra.mxu3 %vm914_vm1, %v869_v0  ;;  %v849_v0 = vld [vmem:[%s10579_s10 + $0xf8] sm:$0xff] }
 0x10a   : > { %8699 = vmatmul.msk.f32.gmra.mxu0 %vm914_vm1, %v833_v1  ;;  %8736 = vmatmul.msk.f32.gmra.mxu3 %vm914_vm1, %v870_v2  ;;  %v886_v1 = vld [vmem:[%s10579_s10 + $0x220] sm:$0xff] }
 0x10f   : > { %v10654_v3 = vpop.f32.mrf.mxu0 }
 0x110   : > { %16221 = vst [vmem:[#allocation6_spill] sm:$0xff] %v10654_v3 }
 0x112   : > { %8700 = vmatmul.msk.f32.gmra.mxu0 %vm914_vm1, %v834_v4  ;;  %8737 = vmatmul.msk.f32.gmra.mxu3 %vm914_vm1, %v871_v5  ;;  %v850_v5 = vld [vmem:[%s10579_s10 + $0x100] sm:$0xff] }
 0x115   : > { %v10660_v6 = vpop.f32.mrf.mxu3 }
 0x117   : > { %v10662_v7 = vpop.f32.mrf.mxu0 }
 0x118   : > { %16222 = vst [vmem:[#allocation7_spill] sm:$0xff] %v10662_v7 }
 0x11a   : > { %8701 = vmatmul.msk.f32.gmra.mxu0 %vm914_vm1, %v835_v8  ;;  %8738 = vmatmul.msk.f32.gmra.mxu3 %vm914_vm1, %v872_v9  ;;  %v887_v8 = vld [vmem:[%s10579_s10 + $0x228] sm:$0xff] }
 0x11d   : > { %v10668_v10 = vpop.f32.mrf.mxu3 }
 0x11f   : > { %v10670_v11 = vpop.f32.mrf.mxu0 }
 0x120   : > { %16223 = vst [vmem:[#allocation8_spill] sm:$0xff] %v10670_v11 }
 0x122   : > { %8702 = vmatmul.msk.f32.gmra.mxu0 %vm914_vm1, %v836_v12  ;;  %8739 = vmatmul.msk.f32.gmra.mxu3 %vm914_vm1, %v873_v13  ;;  %v851_v13 = vld [vmem:[%s10579_s10 + $0x108] sm:$0xff] }
 0x125   : > { %v10676_v14 = vpop.f32.mrf.mxu3 }
 0x127   : > { %v10678_v15 = vpop.f32.mrf.mxu0 }
 0x128   : > { %16224 = vst [vmem:[#allocation9_spill] sm:$0xff] %v10678_v15 }
 0x12a   : > { %8703 = vmatmul.msk.f32.gmra.mxu0 %vm914_vm1, %v837_v16  ;;  %8740 = vmatmul.msk.f32.gmra.mxu3 %vm914_vm1, %v874_v17  ;;  %v888_v16 = vld [vmem:[%s10579_s10 + $0x230] sm:$0xff] }
 0x12d   : > { %v10684_v18 = vpop.f32.mrf.mxu3 }
 0x12e   : > { %16225 = vst [vmem:[#allocation10_spill] sm:$0xff] %v10684_v18 }
 0x12f   : > { %v10686_v19 = vpop.f32.mrf.mxu0 }
 0x130   : > { %16226 = vst [vmem:[#allocation11_spill] sm:$0xff] %v10686_v19 }
 0x132   : > { %8704 = vmatmul.msk.f32.gmra.mxu0 %vm914_vm1, %v838_v20  ;;  %8741 = vmatmul.msk.f32.gmra.mxu3 %vm914_vm1, %v875_v21  ;;  %v852_v21 = vld [vmem:[%s10579_s10 + $0x110] sm:$0xff] }
 0x135   : > { %v10692_v22 = vpop.f32.mrf.mxu3 }
 0x136   : > { %16227 = vst [vmem:[#allocation12_spill] sm:$0xff] %v10692_v22 }
 0x137   : > { %v10694_v23 = vpop.f32.mrf.mxu0 }
 0x138   : > { %16228 = vst [vmem:[#allocation13_spill] sm:$0xff] %v10694_v23 }
 0x13a   : > { %8705 = vmatmul.msk.f32.gmra.mxu0 %vm914_vm1, %v839_v24  ;;  %8742 = vmatmul.msk.f32.gmra.mxu3 %vm914_vm1, %v876_v25  ;;  %v889_v24 = vld [vmem:[%s10579_s10 + $0x238] sm:$0xff] }
 0x13d   : > { %v10700_v26 = vpop.f32.mrf.mxu3 }
 0x13e   : > { %16229 = vst [vmem:[#allocation14_spill] sm:$0xff] %v10700_v26 }
 0x13f   : > { %v10702_v27 = vpop.f32.mrf.mxu0 }
 0x140   : > { %16230 = vst [vmem:[#allocation15_spill] sm:$0xff] %v10702_v27 }
 0x142   : > { %8706 = vmatmul.msk.f32.gmra.mxu0 %vm914_vm1, %v840_v28  ;;  %8743 = vmatmul.msk.f32.gmra.mxu3 %vm914_vm1, %v877_v29  ;;  %v853_v29 = vld [vmem:[%s10579_s10 + $0x118] sm:$0xff] }
 0x145   : > { %v10708_v30 = vpop.f32.mrf.mxu3 }
 0x147   : > { %v10710_v31 = vpop.f32.mrf.mxu0 }
 0x148   : > { %16231 = vst [vmem:[#allocation16_spill] sm:$0xff] %v10710_v31 }
 0x14a   : > { %8707 = vmatmul.msk.f32.gmra.mxu0 %vm914_vm1, %v841_v32  ;;  %8744 = vmatmul.msk.f32.gmra.mxu3 %vm914_vm1, %v878_v33  ;;  %v890_v32 = vld [vmem:[%s10579_s10 + $0x240] sm:$0xff] }
 0x14d   : > { %v10716_v34 = vpop.f32.mrf.mxu3 }
 0x14f   : > { %v10718_v35 = vpop.f32.mrf.mxu0 }
 0x150   : > { %16232 = vst [vmem:[#allocation17_spill] sm:$0xff] %v10718_v35 }
 0x152   : > { %8708 = vmatmul.msk.f32.gmra.mxu0 %vm914_vm1, %v842_v36  ;;  %8745 = vmatmul.msk.f32.gmra.mxu3 %vm914_vm1, %v879_v37  ;;  %v854_v37 = vld [vmem:[%s10579_s10 + $0x120] sm:$0xff] }
 0x155   : > { %v10724_v38 = vpop.f32.mrf.mxu3 }
 0x157   : > { %v10726_v39 = vpop.f32.mrf.mxu0 }
 0x158   : > { %16233 = vst [vmem:[#allocation18_spill] sm:$0xff] %v10726_v39 }
 0x15a   : > { %8709 = vmatmul.msk.f32.gmra.mxu0 %vm914_vm1, %v843_v40  ;;  %8746 = vmatmul.msk.f32.gmra.mxu3 %vm914_vm1, %v880_v41  ;;  %v891_v40 = vld [vmem:[%s10579_s10 + $0x248] sm:$0xff] }
 0x15d   : > { %v10732_v42 = vpop.f32.mrf.mxu3 }
 0x15f   : > { %v10734_v43 = vpop.f32.mrf.mxu0 }
 0x160   : > { %16234 = vst [vmem:[#allocation19_spill] sm:$0xff] %v10734_v43 }
 0x162   : > { %8710 = vmatmul.msk.f32.gmra.mxu0 %vm914_vm1, %v844_v44  ;;  %8747 = vmatmul.msk.f32.gmra.mxu3 %vm914_vm1, %v881_v45  ;;  %v892_v45 = vld [vmem:[%s10579_s10 + $0x250] sm:$0xff] }
 0x165   : > { %v10740_v46 = vpop.f32.mrf.mxu3 }
 0x167   : > { %v10742_v47 = vpop.f32.mrf.mxu0 }
 0x168   : > { %16235 = vst [vmem:[#allocation20_spill] sm:$0xff] %v10742_v47 }
 0x16a   : > { %8711 = vmatmul.msk.f32.gmra.mxu0 %vm914_vm1, %v845_v48  ;;  %8748 = vmatmul.msk.f32.gmra.mxu3 %vm914_vm1, %v882_v49 }
 0x16d   : > { %v10748_v50 = vpop.f32.mrf.mxu3 }
 0x16f   : > { %v10750_v51 = vpop.f32.mrf.mxu0 }
 0x170   : > { %16236 = vst [vmem:[#allocation21_spill] sm:$0xff] %v10750_v51 }
 0x172   : > { %8712 = vmatmul.msk.f32.gmra.mxu0 %vm914_vm1, %v846_v52  ;;  %8749 = vmatmul.msk.f32.gmra.mxu3 %vm914_vm1, %v883_v53  ;;  %v893_v52 = vld [vmem:[%s10579_s10 + $0x258] sm:$0xff] }
 0x175   : > { %v10756_v54 = vpop.f32.mrf.mxu3 }
 0x177   : > { %v10758_v55 = vpop.f32.mrf.mxu0 }
 0x178   : > { %16237 = vst [vmem:[#allocation22_spill] sm:$0xff] %v10758_v55 }
 0x17a   : > { %8713 = vmatmul.msk.f32.gmra.mxu0 %vm914_vm1, %v847_v56  ;;  %8750 = vmatmul.msk.f32.gmra.mxu3 %vm914_vm1, %v884_v57  ;;  %v894_v57 = vld [vmem:[%s10579_s10 + $0x260] sm:$0xff] }
 0x17d   : > { %v10764_v58 = vpop.f32.mrf.mxu3 }
 0x17f   : > { %v10766_v59 = vpop.f32.mrf.mxu0 }
 0x180   : > { %16238 = vst [vmem:[#allocation23_spill] sm:$0xff] %v10766_v59 }
 0x182   : > { %8714 = vmatmul.msk.f32.gmra.mxu0 %vm914_vm1, %v848_v60  ;;  %8751 = vmatmul.msk.f32.gmra.mxu3 %vm914_vm1, %v885_v61 }
 0x185   : > { %v10772_v62 = vpop.f32.mrf.mxu3 }
 0x186   : > { %16239 = vst [vmem:[#allocation24_spill] sm:$0xff] %v10772_v62 }
 0x187   : > { %v10774_v63 = vpop.f32.mrf.mxu0 }
 0x188   : > { %16240 = vst [vmem:[#allocation25_spill] sm:$0xff] %v10774_v63 }
 0x18a   : > { %8715 = vmatmul.msk.f32.gmra.mxu0 %vm914_vm1, %v849_v0  ;;  %8752 = vmatmul.msk.f32.gmra.mxu3 %vm914_vm1, %v886_v1  ;;  %v895_v0 = vld [vmem:[%s10579_s10 + $0x268] sm:$0xff] }
 0x18d   : > { %v10780_v2 = vpop.f32.mrf.mxu3 }
 0x18f   : > { %v10782_v4 = vpop.f32.mrf.mxu0 }
 0x190   : > { %16241 = vst [vmem:[#allocation26_spill] sm:$0xff] %v10782_v4 }
 0x192   : > { %8716 = vmatmul.msk.f32.gmra.mxu0 %vm914_vm1, %v850_v5  ;;  %8753 = vmatmul.msk.f32.gmra.mxu3 %vm914_vm1, %v887_v8  ;;  %v896_v8 = vld [vmem:[%s10579_s10 + $0x270] sm:$0xff] }
 0x195   : > { %v10788_v9 = vpop.f32.mrf.mxu3 }
 0x196   : > { %16242 = vst [vmem:[#allocation27_spill] sm:$0xff] %v10788_v9 }
 0x197   : > { %v10790_v12 = vpop.f32.mrf.mxu0 }
 0x198   : > { %16243 = vst [vmem:[#allocation28_spill] sm:$0xff] %v10790_v12 }
 0x19a   : > { %8717 = vmatmul.msk.f32.gmra.mxu0 %vm914_vm1, %v851_v13  ;;  %8754 = vmatmul.msk.f32.gmra.mxu3 %vm914_vm1, %v888_v16 }
 0x19d   : > { %v10796_v17 = vpop.f32.mrf.mxu3 }
 0x19e   : > { %16244 = vst [vmem:[#allocation29_spill] sm:$0xff] %v10796_v17 }
 0x19f   : > { %v10798_v20 = vpop.f32.mrf.mxu0 }
 0x1a0   : > { %16245 = vst [vmem:[#allocation30_spill] sm:$0xff] %v10798_v20 }
 0x1a2   : > { %8718 = vmatmul.msk.f32.gmra.mxu0 %vm914_vm1, %v852_v21  ;;  %8755 = vmatmul.msk.f32.gmra.mxu3 %vm914_vm1, %v889_v24  ;;  %v897_v21 = vld [vmem:[%s10579_s10 + $0x278] sm:$0xff] }
 0x1a5   : > { %v10804_v25 = vpop.f32.mrf.mxu3 }
 0x1a7   : > { %v10806_v28 = vpop.f32.mrf.mxu0 }
 0x1a8   : > { %16246 = vst [vmem:[#allocation31_spill] sm:$0xff] %v10806_v28 }
 0x1aa   : > { %8719 = vmatmul.msk.f32.gmra.mxu0 %vm914_vm1, %v853_v29  ;;  %8756 = vmatmul.msk.f32.gmra.mxu3 %vm914_vm1, %v890_v32  ;;  %v898_v32 = vld [vmem:[%s10579_s10 + $0x280] sm:$0xff] }
 0x1ad   : > { %v10812_v33 = vpop.f32.mrf.mxu3 }
 0x1ae   : > { %16247 = vst [vmem:[#allocation32_spill] sm:$0xff] %v10812_v33 }
 0x1af   : > { %v10814_v36 = vpop.f32.mrf.mxu0 }
 0x1b0   : > { %16248 = vst [vmem:[#allocation33_spill] sm:$0xff] %v10814_v36 }
 0x1b2   : > { %8720 = vmatmul.msk.f32.gmra.mxu0 %vm914_vm1, %v854_v37  ;;  %8757 = vmatmul.msk.f32.gmra.mxu3 %vm914_vm1, %v891_v40 }
 0x1b5   : > { %v10820_v41 = vpop.f32.mrf.mxu3 }
 0x1b6   : > { %16249 = vst [vmem:[#allocation34_spill] sm:$0xff] %v10820_v41 }
 0x1b7   : > { %v10822_v44 = vpop.f32.mrf.mxu0 }
 0x1b8   : > { %16250 = vst [vmem:[#allocation35_spill] sm:$0xff] %v10822_v44 }
 0x1ba   : > { %8758 = vmatmul.msk.f32.gmra.mxu3 %vm914_vm1, %v892_v45  ;;  %v899_v45 = vld [vmem:[%s10579_s10 + $0x288] sm:$0xff] }
 0x1bd   : > { %v10826_v48 = vpop.f32.mrf.mxu3 }
 0x1be   : > { %16251 = vst [vmem:[#allocation36_spill] sm:$0xff] %v10826_v48 }
 0x1bf   : > { %v10828_v49 = vpop.f32.mrf.mxu0 }
 0x1c0   : > { %16252 = vst [vmem:[#allocation37_spill] sm:$0xff] %v10828_v49 }
 0x1c2   : > { %8759 = vmatmul.msk.f32.gmra.mxu3 %vm914_vm1, %v893_v52 }
 0x1c5   : > { %v10832_v53 = vpop.f32.mrf.mxu3 }
 0x1c6   : > { %16253 = vst [vmem:[#allocation38_spill] sm:$0xff] %v10832_v53  ;;  %v903_v53 = vld [vmem:[%s10579_s10 + $0x2a8] sm:$0xff] }
 0x1c7   : > { %v10834_v56 = vpop.f32.mrf.mxu0 }
 0x1c8   : > { %16254 = vst [vmem:[#allocation39_spill] sm:$0xff] %v10834_v56 }
 0x1ca   : > { %8760 = vmatmul.msk.f32.gmra.mxu3 %vm914_vm1, %v894_v57 }
 0x1cd   : > { %v10838_v60 = vpop.f32.mrf.mxu3 }
 0x1ce   : > { %16255 = vst [vmem:[#allocation40_spill] sm:$0xff] %v10838_v60 }
 0x1cf   : > { %v10840_v61 = vpop.f32.mrf.mxu0 }
 0x1d0   : > { %16256 = vst [vmem:[#allocation41_spill] sm:$0xff] %v10840_v61 }
 0x1d2   : > { %8761 = vmatmul.msk.f32.gmra.mxu3 %vm914_vm1, %v895_v0  ;;  %v900_v0 = vld [vmem:[%s10579_s10 + $0x290] sm:$0xff] }
 0x1d5   : > { %v10844_v1 = vpop.f32.mrf.mxu3 }
 0x1d6   : > { %16257 = vst [vmem:[#allocation42_spill] sm:$0xff] %v10844_v1  ;;  %v1513_v1 = vmul.f32 %v10662_v7, %v10662_v7  ;;  %v1517_v7 = vmul.f32 %v10694_v23, %v10694_v23 }
 0x1d7   : > { %v10846_v5 = vpop.f32.mrf.mxu0 }
 0x1d8   : > { %16258 = vst [vmem:[#allocation43_spill] sm:$0xff] %v10846_v5 }
 0x1da   : > { %8762 = vmatmul.msk.f32.gmra.mxu3 %vm914_vm1, %v896_v8 }
 0x1dd   : > { %v10850_v13 = vpop.f32.mrf.mxu3 }
 0x1de   : > { %16259 = vst [vmem:[#allocation44_spill] sm:$0xff] %v10850_v13 }
 0x1df   : > { %v10852_v16 = vpop.f32.mrf.mxu0 }
 0x1e0   : > { %16260 = vst [vmem:[#allocation45_spill] sm:$0xff] %v10852_v16 }
 0x1e2   : > { %8763 = vmatmul.msk.f32.gmra.mxu3 %vm914_vm1, %v897_v21 }
 0x1e5   : > { %v10856_v24 = vpop.f32.mrf.mxu3 }
 0x1e6   : > { %16261 = vst [vmem:[#allocation46_spill] sm:$0xff] %v10856_v24 }
 0x1e7   : > { %v10858_v29 = vpop.f32.mrf.mxu0 }
 0x1e8   : > { %16262 = vst [vmem:[#allocation47_spill] sm:$0xff] %v10858_v29 }
 0x1ea   : > { %8764 = vmatmul.msk.f32.gmra.mxu3 %vm914_vm1, %v898_v32  ;;  %v901_v32 = vld [vmem:[%s10579_s10 + $0x298] sm:$0xff] }
 0x1ed   : > { %v10862_v37 = vpop.f32.mrf.mxu3 }
 0x1ee   : > { %16263 = vst [vmem:[#allocation48_spill] sm:$0xff] %v10862_v37  ;;  %v1576_v5 = vmul.f32 %v10862_v37, %v10862_v37  ;;  %v1549_v37 = vmul.f32 %v10660_v6, %v10660_v6 }
 0x1ef   : > { %v10864_v40 = vpop.f32.mrf.mxu0 }
 0x1f0   : > { %16264 = vst [vmem:[#allocation49_spill] sm:$0xff] %v10864_v40  ;;  %v1611_v41 = vsel %vm914_vm1, %v1576_v5, 0.0 }
 0x1f2   : > { %8765 = vmatmul.msk.f32.gmra.mxu3 %vm914_vm1, %v899_v45  ;;  %v902_v45 = vld [vmem:[%s10579_s10 + $0x2a0] sm:$0xff] }
 0x1f5   : > { %v10868_v52 = vpop.f32.mrf.mxu3 }
 0x1f6   : > { %16265 = vst [vmem:[#allocation50_spill] sm:$0xff] %v10868_v52 }
 0x1f7   : > { %v10870_v57 = vpop.f32.mrf.mxu0 }
 0x1f8   : > { %16266 = vst [vmem:[#allocation51_spill] sm:$0xff] %v10870_v57 }
 0x1fa   : > { %8766 = vmatmul.msk.f32.gmra.mxu3 %vm914_vm1, %v900_v0  ;;  %v1512_v0 = vmul.f32 %v10654_v3, %v10654_v3 }
 0x1fc   : > { %v1608_v13 = vsel %vm914_vm1, %v1512_v0, 0.0  ;;  %v904_v0 = vld [vmem:[%s10579_s10 + $0x2b0] sm:$0xff] }
 0x1fd   : > { %v10874_v8 = vpop.f32.mrf.mxu3 }
 0x1fe   : > { %16267 = vst [vmem:[#allocation52_spill] sm:$0xff] %v10874_v8  ;;  %v1578_v9 = vmul.f32 %v10874_v8, %v10874_v8 }
 0x1ff   : > { %v10876_v21 = vpop.f32.mrf.mxu0 }
 0x202   : > { %8767 = vmatmul.msk.f32.gmra.mxu3 %vm914_vm1, %v901_v32 }
 0x205   : > { %v10880_v60 = vpop.f32.mrf.mxu3 }
 0x206   : > { %16268 = vst [vmem:[#allocation53_spill] sm:$0xff] %v10880_v60 }
 0x207   : > { %v10882_v40 = vpop.f32.mrf.mxu0 }
 0x20a   : > { %8768 = vmatmul.msk.f32.gmra.mxu3 %vm914_vm1, %v902_v45 }
 0x20d   : > { %v10886_v29 = vpop.f32.mrf.mxu3 }
 0x20e   : > { %16269 = vst [vmem:[#allocation54_spill] sm:$0xff] %v10886_v29 }
 0x20f   : > { %v10890_v24 = vpop.f32.mrf.mxu0 }
 0x210   : > { %v1544_v32 = vmul.f32 %v10890_v24, %v10890_v24 }
 0x212   : > { %v1609_v61 = vsel %vm914_vm1, %v1544_v32, 0.0  ;;  %8769 = vmatmul.msk.f32.gmra.mxu3 %vm914_vm1, %v903_v53  ;;  %v1550_v53 = vmul.f32 %v10668_v10, %v10668_v10 }
 0x213   : > { %v1610_v45 = vadd.f32 %v1609_v61, %v1608_v13  ;;  %v1577_v61 = vmul.f32 %v10868_v52, %v10868_v52  ;;  %v1613_v13 = vsel %vm914_vm1, %v1513_v1, 0.0  ;;  %v1514_v52 = vmul.f32 %v10670_v11, %v10670_v11  ;;  %v905_v11 = vld [vmem:[%s10579_s10 + $0x2b8] sm:$0xff] }
 0x215   : > { %v10901_v33 = vadd.f32 %v1611_v41, %v1610_v45  ;;  %v10903_v3 = vpop.f32.mrf.mxu3  ;;  %v1518_v41 = vmul.f32 %v10702_v27, %v10702_v27  ;;  %v1634_v45 = vsel %vm914_vm1, %v1549_v37, 0.0  ;;  %v1639_v27 = vsel %vm914_vm1, %v1550_v53, 0.0 }
 0x216   : > { %16270 = vst [vmem:[#allocation55_spill] sm:$0xff] %v10903_v3  ;;  %v1616_v1 = vsel %vm914_vm1, %v1577_v61, 0.0  ;;  %v1515_v37 = vmul.f32 %v10678_v15, %v10678_v15  ;;  %v1581_v61 = vmul.f32 %v10903_v3, %v10903_v3  ;;  %v1516_v15 = vmul.f32 %v10686_v19, %v10686_v19 }
 0x217   : > { %v10909_v49 = vpop.f32.mrf.mxu0  ;;  %9692 = vrsqrt.f32 %v10901_v33  ;;  %v1638_v44 = vsel %vm914_vm1, %v1518_v41, 0.0  ;;  %v1552_v41 = vmul.f32 %v10684_v18, %v10684_v18  ;;  %v1618_v28 = vsel %vm914_vm1, %v1514_v52, 0.0 }
 0x218   : > { %v1545_v5 = vmul.f32 %v10909_v49, %v10909_v49  ;;  %v1636_v18 = vsel %vm914_vm1, %v1581_v61, 0.0  ;;  %vm1775_vm2 = vcmp.eq.f32.partialorder %v10901_v33, inf  ;;  %vm1777_vm3 = vcmp.eq.f32.partialorder %v10901_v33, 0.0 }
 0x21a   : > { %v1614_v32 = vsel %vm914_vm1, %v1545_v5, 0.0  ;;  %8770 = vmatmul.msk.f32.gmra.mxu3 %vm914_vm1, %v904_v0  ;;  %v1551_v0 = vmul.f32 %v10676_v14, %v10676_v14  ;;  %v1519_v5 = vmul.f32 %v10710_v31, %v10710_v31  ;;  %v1633_v31 = vsel %vm914_vm1, %v1517_v7, 0.0 }
 0x21b   : > { %v1615_v57 = vadd.f32 %v1614_v32, %v1613_v13  ;;  %v1635_v48 = vadd.f32 %v1634_v45, %v1633_v31 }
 0x21c   : > { %v1644_v19 = vsel %vm914_vm1, %v1551_v0, 0.0  ;;  %v1643_v7 = vsel %vm914_vm1, %v1519_v5, 0.0  ;;  %v1649_v0 = vsel %vm914_vm1, %v1552_v41, 0.0  ;;  %v1621_v5 = vsel %vm914_vm1, %v1578_v9, 0.0 }
 0x21d   : > { %v9693_v17 = vpop.eup %9692  ;;  %v10938_v13 = vadd.f32 %v1616_v1, %v1615_v57  ;;  %v10940_v53 = vpop.f32.mrf.mxu3  ;;  %v1640_v57 = vadd.f32 %v1639_v27, %v1638_v44  ;;  %v1520_v44 = vmul.f32 %v10718_v35, %v10718_v35 }
 0x21e   : > { %16271 = vst [vmem:[#allocation56_spill] sm:$0xff] %v10940_v53  ;;  %v1582_v32 = vmul.f32 %v10940_v53, %v10940_v53  ;;  %v1769_v23 = vmul.f32 %v9693_v17, %v10901_v33 }
 0x21f   : > { %v10952_v1 = vpop.f32.mrf.mxu0  ;;  %9694 = vrsqrt.f32 %v10938_v13  ;;  %vm1787_vm4 = vcmp.eq.f32.partialorder %v10938_v13, inf  ;;  %vm1789_vm5 = vcmp.eq.f32.partialorder %v10938_v13, 0.0 }
 0x220   : > { %v1641_v3 = vsel %vm914_vm1, %v1582_v32, 0.0  ;;  %v1546_v53 = vmul.f32 %v10952_v1, %v10952_v1  ;;  %v1770_v62 = vmul.f32 %v9693_v17, %v1769_v23  ;;  %v1623_v23 = vsel %vm914_vm1, %v1515_v37, 0.0 }
 0x221   : > { %v10964_v27 = vadd.f32 %v1641_v3, %v1640_v57  ;;  %v10975_v3 = vsel %vm914_vm1, %v1516_v15, 0.0  ;;  %v1521_v37 = vmul.f32 %v10726_v39, %v10726_v39 }
 0x222   : > { %v1619_v8 = vsel %vm914_vm1, %v1546_v53, 0.0  ;;  %8771 = vmatmul.msk.f32.gmra.mxu3 %vm914_vm1, %v905_v11  ;;  %v1771_v32 = vmul.f32 0.5, %v1770_v62  ;;  %v1553_v11 = vmul.f32 %v10692_v22, %v10692_v22  ;;  %v1645_v62 = vadd.f32 %v1644_v19, %v1643_v7 }
 0x223   : > { %v1620_v52 = vadd.f32 %v1619_v8, %v1618_v28  ;;  %9696 = vrsqrt.f32 %v10964_v27  ;;  %v10980_v53 = vadd.f32 %v1636_v18, %v1635_v48  ;;  %v1648_v8 = vsel %vm914_vm1, %v1520_v44, 0.0  ;;  %v906_v48 = vld [vmem:[%s10579_s10 + $0x2c0] sm:$0xff] }
 0x224   : > { %v1772_v61 = vsub.f32 1.5, %v1771_v32  ;;  %v1579_v19 = vmul.f32 %v10880_v60, %v10880_v60  ;;  %vm1847_vm6 = vcmp.eq.f32.partialorder %v10964_v27, inf  ;;  %vm1849_vm7 = vcmp.eq.f32.partialorder %v10964_v27, 0.0 }
 0x225   : > { %v9695_v57 = vpop.eup %9694  ;;  %v10982_v31 = vadd.f32 %v1621_v5, %v1620_v52  ;;  %v10984_v28 = vpop.f32.mrf.mxu3  ;;  %v1778_v5 = vand.u32 2147483648, %v10901_v33 }
 0x226   : > { %16272 = vst [vmem:[#allocation57_spill] sm:$0xff] %v10984_v28  ;;  %v1583_v15 = vmul.f32 %v10984_v28, %v10984_v28  ;;  %v1773_v45 = vmul.f32 %v9693_v17, %v1772_v61  ;;  %v1781_v9 = vmul.f32 %v9695_v57, %v10938_v13 }
 0x227   : > { %v10994_v18 = vpop.f32.mrf.mxu0  ;;  %9698 = vrsqrt.f32 %v10982_v31  ;;  %vm1799_vm8 = vcmp.eq.f32.partialorder %v10982_v31, inf  ;;  %vm1801_vm9 = vcmp.eq.f32.partialorder %v10982_v31, 0.0 }
 0x228   : > { %v1646_v41 = vsel %vm914_vm1, %v1583_v15, 0.0  ;;  %v1547_v17 = vmul.f32 %v10994_v18, %v10994_v18  ;;  %v1774_v7 = vmul.f32 %v1773_v45, %v10901_v33  ;;  %v1782_v44 = vmul.f32 %v9695_v57, %v1781_v9 }
 0x229   : > { %v9697_v32 = vpop.eup %9696  ;;  %v11003_v52 = vadd.f32 %v1646_v41, %v1645_v62  ;;  %9700 = vrsqrt.f32 %v10980_v53  ;;  %v1653_v45 = vsel %vm914_vm1, %v1521_v37, 0.0  ;;  %v1626_v41 = vsel %vm914_vm1, %v1579_v19, 0.0 }
 0x22a   : > { %v1624_v61 = vsel %vm914_vm1, %v1547_v17, 0.0  ;;  %8772 = vmatmul.msk.f32.gmra.mxu3 %vm914_vm1, %v906_v48  ;;  %v1776_v15 = vsel %vm1775_vm2, %v10901_v33, %v1774_v7  ;;  %v1783_v39 = vmul.f32 0.5, %v1782_v44  ;;  %v1841_v35 = vmul.f32 %v9697_v32, %v10964_v27 }
 0x22b   : > { %v1625_v9 = vadd.f32 %v1624_v61, %v1623_v23  ;;  %v1779_v62 = vsel %vm1777_vm3, %v1778_v5, %v1776_v15  ;;  %9702 = vrsqrt.f32 %v11003_v52  ;;  %v1654_v48 = vsel %vm914_vm1, %v1553_v11, 0.0  ;;  %v907_v5 = vld [vmem:[%s10579_s10 + $0x2c8] sm:$0xff] }
 0x22c   : > { %v2152_v28 = vadd.f32 1e-08, %v1779_v62  ;;  %v1784_v60 = vsub.f32 1.5, %v1783_v39  ;;  %v1842_v22 = vmul.f32 %v9697_v32, %v1841_v35  ;;  %v11018_v33 = vmul.f32 %v10700_v26, %v10700_v26 }
 0x22d   : > { %v9699_v16 = vpop.eup %9698  ;;  %v1650_v17 = vadd.f32 %v1649_v0, %v1648_v8  ;;  %v11020_v7 = vadd.f32 %v1626_v41, %v1625_v9  ;;  %v11022_v23 = vpop.f32.mrf.mxu3  ;;  %v1655_v44 = vadd.f32 %v1654_v48, %v1653_v45  ;;  %v1580_v0 = vmul.f32 %v10886_v29, %v10886_v29 }
 0x22e   : > { %16273 = vst [vmem:[#allocation58_spill] sm:$0xff] %v11022_v23  ;;  %v1584_v37 = vmul.f32 %v11022_v23, %v11022_v23  ;;  %2216 = vrot.lane.b32.xlu0 %v2152_v28, %s10280_s13  ;;  %v1785_v35 = vmul.f32 %v9695_v57, %v1784_v60  ;;  %v1843_v39 = vmul.f32 0.5, %v1842_v22  ;;  %v1793_v19 = vmul.f32 %v9699_v16, %v10982_v31 }
 0x22f   : > { %v11028_v11 = vpop.eup %9700  ;;  %v11032_v8 = vpop.f32.mrf.mxu0  ;;  %9704 = vrsqrt.f32 %v11020_v7  ;;  %v1790_v45 = vand.u32 2147483648, %v10938_v13  ;;  %vm1811_vm10 = vcmp.eq.f32.partialorder %v11020_v7, inf  ;;  %vm1813_vm11 = vcmp.eq.f32.partialorder %v11020_v7, 0.0 }
 0x230   : > { %v1651_v61 = vsel %vm914_vm1, %v1584_v37, 0.0  ;;  %v1548_v22 = vmul.f32 %v11032_v8, %v11032_v8  ;;  %v1786_v60 = vmul.f32 %v1785_v35, %v10938_v13  ;;  %v1844_v57 = vsub.f32 1.5, %v1843_v39 }
 0x231   : > { %v9703_v28 = vpop.eup %9702  ;;  %v11041_v15 = vadd.f32 %v1651_v61, %v1650_v17  ;;  %v1794_v9 = vmul.f32 %v9699_v16, %v1793_v19  ;;  %v1829_v17 = vmul.f32 %v11028_v11, %v10980_v53  ;;  %v1631_v61 = vsel %vm914_vm1, %v1580_v0, 0.0 }
 0x232   : > { %v1629_v62 = vsel %vm914_vm1, %v1548_v22, 0.0  ;;  %8773 = vmatmul.msk.f32.gmra.mxu3 %vm914_vm1, %v907_v5  ;;  %v1788_v41 = vsel %vm1787_vm4, %v10938_v13, %v1786_v60  ;;  %v1845_v48 = vmul.f32 %v9697_v32, %v1844_v57  ;;  %v1853_v37 = vmul.f32 %v9703_v28, %v11003_v52 }
 0x233   : > { %v1630_v35 = vadd.f32 %v1629_v62, %v10975_v3  ;;  %v1791_v39 = vsel %vm1789_vm5, %v1790_v45, %v1788_v41  ;;  %v1795_v23 = vmul.f32 0.5, %v1794_v9  ;;  %9706 = vrsqrt.f32 %v11041_v15  ;;  %v908_v45 = vld [vmem:[%s10579_s10 + $0x2d0] sm:$0xff] }
 0x234   : > { %v2153_v19 = vadd.f32 1e-08, %v1791_v39  ;;  %v1846_v22 = vmul.f32 %v1845_v48, %v10964_v27  ;;  %v1854_v29 = vmul.f32 %v9703_v28, %v1853_v37  ;;  %v1850_v9 = vand.u32 2147483648, %v10964_v27 }
 0x235   : > { %v9705_v5 = vpop.eup %9704  ;;  %v11054_v26 = vadd.f32 %v1631_v61, %v1630_v35  ;;  %v11056_v13 = vpop.f32.mrf.mxu3  ;;  %v1796_v3 = vsub.f32 1.5, %v1795_v23  ;;  %v1830_v23 = vmul.f32 %v11028_v11, %v1829_v17  ;;  %v1522_v41 = vmul.f32 %v10734_v43, %v10734_v43 }
 0x236   : > { %v1585_v32 = vmul.f32 %v11056_v13, %v11056_v13  ;;  %2218 = vrot.lane.b32.xlu0 %v2153_v19, %s10280_s13  ;;  %v1848_v0 = vsel %vm1847_vm6, %v10964_v27, %v1846_v22  ;;  %v1805_v60 = vmul.f32 %v9705_v5, %v11020_v7  ;;  %v1855_v57 = vmul.f32 0.5, %v1854_v29 }
 0x237   : > { %v1797_v62 = vmul.f32 %v9699_v16, %v1796_v3  ;;  %9708 = vrsqrt.f32 %v11054_v26  ;;  %v1851_v39 = vsel %vm1849_vm7, %v1850_v9, %v1848_v0  ;;  %v1523_v16 = vmul.f32 %v10742_v47, %v10742_v47  ;;  %v795_v47 = vld [vmem:[%s10577_s9 + $0x48] sm:$0xff] }
 0x238   : > { %v1656_v48 = vsel %vm914_vm1, %v1585_v32, 0.0  ;;  %v1806_v37 = vmul.f32 %v9705_v5, %v1805_v60  ;;  %v1856_v61 = vsub.f32 1.5, %v1855_v57  ;;  %v1802_v17 = vand.u32 2147483648, %v10982_v31 }
 0x239   : > { %v11073_v35 = vadd.f32 %v1656_v48, %v1655_v44  ;;  %v1798_v29 = vmul.f32 %v1797_v62, %v10982_v31  ;;  %v11081_v22 = vpop.eup %9706  ;;  %v1831_v44 = vmul.f32 0.5, %v1830_v23  ;;  %v1658_v3 = vsel %vm914_vm1, %v1522_v41, 0.0 }
 0x23a   : > { %8774 = vmatmul.msk.f32.gmra.mxu3 %vm914_vm1, %v908_v45  ;;  %v1807_v19 = vmul.f32 0.5, %v1806_v37  ;;  %v2158_v32 = vadd.f32 1e-08, %v1851_v39  ;;  %v1659_v45 = vsel %vm914_vm1, %v11018_v33, 0.0  ;;  %v1555_v9 = vmul.f32 %v10708_v30, %v10708_v30 }
 0x23b   : > { %v1800_v27 = vsel %vm1799_vm8, %v10982_v31, %v1798_v29  ;;  %9710 = vrsqrt.f32 %v11073_v35  ;;  %v1857_v31 = vmul.f32 %v9703_v28, %v1856_v61  ;;  %v1865_v39 = vmul.f32 %v11081_v22, %v11041_v15  ;;  %v909_v28 = vld [vmem:[%s10579_s10 + $0x2d8] sm:$0xff] }
 0x23c   : > { %v1803_v0 = vsel %vm1801_vm9, %v1802_v17, %v1800_v27  ;;  %v1808_v60 = vsub.f32 1.5, %v1807_v19  ;;  %v1556_v33 = vmul.f32 %v10716_v34, %v10716_v34  ;;  %v1660_v29 = vadd.f32 %v1659_v45, %v1658_v3 }
 0x23d   : > { %v9709_v57 = vpop.eup %9708  ;;  %v11091_v62 = vpop.f32.mrf.mxu3  ;;  %v2154_v48 = vadd.f32 1e-08, %v1803_v0  ;;  %v1663_v17 = vsel %vm914_vm1, %v1523_v16, 0.0  ;;  %v1832_v61 = vsub.f32 1.5, %v1831_v44  ;;  %v1814_v3 = vand.u32 2147483648, %v11020_v7 }
 0x23e   : > { %v1586_v23 = vmul.f32 %v11091_v62, %v11091_v62  ;;  %2228 = vrot.lane.b32.xlu0 %v2158_v32, %s10280_s13  ;;  %v1809_v41 = vmul.f32 %v9705_v5, %v1808_v60  ;;  %v1817_v37 = vmul.f32 %v9709_v57, %v11054_v26  ;;  %v1858_v16 = vmul.f32 %v1857_v31, %v11003_v52 }
 0x23f   : > { %2220 = vrot.lane.b32.xlu1 %v2154_v48, %s10280_s13  ;;  %v1866_v48 = vmul.f32 %v11081_v22, %v1865_v39  ;;  %vm1859_vm12 = vcmp.eq.f32.partialorder %v11003_v52, inf  ;;  %vm1861_vm13 = vcmp.eq.f32.partialorder %v11003_v52, 0.0  ;;  %vm1823_vm14 = vcmp.eq.f32.partialorder %v11054_v26, inf }
 0x240   : > { %v1661_v19 = vsel %vm914_vm1, %v1586_v23, 0.0  ;;  %v1810_v27 = vmul.f32 %v1809_v41, %v11020_v7  ;;  %v1818_v5 = vmul.f32 %v9709_v57, %v1817_v37  ;;  %v1664_v23 = vsel %vm914_vm1, %v1555_v9, 0.0 }
 0x241   : > { %v9711_v32 = vpop.eup %9710  ;;  %v11107_v0 = vadd.f32 %v1661_v19, %v1660_v29  ;;  %v1833_v37 = vmul.f32 %v11028_v11, %v1832_v61  ;;  %v11123_v19 = vmul.f32 %v10724_v38, %v10724_v38  ;;  %v1665_v39 = vadd.f32 %v1664_v23, %v1663_v17 }
 0x242   : > { %8775 = vmatmul.msk.f32.gmra.mxu3 %vm914_vm1, %v909_v28  ;;  %v1812_v44 = vsel %vm1811_vm10, %v11020_v7, %v1810_v27  ;;  %v1819_v60 = vmul.f32 0.5, %v1818_v5  ;;  %v1877_v45 = vmul.f32 %v9711_v32, %v11073_v35  ;;  %v1669_v7 = vsel %vm914_vm1, %v1556_v33, 0.0  ;;  %v910_v33 = vld [vmem:[%s10579_s10 + $0x2e0] sm:$0xff] }
 0x243   : > { %v1815_v41 = vsel %vm1813_vm11, %v1814_v3, %v1812_v44  ;;  %9712 = vrsqrt.f32 %v11107_v0  ;;  %v1860_v9 = vsel %vm1859_vm12, %v11003_v52, %v1858_v16  ;;  %v1867_v3 = vmul.f32 0.5, %v1866_v48 }
 0x244   : > { %v2155_v29 = vadd.f32 1e-08, %v1815_v41  ;;  %v1820_v31 = vsub.f32 1.5, %v1819_v60  ;;  %v1878_v28 = vmul.f32 %v9711_v32, %v1877_v45  ;;  %v1524_v44 = vmul.f32 %v10750_v51, %v10750_v51 }
 0x245   : > { %v11125_v27 = vpop.f32.mrf.mxu3  ;;  %v1862_v17 = vand.u32 2147483648, %v11003_v52  ;;  %v1834_v60 = vmul.f32 %v1833_v37, %v10980_v53  ;;  %vm1825_vm15 = vcmp.eq.f32.partialorder %v11054_v26, 0.0  ;;  %v11147_v52 = vld [vmem:[%s16062_s5 + $0x8] sm:$0x7]  ;;  %vm1835_vm2 = vcmp.eq.f32.partialorder %v10980_v53, inf }
 0x246   : > { %v1587_v11 = vmul.f32 %v11125_v27, %v11125_v27  ;;  %v1821_v61 = vmul.f32 %v9709_v57, %v1820_v31  ;;  %v1879_v5 = vmul.f32 0.5, %v1878_v28  ;;  %9389 = vmatpush.msk.msrb.mxu3 %vm1203_vm0, %v11147_v52  ;;  %vm1883_vm3 = vcmp.eq.f32.partialorder %v11073_v35, inf }
 0x247   : > { %2222 = vrot.lane.b32.xlu1 %v2155_v29, %s10280_s13  ;;  %v1863_v41 = vsel %vm1861_vm13, %v1862_v17, %v1860_v9  ;;  %v1826_v29 = vand.u32 2147483648, %v11054_v26  ;;  %v1668_v9 = vsel %vm914_vm1, %v1524_v44, 0.0  ;;  %vm1885_vm4 = vcmp.eq.f32.partialorder %v11073_v35, 0.0 }
 0x248   : > { %v1666_v16 = vsel %vm914_vm1, %v1587_v11, 0.0  ;;  %v1822_v45 = vmul.f32 %v1821_v61, %v11054_v26  ;;  %v1880_v57 = vsub.f32 1.5, %v1879_v5  ;;  %v1868_v11 = vsub.f32 1.5, %v1867_v3 }
 0x249   : > { %v9713_v48 = vpop.eup %9712  ;;  %v11140_v23 = vadd.f32 %v1666_v16, %v1665_v39  ;;  %v11155_v39 = vld [vmem:[%s16062_s5] sm:$0xff]  ;;  %v1836_v5 = vsel %vm1835_vm2, %v10980_v53, %v1834_v60  ;;  %v2159_v17 = vadd.f32 1e-08, %v1863_v41  ;;  %v1886_v44 = vand.u32 2147483648, %v11073_v35 }
 0x24a   : > { %8776 = vmatmul.msk.f32.gmra.mxu3 %vm914_vm1, %v910_v33  ;;  %v1824_v37 = vsel %vm1823_vm14, %v11054_v26, %v1822_v45  ;;  %v1881_v31 = vmul.f32 %v9711_v32, %v1880_v57  ;;  %v1889_v28 = vmul.f32 %v9713_v48, %v11107_v0  ;;  %v1869_v57 = vmul.f32 %v11081_v22, %v1868_v11 }
 0x24b   : > { %v1827_v61 = vsel %vm1825_vm15, %v1826_v29, %v1824_v37  ;;  %9714 = vrsqrt.f32 %v11140_v23  ;;  %9390 = vmatpush.msrb.mxu3 %v11155_v39  ;;  %v1670_v29 = vadd.f32 %v1669_v7, %v1668_v9  ;;  %v1525_v41 = vmul.f32 %v10758_v55, %v10758_v55  ;;  %v911_v37 = vld [vmem:[%s10579_s10 + $0x2e8] sm:$0xff] }
 0x24c   : > { %v2156_v26 = vadd.f32 1e-08, %v1827_v61  ;;  %v1882_v32 = vmul.f32 %v1881_v31, %v11073_v35  ;;  %v1890_v3 = vmul.f32 %v9713_v48, %v1889_v28  ;;  %v1838_v28 = vand.u32 2147483648, %v10980_v53 }
 0x24d   : > { %v11164_v33 = vpop.f32.mrf.mxu3  ;;  %vm1837_vm5 = vcmp.eq.f32.partialorder %v10980_v53, 0.0  ;;  %v1870_v11 = vmul.f32 %v1869_v57, %v11041_v15  ;;  %v1673_v53 = vsel %vm914_vm1, %v1525_v41, 0.0  ;;  %vm1895_vm6 = vcmp.eq.f32.partialorder %v11107_v0, inf  ;;  %v912_v41 = vld [vmem:[%s10579_s10 + $0x2f0] sm:$0xff] }
 0x24e   : > { %v1588_v16 = vmul.f32 %v11164_v33, %v11164_v33  ;;  %2224 = vrot.lane.b32.xlu2 %v2156_v26, %s10280_s13  ;;  %v1884_v60 = vsel %vm1883_vm3, %v11073_v35, %v1882_v32  ;;  %v1891_v45 = vmul.f32 0.5, %v1890_v3  ;;  %v1839_v22 = vsel %vm1837_vm5, %v1838_v28, %v1836_v5 }
 0x24f   : > { %2230 = vrot.lane.b32.xlu1 %v2159_v17, %s10280_s13  ;;  %v1887_v31 = vsel %vm1885_vm4, %v1886_v44, %v1884_v60  ;;  %v1674_v3 = vsel %vm914_vm1, %v11123_v19, 0.0  ;;  %v2157_v17 = vadd.f32 1e-08, %v1839_v22  ;;  %vm1897_vm7 = vcmp.eq.f32.partialorder %v11107_v0, 0.0 }
 0x250   : > { %v1671_v61 = vsel %vm914_vm1, %v1588_v16, 0.0  ;;  %v2161_v51 = vadd.f32 1e-08, %v1887_v31  ;;  %v1892_v26 = vsub.f32 1.5, %v1891_v45  ;;  %vm1871_vm8 = vcmp.eq.f32.partialorder %v11041_v15, inf }
 0x251   : > { %v9715_v35 = vpop.eup %9714  ;;  %v11182_v32 = vadd.f32 %v1671_v61, %v1670_v29  ;;  %v1872_v60 = vsel %vm1871_vm8, %v11041_v15, %v1870_v11  ;;  %v1675_v57 = vadd.f32 %v1674_v3, %v1673_v53  ;;  %v1526_v29 = vmul.f32 %v10766_v59, %v10766_v59 }
 0x252   : > { %8777 = vmatmul.msk.f32.gmra.mxu3 %vm914_vm1, %v911_v37  ;;  %2234 = vrot.lane.b32.xlu0 %v2161_v51, %s10280_s13  ;;  %v1893_v7 = vmul.f32 %v9713_v48, %v1892_v26  ;;  %v1901_v9 = vmul.f32 %v9715_v35, %v11140_v23  ;;  %v1898_v51 = vand.u32 2147483648, %v11107_v0  ;;  %v1874_v31 = vand.u32 2147483648, %v11041_v15 }
 0x253   : > { %9716 = vrsqrt.f32 %v11182_v32  ;;  %vm1873_vm9 = vcmp.eq.f32.partialorder %v11041_v15, 0.0  ;;  %v1558_v11 = vmul.f32 %v10732_v42, %v10732_v42  ;;  %v1678_v15 = vsel %vm914_vm1, %v1526_v29, 0.0 }
 0x254   : > { %v1894_v5 = vmul.f32 %v1893_v7, %v11107_v0  ;;  %v1902_v44 = vmul.f32 %v9715_v35, %v1901_v9  ;;  %vm1907_vm10 = vcmp.eq.f32.partialorder %v11140_v23, inf  ;;  %v1527_v29 = vmul.f32 %v10774_v63, %v10774_v63 }
 0x255   : > { %v11193_v16 = vpop.f32.mrf.mxu3  ;;  %vm1909_vm11 = vcmp.eq.f32.partialorder %v11140_v23, 0.0  ;;  %vm1919_vm12 = vcmp.eq.f32.partialorder %v11182_v32, inf  ;;  %vm1921_vm13 = vcmp.eq.f32.partialorder %v11182_v32, 0.0  ;;  %vm2443_vm4 = vcmask 1040384  }
 0x256   : > { %v1589_v19 = vmul.f32 %v11193_v16, %v11193_v16  ;;  %2226 = vrot.lane.b32.xlu2 %v2157_v17, %s10280_s13  ;;  %v1896_v48 = vsel %vm1895_vm6, %v11107_v0, %v1894_v5  ;;  %v1903_v45 = vmul.f32 0.5, %v1902_v44  ;;  %v1875_v0 = vsel %vm1873_vm9, %v1874_v31, %v1872_v60 }
 0x257   : > { %v1899_v37 = vsel %vm1897_vm7, %v1898_v51, %v1896_v48  ;;  %v2160_v53 = vadd.f32 1e-08, %v1875_v0  ;;  %v1679_v51 = vsel %vm914_vm1, %v1558_v11, 0.0 }
 0x258   : > { %v1676_v28 = vsel %vm914_vm1, %v1589_v19, 0.0  ;;  %v2162_v61 = vadd.f32 1e-08, %v1899_v37  ;;  %v1904_v26 = vsub.f32 1.5, %v1903_v45  ;;  %v1680_v60 = vadd.f32 %v1679_v51, %v1678_v15  ;;  %v913_v45 = vld [vmem:[%s10579_s10 + $0x2f8] sm:$0xff] }
 0x259   : > { %v9717_v22 = vpop.eup %9716  ;;  %v11210_v7 = vadd.f32 %v1676_v28, %v1675_v57  ;;  %v1910_v57 = vand.u32 2147483648, %v11140_v23  ;;  %v1559_v28 = vmul.f32 %v10740_v46, %v10740_v46 }
 0x25a   : > { %8778 = vmatmul.msk.f32.gmra.mxu3 %vm914_vm1, %v912_v41  ;;  %2236 = vrot.lane.b32.xlu1 %v2162_v61, %s10280_s13  ;;  %v1905_v9 = vmul.f32 %v9715_v35, %v1904_v26  ;;  %v1913_v3 = vmul.f32 %v9717_v22, %v11182_v32 }
 0x25b   : > { %9718 = vrsqrt.f32 %v11210_v7  ;;  %vm1931_vm14 = vcmp.eq.f32.partialorder %v11210_v7, inf  ;;  %vm1933_vm15 = vcmp.eq.f32.partialorder %v11210_v7, 0.0 }
 0x25c   : > { %v1906_v17 = vmul.f32 %v1905_v9, %v11140_v23  ;;  %v1914_v5 = vmul.f32 %v9717_v22, %v1913_v3  ;;  %v1683_v9 = vsel %vm914_vm1, %v1527_v29, 0.0 }
 0x25d   : > { %v11220_v44 = vpop.f32.mrf.mxu3 }
 0x25e   : > { %v1590_v19 = vmul.f32 %v11220_v44, %v11220_v44  ;;  %2232 = vrot.lane.b32.xlu2 %v2160_v53, %s10280_s13  ;;  %v1908_v35 = vsel %vm1907_vm10, %v11140_v23, %v1906_v17  ;;  %v1915_v48 = vmul.f32 0.5, %v1914_v5  ;;  %v1684_v53 = vsel %vm914_vm1, %v1559_v28, 0.0 }
 0x25f   : > { %v1911_v26 = vsel %vm1909_vm11, %v1910_v57, %v1908_v35  ;;  %v1922_v5 = vand.u32 2147483648, %v11182_v32  ;;  %v1685_v35 = vadd.f32 %v1684_v53, %v1683_v9 }
 0x260   : > { %v1681_v41 = vsel %vm914_vm1, %v1590_v19, 0.0  ;;  %v1916_v37 = vsub.f32 1.5, %v1915_v48  ;;  %v2163_v3 = vadd.f32 1e-08, %v1911_v26 }
 0x261   : > { %v9719_v31 = vpop.eup %9718  ;;  %v11236_v61 = vadd.f32 %v1681_v41, %v1680_v60  ;;  %v1528_v60 = vmul.f32 %v10782_v4, %v10782_v4 }
 0x262   : > { %8779 = vmatmul.msk.f32.gmra.mxu3 %vm914_vm1, %v913_v45  ;;  %v1917_v0 = vmul.f32 %v9717_v22, %v1916_v37  ;;  %v1925_v11 = vmul.f32 %v9719_v31, %v11210_v7  ;;  %v1560_v37 = vmul.f32 %v10748_v50, %v10748_v50 }
 0x263   : > { %9720 = vrsqrt.f32 %v11236_v61  ;;  %vm1943_vm2 = vcmp.eq.f32.partialorder %v11236_v61, inf  ;;  %vm1945_vm3 = vcmp.eq.f32.partialorder %v11236_v61, 0.0 }
 0x264   : > { %v1918_v23 = vmul.f32 %v1917_v0, %v11182_v32  ;;  %v1926_v15 = vmul.f32 %v9719_v31, %v1925_v11  ;;  %v1688_v0 = vsel %vm914_vm1, %v1528_v60, 0.0 }
 0x265   : > { %v11244_v17 = vpop.f32.mrf.mxu3 }
 0x266   : > { %v1591_v22 = vmul.f32 %v11244_v17, %v11244_v17  ;;  %2238 = vrot.lane.b32.xlu2 %v2163_v3, %s10280_s13  ;;  %v1920_v51 = vsel %vm1919_vm12, %v11182_v32, %v1918_v23  ;;  %v1927_v19 = vmul.f32 0.5, %v1926_v15  ;;  %v1689_v3 = vsel %vm914_vm1, %v1560_v37, 0.0 }
 0x267   : > { %v1923_v48 = vsel %vm1921_vm13, %v1922_v5, %v1920_v51  ;;  %v1934_v15 = vand.u32 2147483648, %v11210_v7  ;;  %vm2312_vm13 = vcmask 179200  }
 0x268   : > { %v1686_v45 = vsel %vm914_vm1, %v1591_v22, 0.0  ;;  %v2164_v57 = vadd.f32 1e-08, %v1923_v48  ;;  %v1928_v29 = vsub.f32 1.5, %v1927_v19  ;;  %v1690_v22 = vadd.f32 %v1689_v3, %v1688_v0 }
 0x269   : > { %v9721_v41 = vpop.eup %9720  ;;  %v11258_v28 = vadd.f32 %v1686_v45, %v1685_v35  ;;  %v1529_v19 = vmul.f32 %v10790_v12, %v10790_v12  ;;  %v1946_v3 = vand.u32 2147483648, %v11236_v61 }
 0x26a   : > { %8940 = vmatmul.msk.f32.vlgmr.msrb.gmra.mxu3 %vm914_vm1, %v10876_v21  ;;  %2240 = vrot.lane.b32.xlu0 %v2164_v57, %s10280_s13  ;;  %v1929_v32 = vmul.f32 %v9719_v31, %v1928_v29  ;;  %v1937_v26 = vmul.f32 %v9721_v41, %v11236_v61  ;;  %v1561_v57 = vmul.f32 %v10756_v54, %v10756_v54 }
 0x26b   : > { %9722 = vrsqrt.f32 %v11258_v28  ;;  %vm1955_vm5 = vcmp.eq.f32.partialorder %v11258_v28, inf  ;;  %vm1957_vm6 = vcmp.eq.f32.partialorder %v11258_v28, 0.0 }
 0x26c   : > { %v1930_v11 = vmul.f32 %v1929_v32, %v11210_v7  ;;  %v1938_v9 = vmul.f32 %v9721_v41, %v1937_v26  ;;  %v1693_v32 = vsel %vm914_vm1, %v1529_v19, 0.0 }
 0x26d   : > { %v11268_v23 = vpop.f32.mrf.mxu3 }
 0x26e   : > { %v1592_v31 = vmul.f32 %v11268_v23, %v11268_v23  ;;  %v1932_v53 = vsel %vm1931_vm14, %v11210_v7, %v1930_v11  ;;  %v1939_v5 = vmul.f32 0.5, %v1938_v9  ;;  %v1694_v11 = vsel %vm914_vm1, %v1561_v57, 0.0 }
 0x26f   : > { %v1935_v51 = vsel %vm1933_vm15, %v1934_v15, %v1932_v53  ;;  %v1695_v53 = vadd.f32 %v1694_v11, %v1693_v32  ;;  %v768_v32 = vld [vmem:[%s16061_s4 + $0x18] sm:$0xff]  ;;  %vm2346_vm14 = vcmask 269312  }
 0x270   : > { %v1691_v35 = vsel %vm914_vm1, %v1592_v31, 0.0  ;;  %v2165_v48 = vadd.f32 1e-08, %v1935_v51  ;;  %v1940_v60 = vsub.f32 1.5, %v1939_v5 }
 0x271   : > { %v9723_v45 = vpop.eup %9722  ;;  %v11281_v29 = vadd.f32 %v1691_v35, %v1690_v22  ;;  %v1530_v22 = vmul.f32 %v10798_v20, %v10798_v20 }
 0x272   : > { %8941 = vmatmul.msk.f32.gmra.mxu3 %vm914_vm1, %v10882_v40  ;;  %2242 = vrot.lane.b32.xlu1 %v2165_v48, %s10280_s13  ;;  %v1941_v7 = vmul.f32 %v9721_v41, %v1940_v60  ;;  %v1949_v37 = vmul.f32 %v9723_v45, %v11258_v28  ;;  %v1562_v60 = vmul.f32 %v10764_v58, %v10764_v58 }
 0x273   : > { %9724 = vrsqrt.f32 %v11281_v29  ;;  %vm1967_vm7 = vcmp.eq.f32.partialorder %v11281_v29, inf  ;;  %vm1969_vm8 = vcmp.eq.f32.partialorder %v11281_v29, 0.0 }
 0x274   : > { %v1942_v26 = vmul.f32 %v1941_v7, %v11236_v61  ;;  %v1950_v0 = vmul.f32 %v9723_v45, %v1949_v37 }
 0x275   : > { %v11291_v9 = vpop.f32.mrf.mxu3 }
 0x276   : > { %v1593_v41 = vmul.f32 %v11291_v9, %v11291_v9  ;;  %v1944_v15 = vsel %vm1943_vm2, %v11236_v61, %v1942_v26  ;;  %v1951_v31 = vmul.f32 0.5, %v1950_v0  ;;  %v769_v61 = vld [vmem:[%s16061_s4 + $0x20] sm:$0x1]  ;;  %v1698_v26 = vsel %vm914_vm1, %v1530_v22, 0.0 }
 0x277   : > { %v1947_v5 = vsel %vm1945_vm3, %v1946_v3, %v1944_v15  ;;  %8780 = vmatpush.msk.msra.mxu1 %vm2443_vm4, %v769_v61  ;;  %9384 = vmatpush.msk.msra.mxu2 %vm2443_vm4, %v769_v61  ;;  %v767_v61 = vld [vmem:[%s16061_s4 + $0x10] sm:$0xff] }
 0x278   : > { %v1696_v51 = vsel %vm914_vm1, %v1593_v41, 0.0  ;;  %v2166_v19 = vadd.f32 1e-08, %v1947_v5  ;;  %v1952_v35 = vsub.f32 1.5, %v1951_v31 }
 0x279   : > { %v9725_v48 = vpop.eup %9724  ;;  %v11304_v57 = vadd.f32 %v1696_v51, %v1695_v53  ;;  %2459 = vmatpush.msra.mxu1 %v768_v32  ;;  %9385 = vmatpush.msra.mxu2 %v768_v32 }
 0x27a   : > { %8942 = vmatmul.msk.f32.gmra.mxu3 %vm914_vm1, %v10890_v24  ;;  %2244 = vrot.lane.b32.xlu2 %v2166_v19, %s10280_s13  ;;  %v1953_v7 = vmul.f32 %v9723_v45, %v1952_v35  ;;  %v1961_v37 = vmul.f32 %v9725_v48, %v11281_v29  ;;  %v1699_v24 = vsel %vm914_vm1, %v1562_v60, 0.0  ;;  %v1958_v45 = vand.u32 2147483648, %v11258_v28 }
 0x27b   : > { %9726 = vrsqrt.f32 %v11304_v57  ;;  %v1700_v53 = vadd.f32 %v1699_v24, %v1698_v26  ;;  %2460 = vmatpush.msra.mxu1 %v767_v61  ;;  %9386 = vmatpush.msra.mxu2 %v767_v61  ;;  %vm1979_vm9 = vcmp.eq.f32.partialorder %v11304_v57, inf  ;;  %vm1981_vm10 = vcmp.eq.f32.partialorder %v11304_v57, 0.0 }
 0x27c   : > { %v1954_v0 = vmul.f32 %v1953_v7, %v11258_v28  ;;  %v1962_v11 = vmul.f32 %v9725_v48, %v1961_v37  ;;  %v766_v37 = vld [vmem:[%s16061_s4 + $0x8] sm:$0xff] }
 0x27d   : > { %v11320_v3 = vpop.f32.mrf.mxu3  ;;  %2461 = vmatpush.msra.mxu1 %v766_v37  ;;  %9387 = vmatpush.msra.mxu2 %v766_v37 }
 0x27e   : > { %v1594_v41 = vmul.f32 %v11320_v3, %v11320_v3  ;;  %v1956_v15 = vsel %vm1955_vm5, %v11258_v28, %v1954_v0  ;;  %v1963_v31 = vmul.f32 0.5, %v1962_v11 }
 0x27f   : > { %v1959_v5 = vsel %vm1957_vm6, %v1958_v45, %v1956_v15 }
 0x280   : > { %v1701_v22 = vsel %vm914_vm1, %v1594_v41, 0.0  ;;  %v2167_v51 = vadd.f32 1e-08, %v1959_v5  ;;  %v1964_v19 = vsub.f32 1.5, %v1963_v31  ;;  %v1532_v41 = vmul.f32 %v10814_v36, %v10814_v36  ;;  %v16295_v36 = vld [vmem:[#allocation37_spill] sm:$0xff] }
 0x281   : > { %v9727_v35 = vpop.eup %9726  ;;  %v11329_v60 = vadd.f32 %v1701_v22, %v1700_v53  ;;  %v1564_v5 = vmul.f32 %v10780_v2, %v10780_v2 }
 0x282   : > { %8943 = vmatmul.msk.f32.gmra.mxu3 %vm914_vm1, %v10909_v49  ;;  %2246 = vrot.lane.b32.xlu0 %v2167_v51, %s10280_s13  ;;  %v1965_v28 = vmul.f32 %v9725_v48, %v1964_v19  ;;  %v1973_v7 = vmul.f32 %v9727_v35, %v11304_v57  ;;  %v765_v49 = vld [vmem:[%s16061_s4] sm:$0xff]  ;;  %v1970_v48 = vand.u32 2147483648, %v11281_v29  ;;  %v1708_v51 = vsel %vm914_vm1, %v1532_v41, 0.0 }
 0x283   : > { %9728 = vrsqrt.f32 %v11329_v60  ;;  %2462 = vmatpush.msra.mxu1 %v765_v49  ;;  %9388 = vmatpush.msra.mxu2 %v765_v49  ;;  %vm1991_vm11 = vcmp.eq.f32.partialorder %v11329_v60, inf  ;;  %vm1993_vm12 = vcmp.eq.f32.partialorder %v11329_v60, 0.0 }
 0x284   : > { %v1966_v32 = vmul.f32 %v1965_v28, %v11281_v29  ;;  %v1974_v26 = vmul.f32 %v9727_v35, %v1973_v7 }
 0x285   : > { %v11346_v0 = vpop.f32.mrf.mxu3  ;;  %8909 = vmatpush.msk.msrb.mxu1 %vm1203_vm0, %v11147_v52  ;;  %v1709_v52 = vsel %vm914_vm1, %v1564_v5, 0.0 }
 0x286   : > { %16274 = vst [vmem:[#allocation59_spill] sm:$0xff] %v11346_v0  ;;  %v1968_v11 = vsel %vm1967_vm7, %v11281_v29, %v1966_v32  ;;  %v1975_v24 = vmul.f32 0.5, %v1974_v26  ;;  %v1710_v37 = vadd.f32 %v1709_v52, %v1708_v51  ;;  %v786_v51 = vld [vmem:[%s10577_s9] sm:$0xff] }
 0x287   : > { %v1971_v45 = vsel %vm1969_vm8, %v1970_v48, %v1968_v11  ;;  %4293 = vmatpush.msrb.mxu1 %v11155_v39 }
 0x288   : > { %v2168_v15 = vadd.f32 1e-08, %v1971_v45  ;;  %v1976_v31 = vsub.f32 1.5, %v1975_v24 }
 0x289   : > { %v9729_v53 = vpop.eup %9728 }
 0x28a   : > { %8944 = vmatmul.msk.f32.gmra.mxu3 %vm914_vm1, %v10952_v1  ;;  %2248 = vrot.lane.b32.xlu1 %v2168_v15, %s10280_s13  ;;  %v1977_v29 = vmul.f32 %v9727_v35, %v1976_v31  ;;  %v1985_v22 = vmul.f32 %v9729_v53, %v11329_v60  ;;  %v1982_v1 = vand.u32 2147483648, %v11304_v57 }
 0x28c   : > { %v1978_v19 = vmul.f32 %v1977_v29, %v11304_v57  ;;  %v1986_v61 = vmul.f32 %v9729_v53, %v1985_v22 }
 0x28d   : > { %v11366_v28 = vpop.f32.mrf.mxu3 }
 0x28e   : > { %16275 = vst [vmem:[#allocation60_spill] sm:$0xff] %v11366_v28  ;;  %v1596_v35 = vmul.f32 %v11366_v28, %v11366_v28  ;;  %v1980_v7 = vsel %vm1979_vm9, %v11304_v57, %v1978_v19  ;;  %v1987_v39 = vmul.f32 0.5, %v1986_v61  ;;  %v1994_v57 = vand.u32 2147483648, %v11329_v60 }
 0x28f   : > { %v1983_v32 = vsel %vm1981_vm10, %v1982_v1, %v1980_v7 }
 0x290   : > { %v1711_v26 = vsel %vm914_vm1, %v1596_v35, 0.0  ;;  %v2169_v49 = vadd.f32 1e-08, %v1983_v32  ;;  %v1988_v48 = vsub.f32 1.5, %v1987_v39  ;;  %v1567_v35 = vmul.f32 %v10804_v25, %v10804_v25 }
 0x291   : > { %v1712_v11 = vadd.f32 %v1711_v26, %v1710_v37 }
 0x292   : > { %8945 = vmatmul.msk.f32.gmra.mxu3 %vm914_vm1, %v10994_v18  ;;  %2250 = vrot.lane.b32.xlu2 %v2169_v49, %s10280_s13  ;;  %v1989_v24 = vmul.f32 %v9729_v53, %v1988_v48  ;;  %v1724_v26 = vsel %vm914_vm1, %v1567_v35, 0.0  ;;  %v787_v48 = vld [vmem:[%s10577_s9 + $0x8] sm:$0xff]  ;;  %v789_v35 = vld [vmem:[%s10577_s9 + $0x18] sm:$0xff] }
 0x293   : > { %9730 = vrsqrt.f32 %v1712_v11  ;;  %vm2015_vm15 = vcmp.eq.f32.partialorder %v1712_v11, inf  ;;  %v2018_v32 = vand.u32 2147483648, %v1712_v11  ;;  %vm2017_vm2 = vcmp.eq.f32.partialorder %v1712_v11, 0.0 }
 0x294   : > { %v1990_v45 = vmul.f32 %v1989_v24, %v11329_v60 }
 0x295   : > { %v11379_v41 = vpop.f32.mrf.mxu3 }
 0x296   : > { %16276 = vst [vmem:[#allocation61_spill] sm:$0xff] %v11379_v41  ;;  %v1992_v15 = vsel %vm1991_vm11, %v11329_v60, %v1990_v45  ;;  %v1535_v60 = vmul.f32 %v10834_v56, %v10834_v56 }
 0x297   : > { %v1995_v31 = vsel %vm1993_vm12, %v1994_v57, %v1992_v15 }
 0x298   : > { %v2170_v5 = vadd.f32 1e-08, %v1995_v31  ;;  %v1723_v7 = vsel %vm914_vm1, %v1535_v60, 0.0 }
 0x299   : > { %v9731_v18 = vpop.eup %9730  ;;  %v1725_v45 = vadd.f32 %v1724_v26, %v1723_v7 }
 0x29a   : > { %2252 = vrot.lane.b32.xlu1 %v2170_v5, %s10280_s13  ;;  %8946 = vmatmul.msk.f32.gmra.mxu3 %vm914_vm1, %v11032_v8  ;;  %v2009_v53 = vmul.f32 %v9731_v18, %v1712_v11 }
 0x29c   : > { %v2010_v29 = vmul.f32 %v9731_v18, %v2009_v53 }
 0x29d   : > { %v11388_v22 = vpop.f32.mrf.mxu3 }
 0x29e   : > { %16277 = vst [vmem:[#allocation62_spill] sm:$0xff] %v11388_v22  ;;  %v2011_v19 = vmul.f32 0.5, %v2010_v29 }
 0x2a0   : > { %v2217_v61 = vpop.permute.xlu0 %2216  ;;  %v2012_v52 = vsub.f32 1.5, %v2011_v19 }
 0x2a1   : > { %v2313_v1 = vsel %vm2312_vm13, %v786_v51, %v2217_v61 }
 0x2a2   : > { %8781 = vmatmul.msk.f32.vlgmr.msra.gmra.mxu1 %vm2346_vm14, %v2313_v1  ;;  %8947 = vmatmul.msk.f32.gmra.mxu3 %vm914_vm1, %v10660_v6  ;;  %v2013_v8 = vmul.f32 %v9731_v18, %v2012_v52 }
 0x2a4   : > { %v2014_v39 = vmul.f32 %v2013_v8, %v1712_v11 }
 0x2a5   : > { %v11400_v37 = vpop.f32.mrf.mxu3 }
 0x2a6   : > { %16278 = vst [vmem:[#allocation63_spill] sm:$0xff] %v11400_v37  ;;  %v1599_v49 = vmul.f32 %v11400_v37, %v11400_v37  ;;  %v2016_v24 = vsel %vm2015_vm15, %v1712_v11, %v2014_v39  ;;  %v788_v11 = vld [vmem:[%s10577_s9 + $0x10] sm:$0xff]  ;;  %v16300_v37 = vld [vmem:[#allocation41_spill] sm:$0xff] }
 0x2a7   : > { %v2019_v57 = vsel %vm2017_vm2, %v2018_v32, %v2016_v24  ;;  %v16282_v32 = vld [vmem:[#allocation36_spill] sm:$0xff] }
 0x2a8   : > { %v1726_v6 = vsel %vm914_vm1, %v1599_v49, 0.0  ;;  %v2219_v15 = vpop.permute.xlu0 %2218  ;;  %v2172_v31 = vadd.f32 1e-08, %v2019_v57  ;;  %v1570_v26 = vmul.f32 %v16282_v32, %v16282_v32  ;;  %v2225_v57 = vpop.permute.xlu2 %2224 }
 0x2a9   : > { %v1727_v5 = vadd.f32 %v1726_v6, %v1725_v45  ;;  %v2314_v18 = vsel %vm2312_vm13, %v787_v48, %v2219_v15 }
 0x2aa   : > { %8782 = vmatmul.msk.f32.gmra.mxu1 %vm2346_vm14, %v2314_v18  ;;  %2256 = vrot.lane.b32.xlu1 %v2172_v31, %s10280_s13  ;;  %v1739_v31 = vsel %vm914_vm1, %v1570_v26, 0.0 }
 0x2ab   : > { %8948 = vmatmul.msk.f32.gmra.mxu3 %vm914_vm1, %v10668_v10  ;;  %9732 = vrsqrt.f32 %v1727_v5  ;;  %v16281_v10 = vld [vmem:[#allocation45_spill] sm:$0xff]  ;;  %vm2051_vm3 = vcmp.eq.f32.partialorder %v1727_v5, inf  ;;  %v2054_v15 = vand.u32 2147483648, %v1727_v5  ;;  %vm2053_vm4 = vcmp.eq.f32.partialorder %v1727_v5, 0.0 }
 0x2ac   : > { %v1538_v8 = vmul.f32 %v16281_v10, %v16281_v10 }
 0x2ad   : > { %v11412_v53 = vpop.f32.mrf.mxu3 }
 0x2ae   : > { %16279 = vst [vmem:[#allocation64_spill] sm:$0xff] %v11412_v53  ;;  %v1738_v24 = vsel %vm914_vm1, %v1538_v8, 0.0  ;;  %v16285_v8 = vld [vmem:[#allocation12_spill] sm:$0xff] }
 0x2b1   : > { %v9733_v29 = vpop.eup %9732  ;;  %v2221_v51 = vpop.permute.xlu1 %2220 }
 0x2b2   : > { %v2315_v19 = vsel %vm2312_vm13, %v788_v11, %v2221_v51  ;;  %v2045_v60 = vmul.f32 %v9733_v29, %v1727_v5 }
 0x2b3   : > { %8783 = vmatmul.msk.f32.gmra.mxu1 %vm2346_vm14, %v2315_v19  ;;  %8949 = vmatmul.msk.f32.gmra.mxu3 %vm914_vm1, %v10676_v14  ;;  %v16283_v14 = vld [vmem:[#allocation10_spill] sm:$0xff] }
 0x2b4   : > { %v2046_v61 = vmul.f32 %v9733_v29, %v2045_v60  ;;  %v790_v19 = vld [vmem:[%s10577_s9 + $0x20] sm:$0xff] }
 0x2b5   : > { %v11419_v52 = vpop.f32.mrf.mxu3 }
 0x2b6   : > { %16280 = vst [vmem:[#allocation65_spill] sm:$0xff] %v11419_v52  ;;  %v2047_v1 = vmul.f32 0.5, %v2046_v61 }
 0x2b8   : > { %v2048_v7 = vsub.f32 1.5, %v2047_v1 }
 0x2b9   : > { %v2223_v39 = vpop.permute.xlu1 %2222 }
 0x2ba   : > { %v2316_v49 = vsel %vm2312_vm13, %v789_v35, %v2223_v39  ;;  %v2049_v48 = vmul.f32 %v9733_v29, %v2048_v7  ;;  %v1740_v29 = vadd.f32 %v1739_v31, %v1738_v24  ;;  %v2317_v35 = vsel %vm2312_vm13, %v790_v19, %v2225_v57  ;;  %v791_v39 = vld [vmem:[%s10577_s9 + $0x28] sm:$0xff]  ;;  %v16289_v31 = vld [vmem:[#allocation14_spill] sm:$0xff] }
 0x2bb   : > { %8784 = vmatmul.msk.f32.gmra.mxu1 %vm2346_vm14, %v2316_v49  ;;  %8950 = vmatmul.msk.f32.gmra.mxu3 %vm914_vm1, %v16283_v14  ;;  %v16287_v49 = vld [vmem:[#allocation31_spill] sm:$0xff] }
 0x2bc   : > { %v2050_v45 = vmul.f32 %v2049_v48, %v1727_v5  ;;  %v1531_v48 = vmul.f32 %v16287_v49, %v16287_v49  ;;  %v16296_v49 = vld [vmem:[#allocation42_spill] sm:$0xff] }
 0x2bd   : > { %v11431_v6 = vpop.f32.mrf.mxu3  ;;  %v1573_v20 = vmul.f32 %v16296_v49, %v16296_v49 }
 0x2be   : > { %16284 = vst [vmem:[#allocation36_spill] sm:$0xff] %v11431_v6  ;;  %v1602_v18 = vmul.f32 %v11431_v6, %v11431_v6  ;;  %v2052_v11 = vsel %vm2051_vm3, %v1727_v5, %v2050_v45  ;;  %v2227_v5 = vpop.permute.xlu2 %2226  ;;  %v16288_v45 = vld [vmem:[#allocation24_spill] sm:$0xff] }
 0x2bf   : > { %v2055_v51 = vsel %vm2053_vm4, %v2054_v15, %v2052_v11  ;;  %v2318_v14 = vsel %vm2312_vm13, %v791_v39, %v2227_v5  ;;  %v1563_v57 = vmul.f32 %v16288_v45, %v16288_v45  ;;  %v1595_v15 = vmul.f32 %v11346_v0, %v11346_v0  ;;  %v2229_v39 = vpop.permute.xlu0 %2228 }
 0x2c0   : > { %v1741_v60 = vsel %vm914_vm1, %v1602_v18, 0.0  ;;  %v2175_v61 = vadd.f32 1e-08, %v2055_v51  ;;  %v1703_v11 = vsel %vm914_vm1, %v1531_v48, 0.0  ;;  %v16294_v48 = vld [vmem:[#allocation51_spill] sm:$0xff] }
 0x2c1   : > { %v1742_v1 = vadd.f32 %v1741_v60, %v1740_v29  ;;  %v1704_v19 = vsel %vm914_vm1, %v1563_v57, 0.0  ;;  %v16291_v60 = vld [vmem:[#allocation27_spill] sm:$0xff]  ;;  %v1706_v5 = vsel %vm914_vm1, %v1595_v15, 0.0  ;;  %v1541_v56 = vmul.f32 %v16294_v48, %v16294_v48 }
 0x2c2   : > { %2262 = vrot.lane.b32.xlu1 %v2175_v61, %s10280_s13  ;;  %v1565_v61 = vmul.f32 %v16291_v60, %v16291_v60  ;;  %v1705_v10 = vadd.f32 %v1704_v19, %v1703_v11  ;;  %v1534_v57 = vmul.f32 %v16295_v36, %v16295_v36 }
 0x2c3   : > { %8785 = vmatmul.msk.f32.gmra.mxu1 %vm2346_vm14, %v2317_v35  ;;  %8951 = vmatmul.msk.f32.gmra.mxu3 %vm914_vm1, %v16285_v8  ;;  %9734 = vrsqrt.f32 %v1742_v1  ;;  %v16292_v35 = vld [vmem:[#allocation29_spill] sm:$0xff]  ;;  %vm2087_vm5 = vcmp.eq.f32.partialorder %v1742_v1, inf  ;;  %vm2089_vm6 = vcmp.eq.f32.partialorder %v1742_v1, 0.0 }
 0x2c4   : > { %v1566_v8 = vmul.f32 %v16292_v35, %v16292_v35  ;;  %v11474_v12 = vadd.f32 %v1706_v5, %v1705_v10  ;;  %v1714_v11 = vsel %vm914_vm1, %v1565_v61, 0.0  ;;  %v1753_v5 = vsel %vm914_vm1, %v1541_v56, 0.0 }
 0x2c5   : > { %v11443_v7 = vpop.f32.mrf.mxu3 }
 0x2c6   : > { %16286 = vst [vmem:[#allocation10_spill] sm:$0xff] %v11443_v7  ;;  %v1719_v19 = vsel %vm914_vm1, %v1566_v8, 0.0  ;;  %v1718_v8 = vsel %vm914_vm1, %v1534_v57, 0.0  ;;  %9736 = vrsqrt.f32 %v11474_v12  ;;  %v793_v57 = vld [vmem:[%s10577_s9 + $0x38] sm:$0xff]  ;;  %vm2003_vm11 = vcmp.eq.f32.partialorder %v11474_v12, inf }
 0x2c7   : > { %vm2005_vm12 = vcmp.eq.f32.partialorder %v11474_v12, 0.0 }
 0x2c9   : > { %v9735_v26 = vpop.eup %9734 }
 0x2ca   : > { %v2081_v24 = vmul.f32 %v9735_v26, %v1742_v1 }
 0x2cb   : > { %8786 = vmatmul.msk.f32.gmra.mxu1 %vm2346_vm14, %v2318_v14  ;;  %8952 = vmatmul.msk.f32.gmra.mxu3 %vm914_vm1, %v16289_v31  ;;  %v792_v14 = vld [vmem:[%s10577_s9 + $0x30] sm:$0xff]  ;;  %v16293_v31 = vld [vmem:[#allocation35_spill] sm:$0xff] }
 0x2cc   : > { %v2082_v18 = vmul.f32 %v9735_v26, %v2081_v24  ;;  %v1533_v24 = vmul.f32 %v16293_v31, %v16293_v31  ;;  %v2319_v15 = vsel %vm2312_vm13, %v792_v14, %v2229_v39  ;;  %v16297_v31 = vld [vmem:[#allocation32_spill] sm:$0xff]  ;;  %v1754_v39 = vsel %vm914_vm1, %v1573_v20, 0.0 }
 0x2cd   : > { %v11457_v29 = vpop.f32.mrf.mxu3  ;;  %v1568_v6 = vmul.f32 %v16297_v31, %v16297_v31  ;;  %v1542_v20 = vmul.f32 %v10876_v21, %v10876_v21 }
 0x2ce   : > { %16290 = vst [vmem:[#allocation12_spill] sm:$0xff] %v11457_v29  ;;  %v2083_v51 = vmul.f32 0.5, %v2082_v18  ;;  %v1713_v10 = vsel %vm914_vm1, %v1533_v24, 0.0  ;;  %v1755_v24 = vadd.f32 %v1754_v39, %v1753_v5 }
 0x2cf   : > { %v1715_v56 = vadd.f32 %v1714_v11, %v1713_v10  ;;  %v1536_v11 = vmul.f32 %v16300_v37, %v16300_v37 }
 0x2d0   : > { %v2084_v18 = vsub.f32 1.5, %v2083_v51  ;;  %v1597_v51 = vmul.f32 %v11379_v41, %v11379_v41 }
 0x2d2   : > { %v2085_v4 = vmul.f32 %v9735_v26, %v2084_v18  ;;  %v1598_v26 = vmul.f32 %v11388_v22, %v11388_v22  ;;  %v2090_v18 = vand.u32 2147483648, %v1742_v1  ;;  %v1716_v48 = vsel %vm914_vm1, %v1597_v51, 0.0  ;;  %v16301_v51 = vld [vmem:[#allocation44_spill] sm:$0xff] }
 0x2d3   : > { %8787 = vmatmul.msk.f32.gmra.mxu1 %vm2346_vm14, %v2319_v15  ;;  %8953 = vmatmul.msk.f32.gmra.mxu3 %vm914_vm1, %v10708_v30  ;;  %v1574_v5 = vmul.f32 %v16301_v51, %v16301_v51  ;;  %v11511_v39 = vadd.f32 %v1716_v48, %v1715_v56  ;;  %v1758_v48 = vsel %vm914_vm1, %v1542_v20, 0.0  ;;  %v2233_v20 = vpop.permute.xlu2 %2232 }
 0x2d4   : > { %v2086_v61 = vmul.f32 %v2085_v4, %v1742_v1  ;;  %v2231_v4 = vpop.permute.xlu1 %2230  ;;  %v1721_v63 = vsel %vm914_vm1, %v1598_v26, 0.0  ;;  %v16302_v26 = vld [vmem:[#allocation43_spill] sm:$0xff] }
 0x2d5   : > { %v11492_v14 = vpop.f32.mrf.mxu3  ;;  %v2320_v21 = vsel %vm2312_vm13, %v793_v57, %v2231_v4  ;;  %vm2027_vm3 = vcmp.eq.f32.partialorder %v11511_v39, inf }
 0x2d6   : > { %16298 = vst [vmem:[#allocation24_spill] sm:$0xff] %v11492_v14  ;;  %v1605_v30 = vmul.f32 %v11492_v14, %v11492_v14  ;;  %v2088_v15 = vsel %vm2087_vm5, %v1742_v1, %v2086_v61  ;;  %v16299_v14 = vld [vmem:[#allocation34_spill] sm:$0xff]  ;;  %v1720_v61 = vadd.f32 %v1719_v19, %v1718_v8  ;;  %v1729_v19 = vsel %vm914_vm1, %v1568_v6, 0.0 }
 0x2d7   : > { %v2091_v36 = vsel %vm2089_vm6, %v2090_v18, %v2088_v15  ;;  %v1569_v1 = vmul.f32 %v16299_v14, %v16299_v14  ;;  %v1728_v8 = vsel %vm914_vm1, %v1536_v11, 0.0  ;;  %v16304_v15 = vld [vmem:[#allocation38_spill] sm:$0xff]  ;;  %vm2029_vm6 = vcmp.eq.f32.partialorder %v11511_v39, 0.0 }
 0x2d8   : > { %v1756_v59 = vsel %vm914_vm1, %v1605_v30, 0.0  ;;  %v2178_v55 = vadd.f32 1e-08, %v2091_v36  ;;  %v1537_v36 = vmul.f32 %v16302_v26, %v16302_v26  ;;  %v11517_v18 = vadd.f32 %v1721_v63, %v1720_v61 }
 0x2d9   : > { %v11507_v10 = vadd.f32 %v1756_v59, %v1755_v24  ;;  %v11523_v59 = vpop.eup %9736  ;;  %v1734_v63 = vsel %vm914_vm1, %v1569_v1, 0.0  ;;  %v1601_v30 = vmul.f32 %v11419_v52, %v11419_v52  ;;  %v1571_v56 = vmul.f32 %v16304_v15, %v16304_v15  ;;  %v794_v1 = vld [vmem:[%s10577_s9 + $0x40] sm:$0xff] }
 0x2da   : > { %2268 = vrot.lane.b32.xlu1 %v2178_v55, %s10280_s13  ;;  %v1600_v55 = vmul.f32 %v11412_v53, %v11412_v53  ;;  %v1759_v24 = vsel %vm914_vm1, %v1574_v5, 0.0  ;;  %v1733_v6 = vsel %vm914_vm1, %v1537_v36, 0.0  ;;  %v1997_v61 = vmul.f32 %v11523_v59, %v11474_v12 }
 0x2db   : > { %8788 = vmatmul.msk.f32.gmra.mxu1 %vm2346_vm14, %v2320_v21  ;;  %8954 = vmatmul.msk.f32.gmra.mxu3 %vm914_vm1, %v10716_v34  ;;  %9738 = vrsqrt.f32 %v11507_v10  ;;  %v1760_v57 = vadd.f32 %v1759_v24, %v1758_v48  ;;  %v1730_v11 = vadd.f32 %v1729_v19, %v1728_v8  ;;  %v1543_v21 = vmul.f32 %v10882_v40, %v10882_v40  ;;  %v16306_v48 = vld [vmem:[#allocation47_spill] sm:$0xff]  ;;  %v16307_v19 = vld [vmem:[#allocation49_spill] sm:$0xff] }
 0x2dc   : > { %9740 = vrsqrt.f32 %v11511_v39  ;;  %v1731_v5 = vsel %vm914_vm1, %v1600_v55, 0.0  ;;  %v1539_v24 = vmul.f32 %v16306_v48, %v16306_v48  ;;  %v1736_v52 = vsel %vm914_vm1, %v1601_v30, 0.0  ;;  %v2235_v48 = vpop.permute.xlu0 %2234 }
 0x2dd   : > { %v11533_v34 = vpop.f32.mrf.mxu3  ;;  %9742 = vrsqrt.f32 %v11517_v18  ;;  %v1735_v22 = vadd.f32 %v1734_v63, %v1733_v6  ;;  %v1540_v8 = vmul.f32 %v16307_v19, %v16307_v19  ;;  %v2321_v40 = vsel %vm2312_vm13, %v794_v1, %v2233_v20 }
 0x2de   : > { %16303 = vst [vmem:[#allocation14_spill] sm:$0xff] %v11533_v34  ;;  %v1606_v4 = vmul.f32 %v11533_v34, %v11533_v34  ;;  %v16305_v34 = vld [vmem:[#allocation46_spill] sm:$0xff]  ;;  %v1744_v63 = vsel %vm914_vm1, %v1571_v56, 0.0  ;;  %v1763_v6 = vsel %vm914_vm1, %v1543_v21, 0.0  ;;  %v2322_v43 = vsel %vm2312_vm13, %v795_v47, %v2235_v48 }
 0x2df   : > { %v1575_v36 = vmul.f32 %v16305_v34, %v16305_v34  ;;  %v1748_v56 = vsel %vm914_vm1, %v1540_v8, 0.0  ;;  %vm2123_vm7 = vcmp.eq.f32.partialorder %v11507_v10, inf  ;;  %vm2125_vm8 = vcmp.eq.f32.partialorder %v11507_v10, 0.0 }
 0x2e0   : > { %v1761_v26 = vsel %vm914_vm1, %v1606_v4, 0.0  ;;  %v11561_v4 = vadd.f32 %v1731_v5, %v1730_v11  ;;  %v16308_v11 = vld [vmem:[#allocation40_spill] sm:$0xff]  ;;  %vm2039_vm4 = vcmp.eq.f32.partialorder %v11517_v18, inf  ;;  %vm2041_vm5 = vcmp.eq.f32.partialorder %v11517_v18, 0.0 }
 0x2e1   : > { %v9739_v37 = vpop.eup %9738  ;;  %v11555_v53 = vadd.f32 %v1761_v26, %v1760_v57  ;;  %v1998_v26 = vmul.f32 %v11523_v59, %v1997_v61  ;;  %v11572_v57 = vadd.f32 %v1736_v52, %v1735_v22  ;;  %v1572_v5 = vmul.f32 %v16308_v11, %v16308_v11 }
 0x2e2   : > { %v2117_v55 = vmul.f32 %v9739_v37, %v11507_v10  ;;  %v11568_v30 = vpop.eup %9740  ;;  %v1603_v61 = vmul.f32 %v11443_v7, %v11443_v7  ;;  %v1604_v22 = vmul.f32 %v11457_v29, %v11457_v29 }
 0x2e3   : > { %8789 = vmatmul.msk.f32.gmra.mxu1 %vm2346_vm14, %v2321_v40  ;;  %8955 = vmatmul.msk.f32.gmra.mxu3 %vm914_vm1, %v10724_v38  ;;  %9744 = vrsqrt.f32 %v11555_v53  ;;  %v11574_v1 = vpop.eup %9742  ;;  %v1764_v38 = vsel %vm914_vm1, %v1575_v36, 0.0  ;;  %v1743_v40 = vsel %vm914_vm1, %v1539_v24, 0.0  ;;  %v1999_v36 = vmul.f32 0.5, %v1998_v26 }
 0x2e4   : > { %v2118_v20 = vmul.f32 %v9739_v37, %v2117_v55  ;;  %v1765_v55 = vadd.f32 %v1764_v38, %v1763_v6  ;;  %v2021_v24 = vmul.f32 %v11568_v30, %v11511_v39  ;;  %9746 = vrsqrt.f32 %v11561_v4 }
 0x2e5   : > { %v11582_v19 = vpop.f32.mrf.mxu3  ;;  %v2033_v8 = vmul.f32 %v11574_v1, %v11517_v18  ;;  %9748 = vrsqrt.f32 %v11572_v57  ;;  %v1745_v6 = vadd.f32 %v1744_v63, %v1743_v40  ;;  %v1746_v38 = vsel %vm914_vm1, %v1603_v61, 0.0 }
 0x2e6   : > { %16309 = vst [vmem:[#allocation27_spill] sm:$0xff] %v11582_v19  ;;  %v1607_v52 = vmul.f32 %v11582_v19, %v11582_v19  ;;  %v2119_v21 = vmul.f32 0.5, %v2118_v20  ;;  %v1749_v20 = vsel %vm914_vm1, %v1572_v5, 0.0  ;;  %v1751_v19 = vsel %vm914_vm1, %v1604_v22, 0.0 }
 0x2e7   : > { %v2000_v0 = vsub.f32 1.5, %v1999_v36  ;;  %v2022_v63 = vmul.f32 %v11568_v30, %v2021_v24  ;;  %vm2135_vm9 = vcmp.eq.f32.partialorder %v11555_v53, inf  ;;  %vm2137_vm10 = vcmp.eq.f32.partialorder %v11555_v53, 0.0 }
 0x2e8   : > { %v1766_v7 = vsel %vm914_vm1, %v1607_v52, 0.0  ;;  %v2120_v41 = vsub.f32 1.5, %v2119_v21  ;;  %v1750_v21 = vadd.f32 %v1749_v20, %v1748_v56  ;;  %v2237_v56 = vpop.permute.xlu1 %2236 }
 0x2e9   : > { %v9745_v29 = vpop.eup %9744  ;;  %v11599_v26 = vadd.f32 %v1766_v7, %v1765_v55  ;;  %v11609_v7 = vadd.f32 %v1746_v38, %v1745_v6  ;;  %v796_v55 = vld [vmem:[%s10577_s9 + $0x50] sm:$0xff]  ;;  %v2001_v36 = vmul.f32 %v11523_v59, %v2000_v0 }
 0x2ea   : > { %v2121_v28 = vmul.f32 %v9739_v37, %v2120_v41  ;;  %v2129_v52 = vmul.f32 %v9745_v29, %v11555_v53  ;;  %v2034_v41 = vmul.f32 %v11574_v1, %v2033_v8  ;;  %v11613_v37 = vpop.eup %9746  ;;  %v11615_v48 = vadd.f32 %v1751_v19, %v1750_v21 }
 0x2eb   : > { %8790 = vmatmul.msk.f32.gmra.mxu1 %vm2346_vm14, %v2322_v43  ;;  %8956 = vmatmul.msk.f32.gmra.mxu3 %vm914_vm1, %v10732_v42  ;;  %9750 = vrsqrt.f32 %v11599_v26  ;;  %v2126_v42 = vand.u32 2147483648, %v11507_v10  ;;  %v11621_v40 = vpop.eup %9748  ;;  %v2023_v19 = vmul.f32 0.5, %v2022_v63  ;;  %v2002_v21 = vmul.f32 %v2001_v36, %v11474_v12  ;;  %v2239_v36 = vpop.permute.xlu2 %2238 }
 0x2ec   : > { %v2122_v5 = vmul.f32 %v2121_v28, %v11507_v10  ;;  %v2130_v47 = vmul.f32 %v9745_v29, %v2129_v52  ;;  %v2035_v20 = vmul.f32 0.5, %v2034_v41  ;;  %9752 = vrsqrt.f32 %v11609_v7 }
 0x2ed   : > { %v11617_v43 = vpop.f32.mrf.mxu3  ;;  %v2069_v38 = vmul.f32 %v11621_v40, %v11572_v57  ;;  %v2057_v52 = vmul.f32 %v11613_v37, %v11561_v4  ;;  %9754 = vrsqrt.f32 %v11615_v48  ;;  %v2024_v41 = vsub.f32 1.5, %v2023_v19 }
 0x2ee   : > { %v2124_v61 = vsel %vm2123_vm7, %v11507_v10, %v2122_v5  ;;  %v2131_v28 = vmul.f32 0.5, %v2130_v47  ;;  %v2323_v10 = vsel %vm2312_vm13, %v796_v55, %v2237_v56  ;;  %v2036_v47 = vsub.f32 1.5, %v2035_v20 }
 0x2ef   : > { %v2127_v22 = vsel %vm2125_vm8, %v2126_v42, %v2124_v61  ;;  %v2070_v61 = vmul.f32 %v11621_v40, %v2069_v38  ;;  %vm2147_vm15 = vcmp.eq.f32.partialorder %v11599_v26, inf  ;;  %vm2149_vm2 = vcmp.eq.f32.partialorder %v11599_v26, 0.0 }
 0x2f0   : > { %v2181_v24 = vadd.f32 1e-08, %v2127_v22  ;;  %v2132_v8 = vsub.f32 1.5, %v2131_v28  ;;  %v2058_v28 = vmul.f32 %v11613_v37, %v2057_v52  ;;  %v2037_v38 = vmul.f32 %v11574_v1, %v2036_v47 }
 0x2f1   : > { %v9751_v6 = vpop.eup %9750  ;;  %v2025_v52 = vmul.f32 %v11568_v30, %v2024_v41  ;;  %v2150_v41 = vand.u32 2147483648, %v11599_v26  ;;  %vm2075_vm7 = vcmp.eq.f32.partialorder %v11572_v57, inf  ;;  %vm2063_vm8 = vcmp.eq.f32.partialorder %v11561_v4, inf }
 0x2f2   : > { %2274 = vrot.lane.b32.xlu1 %v2181_v24, %s10280_s13  ;;  %v2133_v0 = vmul.f32 %v9745_v29, %v2132_v8  ;;  %v2141_v59 = vmul.f32 %v9751_v6, %v11599_v26  ;;  %v2138_v29 = vand.u32 2147483648, %v11555_v53  ;;  %v11647_v56 = vpop.eup %9752  ;;  %v797_v24 = vld [vmem:[%s10577_s9 + $0x58] sm:$0xff] }
 0x2f3   : > { %8791 = vmatmul.msk.f32.gmra.mxu1 %vm2346_vm14, %v2323_v10  ;;  %8957 = vmatmul.msk.f32.gmra.mxu3 %vm914_vm1, %v10740_v46  ;;  %v11651_v55 = vpop.eup %9754  ;;  %v2004_v10 = vsel %vm2003_vm11, %v11474_v12, %v2002_v21  ;;  %v2038_v21 = vmul.f32 %v2037_v38, %v11517_v18  ;;  %vm2111_vm11 = vcmp.eq.f32.partialorder %v11615_v48, inf }
 0x2f4   : > { %v2134_v63 = vmul.f32 %v2133_v0, %v11555_v53  ;;  %v2142_v5 = vmul.f32 %v9751_v6, %v2141_v59  ;;  %v2006_v0 = vand.u32 2147483648, %v11474_v12  ;;  %v2071_v59 = vmul.f32 0.5, %v2070_v61 }
 0x2f5   : > { %v11641_v42 = vpop.f32.mrf.mxu3 }
 0x2f6   : > { %v2136_v46 = vsel %vm2135_vm9, %v11555_v53, %v2134_v63  ;;  %v2143_v22 = vmul.f32 0.5, %v2142_v5  ;;  %v2059_v53 = vmul.f32 0.5, %v2058_v28  ;;  %v2324_v63 = vsel %vm2312_vm13, %v797_v24, %v2239_v36  ;;  %v2241_v36 = vpop.permute.xlu0 %2240  ;;  %v798_v24 = vld [vmem:[%s10577_s9 + $0x60] sm:$0xff] }
 0x2f7   : > { %v2139_v19 = vsel %vm2137_vm10, %v2138_v29, %v2136_v46  ;;  %v2105_v29 = vmul.f32 %v11651_v55, %v11615_v48  ;;  %v2093_v46 = vmul.f32 %v11647_v56, %v11609_v7  ;;  %v2007_v30 = vsel %vm2005_vm12, %v2006_v0, %v2004_v10 }
 0x2f8   : > { %v2182_v8 = vadd.f32 1e-08, %v2139_v19  ;;  %v2144_v20 = vsub.f32 1.5, %v2143_v22  ;;  %v2072_v61 = vsub.f32 1.5, %v2071_v59  ;;  %v2060_v28 = vsub.f32 1.5, %v2059_v53 }
 0x2f9   : > { %v2106_v12 = vmul.f32 %v11651_v55, %v2105_v29  ;;  %v2094_v22 = vmul.f32 %v11647_v56, %v2093_v46  ;;  %v2040_v0 = vsel %vm2039_vm4, %v11517_v18, %v2038_v21  ;;  %v2243_v21 = vpop.permute.xlu1 %2242  ;;  %vm2077_vm9 = vcmp.eq.f32.partialorder %v11572_v57, 0.0 }
 0x2fa   : > { %2276 = vrot.lane.b32.xlu0 %v2182_v8, %s10280_s13  ;;  %v2145_v5 = vmul.f32 %v9751_v6, %v2144_v20  ;;  %v2026_v6 = vmul.f32 %v2025_v52, %v11511_v39  ;;  %v2171_v8 = vadd.f32 1e-08, %v2007_v30  ;;  %v2073_v52 = vmul.f32 %v11621_v40, %v2072_v61 }
 0x2fb   : > { %8792 = vmatmul.msk.f32.gmra.mxu1 %vm2346_vm14, %v2324_v63  ;;  %8958 = vmatmul.msk.f32.gmra.mxu3 %vm914_vm1, %v10748_v50  ;;  %v2061_v10 = vmul.f32 %v11613_v37, %v2060_v28  ;;  %v2107_v59 = vmul.f32 0.5, %v2106_v12  ;;  %v2095_v53 = vmul.f32 0.5, %v2094_v22  ;;  %v2042_v40 = vand.u32 2147483648, %v11517_v18 }
 0x2fc   : > { %v2146_v1 = vmul.f32 %v2145_v5, %v11599_v26  ;;  %v2028_v38 = vsel %vm2027_vm3, %v11511_v39, %v2026_v6  ;;  %v2030_v37 = vand.u32 2147483648, %v11511_v39  ;;  %v2074_v46 = vmul.f32 %v2073_v52, %v11572_v57  ;;  %v799_v6 = vld [vmem:[%s10577_s9 + $0x68] sm:$0xff] }
 0x2fd   : > { %v11672_v47 = vpop.f32.mrf.mxu3  ;;  %v2043_v5 = vsel %vm2041_vm5, %v2042_v40, %v2040_v0  ;;  %v2062_v30 = vmul.f32 %v2061_v10, %v11561_v4  ;;  %v2326_v28 = vsel %vm2312_vm13, %v799_v6, %v2243_v21  ;;  %v2078_v22 = vand.u32 2147483648, %v11572_v57 }
 0x2fe   : > { %v2148_v50 = vsel %vm2147_vm15, %v11599_v26, %v2146_v1  ;;  %v2325_v26 = vsel %vm2312_vm13, %v798_v24, %v2241_v36  ;;  %v2031_v29 = vsel %vm2029_vm6, %v2030_v37, %v2028_v38  ;;  %v2108_v1 = vsub.f32 1.5, %v2107_v59  ;;  %v2247_v37 = vpop.permute.xlu0 %2246 }
 0x2ff   : > { %v2151_v19 = vsel %vm2149_vm2, %v2150_v41, %v2148_v50  ;;  %v2174_v41 = vadd.f32 1e-08, %v2043_v5  ;;  %v2173_v61 = vadd.f32 1e-08, %v2031_v29  ;;  %v2076_v39 = vsel %vm2075_vm7, %v11572_v57, %v2074_v46  ;;  %v801_v5 = vld [vmem:[%s10577_s9 + $0x78] sm:$0xff] }
 0x300   : > { %v2183_v20 = vadd.f32 1e-08, %v2151_v19  ;;  %v2064_v18 = vsel %vm2063_vm8, %v11561_v4, %v2062_v30  ;;  %v2109_v50 = vmul.f32 %v11651_v55, %v2108_v1  ;;  %v2066_v36 = vand.u32 2147483648, %v11561_v4  ;;  %v802_v30 = vld [vmem:[%s10577_s9 + $0x80] sm:$0xff] }
 0x301   : > { %vm2065_vm10 = vcmp.eq.f32.partialorder %v11561_v4, 0.0  ;;  %v2079_v24 = vsel %vm2077_vm9, %v2078_v22, %v2076_v39  ;;  %vm2099_vm12 = vcmp.eq.f32.partialorder %v11609_v7, inf  ;;  %v2102_v0 = vand.u32 2147483648, %v11609_v7 }
 0x302   : > { %2254 = vrot.lane.b32.xlu0 %v2171_v8, %s10280_s13  ;;  %2278 = vrot.lane.b32.xlu2 %v2183_v20, %s10280_s13  ;;  %v2067_v8 = vsel %vm2065_vm10, %v2066_v36, %v2064_v18  ;;  %v2110_v55 = vmul.f32 %v2109_v50, %v11615_v48  ;;  %v2245_v20 = vpop.permute.xlu2 %2244  ;;  %v2177_v38 = vadd.f32 1e-08, %v2079_v24  ;;  %vm2113_vm15 = vcmp.eq.f32.partialorder %v11615_v48, 0.0  ;;  %v11780_v24 = vld [vmem:[%s16061_s4 + $0x28] ss:$0 sm:$0xff] }
 0x303   : > { %8959 = vmatmul.msk.f32.gmra.mxu3 %vm914_vm1, %v10756_v54  ;;  %8793 = vmatmul.msk.f32.gmra.mxu1 %vm2346_vm14, %v2325_v26  ;;  %v2096_v54 = vsub.f32 1.5, %v2095_v53  ;;  %v2176_v52 = vadd.f32 1e-08, %v2067_v8  ;;  %v2114_v26 = vand.u32 2147483648, %v11615_v48  ;;  %vm2101_vm2 = vcmp.eq.f32.partialorder %v11609_v7, 0.0 }
 0x304   : > { %v2112_v57 = vsel %vm2111_vm11, %v11615_v48, %v2110_v55  ;;  %v2328_v46 = vsel %vm2312_vm13, %v801_v5, %v2247_v37  ;;  %v2249_v48 = vpop.permute.xlu1 %2248  ;;  %vm3169_vm6 = vcmask 130048  }
 0x305   : > { %v11697_v63 = vpop.f32.mrf.mxu3  ;;  %v2097_v12 = vmul.f32 %v11647_v56, %v2096_v54  ;;  %v2115_v53 = vsel %vm2113_vm15, %v2114_v26, %v2112_v57  ;;  %v2329_v1 = vsel %vm2312_vm13, %v802_v30, %v2249_v48  ;;  %v779_v26 = vld [vmem:[%s16062_s5 + $0x18] sm:$0xff] }
 0x306   : > { %v2180_v29 = vadd.f32 1e-08, %v2115_v53  ;;  %3280 = vmatpush.msrb.mxu2 %v779_v26 }
 0x307   : > { %v2098_v56 = vmul.f32 %v2097_v12, %v11609_v7 }
 0x309   : > { %v2100_v10 = vsel %vm2099_vm12, %v11609_v7, %v2098_v56 }
 0x30a   : > { %2260 = vrot.lane.b32.xlu0 %v2174_v41, %s10280_s13  ;;  %2258 = vrot.lane.b32.xlu2 %v2173_v61, %s10280_s13  ;;  %v2103_v40 = vsel %vm2101_vm2, %v2102_v0, %v2100_v10  ;;  %v2251_v6 = vpop.permute.xlu2 %2250  ;;  %v803_v41 = vld [vmem:[%s10577_s9 + $0x88] sm:$0xff] }
 0x30b   : > { %8960 = vmatmul.msk.f32.gmra.mxu3 %vm914_vm1, %v10764_v58  ;;  %8794 = vmatmul.msk.f32.gmra.mxu1 %vm2346_vm14, %v2326_v28  ;;  %v800_v58 = vld [vmem:[%s10577_s9 + $0x70] sm:$0xff] }
 0x30c   : > { %v2327_v4 = vsel %vm2312_vm13, %v800_v58, %v2245_v20  ;;  %v2253_v39 = vpop.permute.xlu1 %2252  ;;  %v804_v28 = vld [vmem:[%s10577_s9 + $0x90] sm:$0xff] }
 0x30d   : > { %v11718_v19 = vpop.f32.mrf.mxu3  ;;  %v2331_v50 = vsel %vm2312_vm13, %v804_v28, %v2253_v39  ;;  %v805_v28 = vld [vmem:[%s10577_s9 + $0x98] sm:$0xff] }
 0x312   : > { %2266 = vrot.lane.b32.xlu0 %v2177_v38, %s10280_s13  ;;  %2264 = vrot.lane.b32.xlu2 %v2176_v52, %s10280_s13 }
 0x313   : > { %8961 = vmatmul.msk.f32.gmra.mxu3 %vm914_vm1, %v16288_v45  ;;  %8795 = vmatmul.msk.f32.gmra.mxu1 %vm2346_vm14, %v2327_v4  ;;  %v2179_v45 = vadd.f32 1e-08, %v2103_v40  ;;  %v778_v40 = vld [vmem:[%s16062_s5 + $0x10] sm:$0xff] }
 0x314   : > { %3281 = vmatpush.msrb.mxu2 %v778_v40 }
 0x315   : > { %v11737_v59 = vpop.f32.mrf.mxu3 }
 0x31a   : > { %2272 = vrot.lane.b32.xlu0 %v2180_v29, %s10280_s13  ;;  %2270 = vrot.lane.b32.xlu2 %v2179_v45, %s10280_s13  ;;  %v816_v29 = vld [vmem:[%s10577_s9 + $0xf0] sm:$0xff]  ;;  %s10281_s13 = smov 16  }
 0x31b   : > { %8962 = vmatmul.msk.f32.gmra.mxu3 %vm914_vm1, %v10780_v2  ;;  %8796 = vmatmul.msk.f32.gmra.mxu1 %vm2346_vm14, %v2328_v46  ;;  %v2330_v2 = vsel %vm2312_vm13, %v803_v41, %v2251_v6 }
 0x31d   : > { %v11746_v7 = vpop.f32.mrf.mxu3 }
 0x31f   : > { %v2464_v54 = vpop.f32.mrf.mxu1 }
 0x323   : > { %8797 = vmatmul.msk.f32.gmra.mxu1 %vm2346_vm14, %v2329_v1  ;;  %8963 = vmatmul.msk.f32.gmra.mxu3 %vm914_vm1, %v16291_v60 }
 0x325   : > { %v11753_v21 = vpop.f32.mrf.mxu3 }
 0x327   : > { %v2467_v18 = vpop.f32.mrf.mxu1 }
 0x32b   : > { %8798 = vmatmul.msk.f32.gmra.mxu1 %vm2346_vm14, %v2330_v2  ;;  %8964 = vmatmul.msk.f32.gmra.mxu3 %vm914_vm1, %v16292_v35 }
 0x32e   : > { %v11760_v61 = vpop.f32.mrf.mxu3 }
 0x330   : > { %v2470_v12 = vpop.f32.mrf.mxu1 }
 0x331   : > { %v11801_v38 = vadd.f32 %v11780_v24, %v2470_v12 }
 0x333   : > { %8799 = vmatmul.msk.f32.gmra.mxu1 %vm2346_vm14, %v2331_v50  ;;  %8965 = vmatmul.msk.f32.gmra.mxu3 %vm914_vm1, %v10804_v25  ;;  %v11785_v25 = vadd.f32 %v11780_v24, %v2464_v54  ;;  %16312 = vst [vmem:[#allocation32_spill] sm:$0xff] %v11801_v38  ;;  %v8815_v4 = vmul.f32 -1.442695, %v11801_v38  ;;  %v817_v50 = vld [vmem:[%s10577_s9 + $0xf8] sm:$0xff] }
 0x335   : > { %16310 = vst [vmem:[#allocation29_spill] sm:$0xff] %v11785_v25  ;;  %v8813_v55 = vmul.f32 -1.442695, %v11785_v25 }
 0x336   : > { %v11767_v60 = vpop.f32.mrf.mxu3 }
 0x337   : > { %9756 = vpow2.f32 %v8813_v55 }
 0x338   : > { %v2473_v35 = vpop.f32.mrf.mxu1 }
 0x33b   : > { %8966 = vmatmul.msk.f32.gmra.mxu3 %vm914_vm1, %v16297_v31 }
 0x33d   : > { %v9757_v58 = vpop.eup %9756 }
 0x33e   : > { %v11771_v22 = vpop.f32.mrf.mxu3  ;;  %v11803_v52 = vadd.f32 1.0, %v9757_v58 }
 0x340   : > { %v2476_v31 = vpop.f32.mrf.mxu1  ;;  %v2699_v40 = vand.u32 2147483648, %v11803_v52  ;;  %vm2693_vm4 = vweird.f32 %v11803_v52 }
 0x341   : > { %v11838_v48 = vadd.f32 %v11780_v24, %v2476_v31 }
 0x343   : > { %8967 = vmatmul.msk.f32.gmra.mxu3 %vm914_vm1, %v16299_v14  ;;  %v11793_v14 = vadd.f32 %v11780_v24, %v2467_v18  ;;  %16315 = vst [vmem:[#allocation38_spill] sm:$0xff] %v11838_v48  ;;  %v8817_v39 = vmul.f32 -1.442695, %v11838_v48 }
 0x345   : > { %16311 = vst [vmem:[#allocation42_spill] sm:$0xff] %v11793_v14 }
 0x346   : > { %v11775_v36 = vpop.f32.mrf.mxu3 }
 0x348   : > { %v2479_v20 = vpop.f32.mrf.mxu1 }
 0x349   : > { %v11858_v31 = vadd.f32 %v11780_v24, %v2479_v20 }
 0x34b   : > { %8968 = vmatmul.msk.f32.gmra.mxu3 %vm914_vm1, %v16282_v32  ;;  %v8814_v32 = vmul.f32 -1.442695, %v11793_v14  ;;  %16317 = vst [vmem:[#allocation40_spill] sm:$0xff] %v11858_v31 }
 0x34d   : > { %9758 = vpow2.f32 %v8814_v32 }
 0x34e   : > { %v11787_v8 = vpop.f32.mrf.mxu3  ;;  %9760 = vrcp.f32 %v11803_v52 }
 0x34f   : > { %9762 = vpow2.f32 %v8815_v4 }
 0x350   : > { %v11809_v57 = vpop.f32.mrf.mxu1 }
 0x353   : > { %8969 = vmatmul.msk.f32.gmra.mxu3 %vm914_vm1, %v16304_v15  ;;  %v9759_v10 = vpop.eup %9758 }
 0x354   : > { %v11819_v0 = vadd.f32 1.0, %v9759_v10  ;;  %v11826_v37 = vpop.eup %9760 }
 0x355   : > { %v9763_v5 = vpop.eup %9762  ;;  %v2689_v45 = vmul.f32 %v11826_v37, %v11803_v52  ;;  %vm2694_vm3 = vweird.f32 %v11826_v37 }
 0x356   : > { %v11795_v56 = vpop.f32.mrf.mxu3  ;;  %9764 = vrcp.f32 %v11819_v0  ;;  %v11840_v1 = vadd.f32 1.0, %v9763_v5  ;;  %vm11879_vm5 = vmor %vm2693_vm4, %vm2694_vm3  ;;  %vm2708_vm9 = vweird.f32 %v11819_v0 }
 0x357   : > { %v2690_v41 = vsub.f32 1.0, %v2689_v45 }
 0x358   : > { %v11833_v46 = vpop.f32.mrf.mxu1  ;;  %vm2723_vm15 = vweird.f32 %v11840_v1 }
 0x359   : > { %v2691_v12 = vmul.f32 %v11826_v37, %v2690_v41  ;;  %v806_v41 = vld [vmem:[%s10577_s9 + $0xa0] sm:$0xff] }
 0x35b   : > { %8970 = vmatmul.msk.f32.gmra.mxu3 %vm914_vm1, %v16308_v11  ;;  %v11814_v11 = vadd.f32 %v11780_v24, %v2473_v35 }
 0x35c   : > { %v11846_v2 = vpop.eup %9764  ;;  %v2279_v18 = vpop.permute.xlu2 %2278 }
 0x35d   : > { %16313 = vst [vmem:[#allocation34_spill] sm:$0xff] %v11814_v11  ;;  %v2704_v35 = vmul.f32 %v11846_v2, %v11819_v0  ;;  %v2344_v10 = vsel %vm2312_vm13, %v817_v50, %v2279_v18  ;;  %v11894_v50 = vadd.f32 %v11780_v24, %v11809_v57  ;;  %vm2709_vm8 = vweird.f32 %v11846_v2 }
 0x35e   : > { %v11805_v15 = vpop.f32.mrf.mxu3  ;;  %vm11912_vm10 = vmor %vm2708_vm9, %vm2709_vm8 }
 0x35f   : > { %v2705_v20 = vsub.f32 1.0, %v2704_v35 }
 0x360   : > { %v11862_v58 = vpop.f32.mrf.mxu1 }
 0x363   : > { %8971 = vmatmul.msk.f32.gmra.mxu3 %vm914_vm1, %v16296_v49  ;;  %v8816_v49 = vmul.f32 -1.442695, %v11814_v11 }
 0x364   : > { %v2259_v45 = vpop.permute.xlu2 %2258 }
 0x365   : > { %9766 = vpow2.f32 %v8816_v49  ;;  %v8818_v49 = vmul.f32 -1.442695, %v11858_v31 }
 0x366   : > { %v11821_v53 = vpop.f32.mrf.mxu3  ;;  %9768 = vrcp.f32 %v11840_v1 }
 0x367   : > { %16314 = vst [vmem:[#allocation44_spill] sm:$0xff] %v11821_v53  ;;  %9770 = vpow2.f32 %v8817_v39 }
 0x368   : > { %v11905_v57 = vpop.f32.mrf.mxu1 }
 0x36b   : > { %8972 = vmatmul.msk.f32.gmra.mxu3 %vm914_vm1, %v16301_v51  ;;  %v9767_v51 = vpop.eup %9766 }
 0x36c   : > { %v2277_v30 = vpop.permute.xlu0 %2276  ;;  %v11860_v32 = vadd.f32 1.0, %v9767_v51  ;;  %v11870_v26 = vpop.eup %9768  ;;  %v2706_v51 = vmul.f32 %v11846_v2, %v2705_v20  ;;  %v8819_v20 = vmul.f32 -1.442695, %v11894_v50 }
 0x36d   : > { %v2343_v54 = vsel %vm2312_vm13, %v816_v29, %v2277_v30  ;;  %v2697_v29 = vand.u32 2147483647, %v11803_v52  ;;  %v9771_v30 = vpop.eup %9770  ;;  %v2719_v18 = vmul.f32 %v11870_v26, %v11840_v1  ;;  %v2700_v52 = vor.u32 1.1754944e-38, %v2699_v40 }
 0x36e   : > { %v11843_v6 = vpop.f32.mrf.mxu3  ;;  %8811 = vmatmul.msk.f32.vlgmr.msra.gmra.mxu2 %vm2346_vm14, %v2343_v54  ;;  %9772 = vrcp.f32 %v11860_v32  ;;  %v2257_v54 = vpop.permute.xlu1 %2256  ;;  %v2712_v40 = vand.u32 2147483647, %v11819_v0  ;;  %vm2724_vm12 = vweird.f32 %v11870_v26 }
 0x36f   : > { %16316 = vst [vmem:[#allocation46_spill] sm:$0xff] %v11843_v6  ;;  %9774 = vpow2.f32 %v8818_v49  ;;  %vm2698_vm7 = vcmp.eq.f32.partialorder %v2697_v29, 8.507059e+37  ;;  %vm11947_vm2 = vmor %vm2723_vm15, %vm2724_vm12  ;;  %v2742_v49 = vand.u32 2147483647, %v11860_v32 }
 0x370   : > { %vm2713_vm11 = vcmp.eq.f32.partialorder %v2712_v40, 8.507059e+37  ;;  %v11945_v40 = vpop.f32.mrf.mxu1 }
 0x371   : > { %vm2743_vm8 = vcmp.eq.f32.partialorder %v2742_v49, 8.507059e+37 }
 0x373   : > { %8973 = vmatmul.msk.f32.gmra.mxu3 %vm914_vm1, %v16305_v34  ;;  %v2692_v34 = vadd.f32 %v11826_v37, %v2691_v12  ;;  %v11896_v12 = vadd.f32 1.0, %v9771_v30 }
 0x374   : > { %v2255_v55 = vpop.permute.xlu0 %2254 }
 0x375   : > { %v2332_v4 = vsel %vm2312_vm13, %v805_v28, %v2255_v55  ;;  %v2696_v39 = vsel %vm11879_vm5, %v11826_v37, %v2692_v34  ;;  %v16321_v28 = vld [vmem:[#allocation48_spill] sm:$0xff]  ;;  %v2333_v37 = vsel %vm2312_vm13, %v806_v41, %v2257_v54  ;;  %v2707_v55 = vadd.f32 %v11846_v2, %v2706_v51  ;;  %v807_v54 = vld [vmem:[%s10577_s9 + $0xa8] sm:$0xff]  ;;  %v16326_v51 = vld [vmem:[#allocation50_spill] sm:$0xff] }
 0x376   : > { %8800 = vmatmul.msk.f32.gmra.mxu1 %vm2346_vm14, %v2332_v4  ;;  %8812 = vmatmul.msk.f32.gmra.mxu2 %vm2346_vm14, %v2344_v10  ;;  %v11874_v5 = vpop.f32.mrf.mxu3  ;;  %16322 = vst [vmem:[#allocation48_spill] sm:$0xff] %v11894_v50  ;;  %v2701_v35 = vsel %vm2698_vm7, %v2700_v52, %v2696_v39  ;;  %v2720_v4 = vsub.f32 1.0, %v2719_v18  ;;  %v11903_v10 = vpop.eup %9772  ;;  %v2714_v34 = vand.u32 2147483648, %v11819_v0  ;;  %9776 = vrcp.f32 %v11896_v12 }
 0x377   : > { %16318 = vst [vmem:[#allocation66_spill] sm:$0xff] %v11874_v5  ;;  %v9775_v29 = vpop.eup %9774  ;;  %v2711_v41 = vsel %vm11912_vm10, %v11846_v2, %v2707_v55  ;;  %v2734_v0 = vmul.f32 %v11903_v10, %v11860_v32  ;;  %9778 = vpow2.f32 %v8819_v20  ;;  %v2727_v20 = vand.u32 2147483647, %v11840_v1 }
 0x378   : > { %v2721_v39 = vmul.f32 %v11870_v26, %v2720_v4  ;;  %v2715_v18 = vor.u32 1.1754944e-38, %v2714_v34  ;;  %v11931_v52 = vadd.f32 1.0, %v9775_v29  ;;  %vm2739_vm4 = vweird.f32 %v11903_v10 }
 0x379   : > { %v2735_v55 = vsub.f32 1.0, %v2734_v0  ;;  %v16330_v0 = vld [vmem:[#allocation52_spill] sm:$0xff]  ;;  %vm2728_vm3 = vcmp.eq.f32.partialorder %v2727_v20, 8.507059e+37  ;;  %vm2738_vm5 = vweird.f32 %v11860_v32  ;;  %v2759_v49 = vand.u32 2147483648, %v11896_v12 }
 0x37a   : > { %v2716_v2 = vsel %vm2713_vm11, %v2715_v18, %v2711_v41  ;;  %9780 = vrcp.f32 %v11931_v52  ;;  %v11962_v18 = vadd.f32 %v11780_v24, %v11862_v58  ;;  %vm11980_vm7 = vmor %vm2738_vm5, %vm2739_vm4  ;;  %vm2753_vm10 = vweird.f32 %v11896_v12 }
 0x37b   : > { %8974 = vmatmul.msk.f32.gmra.mxu3 %vm914_vm1, %v16321_v28  ;;  %v11929_v28 = vadd.f32 %v11780_v24, %v11833_v46  ;;  %v2729_v46 = vand.u32 2147483648, %v11840_v1 }
 0x37c   : > { %v11938_v4 = vpop.eup %9776  ;;  %16331 = vst [vmem:[#allocation52_spill] sm:$0xff] %v11962_v18  ;;  %v8821_v20 = vmul.f32 -1.442695, %v11962_v18 }
 0x37d   : > { %16327 = vst [vmem:[#allocation50_spill] sm:$0xff] %v11929_v28  ;;  %v8820_v34 = vmul.f32 -1.442695, %v11929_v28  ;;  %v9779_v29 = vpop.eup %9778  ;;  %v2749_v1 = vmul.f32 %v11938_v4, %v11896_v12  ;;  %vm2754_vm9 = vweird.f32 %v11938_v4 }
 0x37e   : > { %8801 = vmatmul.msk.f32.gmra.mxu1 %vm2346_vm14, %v2333_v37  ;;  %8845 = vmatmul.msk.f32.vlgmr.msrb.gmra.mxu2 %vm3169_vm6, %v2701_v35  ;;  %v11916_v30 = vpop.f32.mrf.mxu3  ;;  %v2334_v37 = vsel %vm2312_vm13, %v807_v54, %v2259_v45  ;;  %v2722_v35 = vadd.f32 %v11870_v26, %v2721_v39  ;;  %v2261_v45 = vpop.permute.xlu0 %2260  ;;  %v808_v54 = vld [vmem:[%s10577_s9 + $0xb0] sm:$0xff]  ;;  %v2736_v39 = vmul.f32 %v11903_v10, %v2735_v55  ;;  %vm12013_vm11 = vmor %vm2753_vm10, %vm2754_vm9 }
 0x37f   : > { %16325 = vst [vmem:[#allocation67_spill] sm:$0xff] %v11916_v30  ;;  %9782 = vpow2.f32 %v8820_v34  ;;  %v2744_v34 = vand.u32 2147483648, %v11860_v32  ;;  %v16335_v32 = vld [vmem:[#allocation53_spill] sm:$0xff] }
 0x380   : > { %v2726_v41 = vsel %vm11947_vm2, %v11870_v26, %v2722_v35  ;;  %v2335_v26 = vsel %vm2312_vm13, %v808_v54, %v2261_v45  ;;  %v2737_v55 = vadd.f32 %v11903_v10, %v2736_v39  ;;  %v11973_v58 = vpop.eup %9780  ;;  %v2263_v54 = vpop.permute.xlu1 %2262  ;;  %vm2768_vm2 = vweird.f32 %v11931_v52 }
 0x381   : > { %vm2769_vm15 = vweird.f32 %v11973_v58 }
 0x382   : > { %v2741_v39 = vsel %vm11980_vm7, %v11903_v10, %v2737_v55 }
 0x383   : > { %8975 = vmatmul.msk.f32.gmra.mxu3 %vm914_vm1, %v16326_v51  ;;  %v2730_v51 = vor.u32 1.1754944e-38, %v2729_v46  ;;  %v2750_v46 = vsub.f32 1.0, %v2749_v1 }
 0x385   : > { %v2731_v35 = vsel %vm2728_vm3, %v2730_v51, %v2726_v41  ;;  %v9783_v45 = vpop.eup %9782  ;;  %v809_v41 = vld [vmem:[%s10577_s9 + $0xb8] sm:$0xff]  ;;  %v2751_v1 = vmul.f32 %v11938_v4, %v2750_v46  ;;  %v2497_v51 = vpop.f32.mrf.mxu1  ;;  %vm2770_vm3 = vmor %vm2768_vm2, %vm2769_vm15 }
 0x386   : > { %8802 = vmatmul.msk.f32.gmra.mxu1 %vm2346_vm14, %v2334_v37  ;;  %8846 = vmatmul.msk.f32.gmra.mxu2 %vm3169_vm6, %v2716_v2  ;;  %v11964_v37 = vpop.f32.mrf.mxu3  ;;  %v11966_v2 = vadd.f32 1.0, %v9779_v29  ;;  %v11997_v18 = vadd.f32 1.0, %v9783_v45  ;;  %v2336_v10 = vsel %vm2312_vm13, %v809_v41, %v2263_v54  ;;  %v2757_v45 = vand.u32 2147483647, %v11896_v12 }
 0x387   : > { %16332 = vst [vmem:[#allocation68_spill] sm:$0xff] %v11964_v37  ;;  %v2760_v12 = vor.u32 1.1754944e-38, %v2759_v49 }
 0x388   : > { %9784 = vrcp.f32 %v11966_v2  ;;  %vm2758_vm12 = vcmp.eq.f32.partialorder %v2757_v45, 8.507059e+37  ;;  %vm2783_vm7 = vweird.f32 %v11966_v2 }
 0x389   : > { %9786 = vpow2.f32 %v8821_v20 }
 0x38a   : > { %9788 = vrcp.f32 %v11997_v18 }
 0x38b   : > { %8976 = vmatmul.msk.f32.gmra.mxu3 %vm914_vm1, %v16330_v0  ;;  %v2764_v0 = vmul.f32 %v11973_v58, %v11931_v52 }
 0x38d   : > { %v2765_v20 = vsub.f32 1.0, %v2764_v0 }
 0x38e   : > { %8803 = vmatmul.msk.f32.gmra.mxu1 %vm2346_vm14, %v2335_v26  ;;  %8847 = vmatmul.msk.f32.gmra.mxu2 %vm3169_vm6, %v2731_v35  ;;  %v2745_v26 = vor.u32 1.1754944e-38, %v2744_v34  ;;  %v11995_v35 = vadd.f32 %v11780_v24, %v11905_v57  ;;  %v12000_v46 = vpop.f32.mrf.mxu3  ;;  %v2752_v34 = vadd.f32 %v11938_v4, %v2751_v1  ;;  %v12006_v57 = vpop.eup %9784 }
 0x38f   : > { %16337 = vst [vmem:[#allocation69_spill] sm:$0xff] %v12000_v46  ;;  %v9787_v41 = vpop.eup %9786  ;;  %v2265_v1 = vpop.permute.xlu2 %2264  ;;  %vm2784_vm5 = vweird.f32 %v12006_v57 }
 0x390   : > { %16336 = vst [vmem:[#allocation53_spill] sm:$0xff] %v11995_v35  ;;  %v2746_v55 = vsel %vm2743_vm8, %v2745_v26, %v2741_v39  ;;  %v8822_v29 = vmul.f32 -1.442695, %v11995_v35  ;;  %v810_v39 = vld [vmem:[%s10577_s9 + $0xc0] sm:$0xff]  ;;  %v2756_v0 = vsel %vm12013_vm11, %v11938_v4, %v2752_v34  ;;  %v2779_v26 = vmul.f32 %v12006_v57, %v11966_v2  ;;  %v2500_v4 = vpop.f32.mrf.mxu1  ;;  %vm12070_vm8 = vmor %vm2783_vm7, %vm2784_vm5 }
 0x391   : > { %v12030_v35 = vadd.f32 1.0, %v9787_v41  ;;  %v2337_v54 = vsel %vm2312_vm13, %v810_v39, %v2265_v1  ;;  %v2761_v34 = vsel %vm2758_vm12, %v2760_v12, %v2756_v0  ;;  %v2772_v39 = vand.u32 2147483647, %v11931_v52  ;;  %v811_v0 = vld [vmem:[%s10577_s9 + $0xc8] sm:$0xff] }
 0x392   : > { %9790 = vpow2.f32 %v8822_v29  ;;  %v2780_v49 = vsub.f32 1.0, %v2779_v26  ;;  %v12037_v29 = vpop.eup %9788  ;;  %vm2798_vm11 = vweird.f32 %v11997_v18 }
 0x393   : > { %8977 = vmatmul.msk.f32.gmra.mxu3 %vm914_vm1, %v16335_v32  ;;  %v2766_v32 = vmul.f32 %v11973_v58, %v2765_v20  ;;  %9792 = vrcp.f32 %v12030_v35  ;;  %v2794_v12 = vmul.f32 %v12037_v29, %v11997_v18  ;;  %vm2773_vm4 = vcmp.eq.f32.partialorder %v2772_v39, 8.507059e+37 }
 0x394   : > { %vm2799_vm10 = vweird.f32 %v12037_v29 }
 0x395   : > { %v2767_v20 = vadd.f32 %v11973_v58, %v2766_v32  ;;  %v2267_v32 = vpop.permute.xlu0 %2266  ;;  %vm12102_vm12 = vmor %vm2798_vm11, %vm2799_vm10 }
 0x396   : > { %8804 = vmatmul.msk.f32.gmra.mxu1 %vm2346_vm14, %v2336_v10  ;;  %8848 = vmatmul.msk.f32.gmra.mxu2 %vm3169_vm6, %v2746_v55  ;;  %v16340_v10 = vld [vmem:[#allocation54_spill] sm:$0xff]  ;;  %v12028_v55 = vadd.f32 %v11780_v24, %v11945_v40  ;;  %v2774_v40 = vand.u32 2147483648, %v11931_v52  ;;  %v12041_v41 = vpop.f32.mrf.mxu3  ;;  %v12054_v52 = vadd.f32 %v11780_v24, %v2497_v51  ;;  %v2338_v28 = vsel %vm2312_vm13, %v811_v0, %v2267_v32  ;;  %v812_v32 = vld [vmem:[%s10577_s9 + $0xd0] sm:$0xff] }
 0x397   : > { %16342 = vst [vmem:[#allocation70_spill] sm:$0xff] %v12041_v41  ;;  %v2771_v26 = vsel %vm2770_vm3, %v11973_v58, %v2767_v20  ;;  %vm2813_vm3 = vweird.f32 %v12030_v35  ;;  %v16466_v41 = vld [vmem:[#allocation51_spill] sm:$0xff] }
 0x398   : > { %16341 = vst [vmem:[#allocation54_spill] sm:$0xff] %v12028_v55  ;;  %v8823_v45 = vmul.f32 -1.442695, %v12028_v55  ;;  %v9791_v1 = vpop.eup %9790  ;;  %v2503_v51 = vpop.f32.mrf.mxu1  ;;  %v8824_v39 = vmul.f32 -1.442695, %v12054_v52 }
 0x399   : > { %v12056_v55 = vadd.f32 1.0, %v9791_v1  ;;  %v2787_v1 = vand.u32 2147483647, %v11966_v2 }
 0x39a   : > { %9794 = vpow2.f32 %v8823_v45  ;;  %v2789_v45 = vand.u32 2147483648, %v11966_v2 }
 0x39b   : > { %8978 = vmatmul.msk.f32.gmra.mxu3 %vm914_vm1, %v16340_v10  ;;  %v2781_v10 = vmul.f32 %v12006_v57, %v2780_v49  ;;  %v2795_v49 = vsub.f32 1.0, %v2794_v12  ;;  %9796 = vrcp.f32 %v12056_v55  ;;  %vm2788_vm9 = vcmp.eq.f32.partialorder %v2787_v1, 8.507059e+37 }
 0x39c   : > { %9798 = vpow2.f32 %v8824_v39  ;;  %v2802_v1 = vand.u32 2147483647, %v11997_v18 }
 0x39d   : > { %v2782_v20 = vadd.f32 %v12006_v57, %v2781_v10 }
 0x39e   : > { %8805 = vmatmul.msk.f32.gmra.mxu1 %vm2346_vm14, %v2337_v54  ;;  %8849 = vmatmul.msk.f32.gmra.mxu2 %vm3169_vm6, %v2761_v34  ;;  %v16343_v54 = vld [vmem:[#allocation55_spill] sm:$0xff]  ;;  %v2775_v34 = vor.u32 1.1754944e-38, %v2774_v40  ;;  %v12063_v40 = vpop.eup %9792  ;;  %v12075_v10 = vpop.f32.mrf.mxu3  ;;  %vm2803_vm15 = vcmp.eq.f32.partialorder %v2802_v1, 8.507059e+37 }
 0x39f   : > { %16344 = vst [vmem:[#allocation55_spill] sm:$0xff] %v12054_v52  ;;  %v2786_v12 = vsel %vm12070_vm8, %v12006_v57, %v2782_v20  ;;  %v2809_v2 = vmul.f32 %v12063_v40, %v12030_v35  ;;  %v12086_v52 = vadd.f32 %v11780_v24, %v2500_v4  ;;  %v2804_v4 = vand.u32 2147483648, %v11997_v18  ;;  %v16352_v18 = vld [vmem:[#allocation57_spill] sm:$0xff] }
 0x3a0   : > { %v2776_v58 = vsel %vm2773_vm4, %v2775_v34, %v2771_v26  ;;  %v9795_v0 = vpop.eup %9794  ;;  %v2269_v26 = vpop.permute.xlu1 %2268  ;;  %16347 = vst [vmem:[#allocation71_spill] sm:$0xff] %v12075_v10  ;;  %v16348_v34 = vld [vmem:[#allocation56_spill] sm:$0xff]  ;;  %vm2814_vm2 = vweird.f32 %v12063_v40  ;;  %vm2828_vm8 = vweird.f32 %v12056_v55 }
 0x3a1   : > { %16349 = vst [vmem:[#allocation56_spill] sm:$0xff] %v12086_v52  ;;  %v2339_v50 = vsel %vm2312_vm13, %v812_v32, %v2269_v26  ;;  %v12089_v31 = vadd.f32 1.0, %v9795_v0  ;;  %v8825_v39 = vmul.f32 -1.442695, %v12086_v52  ;;  %v813_v32 = vld [vmem:[%s10577_s9 + $0xd8] sm:$0xff]  ;;  %v2271_v26 = vpop.permute.xlu2 %2270  ;;  %vm12134_vm4 = vmor %vm2813_vm3, %vm2814_vm2 }
 0x3a2   : > { %v2340_v52 = vsel %vm2312_vm13, %v813_v32, %v2271_v26  ;;  %v814_v32 = vld [vmem:[%s10577_s9 + $0xe0] sm:$0xff]  ;;  %v2273_v26 = vpop.permute.xlu0 %2272 }
 0x3a3   : > { %8979 = vmatmul.msk.f32.gmra.mxu3 %vm914_vm1, %v16343_v54  ;;  %v2796_v54 = vmul.f32 %v12037_v29, %v2795_v49  ;;  %v2810_v49 = vsub.f32 1.0, %v2809_v2  ;;  %9800 = vrcp.f32 %v12089_v31 }
 0x3a4   : > { %9802 = vpow2.f32 %v8825_v39  ;;  %v2819_v39 = vand.u32 2147483648, %v12030_v35 }
 0x3a5   : > { %v2797_v20 = vadd.f32 %v12037_v29, %v2796_v54  ;;  %v2811_v54 = vmul.f32 %v12063_v40, %v2810_v49 }
 0x3a6   : > { %8806 = vmatmul.msk.f32.gmra.mxu1 %vm2346_vm14, %v2338_v28  ;;  %8850 = vmatmul.msk.f32.gmra.mxu2 %vm3169_vm6, %v2776_v58  ;;  %v2790_v58 = vor.u32 1.1754944e-38, %v2789_v45  ;;  %v12095_v45 = vpop.eup %9796  ;;  %v2817_v28 = vand.u32 2147483647, %v12030_v35  ;;  %v16357_v35 = vld [vmem:[#allocation58_spill] sm:$0xff] }
 0x3a7   : > { %v9799_v0 = vpop.eup %9798  ;;  %v2824_v2 = vmul.f32 %v12095_v45, %v12056_v55  ;;  %v2812_v49 = vadd.f32 %v12063_v40, %v2811_v54  ;;  %vm2829_vm7 = vweird.f32 %v12095_v45 }
 0x3a8   : > { %v2791_v57 = vsel %vm2788_vm9, %v2790_v58, %v2786_v12  ;;  %v2801_v12 = vsel %vm12102_vm12, %v12037_v29, %v2797_v20  ;;  %v12116_v58 = vadd.f32 %v11780_v24, %v2503_v51  ;;  %v12121_v29 = vadd.f32 1.0, %v9799_v0  ;;  %vm12166_vm9 = vmor %vm2828_vm8, %vm2829_vm7 }
 0x3a9   : > { %v12127_v51 = vpop.eup %9800  ;;  %vm2818_vm5 = vcmp.eq.f32.partialorder %v2817_v28, 8.507059e+37 }
 0x3aa   : > { %16353 = vst [vmem:[#allocation57_spill] sm:$0xff] %v12116_v58  ;;  %v8826_v1 = vmul.f32 -1.442695, %v12116_v58  ;;  %9804 = vrcp.f32 %v12121_v29  ;;  %v9803_v0 = vpop.eup %9802  ;;  %vm2844_vm11 = vweird.f32 %v12127_v51  ;;  %vm2858_vm2 = vweird.f32 %v12121_v29 }
 0x3ab   : > { %8980 = vmatmul.msk.f32.gmra.mxu3 %vm914_vm1, %v16348_v34  ;;  %v2805_v34 = vor.u32 1.1754944e-38, %v2804_v4  ;;  %v2825_v4 = vsub.f32 1.0, %v2824_v2  ;;  %v2839_v2 = vmul.f32 %v12127_v51, %v12089_v31  ;;  %v12150_v58 = vadd.f32 1.0, %v9803_v0 }
 0x3ac   : > { %9806 = vpow2.f32 %v8826_v1  ;;  %v2834_v1 = vand.u32 2147483648, %v12056_v55  ;;  %v2832_v0 = vand.u32 2147483647, %v12056_v55 }
 0x3ad   : > { %v2806_v20 = vsel %vm2803_vm15, %v2805_v34, %v2801_v12  ;;  %v2816_v12 = vsel %vm12134_vm4, %v12063_v40, %v2812_v49  ;;  %v2826_v54 = vmul.f32 %v12095_v45, %v2825_v4  ;;  %v2820_v34 = vor.u32 1.1754944e-38, %v2819_v39 }
 0x3ae   : > { %8807 = vmatmul.msk.f32.gmra.mxu1 %vm2346_vm14, %v2339_v50  ;;  %8851 = vmatmul.msk.f32.gmra.mxu2 %vm3169_vm6, %v2791_v57  ;;  %v2506_v50 = vpop.f32.mrf.mxu1  ;;  %v12118_v57 = vpop.f32.mrf.mxu3  ;;  %v2840_v39 = vsub.f32 1.0, %v2839_v2  ;;  %9808 = vrcp.f32 %v12150_v58  ;;  %v2835_v55 = vor.u32 1.1754944e-38, %v2834_v1  ;;  %vm2833_vm10 = vcmp.eq.f32.partialorder %v2832_v0, 8.507059e+37 }
 0x3af   : > { %16354 = vst [vmem:[#allocation72_spill] sm:$0xff] %v12118_v57  ;;  %v2821_v40 = vsel %vm2818_vm5, %v2820_v34, %v2816_v12  ;;  %v2827_v4 = vadd.f32 %v12095_v45, %v2826_v54  ;;  %v815_v12 = vld [vmem:[%s10577_s9 + $0xe8] sm:$0xff]  ;;  %v2275_v54 = vpop.permute.xlu1 %2274  ;;  %v2847_v0 = vand.u32 2147483647, %v12089_v31  ;;  %vm2873_vm7 = vweird.f32 %v12150_v58 }
 0x3b1   : > { %v2831_v2 = vsel %vm12166_vm9, %v12095_v45, %v2827_v4  ;;  %vm2848_vm12 = vcmp.eq.f32.partialorder %v2847_v0, 8.507059e+37 }
 0x3b2   : > { %v2836_v45 = vsel %vm2833_vm10, %v2835_v55, %v2831_v2 }
 0x3b3   : > { %8981 = vmatmul.msk.f32.gmra.mxu3 %vm914_vm1, %v16352_v18 }
 0x3b6   : > { %8808 = vmatmul.msk.f32.gmra.mxu1 %vm2346_vm14, %v2340_v52  ;;  %8852 = vmatmul.msk.f32.gmra.mxu2 %vm3169_vm6, %v2806_v20  ;;  %v2509_v18 = vpop.f32.mrf.mxu1  ;;  %v12148_v20 = vadd.f32 %v11780_v24, %v2506_v50  ;;  %v2341_v52 = vsel %vm2312_vm13, %v814_v32, %v2273_v26  ;;  %v12153_v49 = vpop.f32.mrf.mxu3 }
 0x3b7   : > { %16359 = vst [vmem:[#allocation73_spill] sm:$0xff] %v12153_v49  ;;  %v12159_v50 = vpop.eup %9804 }
 0x3b8   : > { %16358 = vst [vmem:[#allocation58_spill] sm:$0xff] %v12148_v20  ;;  %v8827_v28 = vmul.f32 -1.442695, %v12148_v20  ;;  %v9807_v26 = vpop.eup %9806  ;;  %v2854_v34 = vmul.f32 %v12159_v50, %v12121_v29  ;;  %vm2859_vm15 = vweird.f32 %v12159_v50 }
 0x3b9   : > { %v12183_v20 = vadd.f32 1.0, %v9807_v26  ;;  %vm2860_vm3 = vmor %vm2858_vm2, %vm2859_vm15 }
 0x3ba   : > { %9810 = vpow2.f32 %v8827_v28 }
 0x3bb   : > { %8982 = vmatmul.msk.f32.gmra.mxu3 %vm914_vm1, %v16357_v35  ;;  %v2841_v35 = vmul.f32 %v12127_v51, %v2840_v39  ;;  %v12189_v39 = vpop.eup %9808  ;;  %9812 = vrcp.f32 %v12183_v20 }
 0x3bc   : > { %v2869_v2 = vmul.f32 %v12189_v39, %v12150_v58  ;;  %vm2874_vm5 = vweird.f32 %v12189_v39 }
 0x3bd   : > { %v2842_v4 = vadd.f32 %v12127_v51, %v2841_v35  ;;  %vm2875_vm8 = vmor %vm2873_vm7, %vm2874_vm5 }
 0x3be   : > { %8809 = vmatmul.msk.f32.gmra.mxu1 %vm2346_vm14, %v2341_v52  ;;  %8853 = vmatmul.msk.f32.gmra.mxu2 %vm3169_vm6, %v2821_v40  ;;  %v12180_v52 = vadd.f32 %v11780_v24, %v2509_v18  ;;  %v2342_v40 = vsel %vm2312_vm13, %v815_v12, %v2275_v54  ;;  %v2512_v32 = vpop.f32.mrf.mxu1  ;;  %v2849_v18 = vand.u32 2147483648, %v12089_v31  ;;  %v12193_v28 = vpop.f32.mrf.mxu3  ;;  %vm2843_vm13 = vweird.f32 %v12089_v31 }
 0x3bf   : > { %16363 = vst [vmem:[#allocation75_spill] sm:$0xff] %v12193_v28 }
 0x3c0   : > { %16362 = vst [vmem:[#allocation74_spill] sm:$0xff] %v12180_v52  ;;  %v8828_v1 = vmul.f32 -1.442695, %v12180_v52  ;;  %v9811_v26 = vpop.eup %9810  ;;  %v2850_v35 = vor.u32 1.1754944e-38, %v2849_v18  ;;  %v2862_v18 = vand.u32 2147483647, %v12121_v29 }
 0x3c1   : > { %v12207_v31 = vadd.f32 1.0, %v9811_v26 }
 0x3c2   : > { %9814 = vpow2.f32 %v8828_v1  ;;  %vm2863_vm4 = vcmp.eq.f32.partialorder %v2862_v18, 8.507059e+37 }
 0x3c3   : > { %8983 = vmatmul.msk.f32.gmra.mxu3 %vm914_vm1, %v11056_v13  ;;  %v2855_v13 = vsub.f32 1.0, %v2854_v34  ;;  %v12205_v34 = vadd.f32 %v11780_v24, %v2512_v32  ;;  %v2864_v32 = vand.u32 2147483648, %v12121_v29  ;;  %9816 = vrcp.f32 %v12207_v31 }
 0x3c4   : > { %vm2903_vm15 = vweird.f32 %v12207_v31 }
 0x3c5   : > { %v2856_v54 = vmul.f32 %v12159_v50, %v2855_v13  ;;  %16364 = vst [vmem:[#allocation76_spill] sm:$0xff] %v12205_v34  ;;  %v8829_v13 = vmul.f32 -1.442695, %v12205_v34 }
 0x3c6   : > { %8810 = vmatmul.msk.f32.gmra.mxu1 %vm2346_vm14, %v2342_v40  ;;  %8854 = vmatmul.msk.f32.gmra.mxu2 %vm3169_vm6, %v2836_v45  ;;  %vm2845_vm14 = vmor %vm2843_vm13, %vm2844_vm11  ;;  %v2870_v45 = vsub.f32 1.0, %v2869_v2  ;;  %v12221_v0 = vpop.f32.mrf.mxu3  ;;  %v2865_v2 = vor.u32 1.1754944e-38, %v2864_v32  ;;  %v2877_v32 = vand.u32 2147483647, %v12150_v58  ;;  %vm2888_vm11 = vweird.f32 %v12183_v20 }
 0x3c7   : > { %v2846_v12 = vsel %vm2845_vm14, %v12127_v51, %v2842_v4  ;;  %v16365_v51 = vld [vmem:[#allocation6_spill] sm:$0xff]  ;;  %v2857_v40 = vadd.f32 %v12159_v50, %v2856_v54  ;;  %v2515_v4 = vpop.f32.mrf.mxu1  ;;  %9818 = vpow2.f32 %v8829_v13 }
 0x3c8   : > { %v2851_v55 = vsel %vm2848_vm12, %v2850_v35, %v2846_v12  ;;  %16366 = vst [vmem:[#allocation6_spill] sm:$0xff] %v12221_v0  ;;  %v2871_v12 = vmul.f32 %v12189_v39, %v2870_v45  ;;  %v12230_v29 = vadd.f32 %v11780_v24, %v2515_v4  ;;  %v2879_v45 = vand.u32 2147483648, %v12150_v58 }
 0x3c9   : > { %v2861_v26 = vsel %vm2860_vm3, %v12159_v50, %v2857_v40  ;;  %v16368_v50 = vld [vmem:[#allocation7_spill] sm:$0xff]  ;;  %vm2878_vm9 = vcmp.eq.f32.partialorder %v2877_v32, 8.507059e+37  ;;  %v2892_v32 = vand.u32 2147483647, %v12183_v20 }
 0x3ca   : > { %16367 = vst [vmem:[#allocation77_spill] sm:$0xff] %v12230_v29  ;;  %v8830_v4 = vmul.f32 -1.442695, %v12230_v29 }
 0x3cb   : > { %8984 = vmatmul.msk.f32.gmra.mxu3 %vm914_vm1, %v11091_v62  ;;  %v12214_v62 = vpop.eup %9812  ;;  %vm2893_vm14 = vcmp.eq.f32.partialorder %v2892_v32, 8.507059e+37 }
 0x3cc   : > { %v9815_v1 = vpop.eup %9814  ;;  %v2884_v54 = vmul.f32 %v12214_v62, %v12183_v20  ;;  %vm2889_vm10 = vweird.f32 %v12214_v62 }
 0x3cd   : > { %v12232_v35 = vadd.f32 1.0, %v9815_v1  ;;  %vm2890_vm13 = vmor %vm2888_vm11, %vm2889_vm10 }
 0x3ce   : > { %8855 = vmatmul.msk.f32.gmra.mxu2 %vm3169_vm6, %v2851_v55  ;;  %8910 = vmatmul.msk.f32.vlgmr.msrb.gmra.mxu1 %vm914_vm1, %v16365_v51  ;;  %v2866_v55 = vsel %vm2863_vm4, %v2865_v2, %v2861_v26  ;;  %v2872_v51 = vadd.f32 %v12189_v39, %v2871_v12  ;;  %v2885_v40 = vsub.f32 1.0, %v2884_v54  ;;  %v2880_v54 = vor.u32 1.1754944e-38, %v2879_v45  ;;  %v12255_v58 = vpop.f32.mrf.mxu3 }
 0x3cf   : > { %9820 = vrcp.f32 %v12232_v35  ;;  %v2518_v13 = vpop.f32.mrf.mxu1  ;;  %16370 = vst [vmem:[#allocation78_spill] sm:$0xff] %v12255_v58  ;;  %v2894_v45 = vand.u32 2147483648, %v12183_v20  ;;  %vm2918_vm5 = vweird.f32 %v12232_v35 }
 0x3d0   : > { %v2876_v1 = vsel %vm2875_vm8, %v12189_v39, %v2872_v51  ;;  %v2886_v26 = vmul.f32 %v12214_v62, %v2885_v40  ;;  %9822 = vpow2.f32 %v8830_v4  ;;  %v12253_v2 = vadd.f32 %v11780_v24, %v2518_v13  ;;  %v16371_v39 = vld [vmem:[#allocation8_spill] sm:$0xff] }
 0x3d2   : > { %16369 = vst [vmem:[#allocation7_spill] sm:$0xff] %v12253_v2  ;;  %v2887_v51 = vadd.f32 %v12214_v62, %v2886_v26  ;;  %v8831_v4 = vmul.f32 -1.442695, %v12253_v2 }
 0x3d3   : > { %8985 = vmatmul.msk.f32.gmra.mxu3 %vm914_vm1, %v11125_v27  ;;  %v12239_v27 = vpop.eup %9816 }
 0x3d4   : > { %v9819_v18 = vpop.eup %9818  ;;  %v2899_v12 = vmul.f32 %v12239_v27, %v12207_v31  ;;  %vm2904_vm12 = vweird.f32 %v12239_v27 }
 0x3d5   : > { %v9821_v40 = vpop.eup %9820  ;;  %vm2905_vm2 = vmor %vm2903_vm15, %vm2904_vm12 }
 0x3d6   : > { %8856 = vmatmul.msk.f32.gmra.mxu2 %vm3169_vm6, %v2866_v55  ;;  %8911 = vmatmul.msk.f32.gmra.mxu1 %vm914_vm1, %v16368_v50  ;;  %v12257_v55 = vadd.f32 1.0, %v9819_v18  ;;  %v2881_v50 = vsel %vm2878_vm9, %v2880_v54, %v2876_v1  ;;  %v9823_v13 = vpop.eup %9822  ;;  %v2891_v18 = vsel %vm2890_vm13, %v12214_v62, %v2887_v51  ;;  %v2914_v26 = vmul.f32 %v9821_v40, %v12232_v35  ;;  %v12276_v20 = vpop.f32.mrf.mxu3 }
 0x3d7   : > { %v12274_v54 = vadd.f32 1.0, %v9823_v13  ;;  %16372 = vst [vmem:[#allocation8_spill] sm:$0xff] %v12276_v20  ;;  %vm2919_vm4 = vweird.f32 %v9821_v40 }
 0x3d8   : > { %9824 = vrcp.f32 %v12257_v55  ;;  %v2915_v51 = vsub.f32 1.0, %v2914_v26  ;;  %vm2920_vm7 = vmor %vm2918_vm5, %vm2919_vm4  ;;  %vm2933_vm10 = vweird.f32 %v12257_v55 }
 0x3d9   : > { %9826 = vpow2.f32 %v8831_v4  ;;  %vm2948_vm12 = vweird.f32 %v12274_v54 }
 0x3da   : > { %9828 = vrcp.f32 %v12274_v54  ;;  %v2916_v13 = vmul.f32 %v9821_v40, %v2915_v51 }
 0x3db   : > { %8986 = vmatmul.msk.f32.gmra.mxu3 %vm914_vm1, %v11164_v33  ;;  %v2900_v33 = vsub.f32 1.0, %v2899_v12  ;;  %v2895_v12 = vor.u32 1.1754944e-38, %v2894_v45  ;;  %v2907_v45 = vand.u32 2147483647, %v12207_v31 }
 0x3dd   : > { %v2901_v1 = vmul.f32 %v12239_v27, %v2900_v33  ;;  %vm2908_vm3 = vcmp.eq.f32.partialorder %v2907_v45, 8.507059e+37 }
 0x3de   : > { %8857 = vmatmul.msk.f32.gmra.mxu2 %vm3169_vm6, %v2881_v50  ;;  %8912 = vmatmul.msk.f32.gmra.mxu1 %vm914_vm1, %v16371_v39  ;;  %v2896_v50 = vsel %vm2893_vm14, %v2895_v12, %v2891_v18  ;;  %v16373_v39 = vld [vmem:[#allocation9_spill] sm:$0xff]  ;;  %v9825_v33 = vpop.eup %9824  ;;  %v12299_v51 = vpop.f32.mrf.mxu3 }
 0x3df   : > { %v2902_v62 = vadd.f32 %v12239_v27, %v2901_v1  ;;  %v9827_v4 = vpop.eup %9826  ;;  %v2929_v18 = vmul.f32 %v9825_v33, %v12257_v55  ;;  %16375 = vst [vmem:[#allocation9_spill] sm:$0xff] %v12299_v51  ;;  %vm2934_vm9 = vweird.f32 %v9825_v33 }
 0x3e0   : > { %v12291_v26 = vadd.f32 1.0, %v9827_v4  ;;  %vm2935_vm11 = vmor %vm2933_vm10, %vm2934_vm9 }
 0x3e1   : > { %v2906_v32 = vsel %vm2905_vm2, %v12239_v27, %v2902_v62  ;;  %v12296_v27 = vpop.eup %9828  ;;  %v2924_v62 = vand.u32 2147483648, %v12232_v35 }
 0x3e2   : > { %9830 = vrcp.f32 %v12291_v26  ;;  %vm2949_vm14 = vweird.f32 %v12296_v27  ;;  %vm2963_vm4 = vweird.f32 %v12291_v26 }
 0x3e3   : > { %8987 = vmatmul.msk.f32.gmra.mxu3 %vm914_vm1, %v11193_v16  ;;  %v2909_v16 = vand.u32 2147483648, %v12207_v31  ;;  %v16374_v31 = vld [vmem:[#allocation11_spill] sm:$0xff]  ;;  %vm2950_vm15 = vmor %vm2948_vm12, %vm2949_vm14 }
 0x3e5   : > { %v2910_v1 = vor.u32 1.1754944e-38, %v2909_v16 }
 0x3e6   : > { %8858 = vmatmul.msk.f32.gmra.mxu2 %vm3169_vm6, %v2896_v50  ;;  %8913 = vmatmul.msk.f32.gmra.mxu1 %vm914_vm1, %v16373_v39  ;;  %v2917_v50 = vadd.f32 %v9821_v40, %v2916_v13  ;;  %v2930_v39 = vsub.f32 1.0, %v2929_v18  ;;  %v2925_v18 = vor.u32 1.1754944e-38, %v2924_v62  ;;  %v2937_v62 = vand.u32 2147483647, %v12257_v55 }
 0x3e7   : > { %v2911_v12 = vsel %vm2908_vm3, %v2910_v1, %v2906_v32  ;;  %v2944_v32 = vmul.f32 %v12296_v27, %v12274_v54 }
 0x3e8   : > { %v2921_v45 = vsel %vm2920_vm7, %v9821_v40, %v2917_v50  ;;  %v2931_v4 = vmul.f32 %v9825_v33, %v2930_v39  ;;  %v12317_v39 = vpop.eup %9830  ;;  %vm2938_vm13 = vcmp.eq.f32.partialorder %v2937_v62, 8.507059e+37  ;;  %v2952_v62 = vand.u32 2147483647, %v12274_v54 }
 0x3e9   : > { %v2945_v50 = vsub.f32 1.0, %v2944_v32  ;;  %vm2964_vm3 = vweird.f32 %v12317_v39 }
 0x3ea   : > { %v2932_v40 = vadd.f32 %v9825_v33, %v2931_v4  ;;  %v2959_v4 = vmul.f32 %v12317_v39, %v12291_v26  ;;  %vm2953_vm2 = vcmp.eq.f32.partialorder %v2952_v62, 8.507059e+37  ;;  %v2967_v62 = vand.u32 2147483647, %v12291_v26  ;;  %vm2965_vm5 = vmor %vm2963_vm4, %vm2964_vm3 }
 0x3eb   : > { %8988 = vmatmul.msk.f32.gmra.mxu3 %vm914_vm1, %v11220_v44  ;;  %v2922_v44 = vand.u32 2147483647, %v12232_v35 }
 0x3ec   : > { %vm2968_vm7 = vcmp.eq.f32.partialorder %v2967_v62, 8.507059e+37 }
 0x3ed   : > { %vm2923_vm8 = vcmp.eq.f32.partialorder %v2922_v44, 8.507059e+37 }
 0x3ee   : > { %8859 = vmatmul.msk.f32.gmra.mxu2 %vm3169_vm6, %v2911_v12  ;;  %8914 = vmatmul.msk.f32.gmra.mxu1 %vm914_vm1, %v16374_v31  ;;  %v2926_v35 = vsel %vm2923_vm8, %v2925_v18, %v2921_v45  ;;  %v16377_v31 = vld [vmem:[#allocation13_spill] sm:$0xff]  ;;  %v12324_v45 = vpop.f32.mrf.mxu3  ;;  %v2946_v18 = vmul.f32 %v12296_v27, %v2945_v50 }
 0x3ef   : > { %16378 = vst [vmem:[#allocation13_spill] sm:$0xff] %v12324_v45 }
 0x3f1   : > { %v12304_v16 = vpop.f32.mrf.mxu2 }
 0x3f3   : > { %8989 = vmatmul.msk.f32.gmra.mxu3 %vm914_vm1, %v11244_v17  ;;  %v2521_v13 = vpop.f32.mrf.mxu1  ;;  %v2939_v17 = vand.u32 2147483648, %v12257_v55 }
 0x3f4   : > { %v12311_v1 = vadd.f32 %v11780_v24, %v2521_v13  ;;  %v2936_v13 = vsel %vm2935_vm11, %v9825_v33, %v2932_v40  ;;  %v16380_v33 = vld [vmem:[#allocation15_spill] sm:$0xff]  ;;  %v12341_v40 = vld [vmem:[%s16062_s5 + $0x20] ss:$0 sm:$0xff] }
 0x3f6   : > { %16376 = vst [vmem:[#allocation11_spill] sm:$0xff] %v12311_v1  ;;  %v8832_v12 = vmul.f32 -1.442695, %v12311_v1  ;;  %8860 = vmatmul.msk.f32.gmra.mxu2 %vm3169_vm6, %v2926_v35  ;;  %8915 = vmatmul.msk.f32.gmra.mxu1 %vm914_vm1, %v16377_v31  ;;  %v2940_v35 = vor.u32 1.1754944e-38, %v2939_v17  ;;  %v2954_v17 = vand.u32 2147483648, %v12274_v54 }
 0x3f7   : > { %v12361_v54 = vld [vmem:[%s16061_s4 + $0x28] ss:$0 sm:$0xff] }
 0x3f8   : > { %9832 = vpow2.f32 %v8832_v12  ;;  %v2941_v55 = vsel %vm2938_vm13, %v2940_v35, %v2936_v13 }
 0x3f9   : > { %v12322_v44 = vpop.f32.mrf.mxu2 }
 0x3fb   : > { %8990 = vmatmul.msk.f32.gmra.mxu3 %vm914_vm1, %v11268_v23  ;;  %v2524_v32 = vpop.f32.mrf.mxu1  ;;  %v2947_v23 = vadd.f32 %v12296_v27, %v2946_v18 }
 0x3fc   : > { %v12332_v12 = vadd.f32 %v11780_v24, %v2524_v32  ;;  %v2960_v24 = vsub.f32 1.0, %v2959_v4 }
 0x3fd   : > { %v2951_v18 = vsel %vm2950_vm15, %v12296_v27, %v2947_v23 }
 0x3fe   : > { %16379 = vst [vmem:[#allocation79_spill] sm:$0xff] %v12332_v12  ;;  %v9833_v31 = vpop.eup %9832  ;;  %v8833_v1 = vmul.f32 -1.442695, %v12332_v12  ;;  %8861 = vmatmul.msk.f32.gmra.mxu2 %vm3169_vm6, %v2941_v55  ;;  %8916 = vmatmul.msk.f32.gmra.mxu1 %vm914_vm1, %v16380_v33  ;;  %v2961_v35 = vmul.f32 %v12317_v39, %v2960_v24  ;;  %v2955_v55 = vor.u32 1.1754944e-38, %v2954_v17 }
 0x3ff   : > { %v12345_v50 = vadd.f32 1.0, %v9833_v31 }
 0x400   : > { %9834 = vpow2.f32 %v8833_v1  ;;  %v12356_v1 = vpop.f32.mrf.mxu3  ;;  %v2956_v27 = vsel %vm2953_vm2, %v2955_v55, %v2951_v18  ;;  %v2962_v17 = vadd.f32 %v12317_v39, %v2961_v35 }
 0x401   : > { %9836 = vrcp.f32 %v12345_v50  ;;  %v3283_v13 = vpop.f32.mrf.mxu2  ;;  %16381 = vst [vmem:[#allocation15_spill] sm:$0xff] %v12356_v1  ;;  %vm2978_vm9 = vweird.f32 %v12345_v50 }
 0x402   : > { %v3284_v32 = vadd.f32 %v12341_v40, %v3283_v13 }
 0x403   : > { %8991 = vmatmul.msk.f32.gmra.mxu3 %vm914_vm1, %v11291_v9  ;;  %v2527_v4 = vpop.f32.mrf.mxu1  ;;  %v16383_v9 = vld [vmem:[#allocation16_spill] sm:$0xff] }
 0x404   : > { %v8877_v31 = vmul.f32 -1.442695, %v3284_v32  ;;  %v12364_v33 = vadd.f32 %v12361_v54, %v2527_v4  ;;  %v2969_v4 = vand.u32 2147483648, %v12291_v26 }
 0x406   : > { %16382 = vst [vmem:[#allocation80_spill] sm:$0xff] %v12364_v33  ;;  %v9835_v23 = vpop.eup %9834  ;;  %9838 = vpow2.f32 %v8877_v31  ;;  %v8834_v24 = vmul.f32 -1.442695, %v12364_v33  ;;  %8862 = vmatmul.msk.f32.gmra.mxu2 %vm3169_vm6, %v2956_v27  ;;  %8917 = vmatmul.msk.f32.gmra.mxu1 %vm914_vm1, %v16383_v9  ;;  %v2966_v31 = vsel %vm2965_vm5, %v12317_v39, %v2962_v17 }
 0x407   : > { %v9837_v13 = vpop.eup %9836  ;;  %v12372_v32 = vadd.f32 1.0, %v9835_v23 }
 0x408   : > { %9840 = vpow2.f32 %v8834_v24  ;;  %v2974_v18 = vmul.f32 %v9837_v13, %v12345_v50  ;;  %v2970_v24 = vor.u32 1.1754944e-38, %v2969_v4  ;;  %vm2979_vm8 = vweird.f32 %v9837_v13 }
 0x409   : > { %9842 = vrcp.f32 %v12372_v32  ;;  %v3286_v55 = vpop.f32.mrf.mxu2  ;;  %vm2980_vm10 = vmor %vm2978_vm9, %vm2979_vm8  ;;  %vm2993_vm14 = vweird.f32 %v12372_v32 }
 0x40a   : > { %v3287_v35 = vadd.f32 %v12341_v40, %v3286_v55  ;;  %v2975_v27 = vsub.f32 1.0, %v2974_v18  ;;  %v2971_v29 = vsel %vm2968_vm7, %v2970_v24, %v2966_v31  ;;  %v12388_v55 = vpop.f32.mrf.mxu3  ;;  %v2984_v18 = vand.u32 2147483648, %v12345_v50 }
 0x40b   : > { %8992 = vmatmul.msk.f32.gmra.mxu3 %vm914_vm1, %v11320_v3  ;;  %v2530_v23 = vpop.f32.mrf.mxu1  ;;  %16385 = vst [vmem:[#allocation81_spill] sm:$0xff] %v12388_v55  ;;  %v16386_v3 = vld [vmem:[#allocation17_spill] sm:$0xff] }
 0x40c   : > { %v9839_v9 = vpop.eup %9838  ;;  %v8878_v33 = vmul.f32 -1.442695, %v3287_v35  ;;  %v12384_v26 = vadd.f32 %v12361_v54, %v2530_v23  ;;  %v2976_v12 = vmul.f32 %v9837_v13, %v2975_v27  ;;  %v2985_v24 = vor.u32 1.1754944e-38, %v2984_v18 }
 0x40d   : > { %v12386_v2 = vadd.f32 1.0, %v9839_v9 }
 0x40e   : > { %16384 = vst [vmem:[#allocation16_spill] sm:$0xff] %v12384_v26  ;;  %v9841_v34 = vpop.eup %9840  ;;  %9844 = vpow2.f32 %v8878_v33  ;;  %v8835_v39 = vmul.f32 -1.442695, %v12384_v26  ;;  %8863 = vmatmul.msk.f32.gmra.mxu2 %vm3169_vm6, %v2971_v29  ;;  %8918 = vmatmul.msk.f32.gmra.mxu1 %vm914_vm1, %v16386_v3  ;;  %v2977_v17 = vadd.f32 %v9837_v13, %v2976_v12  ;;  %v2982_v33 = vand.u32 2147483647, %v12345_v50 }
 0x40f   : > { %v12394_v4 = vpop.eup %9842  ;;  %9846 = vrcp.f32 %v12386_v2  ;;  %v12397_v62 = vadd.f32 1.0, %v9841_v34  ;;  %v16387_v34 = vld [vmem:[#allocation59_spill] sm:$0xff]  ;;  %vm3512_vm2 = vweird.f32 %v12386_v2 }
 0x410   : > { %9848 = vpow2.f32 %v8835_v39  ;;  %v2989_v29 = vmul.f32 %v12394_v4, %v12372_v32  ;;  %v2981_v31 = vsel %vm2980_vm10, %v9837_v13, %v2977_v17  ;;  %vm2983_vm11 = vcmp.eq.f32.partialorder %v2982_v33, 8.507059e+37 }
 0x411   : > { %9850 = vrcp.f32 %v12397_v62  ;;  %v3289_v12 = vpop.f32.mrf.mxu2  ;;  %v2997_v13 = vand.u32 2147483647, %v12372_v32  ;;  %v2999_v17 = vand.u32 2147483648, %v12372_v32  ;;  %vm2994_vm13 = vweird.f32 %v12394_v4 }
 0x412   : > { %v3290_v35 = vadd.f32 %v12341_v40, %v3289_v12  ;;  %v2990_v27 = vsub.f32 1.0, %v2989_v29  ;;  %v2986_v12 = vsel %vm2983_vm11, %v2985_v24, %v2981_v31  ;;  %vm12437_vm12 = vmor %vm2993_vm14, %vm2994_vm13  ;;  %v3012_v11 = vand.u32 2147483647, %v12397_v62 }
 0x413   : > { %8993 = vmatmul.msk.f32.gmra.mxu3 %vm914_vm1, %v16387_v34  ;;  %v2533_v23 = vpop.f32.mrf.mxu1  ;;  %vm12441_vm15 = vcmp.eq.f32.partialorder %v2997_v13, 8.507059e+37  ;;  %v3014_v13 = vand.u32 2147483648, %v12397_v62  ;;  %vm3008_vm5 = vweird.f32 %v12397_v62 }
 0x414   : > { %v9845_v9 = vpop.eup %9844  ;;  %v8879_v39 = vmul.f32 -1.442695, %v3290_v35  ;;  %v12409_v50 = vadd.f32 %v12361_v54, %v2533_v23  ;;  %v2991_v3 = vmul.f32 %v12394_v4, %v2990_v27  ;;  %v16389_v35 = vld [vmem:[#allocation18_spill] sm:$0xff]  ;;  %v12431_v23 = vpop.f32.mrf.mxu3  ;;  %vm12498_vm10 = vcmp.eq.f32.partialorder %v3012_v11, 8.507059e+37 }
 0x415   : > { %v12412_v26 = vpop.eup %9846  ;;  %v12414_v52 = vadd.f32 1.0, %v9845_v9  ;;  %16390 = vst [vmem:[#allocation59_spill] sm:$0xff] %v12431_v23 }
 0x416   : > { %16388 = vst [vmem:[#allocation17_spill] sm:$0xff] %v12409_v50  ;;  %v9849_v29 = vpop.eup %9848  ;;  %9852 = vpow2.f32 %v8879_v39  ;;  %v8836_v18 = vmul.f32 -1.442695, %v12409_v50  ;;  %8864 = vmatmul.msk.f32.gmra.mxu2 %vm3169_vm6, %v2986_v12  ;;  %8919 = vmatmul.msk.f32.gmra.mxu1 %vm914_vm1, %v16389_v35  ;;  %v2992_v33 = vadd.f32 %v12394_v4, %v2991_v3  ;;  %v3508_v34 = vmul.f32 %v12412_v26, %v12386_v2  ;;  %v16395_v50 = vld [vmem:[#allocation60_spill] sm:$0xff] }
 0x417   : > { %v12424_v27 = vpop.eup %9850  ;;  %9854 = vrcp.f32 %v12414_v52  ;;  %v12427_v31 = vadd.f32 1.0, %v9849_v29  ;;  %v3000_v12 = vor.u32 1.1754944e-38, %v2999_v17  ;;  %v3516_v17 = vand.u32 2147483647, %v12386_v2 }
 0x418   : > { %9856 = vpow2.f32 %v8836_v18  ;;  %v3004_v24 = vmul.f32 %v12424_v27, %v12397_v62  ;;  %v2996_v32 = vsel %vm12437_vm12, %v12394_v4, %v2992_v33  ;;  %v3509_v35 = vsub.f32 1.0, %v3508_v34 }
 0x419   : > { %9858 = vrcp.f32 %v12427_v31  ;;  %v3292_v9 = vpop.f32.mrf.mxu2  ;;  %v3518_v33 = vand.u32 2147483648, %v12386_v2  ;;  %vm3513_vm3 = vweird.f32 %v12412_v26  ;;  %vm3009_vm4 = vweird.f32 %v12424_v27 }
 0x41a   : > { %v3293_v29 = vadd.f32 %v12341_v40, %v3292_v9  ;;  %v3005_v18 = vsub.f32 1.0, %v3004_v24  ;;  %v3001_v24 = vsel %vm12441_vm15, %v3000_v12, %v2996_v32  ;;  %v3510_v39 = vmul.f32 %v12412_v26, %v3509_v35  ;;  %vm12489_vm7 = vmor %vm3512_vm2, %vm3513_vm3 }
 0x41b   : > { %8994 = vmatmul.msk.f32.gmra.mxu3 %vm914_vm1, %v16395_v50  ;;  %v2536_v48 = vpop.f32.mrf.mxu1  ;;  %vm3517_vm8 = vcmp.eq.f32.partialorder %v3516_v17, 8.507059e+37  ;;  %vm12494_vm9 = vmor %vm3008_vm5, %vm3009_vm4  ;;  %vm3023_vm11 = vweird.f32 %v12427_v31  ;;  %v3027_v23 = vand.u32 2147483647, %v12427_v31  ;;  %v3531_v55 = vand.u32 2147483647, %v12414_v52 }
 0x41c   : > { %v9853_v38 = vpop.eup %9852  ;;  %v8880_v9 = vmul.f32 -1.442695, %v3293_v29  ;;  %v12456_v14 = vadd.f32 %v12361_v54, %v2536_v48  ;;  %v3006_v4 = vmul.f32 %v12424_v27, %v3005_v18  ;;  %v16397_v29 = vld [vmem:[#allocation19_spill] sm:$0xff]  ;;  %v3511_v12 = vadd.f32 %v12412_v26, %v3510_v39 }
 0x41d   : > { %v12460_v34 = vpop.eup %9854  ;;  %v12462_v50 = vadd.f32 1.0, %v9853_v38  ;;  %v3519_v39 = vor.u32 1.1754944e-38, %v3518_v33  ;;  %vm3527_vm15 = vweird.f32 %v12414_v52  ;;  %vm3532_vm3 = vcmp.eq.f32.partialorder %v3531_v55, 8.507059e+37 }
 0x41e   : > { %16396 = vst [vmem:[#allocation18_spill] sm:$0xff] %v12456_v14  ;;  %v9857_v25 = vpop.eup %9856  ;;  %9860 = vpow2.f32 %v8880_v9  ;;  %v8837_v48 = vmul.f32 -1.442695, %v12456_v14  ;;  %8865 = vmatmul.msk.f32.gmra.mxu2 %vm3169_vm6, %v3001_v24  ;;  %8920 = vmatmul.msk.f32.gmra.mxu1 %vm914_vm1, %v16397_v29  ;;  %v3007_v18 = vadd.f32 %v12424_v27, %v3006_v4  ;;  %v3523_v32 = vmul.f32 %v12460_v34, %v12414_v52  ;;  %v16404_v14 = vld [vmem:[#allocation61_spill] sm:$0xff] }
 0x41f   : > { %v12474_v38 = vpop.eup %9858  ;;  %9862 = vrcp.f32 %v12462_v50  ;;  %v12477_v3 = vadd.f32 1.0, %v9857_v25  ;;  %v3015_v24 = vor.u32 1.1754944e-38, %v3014_v13  ;;  %v3515_v17 = vsel %vm12489_vm7, %v12412_v26, %v3511_v12 }
 0x420   : > { %9864 = vpow2.f32 %v8837_v48  ;;  %v3019_v35 = vmul.f32 %v12474_v38, %v12427_v31  ;;  %v4487_v48 = vpop.f32.mrf.mxu3  ;;  %v3011_v2 = vsel %vm12494_vm9, %v12424_v27, %v3007_v18  ;;  %v12512_v13 = vsel %vm3517_vm8, %v3519_v39, %v3515_v17 }
 0x421   : > { %9866 = vrcp.f32 %v12477_v3  ;;  %v3295_v25 = vpop.f32.mrf.mxu2  ;;  %v3524_v33 = vsub.f32 1.0, %v3523_v32  ;;  %v3533_v26 = vand.u32 2147483648, %v12414_v52  ;;  %vm3024_vm13 = vweird.f32 %v12474_v38  ;;  %v16411_v52 = vld [vmem:[#allocation62_spill] sm:$0xff] }
 0x422   : > { %v3020_v29 = vsub.f32 1.0, %v3019_v35  ;;  %v3296_v27 = vadd.f32 %v12341_v40, %v3295_v25  ;;  %v12527_v32 = vmul.f32 %v4487_v48, %v12512_v13  ;;  %vm3528_vm14 = vweird.f32 %v12460_v34  ;;  %vm12550_vm12 = vmor %vm3023_vm11, %vm3024_vm13 }
 0x423   : > { %8995 = vmatmul.msk.f32.gmra.mxu3 %vm914_vm1, %v16404_v14  ;;  %v2539_v11 = vpop.f32.mrf.mxu1  ;;  %v3016_v14 = vsel %vm12498_vm10, %v3015_v24, %v3011_v2  ;;  %v3525_v9 = vmul.f32 %v12460_v34, %v3524_v33  ;;  %v3029_v2 = vand.u32 2147483648, %v12427_v31  ;;  %vm3529_vm2 = vmor %vm3527_vm15, %vm3528_vm14  ;;  %vm3028_vm4 = vcmp.eq.f32.partialorder %v3027_v23, 8.507059e+37 }
 0x424   : > { %v9861_v4 = vpop.eup %9860  ;;  %v12517_v18 = vadd.f32 %v12361_v54, %v2539_v11  ;;  %v3021_v35 = vmul.f32 %v12474_v38, %v3020_v29  ;;  %16406 = vst [vmem:[#allocation19_spill] sm:$0xff] %v12527_v32  ;;  %v16407_v29 = vld [vmem:[#allocation20_spill] sm:$0xff]  ;;  %vm3038_vm7 = vweird.f32 %v12477_v3  ;;  %vm3542_vm10 = vweird.f32 %v12462_v50 }
 0x425   : > { %v12521_v12 = vpop.eup %9862  ;;  %v12530_v39 = vadd.f32 1.0, %v9861_v4  ;;  %v3526_v11 = vadd.f32 %v12460_v34, %v3525_v9  ;;  %v8881_v4 = vmul.f32 -1.442695, %v3296_v27  ;;  %v12559_v9 = vadd.f32 %v12361_v54, %v12304_v16 }
 0x426   : > { %16405 = vst [vmem:[#allocation60_spill] sm:$0xff] %v12517_v18  ;;  %v9865_v25 = vpop.eup %9864  ;;  %v8838_v17 = vmul.f32 -1.442695, %v12517_v18  ;;  %8866 = vmatmul.msk.f32.gmra.mxu2 %vm3169_vm6, %v3016_v14  ;;  %8921 = vmatmul.msk.f32.gmra.mxu1 %vm914_vm1, %v16407_v29  ;;  %v3022_v62 = vadd.f32 %v12474_v38, %v3021_v35  ;;  %v3538_v33 = vmul.f32 %v12521_v12, %v12462_v50  ;;  %v3030_v18 = vor.u32 1.1754944e-38, %v3029_v2 }
 0x427   : > { %v12538_v24 = vpop.eup %9866  ;;  %v12540_v48 = vadd.f32 1.0, %v9865_v25  ;;  %16410 = vst [vmem:[#allocation61_spill] sm:$0xff] %v12559_v9  ;;  %v3534_v25 = vor.u32 1.1754944e-38, %v3533_v26  ;;  %v3530_v29 = vsel %vm3529_vm2, %v12460_v34, %v3526_v11  ;;  %v8843_v34 = vmul.f32 -1.442695, %v12559_v9 }
 0x428   : > { %9868 = vpow2.f32 %v8838_v17  ;;  %v3034_v14 = vmul.f32 %v12538_v24, %v12477_v3  ;;  %v3026_v31 = vsel %vm12550_vm12, %v12474_v38, %v3022_v62  ;;  %v3539_v1 = vsub.f32 1.0, %v3538_v33  ;;  %v4490_v55 = vpop.f32.mrf.mxu3 }
 0x429   : > { %9870 = vrcp.f32 %v12540_v48  ;;  %v3298_v27 = vpop.f32.mrf.mxu2  ;;  %v12569_v32 = vsel %vm3532_vm3, %v3534_v25, %v3530_v29  ;;  %v3031_v62 = vsel %vm3028_vm4, %v3030_v18, %v3026_v31  ;;  %vm3039_vm5 = vweird.f32 %v12538_v24 }
 0x42a   : > { %9872 = vrcp.f32 %v12530_v39  ;;  %v3035_v17 = vsub.f32 1.0, %v3034_v14  ;;  %v3299_v26 = vadd.f32 %v12341_v40, %v3298_v27  ;;  %v12578_v11 = vmul.f32 %v4490_v55, %v12569_v32  ;;  %vm12601_vm8 = vmor %vm3038_vm7, %vm3039_vm5 }
 0x42b   : > { %8996 = vmatmul.msk.f32.gmra.mxu3 %vm914_vm1, %v16411_v52  ;;  %v2542_v16 = vpop.f32.mrf.mxu1  ;;  %9874 = vpow2.f32 %v8881_v4  ;;  %v3540_v23 = vmul.f32 %v12521_v12, %v3539_v1  ;;  %v16414_v4 = vld [vmem:[#allocation21_spill] sm:$0xff]  ;;  %v3044_v14 = vand.u32 2147483648, %v12477_v3  ;;  %v3042_v31 = vand.u32 2147483647, %v12477_v3  ;;  %v16421_v52 = vld [vmem:[#allocation22_spill] sm:$0xff] }
 0x42c   : > { %v12573_v45 = vadd.f32 %v12361_v54, %v2542_v16  ;;  %v3036_v38 = vmul.f32 %v12538_v24, %v3035_v17  ;;  %16413 = vst [vmem:[#allocation62_spill] sm:$0xff] %v12578_v11  ;;  %v8882_v25 = vmul.f32 -1.442695, %v3299_v26  ;;  %vm3543_vm9 = vweird.f32 %v12521_v12 }
 0x42d   : > { %v3541_v16 = vadd.f32 %v12521_v12, %v3540_v23  ;;  %v3045_v26 = vor.u32 1.1754944e-38, %v3044_v14  ;;  %v3548_v23 = vand.u32 2147483648, %v12462_v50  ;;  %vm3043_vm11 = vcmp.eq.f32.partialorder %v3042_v31, 8.507059e+37  ;;  %vm12623_vm13 = vmor %vm3542_vm10, %vm3543_vm9 }
 0x42e   : > { %16412 = vst [vmem:[#allocation20_spill] sm:$0xff] %v12573_v45  ;;  %v9869_v2 = vpop.eup %9868  ;;  %v8839_v33 = vmul.f32 -1.442695, %v12573_v45  ;;  %8867 = vmatmul.msk.f32.gmra.mxu2 %vm3169_vm6, %v3031_v62  ;;  %8922 = vmatmul.msk.f32.gmra.mxu1 %vm914_vm1, %v16414_v4  ;;  %v3037_v35 = vadd.f32 %v12538_v24, %v3036_v38  ;;  %v16417_v62 = vld [vmem:[#allocation63_spill] sm:$0xff]  ;;  %vm3053_vm12 = vweird.f32 %v12540_v48  ;;  %vm3557_vm9 = vweird.f32 %v12530_v39 }
 0x42f   : > { %v12588_v18 = vpop.eup %9870  ;;  %v12590_v27 = vadd.f32 1.0, %v9869_v2 }
 0x430   : > { %v12593_v1 = vpop.eup %9872  ;;  %9876 = vpow2.f32 %v8839_v33  ;;  %v3049_v17 = vmul.f32 %v12588_v18, %v12540_v48  ;;  %v3041_v3 = vsel %vm12601_vm8, %v12538_v24, %v3037_v35  ;;  %v3546_v33 = vand.u32 2147483647, %v12462_v50 }
 0x431   : > { %9878 = vrcp.f32 %v12590_v27  ;;  %v12599_v29 = vpop.f32.mrf.mxu2  ;;  %v9875_v55 = vpop.eup %9874  ;;  %v3553_v4 = vmul.f32 %v12593_v1, %v12530_v39  ;;  %vm3054_vm14 = vweird.f32 %v12588_v18  ;;  %v3545_v50 = vsel %vm12623_vm13, %v12521_v12, %v3541_v16 }
 0x432   : > { %9880 = vpow2.f32 %v8843_v34  ;;  %v3050_v38 = vsub.f32 1.0, %v3049_v17  ;;  %v12627_v14 = vadd.f32 1.0, %v9875_v55  ;;  %v3046_v17 = vsel %vm3043_vm11, %v3045_v26, %v3041_v3  ;;  %vm12654_vm2 = vmor %vm3053_vm12, %vm3054_vm14 }
 0x433   : > { %8997 = vmatmul.msk.f32.gmra.mxu3 %vm914_vm1, %v16417_v62  ;;  %v2545_v2 = vpop.f32.mrf.mxu1  ;;  %9882 = vpow2.f32 %v8882_v25  ;;  %v3549_v62 = vor.u32 1.1754944e-38, %v3548_v23  ;;  %v3554_v55 = vsub.f32 1.0, %v3553_v4  ;;  %v3059_v12 = vand.u32 2147483648, %v12540_v48 }
 0x434   : > { %v12618_v34 = vadd.f32 %v12361_v54, %v2545_v2  ;;  %v3051_v24 = vmul.f32 %v12588_v18, %v3050_v38  ;;  %vm3547_vm15 = vcmp.eq.f32.partialorder %v3546_v33, 8.507059e+37  ;;  %v3057_v26 = vand.u32 2147483647, %v12540_v48 }
 0x435   : > { %vm3068_vm4 = vweird.f32 %v12590_v27  ;;  %vm3558_vm7 = vweird.f32 %v12593_v1 }
 0x436   : > { %16418 = vst [vmem:[#allocation21_spill] sm:$0xff] %v12618_v34  ;;  %v9877_v25 = vpop.eup %9876  ;;  %v8840_v31 = vmul.f32 -1.442695, %v12618_v34  ;;  %8868 = vmatmul.msk.f32.gmra.mxu2 %vm3169_vm6, %v3046_v17  ;;  %8923 = vmatmul.msk.f32.gmra.mxu1 %vm914_vm1, %v16421_v52  ;;  %v3052_v38 = vadd.f32 %v12588_v18, %v3051_v24  ;;  %v12647_v17 = vsel %vm3547_vm15, %v3549_v62, %v3545_v50  ;;  %v4493_v24 = vpop.f32.mrf.mxu3  ;;  %v3060_v62 = vor.u32 1.1754944e-38, %v3059_v12  ;;  %vm12716_vm10 = vmor %vm3557_vm9, %vm3558_vm7 }
 0x437   : > { %v12638_v2 = vpop.eup %9878  ;;  %v12640_v3 = vadd.f32 1.0, %v9877_v25  ;;  %v3555_v25 = vmul.f32 %v12593_v1, %v3554_v55  ;;  %v12666_v9 = vmul.f32 %v4493_v24, %v12647_v17  ;;  %v12670_v34 = vadd.f32 %v12361_v54, %v12322_v44  ;;  %v16428_v44 = vld [vmem:[#allocation23_spill] sm:$0xff] }
 0x438   : > { %v9881_v16 = vpop.eup %9880  ;;  %9884 = vpow2.f32 %v8840_v31  ;;  %v3064_v35 = vmul.f32 %v12638_v2, %v12590_v27  ;;  %v3056_v48 = vsel %vm12654_vm2, %v12588_v18, %v3052_v38  ;;  %v16424_v31 = vld [vmem:[#allocation64_spill] sm:$0xff]  ;;  %vm3058_vm3 = vcmp.eq.f32.partialorder %v3057_v26, 8.507059e+37 }
 0x439   : > { %9886 = vrcp.f32 %v12640_v3  ;;  %v12650_v23 = vpop.f32.mrf.mxu2  ;;  %v9883_v33 = vpop.eup %9882  ;;  %16425 = vst [vmem:[#allocation63_spill] sm:$0xff] %v12666_v9  ;;  %v3061_v55 = vsel %vm3058_vm3, %v3060_v62, %v3056_v48  ;;  %vm3069_vm5 = vweird.f32 %v12638_v2  ;;  %v3556_v26 = vadd.f32 %v12593_v1, %v3555_v25 }
 0x43a   : > { %9888 = vrcp.f32 %v12627_v14  ;;  %v3065_v50 = vsub.f32 1.0, %v3064_v35  ;;  %16426 = vst [vmem:[#allocation22_spill] sm:$0xff] %v12670_v34  ;;  %v12676_v38 = vadd.f32 1.0, %v9883_v33  ;;  %v3072_v48 = vand.u32 2147483647, %v12590_v27  ;;  %vm12700_vm8 = vmor %vm3068_vm4, %vm3069_vm5 }
 0x43b   : > { %8998 = vmatmul.msk.f32.gmra.mxu3 %vm914_vm1, %v16424_v31  ;;  %v2548_v52 = vpop.f32.mrf.mxu1  ;;  %v3563_v31 = vand.u32 2147483648, %v12530_v39  ;;  %vm3083_vm12 = vweird.f32 %v12640_v3  ;;  %vm3572_vm4 = vweird.f32 %v12627_v14 }
 0x43c   : > { %v12673_v45 = vadd.f32 %v12361_v54, %v2548_v52  ;;  %v3066_v18 = vmul.f32 %v12638_v2, %v3065_v50  ;;  %v3074_v50 = vand.u32 2147483648, %v12590_v27  ;;  %vm3073_vm11 = vcmp.eq.f32.partialorder %v3072_v48, 8.507059e+37 }
 0x43d   : > { %v3564_v51 = vor.u32 1.1754944e-38, %v3563_v31  ;;  %v16435_v31 = vld [vmem:[#allocation25_spill] sm:$0xff] }
 0x43e   : > { %16427 = vst [vmem:[#allocation64_spill] sm:$0xff] %v12673_v45  ;;  %v9885_v12 = vpop.eup %9884  ;;  %v8841_v35 = vmul.f32 -1.442695, %v12673_v45  ;;  %8869 = vmatmul.msk.f32.gmra.mxu2 %vm3169_vm6, %v3061_v55  ;;  %8924 = vmatmul.msk.f32.gmra.mxu1 %vm914_vm1, %v16428_v44  ;;  %v3067_v4 = vadd.f32 %v12638_v2, %v3066_v18  ;;  %v3561_v18 = vand.u32 2147483647, %v12530_v39  ;;  %v12708_v55 = vadd.f32 1.0, %v9881_v16 }
 0x43f   : > { %v12687_v33 = vpop.eup %9886  ;;  %v12689_v24 = vadd.f32 1.0, %v9885_v12  ;;  %v8844_v12 = vmul.f32 -1.442695, %v12670_v34  ;;  %v3560_v44 = vsel %vm12716_vm10, %v12593_v1, %v3556_v26  ;;  %v3302_v34 = vadd.f32 %v12341_v40, %v12599_v29  ;;  %v16433_v45 = vld [vmem:[#allocation65_spill] sm:$0xff]  ;;  %v4496_v1 = vpop.f32.mrf.mxu3 }
 0x440   : > { %v12694_v52 = vpop.eup %9888  ;;  %9890 = vpow2.f32 %v8841_v35  ;;  %v3079_v62 = vmul.f32 %v12687_v33, %v12640_v3  ;;  %v3071_v39 = vsel %vm12700_vm8, %v12638_v2, %v3067_v4  ;;  %v3075_v11 = vor.u32 1.1754944e-38, %v3074_v50 }
 0x441   : > { %9892 = vrcp.f32 %v12689_v24  ;;  %v12712_v35 = vpop.f32.mrf.mxu2  ;;  %v3568_v20 = vmul.f32 %v12694_v52, %v12627_v14  ;;  %vm3562_vm13 = vcmp.eq.f32.partialorder %v3561_v18, 8.507059e+37  ;;  %v3089_v29 = vand.u32 2147483648, %v12640_v3 }
 0x442   : > { %9894 = vrcp.f32 %v12676_v38  ;;  %v3080_v16 = vsub.f32 1.0, %v3079_v62  ;;  %v3076_v4 = vsel %vm3073_vm11, %v3075_v11, %v3071_v39  ;;  %v12738_v26 = vsel %vm3562_vm13, %v3564_v51, %v3560_v44 }
 0x443   : > { %8999 = vmatmul.msk.f32.gmra.mxu3 %vm914_vm1, %v16433_v45  ;;  %v2551_v9 = vpop.f32.mrf.mxu1  ;;  %9896 = vpow2.f32 %v8844_v12  ;;  %vm3084_vm14 = vweird.f32 %v12687_v33  ;;  %v8883_v11 = vmul.f32 -1.442695, %v3302_v34  ;;  %v12752_v62 = vmul.f32 %v4496_v1, %v12738_v26  ;;  %v16439_v1 = vld [vmem:[#allocation36_spill] sm:$0xff] }
 0x444   : > { %v12734_v25 = vadd.f32 %v12361_v54, %v2551_v9  ;;  %v3081_v2 = vmul.f32 %v12687_v33, %v3080_v16  ;;  %v3569_v9 = vsub.f32 1.0, %v3568_v20  ;;  %9898 = vrcp.f32 %v12708_v55  ;;  %vm12763_vm15 = vmor %vm3083_vm12, %vm3084_vm14 }
 0x445   : > { %16436 = vst [vmem:[#allocation65_spill] sm:$0xff] %v12752_v62  ;;  %v3087_v12 = vand.u32 2147483647, %v12640_v3  ;;  %v3090_v16 = vor.u32 1.1754944e-38, %v3089_v29  ;;  %vm3573_vm2 = vweird.f32 %v12694_v52  ;;  %vm3098_vm9 = vweird.f32 %v12689_v24 }
 0x446   : > { %16434 = vst [vmem:[#allocation23_spill] sm:$0xff] %v12734_v25  ;;  %v9891_v45 = vpop.eup %9890  ;;  %v8842_v50 = vmul.f32 -1.442695, %v12734_v25  ;;  %8870 = vmatmul.msk.f32.gmra.mxu2 %vm3169_vm6, %v3076_v4  ;;  %8925 = vmatmul.msk.f32.gmra.mxu1 %vm914_vm1, %v16435_v31  ;;  %v3082_v54 = vadd.f32 %v12687_v33, %v3081_v2  ;;  %v3570_v2 = vmul.f32 %v12694_v52, %v3569_v9  ;;  %vm3574_vm7 = vmor %vm3572_vm4, %vm3573_vm2  ;;  %vm3587_vm14 = vweird.f32 %v12676_v38 }
 0x447   : > { %v12746_v48 = vpop.eup %9892  ;;  %v12749_v51 = vadd.f32 1.0, %v9891_v45  ;;  %v3576_v45 = vand.u32 2147483647, %v12627_v14  ;;  %vm3088_vm3 = vcmp.eq.f32.partialorder %v3087_v12, 8.507059e+37 }
 0x448   : > { %v12754_v18 = vpop.eup %9894  ;;  %9900 = vpow2.f32 %v8842_v50  ;;  %v3094_v20 = vmul.f32 %v12746_v48, %v12689_v24  ;;  %v3086_v39 = vsel %vm12763_vm15, %v12687_v33, %v3082_v54  ;;  %v3578_v50 = vand.u32 2147483648, %v12627_v14  ;;  %v4499_v14 = vpop.f32.mrf.mxu3 }
 0x449   : > { %9902 = vrcp.f32 %v12749_v51  ;;  %v12761_v27 = vpop.f32.mrf.mxu2  ;;  %v9897_v3 = vpop.eup %9896  ;;  %v3583_v31 = vmul.f32 %v12754_v18, %v12676_v38  ;;  %v3091_v54 = vsel %vm3088_vm3, %v3090_v16, %v3086_v39  ;;  %v3571_v9 = vadd.f32 %v12694_v52, %v3570_v2 }
 0x44a   : > { %v3095_v44 = vsub.f32 1.0, %v3094_v20  ;;  %9904 = vpow2.f32 %v8883_v11  ;;  %v12781_v29 = vpop.eup %9898  ;;  %vm3099_vm5 = vweird.f32 %v12746_v48  ;;  %v3104_v11 = vand.u32 2147483648, %v12689_v24 }
 0x44b   : > { %9000 = vmatmul.msk.f32.gmra.mxu3 %vm914_vm1, %v16439_v1  ;;  %v12773_v4 = vpop.f32.mrf.mxu1  ;;  %v3584_v20 = vsub.f32 1.0, %v3583_v31  ;;  %v16440_v1 = vld [vmem:[#allocation26_spill] sm:$0xff]  ;;  %v3579_v12 = vor.u32 1.1754944e-38, %v3578_v50  ;;  %vm3577_vm8 = vcmp.eq.f32.partialorder %v3576_v45, 8.507059e+37  ;;  %v3102_v31 = vand.u32 2147483647, %v12689_v24  ;;  %vm12812_vm10 = vmor %vm3098_vm9, %vm3099_vm5 }
 0x44c   : > { %v3096_v33 = vmul.f32 %v12746_v48, %v3095_v44  ;;  %v3575_v44 = vsel %vm3574_vm7, %v12694_v52, %v3571_v9  ;;  %v3305_v50 = vadd.f32 %v12341_v40, %v12650_v23  ;;  %vm3588_vm11 = vweird.f32 %v12754_v18  ;;  %v16443_v40 = vld [vmem:[#allocation10_spill] sm:$0xff] }
 0x44d   : > { %v3585_v2 = vmul.f32 %v12754_v18, %v3584_v20  ;;  %v12820_v20 = vadd.f32 1.0, %v9897_v3  ;;  %vm3103_vm13 = vcmp.eq.f32.partialorder %v3102_v31, 8.507059e+37  ;;  %vm12833_vm12 = vmor %vm3587_vm14, %vm3588_vm11  ;;  %vm3113_vm2 = vweird.f32 %v12749_v51 }
 0x44e   : > { %v9901_v34 = vpop.eup %9900  ;;  %8871 = vmatmul.msk.f32.gmra.mxu2 %vm3169_vm6, %v3091_v54  ;;  %8926 = vmatmul.msk.f32.gmra.mxu1 %vm914_vm1, %v16440_v1  ;;  %v3097_v25 = vadd.f32 %v12746_v48, %v3096_v33  ;;  %v12803_v54 = vsel %vm3577_vm8, %v3579_v12, %v3575_v44  ;;  %v3105_v1 = vor.u32 1.1754944e-38, %v3104_v11  ;;  %v3593_v11 = vand.u32 2147483648, %v12676_v38 }
 0x44f   : > { %v12793_v39 = vpop.eup %9902  ;;  %v12795_v16 = vadd.f32 1.0, %v9901_v34  ;;  %v12827_v12 = vmul.f32 %v4499_v14, %v12803_v54  ;;  %v3586_v44 = vadd.f32 %v12754_v18, %v3585_v2  ;;  %v16447_v14 = vld [vmem:[#allocation28_spill] sm:$0xff]  ;;  %vm3144_vm11 = vweird.f32 %v12781_v29 }
 0x450   : > { %v3109_v33 = vmul.f32 %v12793_v39, %v12749_v51  ;;  %v9905_v45 = vpop.eup %9904  ;;  %v3101_v24 = vsel %vm12812_vm10, %v12746_v48, %v3097_v25  ;;  %v3591_v25 = vand.u32 2147483647, %v12676_v38  ;;  %v8884_v48 = vmul.f32 -1.442695, %v3305_v50 }
 0x451   : > { %9906 = vrcp.f32 %v12795_v16  ;;  %v12808_v34 = vpop.f32.mrf.mxu2  ;;  %16444 = vst [vmem:[#allocation25_spill] sm:$0xff] %v12827_v12  ;;  %v3106_v3 = vsel %vm3103_vm13, %v3105_v1, %v3101_v24  ;;  %vm3114_vm15 = vweird.f32 %v12793_v39  ;;  %v3590_v31 = vsel %vm12833_vm12, %v12754_v18, %v3586_v44  ;;  %v4502_v1 = vpop.f32.mrf.mxu3 }
 0x452   : > { %v3110_v9 = vsub.f32 1.0, %v3109_v33  ;;  %9908 = vrcp.f32 %v12820_v20  ;;  %v3119_v24 = vand.u32 2147483648, %v12749_v51  ;;  %v3117_v38 = vand.u32 2147483647, %v12749_v51  ;;  %vm3115_vm4 = vmor %vm3113_vm2, %vm3114_vm15 }
 0x453   : > { %9001 = vmatmul.msk.f32.gmra.mxu3 %vm914_vm1, %v16443_v40  ;;  %v12824_v23 = vpop.f32.mrf.mxu1  ;;  %vm3592_vm3 = vcmp.eq.f32.partialorder %v3591_v25, 8.507059e+37  ;;  %9910 = vpow2.f32 %v8884_v48  ;;  %v3139_v18 = vmul.f32 %v12781_v29, %v12708_v55  ;;  %vm3128_vm8 = vweird.f32 %v12795_v16 }
 0x454   : > { %v3111_v52 = vmul.f32 %v12793_v39, %v3110_v9  ;;  %v3594_v9 = vor.u32 1.1754944e-38, %v3593_v11  ;;  %v3120_v48 = vor.u32 1.1754944e-38, %v3119_v24  ;;  %vm3118_vm5 = vcmp.eq.f32.partialorder %v3117_v38, 8.507059e+37 }
 0x455   : > { %v3132_v24 = vand.u32 2147483647, %v12795_v16  ;;  %vm3143_vm13 = vweird.f32 %v12708_v55 }
 0x456   : > { %8872 = vmatmul.msk.f32.gmra.mxu2 %vm3169_vm6, %v3106_v3  ;;  %8927 = vmatmul.msk.f32.gmra.mxu1 %vm914_vm1, %v16447_v14  ;;  %v3112_v2 = vadd.f32 %v12793_v39, %v3111_v52  ;;  %v12855_v44 = vsel %vm3592_vm3, %v3594_v9, %v3590_v31  ;;  %v12857_v3 = vadd.f32 1.0, %v9905_v45  ;;  %v16449_v14 = vld [vmem:[#allocation12_spill] sm:$0xff]  ;;  %vm3145_vm14 = vmor %vm3143_vm13, %vm3144_vm11 }
 0x457   : > { %v9907_v50 = vpop.eup %9906  ;;  %v12861_v51 = vmul.f32 %v4502_v1, %v12855_v44  ;;  %vm3133_vm10 = vcmp.eq.f32.partialorder %v3132_v24, 8.507059e+37  ;;  %v3147_v24 = vand.u32 2147483647, %v12708_v55 }
 0x458   : > { %v3124_v40 = vmul.f32 %v9907_v50, %v12795_v16  ;;  %v3116_v33 = vsel %vm3115_vm4, %v12793_v39, %v3112_v2  ;;  %v12867_v62 = vpop.eup %9908  ;;  %9912 = vrcp.f32 %v12857_v3  ;;  %v16450_v39 = vld [vmem:[#allocation30_spill] sm:$0xff]  ;;  %vm3129_vm7 = vweird.f32 %v9907_v50 }
 0x459   : > { %v12851_v52 = vpop.f32.mrf.mxu2  ;;  %16448 = vst [vmem:[#allocation36_spill] sm:$0xff] %v12861_v51  ;;  %v3121_v31 = vsel %vm3118_vm5, %v3120_v48, %v3116_v33  ;;  %v3140_v2 = vsub.f32 1.0, %v3139_v18  ;;  %v9911_v9 = vpop.eup %9910  ;;  %vm3130_vm9 = vmor %vm3128_vm8, %vm3129_vm7  ;;  %vm3148_vm15 = vcmp.eq.f32.partialorder %v3147_v24, 8.507059e+37  ;;  %vm3602_vm2 = vweird.f32 %v12857_v3 }
 0x45a   : > { %v3125_v11 = vsub.f32 1.0, %v3124_v40  ;;  %v3134_v40 = vand.u32 2147483648, %v12795_v16  ;;  %v12878_v1 = vadd.f32 1.0, %v9911_v9  ;;  %vm3159_vm3 = vweird.f32 %v12867_v62 }
 0x45b   : > { %9002 = vmatmul.msk.f32.gmra.mxu3 %vm914_vm1, %v16449_v14  ;;  %v12865_v25 = vpop.f32.mrf.mxu1  ;;  %v16451_v14 = vld [vmem:[#allocation24_spill] sm:$0xff]  ;;  %vm3158_vm7 = vweird.f32 %v12820_v20 }
 0x45c   : > { %v3126_v12 = vmul.f32 %v9907_v50, %v3125_v11  ;;  %v3141_v11 = vmul.f32 %v12781_v29, %v3140_v2  ;;  %v3135_v48 = vor.u32 1.1754944e-38, %v3134_v40  ;;  %9914 = vrcp.f32 %v12878_v1  ;;  %v764_v40 = vld [vmem:[%s16060_s3 + $0x10] sm:$0xff]  ;;  %vm3160_vm8 = vmor %vm3158_vm7, %vm3159_vm3 }
 0x45d   : > { %v3149_v2 = vand.u32 2147483648, %v12708_v55  ;;  %5015 = vmatpush.msra.mxu2 %v764_v40  ;;  %v3606_v55 = vand.u32 2147483647, %v12857_v3  ;;  %vm3617_vm11 = vweird.f32 %v12878_v1 }
 0x45e   : > { %8873 = vmatmul.msk.f32.gmra.mxu2 %vm3169_vm6, %v3121_v31  ;;  %8928 = vmatmul.msk.f32.gmra.mxu1 %vm914_vm1, %v16450_v39  ;;  %v3127_v45 = vadd.f32 %v9907_v50, %v3126_v12  ;;  %v3154_v12 = vmul.f32 %v12867_v62, %v12820_v20  ;;  %v9913_v31 = vpop.eup %9912  ;;  %v16452_v39 = vld [vmem:[#allocation31_spill] sm:$0xff] }
 0x45f   : > { %v3598_v9 = vmul.f32 %v9913_v31, %v12857_v3  ;;  %v3150_v58 = vor.u32 1.1754944e-38, %v3149_v2  ;;  %vm3603_vm12 = vweird.f32 %v9913_v31  ;;  %v3164_v2 = vand.u32 2147483648, %v12820_v20 }
 0x460   : > { %v3131_v33 = vsel %vm3130_vm9, %v9907_v50, %v3127_v45  ;;  %v3142_v50 = vadd.f32 %v12781_v29, %v3141_v11  ;;  %v3155_v45 = vsub.f32 1.0, %v3154_v12  ;;  %vm3604_vm4 = vmor %vm3602_vm2, %vm3603_vm12  ;;  %vm3607_vm5 = vcmp.eq.f32.partialorder %v3606_v55, 8.507059e+37 }
 0x461   : > { %v12876_v38 = vpop.f32.mrf.mxu2  ;;  %v3136_v16 = vsel %vm3133_vm10, %v3135_v48, %v3131_v33  ;;  %v4505_v33 = vpop.f32.mrf.mxu3  ;;  %v3599_v11 = vsub.f32 1.0, %v3598_v9  ;;  %vm4711_vm12 = vcmask 64512  }
 0x462   : > { %v3146_v12 = vsel %vm3145_vm14, %v12781_v29, %v3142_v50  ;;  %v3156_v48 = vmul.f32 %v12867_v62, %v3155_v45  ;;  %v9915_v40 = vpop.eup %9914  ;;  %v16454_v29 = vld [vmem:[#allocation33_spill] sm:$0xff] }
 0x463   : > { %9003 = vmatmul.msk.f32.gmra.mxu3 %vm914_vm1, %v16451_v14  ;;  %v12885_v18 = vpop.f32.mrf.mxu1  ;;  %v3600_v0 = vmul.f32 %v9913_v31, %v3599_v11  ;;  %v3151_v28 = vsel %vm3148_vm15, %v3150_v58, %v3146_v12  ;;  %v3613_v58 = vmul.f32 %v9915_v40, %v12878_v1  ;;  %vm3618_vm9 = vweird.f32 %v9915_v40 }
 0x464   : > { %v3157_v50 = vadd.f32 %v12867_v62, %v3156_v48  ;;  %vm3619_vm13 = vmor %vm3617_vm11, %vm3618_vm9 }
 0x465   : > { %v3601_v9 = vadd.f32 %v9913_v31, %v3600_v0  ;;  %v3162_v0 = vand.u32 2147483647, %v12820_v20  ;;  %v3614_v12 = vsub.f32 1.0, %v3613_v58 }
 0x466   : > { %8874 = vmatmul.msk.f32.gmra.mxu2 %vm3169_vm6, %v3136_v16  ;;  %8929 = vmatmul.msk.f32.gmra.mxu1 %vm914_vm1, %v16452_v39  ;;  %v3608_v16 = vand.u32 2147483648, %v12857_v3  ;;  %v16453_v39 = vld [vmem:[#allocation14_spill] sm:$0xff]  ;;  %v3161_v48 = vsel %vm3160_vm8, %v12867_v62, %v3157_v50  ;;  %v16457_v62 = vld [vmem:[#allocation35_spill] sm:$0xff] }
 0x467   : > { %v3605_v11 = vsel %vm3604_vm4, %v9913_v31, %v3601_v9  ;;  %v3623_v31 = vand.u32 2147483648, %v12878_v1  ;;  %v3165_v9 = vor.u32 1.1754944e-38, %v3164_v2  ;;  %v3615_v20 = vmul.f32 %v9915_v40, %v3614_v12 }
 0x468   : > { %v3609_v45 = vor.u32 1.1754944e-38, %v3608_v16  ;;  %vm3163_vm10 = vcmp.eq.f32.partialorder %v3162_v0, 8.507059e+37 }
 0x469   : > { %v12900_v14 = vpop.f32.mrf.mxu2  ;;  %v4508_v16 = vpop.f32.mrf.mxu3 }
 0x46b   : > { %9004 = vmatmul.msk.f32.gmra.mxu3 %vm914_vm1, %v16453_v39  ;;  %v12907_v51 = vpop.f32.mrf.mxu1  ;;  %v16456_v39 = vld [vmem:[#allocation27_spill] sm:$0xff] }
 0x46e   : > { %8875 = vmatmul.msk.f32.gmra.mxu2 %vm3169_vm6, %v3151_v28  ;;  %8930 = vmatmul.msk.f32.gmra.mxu1 %vm914_vm1, %v16454_v29  ;;  %v12920_v28 = vsel %vm3607_vm5, %v3609_v45, %v3605_v11  ;;  %v3621_v29 = vand.u32 2147483647, %v12878_v1  ;;  %v3166_v45 = vsel %vm3163_vm10, %v3165_v9, %v3161_v48  ;;  %v3616_v11 = vadd.f32 %v9915_v40, %v3615_v20  ;;  %v16459_v48 = vld [vmem:[#allocation37_spill] sm:$0xff]  ;;  %v16460_v9 = vld [vmem:[#allocation39_spill] sm:$0xff] }
 0x46f   : > { %v12925_v24 = vmul.f32 %v4505_v33, %v12920_v28  ;;  %v3624_v33 = vor.u32 1.1754944e-38, %v3623_v31  ;;  %v4583_v1 = vmul.f32 %v12773_v4, %v12512_v13  ;;  %v12960_v4 = vld [vmem:[%s16062_s5 + $0x20] ss:$0 sm:$0xff] }
 0x470   : > { %v3620_v50 = vsel %vm3619_vm13, %v9915_v40, %v3616_v11  ;;  %vm3622_vm14 = vcmp.eq.f32.partialorder %v3621_v29, 8.507059e+37  ;;  %v4584_v40 = vmul.f32 %v12824_v23, %v12569_v32  ;;  %v3308_v20 = vadd.f32 %v12960_v4, %v12712_v35 }
 0x471   : > { %v12922_v3 = vpop.f32.mrf.mxu2  ;;  %16455 = vst [vmem:[#allocation26_spill] sm:$0xff] %v12925_v24  ;;  %v12936_v58 = vsel %vm3622_vm14, %v3624_v33, %v3620_v50  ;;  %v4585_v29 = vmul.f32 %v12865_v25, %v12647_v17  ;;  %v3311_v33 = vadd.f32 %v12960_v4, %v12761_v27  ;;  %v4586_v35 = vmul.f32 %v12885_v18, %v12738_v26 }
 0x472   : > { %v12941_v12 = vmul.f32 %v4508_v16, %v12936_v58  ;;  %v8885_v23 = vmul.f32 -1.442695, %v3308_v20  ;;  %v4587_v27 = vmul.f32 %v12907_v51, %v12803_v54 }
 0x473   : > { %9005 = vmatmul.msk.f32.gmra.mxu3 %vm914_vm1, %v16456_v39  ;;  %v4310_v55 = vpop.f32.mrf.mxu1  ;;  %v8886_v50 = vmul.f32 -1.442695, %v3311_v33  ;;  %v3317_v33 = vadd.f32 %v12960_v4, %v12851_v52  ;;  %v3320_v52 = vadd.f32 %v12960_v4, %v12876_v38 }
 0x474   : > { %16458 = vst [vmem:[#allocation10_spill] sm:$0xff] %v12941_v12  ;;  %9916 = vpow2.f32 %v8885_v23  ;;  %v4588_v51 = vmul.f32 %v4310_v55, %v12855_v44  ;;  %v16465_v12 = vld [vmem:[#allocation49_spill] sm:$0xff] }
 0x475   : > { %9918 = vpow2.f32 %v8886_v50 }
 0x476   : > { %8876 = vmatmul.msk.f32.gmra.mxu2 %vm3169_vm6, %v3166_v45  ;;  %8931 = vmatmul.msk.f32.gmra.mxu1 %vm914_vm1, %v16457_v62  ;;  %v16461_v45 = vld [vmem:[#allocation41_spill] sm:$0xff] }
 0x479   : > { %v12938_v2 = vpop.f32.mrf.mxu2 }
 0x47a   : > { %v9917_v25 = vpop.eup %9916 }
 0x47b   : > { %v4313_v0 = vpop.f32.mrf.mxu1  ;;  %v3483_v20 = vadd.f32 1.0, %v9917_v25  ;;  %v9919_v23 = vpop.eup %9918  ;;  %v16464_v25 = vld [vmem:[#allocation47_spill] sm:$0xff] }
 0x47c   : > { %v4589_v55 = vmul.f32 %v4313_v0, %v12920_v28  ;;  %v3323_v0 = vadd.f32 %v12960_v4, %v12900_v14 }
 0x47d   : > { %9920 = vrcp.f32 %v3483_v20  ;;  %v3638_v57 = vand.u32 2147483648, %v3483_v20  ;;  %vm3632_vm2 = vweird.f32 %v3483_v20  ;;  %v3636_v10 = vand.u32 2147483647, %v3483_v20 }
 0x47e   : > { %8932 = vmatmul.msk.f32.gmra.mxu1 %vm914_vm1, %v16459_v48  ;;  %9006 = vmatmul.msk.f32.vlgmr.msra.gmra.mxu2 %vm4711_vm12, %v4583_v1  ;;  %v16462_v1 = vld [vmem:[#allocation43_spill] sm:$0xff] }
 0x47f   : > { %vm3637_vm4 = vcmp.eq.f32.partialorder %v3636_v10, 8.507059e+37 }
 0x481   : > { %v12948_v31 = vpop.f32.mrf.mxu2 }
 0x483   : > { %v4316_v39 = vpop.f32.mrf.mxu1  ;;  %v9921_v50 = vpop.eup %9920 }
 0x484   : > { %vm3633_vm15 = vweird.f32 %v9921_v50 }
 0x485   : > { %vm3634_vm3 = vmor %vm3632_vm2, %vm3633_vm15 }
 0x486   : > { %8933 = vmatmul.msk.f32.gmra.mxu1 %vm914_vm1, %v16460_v9  ;;  %9007 = vmatmul.msk.f32.gmra.mxu2 %vm4711_vm12, %v4584_v40  ;;  %v3314_v9 = vadd.f32 %v12960_v4, %v12808_v34 }
 0x488   : > { %v8887_v18 = vmul.f32 -1.442695, %v3314_v9 }
 0x489   : > { %v12955_v16 = vpop.f32.mrf.mxu2 }
 0x48a   : > { %9922 = vpow2.f32 %v8887_v18 }
 0x48b   : > { %v12969_v11 = vpop.f32.mrf.mxu1 }
 0x48e   : > { %8934 = vmatmul.msk.f32.gmra.mxu1 %vm914_vm1, %v16461_v45  ;;  %9008 = vmatmul.msk.f32.gmra.mxu2 %vm4711_vm12, %v4585_v29  ;;  %v16463_v29 = vld [vmem:[#allocation45_spill] sm:$0xff] }
 0x490   : > { %v9923_v9 = vpop.eup %9922 }
 0x491   : > { %v12971_v62 = vpop.f32.mrf.mxu2 }
 0x493   : > { %v12980_v48 = vpop.f32.mrf.mxu1 }
 0x496   : > { %8935 = vmatmul.msk.f32.gmra.mxu1 %vm914_vm1, %v16462_v1  ;;  %9009 = vmatmul.msk.f32.gmra.mxu2 %vm4711_vm12, %v4586_v35  ;;  %v12995_v35 = vadd.f32 1.0, %v9919_v23  ;;  %v8888_v1 = vmul.f32 -1.442695, %v3317_v33 }
 0x498   : > { %9924 = vrcp.f32 %v12995_v35  ;;  %vm3647_vm7 = vweird.f32 %v12995_v35  ;;  %v3651_v10 = vand.u32 2147483647, %v12995_v35 }
 0x499   : > { %v12982_v40 = vpop.f32.mrf.mxu2  ;;  %9926 = vpow2.f32 %v8888_v1 }
 0x49a   : > { %vm3652_vm9 = vcmp.eq.f32.partialorder %v3651_v10, 8.507059e+37 }
 0x49b   : > { %v12997_v34 = vpop.f32.mrf.mxu1 }
 0x49e   : > { %8936 = vmatmul.msk.f32.gmra.mxu1 %vm914_vm1, %v16463_v29  ;;  %9010 = vmatmul.msk.f32.gmra.mxu2 %vm4711_vm12, %v4587_v27  ;;  %v3628_v27 = vmul.f32 %v9921_v50, %v3483_v20  ;;  %v13008_v29 = vadd.f32 1.0, %v9923_v9  ;;  %v13011_v33 = vpop.eup %9924 }
 0x49f   : > { %v9927_v1 = vpop.eup %9926  ;;  %v3643_v38 = vmul.f32 %v13011_v33, %v12995_v35  ;;  %vm3648_vm5 = vweird.f32 %v13011_v33 }
 0x4a0   : > { %v3629_v23 = vsub.f32 1.0, %v3628_v27  ;;  %9928 = vrcp.f32 %v13008_v29  ;;  %v13025_v27 = vadd.f32 1.0, %v9927_v1  ;;  %vm3649_vm8 = vmor %vm3647_vm7, %vm3648_vm5  ;;  %vm3662_vm11 = vweird.f32 %v13008_v29 }
 0x4a1   : > { %v12991_v45 = vpop.f32.mrf.mxu2 }
 0x4a2   : > { %v3630_v24 = vmul.f32 %v9921_v50, %v3629_v23  ;;  %v8890_v23 = vmul.f32 -1.442695, %v3323_v0  ;;  %vm3677_vm2 = vweird.f32 %v13025_v27 }
 0x4a6   : > { %8937 = vmatmul.msk.f32.gmra.mxu1 %vm914_vm1, %v16464_v25  ;;  %9011 = vmatmul.msk.f32.gmra.mxu2 %vm4711_vm12, %v4588_v51  ;;  %v13013_v25 = vpop.f32.mrf.mxu1  ;;  %v8889_v51 = vmul.f32 -1.442695, %v3320_v52  ;;  %v4590_v52 = vmul.f32 %v4316_v39, %v12936_v58  ;;  %v13028_v49 = vpop.eup %9928 }
 0x4a7   : > { %v3658_v1 = vmul.f32 %v13028_v49, %v13008_v29  ;;  %vm3663_vm10 = vweird.f32 %v13028_v49 }
 0x4a8   : > { %9930 = vpow2.f32 %v8889_v51  ;;  %vm3664_vm13 = vmor %vm3662_vm11, %vm3663_vm10 }
 0x4a9   : > { %v13004_v18 = vpop.f32.mrf.mxu2  ;;  %9932 = vrcp.f32 %v13025_v27 }
 0x4aa   : > { %9934 = vpow2.f32 %v8890_v23  ;;  %v3653_v23 = vand.u32 2147483648, %v12995_v35  ;;  %v3329_v35 = vadd.f32 %v12960_v4, %v12938_v2  ;;  %v3666_v2 = vand.u32 2147483647, %v13008_v29 }
 0x4ac   : > { %v8892_v37 = vmul.f32 -1.442695, %v3329_v35  ;;  %vm3667_vm14 = vcmp.eq.f32.partialorder %v3666_v2, 8.507059e+37  ;;  %v3681_v2 = vand.u32 2147483647, %v13025_v27 }
 0x4ae   : > { %8938 = vmatmul.msk.f32.gmra.mxu1 %vm914_vm1, %v16465_v12  ;;  %9012 = vmatmul.msk.f32.gmra.mxu2 %vm4711_vm12, %v4589_v55  ;;  %v3631_v12 = vadd.f32 %v9921_v50, %v3630_v24  ;;  %v3644_v55 = vsub.f32 1.0, %v3643_v38  ;;  %v13034_v14 = vpop.f32.mrf.mxu1  ;;  %v9931_v39 = vpop.eup %9930  ;;  %v3639_v38 = vor.u32 1.1754944e-38, %v3638_v57 }
 0x4af   : > { %v13043_v20 = vadd.f32 1.0, %v9931_v39  ;;  %v13051_v57 = vpop.eup %9932 }
 0x4b0   : > { %v3635_v24 = vsel %vm3634_vm3, %v9921_v50, %v3631_v12  ;;  %v3645_v51 = vmul.f32 %v13011_v33, %v3644_v55  ;;  %v3659_v55 = vsub.f32 1.0, %v3658_v1  ;;  %vm3678_vm15 = vweird.f32 %v13051_v57 }
 0x4b1   : > { %v13021_v9 = vpop.f32.mrf.mxu2  ;;  %9936 = vrcp.f32 %v13043_v20  ;;  %vm3679_vm3 = vmor %vm3677_vm2, %vm3678_vm15  ;;  %vm3692_vm7 = vweird.f32 %v13043_v20 }
 0x4b2   : > { %v3646_v12 = vadd.f32 %v13011_v33, %v3645_v51  ;;  %v3660_v39 = vmul.f32 %v13028_v49, %v3659_v55  ;;  %v3654_v51 = vor.u32 1.1754944e-38, %v3653_v23 }
 0x4b6   : > { %8939 = vmatmul.msk.f32.gmra.mxu1 %vm914_vm1, %v16466_v41  ;;  %9013 = vmatmul.msk.f32.gmra.mxu2 %vm4711_vm12, %v4590_v52  ;;  %v3326_v41 = vadd.f32 %v12960_v4, %v12922_v3  ;;  %v13045_v52 = vsel %vm3637_vm4, %v3639_v38, %v3635_v24  ;;  %v9935_v3 = vpop.eup %9934  ;;  %v3673_v24 = vmul.f32 %v13051_v57, %v13025_v27  ;;  %v13062_v1 = vpop.f32.mrf.mxu1  ;;  %vm3682_vm4 = vcmp.eq.f32.partialorder %v3681_v2, 8.507059e+37 }
 0x4b7   : > { %v4591_v50 = vmul.f32 %v12969_v11, %v13045_v52  ;;  %v3650_v11 = vsel %vm3649_vm8, %v13011_v33, %v3646_v12  ;;  %v3661_v12 = vadd.f32 %v13028_v49, %v3660_v39  ;;  %v13076_v23 = vpop.eup %9936  ;;  %v3696_v2 = vand.u32 2147483647, %v13043_v20 }
 0x4b8   : > { %v8891_v46 = vmul.f32 -1.442695, %v3326_v41  ;;  %v13068_v41 = vadd.f32 1.0, %v9935_v3  ;;  %v3674_v55 = vsub.f32 1.0, %v3673_v24  ;;  %vm3693_vm5 = vweird.f32 %v13076_v23 }
 0x4b9   : > { %v13039_v0 = vpop.f32.mrf.mxu2  ;;  %v3665_v10 = vsel %vm3664_vm13, %v13028_v49, %v3661_v12  ;;  %vm3694_vm8 = vmor %vm3692_vm7, %vm3693_vm5 }
 0x4ba   : > { %9938 = vpow2.f32 %v8891_v46  ;;  %v3668_v46 = vand.u32 2147483648, %v13008_v29  ;;  %v3675_v3 = vmul.f32 %v13051_v57, %v3674_v55  ;;  %v3332_v29 = vadd.f32 %v12960_v4, %v12948_v31 }
 0x4bb   : > { %9940 = vrcp.f32 %v13068_v41  ;;  %vm3707_vm11 = vweird.f32 %v13068_v41 }
 0x4bc   : > { %v3669_v39 = vor.u32 1.1754944e-38, %v3668_v46  ;;  %9942 = vpow2.f32 %v8892_v37  ;;  %v3676_v12 = vadd.f32 %v13051_v57, %v3675_v3  ;;  %v3683_v37 = vand.u32 2147483648, %v13025_v27 }
 0x4bd   : > { %v8893_v31 = vmul.f32 -1.442695, %v3332_v29  ;;  %v3335_v27 = vadd.f32 %v12960_v4, %v12955_v16 }
 0x4be   : > { %9014 = vmatmul.msk.f32.gmra.mxu2 %vm4711_vm12, %v4591_v50  ;;  %v13070_v50 = vsel %vm3652_vm9, %v3654_v51, %v3650_v11  ;;  %v3688_v11 = vmul.f32 %v13076_v23, %v13043_v20  ;;  %v13093_v35 = vsel %vm3667_vm14, %v3669_v39, %v3665_v10  ;;  %vm3697_vm9 = vcmp.eq.f32.partialorder %v3696_v2, 8.507059e+37 }
 0x4bf   : > { %v4592_v33 = vmul.f32 %v12980_v48, %v13070_v50  ;;  %v4593_v49 = vmul.f32 %v12997_v34, %v13093_v35  ;;  %v8894_v16 = vmul.f32 -1.442695, %v3335_v27 }
 0x4c0   : > { %v9939_v48 = vpop.eup %9938  ;;  %v3689_v55 = vsub.f32 1.0, %v3688_v11  ;;  %v3684_v11 = vor.u32 1.1754944e-38, %v3683_v37 }
 0x4c1   : > { %v13064_v38 = vpop.f32.mrf.mxu2  ;;  %v13091_v51 = vadd.f32 1.0, %v9939_v48  ;;  %v13101_v46 = vpop.eup %9940  ;;  %v3680_v48 = vsel %vm3679_vm3, %v13051_v57, %v3676_v12 }
 0x4c2   : > { %v9943_v34 = vpop.eup %9942  ;;  %v3690_v10 = vmul.f32 %v13076_v23, %v3689_v55  ;;  %v3703_v3 = vmul.f32 %v13101_v46, %v13068_v41  ;;  %vm3708_vm10 = vweird.f32 %v13101_v46 }
 0x4c3   : > { %9944 = vrcp.f32 %v13091_v51  ;;  %v13116_v29 = vadd.f32 1.0, %v9943_v34  ;;  %vm3709_vm13 = vmor %vm3707_vm11, %vm3708_vm10  ;;  %vm3722_vm2 = vweird.f32 %v13091_v51 }
 0x4c4   : > { %9946 = vpow2.f32 %v8893_v31  ;;  %v3691_v12 = vadd.f32 %v13076_v23, %v3690_v10  ;;  %v3704_v55 = vsub.f32 1.0, %v3703_v3  ;;  %v3698_v31 = vand.u32 2147483648, %v13043_v20 }
 0x4c5   : > { %9948 = vrcp.f32 %v13116_v29  ;;  %v3338_v20 = vadd.f32 %v12960_v4, %v12971_v62  ;;  %v3711_v62 = vand.u32 2147483647, %v13068_v41  ;;  %vm3737_vm7 = vweird.f32 %v13116_v29 }
 0x4c6   : > { %9015 = vmatmul.msk.f32.gmra.mxu2 %vm4711_vm12, %v4592_v33  ;;  %v13095_v33 = vpop.f32.mrf.mxu1  ;;  %v3695_v34 = vsel %vm3694_vm8, %v13076_v23, %v3691_v12  ;;  %v3699_v3 = vor.u32 1.1754944e-38, %v3698_v31  ;;  %9950 = vpow2.f32 %v8894_v16  ;;  %v3713_v16 = vand.u32 2147483648, %v13068_v41 }
 0x4c7   : > { %v8895_v5 = vmul.f32 -1.442695, %v3338_v20  ;;  %v3341_v41 = vadd.f32 %v12960_v4, %v12982_v40  ;;  %vm3712_vm14 = vcmp.eq.f32.partialorder %v3711_v62, 8.507059e+37  ;;  %v3726_v40 = vand.u32 2147483647, %v13091_v51 }
 0x4c9   : > { %v13087_v24 = vpop.f32.mrf.mxu2  ;;  %v13124_v37 = vpop.eup %9944  ;;  %v8896_v6 = vmul.f32 -1.442695, %v3341_v41 }
 0x4ca   : > { %v3718_v10 = vmul.f32 %v13124_v37, %v13091_v51  ;;  %vm3723_vm15 = vweird.f32 %v13124_v37 }
 0x4cb   : > { %vm3724_vm3 = vmor %vm3722_vm2, %vm3723_vm15 }
 0x4ce   : > { %9016 = vmatmul.msk.f32.gmra.mxu2 %vm4711_vm12, %v4593_v49  ;;  %v13118_v49 = vsel %vm3682_vm4, %v3684_v11, %v3680_v48  ;;  %v13127_v30 = vpop.f32.mrf.mxu1  ;;  %v3705_v48 = vmul.f32 %v13101_v46, %v3704_v55  ;;  %v3719_v55 = vsub.f32 1.0, %v3718_v10  ;;  %v3714_v10 = vor.u32 1.1754944e-38, %v3713_v16 }
 0x4cf   : > { %v4594_v57 = vmul.f32 %v13013_v25, %v13118_v49  ;;  %v9947_v25 = vpop.eup %9946  ;;  %vm3727_vm4 = vcmp.eq.f32.partialorder %v3726_v40, 8.507059e+37 }
 0x4d0   : > { %v13141_v27 = vadd.f32 1.0, %v9947_v25  ;;  %v3706_v12 = vadd.f32 %v13101_v46, %v3705_v48  ;;  %v13149_v31 = vpop.eup %9948 }
 0x4d1   : > { %v13112_v39 = vpop.f32.mrf.mxu2  ;;  %v9951_v2 = vpop.eup %9950  ;;  %v3733_v48 = vmul.f32 %v13149_v31, %v13116_v29  ;;  %vm3738_vm5 = vweird.f32 %v13149_v31 }
 0x4d2   : > { %9952 = vrcp.f32 %v13141_v27  ;;  %v3710_v25 = vsel %vm3709_vm13, %v13101_v46, %v3706_v12  ;;  %v13166_v20 = vadd.f32 1.0, %v9951_v2  ;;  %vm3739_vm8 = vmor %vm3737_vm7, %vm3738_vm5  ;;  %vm3752_vm11 = vweird.f32 %v13141_v27 }
 0x4d3   : > { %9954 = vpow2.f32 %v8895_v5  ;;  %v3728_v5 = vand.u32 2147483648, %v13091_v51  ;;  %v3344_v51 = vadd.f32 %v12960_v4, %v12991_v45  ;;  %v3741_v45 = vand.u32 2147483647, %v13116_v29 }
 0x4d4   : > { %9956 = vrcp.f32 %v13166_v20  ;;  %vm3767_vm2 = vweird.f32 %v13166_v20 }
 0x4d5   : > { %9958 = vpow2.f32 %v8896_v6  ;;  %v3743_v6 = vand.u32 2147483648, %v13116_v29  ;;  %v8897_v53 = vmul.f32 -1.442695, %v3344_v51  ;;  %v781_v29 = vld [vmem:[%s16062_s5 + $0x28] sm:$0xff] }
 0x4d6   : > { %9017 = vmatmul.msk.f32.gmra.mxu2 %vm4711_vm12, %v4594_v57  ;;  %v13143_v57 = vsel %vm3697_vm9, %v3699_v3, %v3695_v34  ;;  %v3720_v34 = vmul.f32 %v13124_v37, %v3719_v55  ;;  %v3734_v55 = vsub.f32 1.0, %v3733_v48  ;;  %vm3742_vm9 = vcmp.eq.f32.partialorder %v3741_v45, 8.507059e+37 }
 0x4d7   : > { %v4595_v23 = vmul.f32 %v13034_v14, %v13143_v57  ;;  %v13156_v14 = vpop.f32.mrf.mxu1 }
 0x4d8   : > { %v3721_v12 = vadd.f32 %v13124_v37, %v3720_v34  ;;  %v13174_v16 = vpop.eup %9952  ;;  %v3735_v2 = vmul.f32 %v13149_v31, %v3734_v55  ;;  %v3729_v34 = vor.u32 1.1754944e-38, %v3728_v5 }
 0x4d9   : > { %v13137_v11 = vpop.f32.mrf.mxu2  ;;  %vm3753_vm10 = vweird.f32 %v13174_v16 }
 0x4da   : > { %v3725_v62 = vsel %vm3724_vm3, %v13124_v37, %v3721_v12  ;;  %v3736_v12 = vadd.f32 %v13149_v31, %v3735_v2  ;;  %v782_v2 = vld [vmem:[%s16062_s5 + $0x30] sm:$0x7]  ;;  %vm3754_vm13 = vmor %vm3752_vm11, %vm3753_vm10 }
 0x4db   : > { %9199 = vmatpush.msk.msrb.mxu0 %vm1203_vm0, %v782_v2 }
 0x4dc   : > { %v3740_v40 = vsel %vm3739_vm8, %v13149_v31, %v3736_v12  ;;  %v3347_v31 = vadd.f32 %v12960_v4, %v13004_v18  ;;  %v3758_v18 = vand.u32 2147483648, %v13141_v27 }
 0x4dd   : > { %7475 = vmatpush.msrb.mxu0 %v781_v29 }
 0x4de   : > { %9018 = vmatmul.msk.f32.gmra.mxu2 %vm4711_vm12, %v4595_v23  ;;  %v13168_v23 = vsel %vm3712_vm14, %v3714_v10, %v3710_v25  ;;  %v3748_v25 = vmul.f32 %v13174_v16, %v13141_v27  ;;  %v8898_v45 = vmul.f32 -1.442695, %v3347_v31  ;;  %v3759_v29 = vor.u32 1.1754944e-38, %v3758_v18 }
 0x4df   : > { %v4596_v46 = vmul.f32 %v13062_v1, %v13168_v23  ;;  %v9955_v1 = vpop.eup %9954  ;;  %v13185_v48 = vpop.f32.mrf.mxu1 }
 0x4e0   : > { %v13191_v41 = vadd.f32 1.0, %v9955_v1  ;;  %v3749_v55 = vsub.f32 1.0, %v3748_v25  ;;  %v13199_v5 = vpop.eup %9956  ;;  %v3744_v25 = vor.u32 1.1754944e-38, %v3743_v6 }
 0x4e1   : > { %v13162_v3 = vpop.f32.mrf.mxu2  ;;  %vm3768_vm15 = vweird.f32 %v13199_v5 }
 0x4e2   : > { %9960 = vrcp.f32 %v13191_v41  ;;  %v3750_v1 = vmul.f32 %v13174_v16, %v3749_v55  ;;  %vm3769_vm3 = vmor %vm3767_vm2, %vm3768_vm15  ;;  %vm3782_vm7 = vweird.f32 %v13191_v41 }
 0x4e3   : > { %9962 = vpow2.f32 %v8897_v53 }
 0x4e4   : > { %v3751_v6 = vadd.f32 %v13174_v16, %v3750_v1 }
 0x4e6   : > { %9019 = vmatmul.msk.f32.gmra.mxu2 %vm4711_vm12, %v4596_v46  ;;  %v13193_v46 = vsel %vm3727_vm4, %v3729_v34, %v3725_v62  ;;  %v3763_v62 = vmul.f32 %v13199_v5, %v13166_v20 }
 0x4e7   : > { %v4597_v37 = vmul.f32 %v13095_v33, %v13193_v46  ;;  %v9959_v33 = vpop.eup %9958  ;;  %v13225_v12 = vpop.f32.mrf.mxu1 }
 0x4e8   : > { %v13221_v51 = vadd.f32 1.0, %v9959_v33  ;;  %v3764_v2 = vsub.f32 1.0, %v3763_v62  ;;  %v13231_v53 = vpop.eup %9960  ;;  %v3756_v33 = vand.u32 2147483647, %v13141_v27  ;;  %v3350_v27 = vadd.f32 %v12960_v4, %v13021_v9 }
 0x4e9   : > { %v13187_v10 = vpop.f32.mrf.mxu2  ;;  %v3778_v62 = vmul.f32 %v13231_v53, %v13191_v41  ;;  %vm3783_vm5 = vweird.f32 %v13231_v53 }
 0x4ea   : > { %9964 = vrcp.f32 %v13221_v51  ;;  %v3765_v1 = vmul.f32 %v13199_v5, %v3764_v2  ;;  %vm3757_vm14 = vcmp.eq.f32.partialorder %v3756_v33, 8.507059e+37  ;;  %v8899_v9 = vmul.f32 -1.442695, %v3350_v27  ;;  %vm3784_vm8 = vmor %vm3782_vm7, %vm3783_vm5 }
 0x4eb   : > { %9966 = vpow2.f32 %v8898_v45  ;;  %v3779_v2 = vsub.f32 1.0, %v3778_v62  ;;  %v3773_v45 = vand.u32 2147483648, %v13166_v20  ;;  %v3771_v33 = vand.u32 2147483647, %v13166_v20 }
 0x4ec   : > { %v3353_v20 = vadd.f32 %v12960_v4, %v13039_v0  ;;  %v3788_v0 = vand.u32 2147483648, %v13191_v41  ;;  %vm3797_vm11 = vweird.f32 %v13221_v51 }
 0x4ed   : > { %v3774_v62 = vor.u32 1.1754944e-38, %v3773_v45  ;;  %vm3772_vm4 = vcmp.eq.f32.partialorder %v3771_v33, 8.507059e+37  ;;  %v3786_v33 = vand.u32 2147483647, %v13191_v41  ;;  %v3356_v41 = vadd.f32 %v12960_v4, %v13064_v38 }
 0x4ee   : > { %9020 = vmatmul.msk.f32.gmra.mxu2 %vm4711_vm12, %v4597_v37  ;;  %v13223_v37 = vsel %vm3742_vm9, %v3744_v25, %v3740_v40  ;;  %v3755_v40 = vsel %vm3754_vm13, %v13174_v16, %v3751_v6  ;;  %v3766_v6 = vadd.f32 %v13199_v5, %v3765_v1  ;;  %v3803_v38 = vand.u32 2147483648, %v13221_v51 }
 0x4ef   : > { %16467 = vst [vmem:[#allocation28_spill] sm:$0xff] %v13223_v37  ;;  %v4598_v55 = vmul.f32 %v13127_v30, %v13223_v37  ;;  %v9963_v30 = vpop.eup %9962  ;;  %v13257_v37 = vpop.f32.mrf.mxu1  ;;  %vm3787_vm9 = vcmp.eq.f32.partialorder %v3786_v33, 8.507059e+37  ;;  %v3801_v33 = vand.u32 2147483647, %v13221_v51 }
 0x4f0   : > { %v13246_v31 = vadd.f32 1.0, %v9963_v30  ;;  %v13254_v18 = vpop.eup %9964  ;;  %v3770_v30 = vsel %vm3769_vm3, %v13199_v5, %v3766_v6 }
 0x4f1   : > { %v13216_v34 = vpop.f32.mrf.mxu2  ;;  %v3793_v1 = vmul.f32 %v13254_v18, %v13221_v51  ;;  %vm3798_vm10 = vweird.f32 %v13254_v18  ;;  %v3359_v51 = vadd.f32 %v12960_v4, %v13087_v24 }
 0x4f2   : > { %9968 = vrcp.f32 %v13246_v31  ;;  %vm3799_vm13 = vmor %vm3797_vm11, %vm3798_vm10  ;;  %v3818_v24 = vand.u32 2147483648, %v13246_v31  ;;  %vm3812_vm2 = vweird.f32 %v13246_v31 }
 0x4f3   : > { %9970 = vpow2.f32 %v8899_v9  ;;  %v8900_v9 = vmul.f32 -1.442695, %v3353_v20 }
 0x4f6   : > { %9021 = vmatmul.msk.f32.gmra.mxu2 %vm4711_vm12, %v4598_v55  ;;  %v13248_v55 = vsel %vm3757_vm14, %v3759_v29, %v3755_v40  ;;  %v3780_v40 = vmul.f32 %v13231_v53, %v3779_v2  ;;  %v3794_v2 = vsub.f32 1.0, %v3793_v1  ;;  %vm3802_vm14 = vcmp.eq.f32.partialorder %v3801_v33, 8.507059e+37 }
 0x4f7   : > { %v4599_v16 = vmul.f32 %v13156_v14, %v13248_v55  ;;  %v9967_v14 = vpop.eup %9966  ;;  %v8902_v33 = vmul.f32 -1.442695, %v3359_v51 }
 0x4f8   : > { %v13273_v27 = vadd.f32 1.0, %v9967_v14  ;;  %v3781_v6 = vadd.f32 %v13231_v53, %v3780_v40  ;;  %v13281_v45 = vpop.eup %9968  ;;  %v3795_v40 = vmul.f32 %v13254_v18, %v3794_v2 }
 0x4f9   : > { %v13242_v25 = vpop.f32.mrf.mxu2  ;;  %v9971_v14 = vpop.eup %9970  ;;  %v3808_v1 = vmul.f32 %v13281_v45, %v13246_v31  ;;  %vm3813_vm15 = vweird.f32 %v13281_v45 }
 0x4fa   : > { %9972 = vrcp.f32 %v13273_v27  ;;  %vm3814_vm3 = vmor %vm3812_vm2, %vm3813_vm15  ;;  %vm3827_vm7 = vweird.f32 %v13273_v27 }
 0x4fb   : > { %9974 = vpow2.f32 %v8900_v9  ;;  %v3809_v2 = vsub.f32 1.0, %v3808_v1  ;;  %v8901_v9 = vmul.f32 -1.442695, %v3356_v41  ;;  %v3804_v1 = vor.u32 1.1754944e-38, %v3803_v38 }
 0x4fe   : > { %9022 = vmatmul.msk.f32.gmra.mxu2 %vm4711_vm12, %v4599_v16  ;;  %v13275_v16 = vsel %vm3772_vm4, %v3774_v62, %v3770_v30  ;;  %v3785_v30 = vsel %vm3784_vm8, %v13231_v53, %v3781_v6  ;;  %v3789_v62 = vor.u32 1.1754944e-38, %v3788_v0  ;;  %v3796_v6 = vadd.f32 %v13254_v18, %v3795_v40 }
 0x4ff   : > { %16468 = vst [vmem:[#allocation12_spill] sm:$0xff] %v13275_v16  ;;  %v4600_v5 = vmul.f32 %v13185_v48, %v13275_v16  ;;  %v13288_v48 = vpop.f32.mrf.mxu1 }
 0x500   : > { %v13302_v16 = vsel %vm3787_vm9, %v3789_v62, %v3785_v30  ;;  %v13308_v0 = vpop.eup %9972  ;;  %v3810_v30 = vmul.f32 %v13281_v45, %v3809_v2 }
 0x501   : > { %v13267_v29 = vpop.f32.mrf.mxu2  ;;  %v4601_v53 = vmul.f32 %v13225_v12, %v13302_v16  ;;  %v9975_v12 = vpop.eup %9974  ;;  %v3823_v40 = vmul.f32 %v13308_v0, %v13273_v27  ;;  %vm3828_vm5 = vweird.f32 %v13308_v0 }
 0x502   : > { %9200 = vmatmul.msk.f32.vlgmr.msrb.gmra.mxu0 %vm914_vm1, %v13267_v29  ;;  %v3811_v2 = vadd.f32 %v13281_v45, %v3810_v30  ;;  %vm3829_vm8 = vmor %vm3827_vm7, %vm3828_vm5 }
 0x503   : > { %v3824_v38 = vsub.f32 1.0, %v3823_v40 }
 0x505   : > { %v3825_v30 = vmul.f32 %v13308_v0, %v3824_v38 }
 0x506   : > { %9023 = vmatmul.msk.f32.gmra.mxu2 %vm4711_vm12, %v4600_v5  ;;  %v13300_v5 = vadd.f32 1.0, %v9971_v14  ;;  %v3800_v14 = vsel %vm3799_vm13, %v13254_v18, %v3796_v6 }
 0x507   : > { %v4358_v62 = vpop.f32.mrf.mxu1  ;;  %v13327_v18 = vsel %vm3802_vm14, %v3804_v1, %v3800_v14  ;;  %v3815_v14 = vsel %vm3814_vm3, %v13281_v45, %v3811_v2  ;;  %v3819_v1 = vor.u32 1.1754944e-38, %v3818_v24  ;;  %v3826_v38 = vadd.f32 %v13308_v0, %v3825_v30 }
 0x508   : > { %9976 = vrcp.f32 %v13300_v5  ;;  %16469 = vst [vmem:[#allocation30_spill] sm:$0xff] %v13327_v18  ;;  %v4602_v6 = vmul.f32 %v13257_v37, %v13327_v18  ;;  %vm3842_vm11 = vweird.f32 %v13300_v5 }
 0x509   : > { %v13294_v20 = vpop.f32.mrf.mxu2  ;;  %9978 = vpow2.f32 %v8901_v9 }
 0x50a   : > { %9201 = vmatmul.msk.f32.gmra.mxu0 %vm914_vm1, %v13294_v20 }
 0x50e   : > { %9024 = vmatmul.msk.f32.gmra.mxu2 %vm4711_vm12, %v4601_v53  ;;  %v13325_v53 = vadd.f32 1.0, %v9975_v12  ;;  %v13333_v9 = vpop.eup %9976  ;;  %v3816_v12 = vand.u32 2147483647, %v13246_v31  ;;  %v3362_v31 = vadd.f32 %v12960_v4, %v13112_v39  ;;  %v3833_v39 = vand.u32 2147483648, %v13273_v27 }
 0x50f   : > { %v9979_v37 = vpop.eup %9978  ;;  %v3838_v40 = vmul.f32 %v13333_v9, %v13300_v5  ;;  %v4361_v45 = vpop.f32.mrf.mxu1  ;;  %vm3843_vm10 = vweird.f32 %v13333_v9 }
 0x510   : > { %9980 = vrcp.f32 %v13325_v53  ;;  %vm3817_vm4 = vcmp.eq.f32.partialorder %v3816_v12, 8.507059e+37  ;;  %v13350_v51 = vadd.f32 1.0, %v9979_v37  ;;  %v8903_v12 = vmul.f32 -1.442695, %v3362_v31  ;;  %vm3844_vm13 = vmor %vm3842_vm11, %vm3843_vm10 }
 0x511   : > { %v13319_v41 = vpop.f32.mrf.mxu2  ;;  %9982 = vpow2.f32 %v8902_v33  ;;  %v3839_v24 = vsub.f32 1.0, %v3838_v40  ;;  %v3831_v37 = vand.u32 2147483647, %v13273_v27  ;;  %v3365_v27 = vadd.f32 %v12960_v4, %v13137_v11 }
 0x512   : > { %9202 = vmatmul.msk.f32.gmra.mxu0 %vm914_vm1, %v13319_v41  ;;  %9984 = vrcp.f32 %v13350_v51  ;;  %vm3857_vm2 = vweird.f32 %v13325_v53  ;;  %vm3872_vm7 = vweird.f32 %v13350_v51 }
 0x513   : > { %v3840_v30 = vmul.f32 %v13333_v9, %v3839_v24  ;;  %9986 = vpow2.f32 %v8903_v12  ;;  %vm3832_vm9 = vcmp.eq.f32.partialorder %v3831_v37, 8.507059e+37  ;;  %v3848_v12 = vand.u32 2147483648, %v13300_v5 }
 0x514   : > { %v8904_v37 = vmul.f32 -1.442695, %v3365_v27 }
 0x516   : > { %9025 = vmatmul.msk.f32.gmra.mxu2 %vm4711_vm12, %v4602_v6  ;;  %v13352_v6 = vsel %vm3817_vm4, %v3819_v1, %v3815_v14  ;;  %v13358_v33 = vpop.eup %9980  ;;  %v3830_v14 = vsel %vm3829_vm8, %v13308_v0, %v3826_v38  ;;  %v3834_v1 = vor.u32 1.1754944e-38, %v3833_v39  ;;  %v3841_v38 = vadd.f32 %v13333_v9, %v3840_v30 }
 0x517   : > { %16470 = vst [vmem:[#allocation24_spill] sm:$0xff] %v13352_v6  ;;  %v4603_v2 = vmul.f32 %v13288_v48, %v13352_v6  ;;  %v9983_v48 = vpop.eup %9982  ;;  %v3853_v40 = vmul.f32 %v13358_v33, %v13325_v53  ;;  %v4364_v11 = vpop.f32.mrf.mxu1  ;;  %vm3858_vm15 = vweird.f32 %v13358_v33 }
 0x518   : > { %v13375_v31 = vadd.f32 1.0, %v9983_v48  ;;  %v13382_v39 = vpop.eup %9984  ;;  %v3846_v48 = vand.u32 2147483647, %v13300_v5  ;;  %v3368_v5 = vadd.f32 %v12960_v4, %v13162_v3  ;;  %vm3859_vm3 = vmor %vm3857_vm2, %vm3858_vm15 }
 0x519   : > { %v13344_v18 = vpop.f32.mrf.mxu2  ;;  %v3854_v24 = vsub.f32 1.0, %v3853_v40  ;;  %v3868_v40 = vmul.f32 %v13382_v39, %v13350_v51  ;;  %vm3873_vm5 = vweird.f32 %v13382_v39 }
 0x51a   : > { %9203 = vmatmul.msk.f32.gmra.mxu0 %vm914_vm1, %v13344_v18  ;;  %9988 = vrcp.f32 %v13375_v31  ;;  %vm3847_vm14 = vcmp.eq.f32.partialorder %v3846_v48, 8.507059e+37  ;;  %v8905_v3 = vmul.f32 -1.442695, %v3368_v5  ;;  %v3861_v48 = vand.u32 2147483647, %v13325_v53  ;;  %vm3874_vm8 = vmor %vm3872_vm7, %vm3873_vm5 }
 0x51b   : > { %v3855_v30 = vmul.f32 %v13358_v33, %v3854_v24  ;;  %9990 = vpow2.f32 %v8904_v37  ;;  %v3869_v24 = vsub.f32 1.0, %v3868_v40  ;;  %v3863_v37 = vand.u32 2147483648, %v13325_v53 }
 0x51c   : > { %v3371_v53 = vadd.f32 %v12960_v4, %v13187_v10  ;;  %vm3862_vm4 = vcmp.eq.f32.partialorder %v3861_v48, 8.507059e+37  ;;  %v3876_v48 = vand.u32 2147483647, %v13350_v51  ;;  %vm3887_vm11 = vweird.f32 %v13375_v31 }
 0x51e   : > { %9026 = vmatmul.msk.f32.gmra.mxu2 %vm4711_vm12, %v4603_v2  ;;  %v13377_v2 = vsel %vm3832_vm9, %v3834_v1, %v3830_v14  ;;  %v3845_v14 = vsel %vm3844_vm13, %v13333_v9, %v3841_v38  ;;  %v3849_v1 = vor.u32 1.1754944e-38, %v3848_v12  ;;  %v3856_v38 = vadd.f32 %v13358_v33, %v3855_v30 }
 0x51f   : > { %16471 = vst [vmem:[#allocation31_spill] sm:$0xff] %v13377_v2  ;;  %v4604_v0 = vmul.f32 %v4358_v62, %v13377_v2  ;;  %v9987_v62 = vpop.eup %9986  ;;  %v3870_v30 = vmul.f32 %v13382_v39, %v3869_v24  ;;  %v8906_v10 = vmul.f32 -1.442695, %v3371_v53  ;;  %vm3877_vm9 = vcmp.eq.f32.partialorder %v3876_v48, 8.507059e+37 }
 0x520   : > { %v13399_v27 = vadd.f32 1.0, %v9987_v62  ;;  %v13406_v12 = vpop.eup %9988  ;;  %v3891_v48 = vand.u32 2147483647, %v13375_v31 }
 0x521   : > { %v13369_v6 = vpop.f32.mrf.mxu2  ;;  %v9991_v62 = vpop.eup %9990  ;;  %v3883_v40 = vmul.f32 %v13406_v12, %v13375_v31  ;;  %vm3888_vm10 = vweird.f32 %v13406_v12 }
 0x522   : > { %9204 = vmatmul.msk.f32.gmra.mxu0 %vm914_vm1, %v13369_v6  ;;  %9992 = vrcp.f32 %v13399_v27  ;;  %vm3889_vm13 = vmor %vm3887_vm11, %vm3888_vm10  ;;  %vm3902_vm2 = vweird.f32 %v13399_v27 }
 0x523   : > { %9994 = vpow2.f32 %v8905_v3  ;;  %v3884_v24 = vsub.f32 1.0, %v3883_v40  ;;  %v3878_v3 = vand.u32 2147483648, %v13350_v51 }
 0x526   : > { %9027 = vmatmul.msk.f32.gmra.mxu2 %vm4711_vm12, %v4604_v0  ;;  %v13401_v0 = vsel %vm3847_vm14, %v3849_v1, %v3845_v14  ;;  %v3860_v14 = vsel %vm3859_vm3, %v13358_v33, %v3856_v38  ;;  %v3864_v1 = vor.u32 1.1754944e-38, %v3863_v37  ;;  %v3871_v38 = vadd.f32 %v13382_v39, %v3870_v30 }
 0x527   : > { %16472 = vst [vmem:[#allocation14_spill] sm:$0xff] %v13401_v0  ;;  %v4605_v9 = vmul.f32 %v4361_v45, %v13401_v0  ;;  %v4367_v45 = vpop.f32.mrf.mxu1  ;;  %v3885_v30 = vmul.f32 %v13406_v12, %v3884_v24  ;;  %vm3892_vm14 = vcmp.eq.f32.partialorder %v3891_v48, 8.507059e+37 }
 0x528   : > { %v13425_v0 = vsel %vm3862_vm4, %v3864_v1, %v3860_v14  ;;  %v13430_v37 = vpop.eup %9992  ;;  %v3875_v14 = vsel %vm3874_vm8, %v13382_v39, %v3871_v38  ;;  %v3879_v1 = vor.u32 1.1754944e-38, %v3878_v3 }
 0x529   : > { %v13393_v2 = vpop.f32.mrf.mxu2  ;;  %16473 = vst [vmem:[#allocation33_spill] sm:$0xff] %v13425_v0  ;;  %v4606_v33 = vmul.f32 %v4364_v11, %v13425_v0  ;;  %v3374_v11 = vadd.f32 %v12960_v4, %v13216_v34  ;;  %v3898_v40 = vmul.f32 %v13430_v37, %v13399_v27  ;;  %v3886_v38 = vadd.f32 %v13406_v12, %v3885_v30 }
 0x52a   : > { %9205 = vmatmul.msk.f32.gmra.mxu0 %vm914_vm1, %v13393_v2  ;;  %vm3903_vm15 = vweird.f32 %v13430_v37 }
 0x52b   : > { %v8907_v34 = vmul.f32 -1.442695, %v3374_v11  ;;  %v3899_v24 = vsub.f32 1.0, %v3898_v40  ;;  %vm3904_vm3 = vmor %vm3902_vm2, %vm3903_vm15 }
 0x52e   : > { %9028 = vmatmul.msk.f32.gmra.mxu2 %vm4711_vm12, %v4605_v9  ;;  %v13423_v9 = vadd.f32 1.0, %v9991_v62  ;;  %v9995_v62 = vpop.eup %9994 }
 0x52f   : > { %v4370_v53 = vpop.f32.mrf.mxu1  ;;  %v13447_v51 = vadd.f32 1.0, %v9995_v62  ;;  %v3890_v62 = vsel %vm3889_vm13, %v13406_v12, %v3886_v38 }
 0x530   : > { %9996 = vrcp.f32 %v13423_v9  ;;  %vm3917_vm7 = vweird.f32 %v13423_v9 }
 0x531   : > { %v13417_v5 = vpop.f32.mrf.mxu2  ;;  %9998 = vpow2.f32 %v8906_v10  ;;  %v3893_v10 = vand.u32 2147483648, %v13375_v31  ;;  %vm3932_vm11 = vweird.f32 %v13447_v51 }
 0x532   : > { %9206 = vmatmul.msk.f32.gmra.mxu0 %vm914_vm1, %v13417_v5  ;;  %10000 = vrcp.f32 %v13447_v51 }
 0x533   : > { %10002 = vpow2.f32 %v8907_v34  ;;  %v3894_v40 = vor.u32 1.1754944e-38, %v3893_v10  ;;  %v3908_v10 = vand.u32 2147483648, %v13399_v27 }
 0x536   : > { %9029 = vmatmul.msk.f32.gmra.mxu2 %vm4711_vm12, %v4606_v33  ;;  %v13449_v33 = vsel %vm3877_vm9, %v3879_v1, %v3875_v14  ;;  %v13454_v3 = vpop.eup %9996  ;;  %v3900_v14 = vmul.f32 %v13430_v37, %v3899_v24 }
 0x537   : > { %v4607_v39 = vmul.f32 %v4367_v45, %v13449_v33  ;;  %v3377_v45 = vadd.f32 %v12960_v4, %v13242_v25  ;;  %v9999_v11 = vpop.eup %9998  ;;  %v3913_v30 = vmul.f32 %v13454_v3, %v13423_v9  ;;  %v13473_v25 = vsel %vm3892_vm14, %v3894_v40, %v3890_v62  ;;  %v4373_v34 = vpop.f32.mrf.mxu1 }
 0x538   : > { %v13471_v31 = vadd.f32 1.0, %v9999_v11  ;;  %16474 = vst [vmem:[#allocation27_spill] sm:$0xff] %v13473_v25  ;;  %v4608_v12 = vmul.f32 %v4370_v53, %v13473_v25  ;;  %v13478_v24 = vpop.eup %10000  ;;  %v3906_v11 = vand.u32 2147483647, %v13399_v27  ;;  %vm3918_vm5 = vweird.f32 %v13454_v3 }
 0x539   : > { %v13443_v0 = vpop.f32.mrf.mxu2  ;;  %v8908_v4 = vmul.f32 -1.442695, %v3377_v45  ;;  %v3914_v38 = vsub.f32 1.0, %v3913_v30  ;;  %v10003_v48 = vpop.eup %10002  ;;  %v3928_v62 = vmul.f32 %v13478_v24, %v13447_v51  ;;  %v3909_v30 = vor.u32 1.1754944e-38, %v3908_v10  ;;  %vm3919_vm8 = vmor %vm3917_vm7, %vm3918_vm5 }
 0x53a   : > { %9207 = vmatmul.msk.f32.gmra.mxu0 %vm914_vm1, %v13443_v0  ;;  %10004 = vrcp.f32 %v13471_v31  ;;  %vm3907_vm4 = vcmp.eq.f32.partialorder %v3906_v11, 8.507059e+37  ;;  %v3921_v11 = vand.u32 2147483647, %v13423_v9  ;;  %vm3933_vm10 = vweird.f32 %v13478_v24 }
 0x53b   : > { %10006 = vpow2.f32 %v8908_v4  ;;  %v3915_v45 = vmul.f32 %v13454_v3, %v3914_v38  ;;  %v3923_v38 = vand.u32 2147483648, %v13423_v9  ;;  %vm3934_vm13 = vmor %vm3932_vm11, %vm3933_vm10  ;;  %vm3947_vm2 = vweird.f32 %v13471_v31 }
 0x53c   : > { %vm3922_vm9 = vcmp.eq.f32.partialorder %v3921_v11, 8.507059e+37 }
 0x53e   : > { %9030 = vmatmul.msk.f32.gmra.mxu2 %vm4711_vm12, %v4607_v39  ;;  %v3901_v39 = vadd.f32 %v13430_v37, %v3900_v14  ;;  %v13489_v14 = vadd.f32 1.0, %v10003_v48 }
 0x53f   : > { %v4376_v10 = vpop.f32.mrf.mxu1 }
 0x540   : > { %v3905_v53 = vsel %vm3904_vm3, %v13430_v37, %v3901_v39  ;;  %v3916_v37 = vadd.f32 %v13454_v3, %v3915_v45  ;;  %v10005_v39 = vpop.eup %10004  ;;  %10008 = vrcp.f32 %v13489_v14  ;;  %vm3962_vm7 = vweird.f32 %v13489_v14 }
 0x541   : > { %v13467_v1 = vpop.f32.mrf.mxu2  ;;  %v13495_v27 = vsel %vm3907_vm4, %v3909_v30, %v3905_v53  ;;  %v10007_v48 = vpop.eup %10006  ;;  %v3943_v45 = vmul.f32 %v10005_v39, %v13471_v31  ;;  %v3924_v30 = vor.u32 1.1754944e-38, %v3923_v38  ;;  %vm3948_vm15 = vweird.f32 %v10005_v39 }
 0x542   : > { %9208 = vmatmul.msk.f32.gmra.mxu0 %vm914_vm1, %v13467_v1  ;;  %16476 = vst [vmem:[#allocation37_spill] sm:$0xff] %v13495_v27  ;;  %v4609_v4 = vmul.f32 %v4373_v34, %v13495_v27  ;;  %v3920_v34 = vsel %vm3919_vm8, %v13454_v3, %v3916_v37  ;;  %vm3949_vm3 = vmor %vm3947_vm2, %vm3948_vm15 }
 0x543   : > { %v13514_v9 = vsel %vm3922_vm9, %v3924_v30, %v3920_v34  ;;  %v3944_v37 = vsub.f32 1.0, %v3943_v45 }
 0x544   : > { %16478 = vst [vmem:[#allocation41_spill] sm:$0xff] %v13514_v9 }
 0x545   : > { %v3945_v34 = vmul.f32 %v10005_v39, %v3944_v37 }
 0x546   : > { %9031 = vmatmul.msk.f32.gmra.mxu2 %vm4711_vm12, %v4608_v12  ;;  %v3929_v12 = vsub.f32 1.0, %v3928_v62  ;;  %v13508_v62 = vadd.f32 1.0, %v10007_v48  ;;  %v3936_v48 = vand.u32 2147483647, %v13447_v51 }
 0x547   : > { %v4379_v11 = vpop.f32.mrf.mxu1  ;;  %v3946_v25 = vadd.f32 %v10005_v39, %v3945_v34 }
 0x548   : > { %v3930_v53 = vmul.f32 %v13478_v24, %v3929_v12  ;;  %10010 = vrcp.f32 %v13508_v62  ;;  %v3938_v12 = vand.u32 2147483648, %v13447_v51  ;;  %vm3937_vm14 = vcmp.eq.f32.partialorder %v3936_v48, 8.507059e+37 }
 0x549   : > { %v13491_v40 = vpop.f32.mrf.mxu2  ;;  %vm3977_vm11 = vweird.f32 %v13508_v62 }
 0x54a   : > { %16475 = vst [vmem:[#allocation35_spill] sm:$0xff] %v13491_v40  ;;  %9209 = vmatmul.msk.f32.gmra.mxu0 %vm914_vm1, %v13491_v40  ;;  %v10009_v40 = vpop.eup %10008  ;;  %v3931_v3 = vadd.f32 %v13478_v24, %v3930_v53  ;;  %v3939_v53 = vor.u32 1.1754944e-38, %v3938_v12  ;;  %v3950_v12 = vsel %vm3949_vm3, %v10005_v39, %v3946_v25  ;;  %v3966_v25 = vand.u32 2147483647, %v13489_v14 }
 0x54b   : > { %v3958_v38 = vmul.f32 %v10009_v40, %v13489_v14  ;;  %vm3963_vm5 = vweird.f32 %v10009_v40 }
 0x54c   : > { %vm3964_vm8 = vmor %vm3962_vm7, %vm3963_vm5  ;;  %vm3967_vm9 = vcmp.eq.f32.partialorder %v3966_v25, 8.507059e+37 }
 0x54d   : > { %v3959_v45 = vsub.f32 1.0, %v3958_v38 }
 0x54e   : > { %9032 = vmatmul.msk.f32.gmra.mxu2 %vm4711_vm12, %v4609_v4  ;;  %v4610_v4 = vmul.f32 %v4376_v10, %v13514_v9  ;;  %v3935_v10 = vsel %vm3934_vm13, %v13478_v24, %v3931_v3  ;;  %v10011_v9 = vpop.eup %10010  ;;  %v3951_v3 = vand.u32 2147483647, %v13471_v31 }
 0x54f   : > { %v3973_v24 = vmul.f32 %v10011_v9, %v13508_v62  ;;  %v3960_v37 = vmul.f32 %v10009_v40, %v3959_v45  ;;  %v4382_v48 = vpop.f32.mrf.mxu1  ;;  %vm3978_vm10 = vweird.f32 %v10011_v9 }
 0x550   : > { %vm3952_vm4 = vcmp.eq.f32.partialorder %v3951_v3, 8.507059e+37  ;;  %vm3979_vm13 = vmor %vm3977_vm11, %vm3978_vm10 }
 0x551   : > { %v13510_v27 = vpop.f32.mrf.mxu2  ;;  %v3961_v34 = vadd.f32 %v10009_v40, %v3960_v37 }
 0x552   : > { %16477 = vst [vmem:[#allocation39_spill] sm:$0xff] %v13510_v27  ;;  %9210 = vmatmul.msk.f32.gmra.mxu0 %vm914_vm1, %v13510_v27  ;;  %v13530_v27 = vsel %vm3937_vm14, %v3939_v53, %v3935_v10 }
 0x553   : > { %v4611_v51 = vmul.f32 %v4379_v11, %v13530_v27  ;;  %v3974_v11 = vsub.f32 1.0, %v3973_v24  ;;  %v3965_v39 = vsel %vm3964_vm8, %v10009_v40, %v3961_v34  ;;  %v3981_v40 = vand.u32 2147483647, %v13508_v62 }
 0x555   : > { %v3975_v45 = vmul.f32 %v10011_v9, %v3974_v11  ;;  %vm3982_vm14 = vcmp.eq.f32.partialorder %v3981_v40, 8.507059e+37 }
 0x556   : > { %9033 = vmatmul.msk.f32.gmra.mxu2 %vm4711_vm12, %v4610_v4  ;;  %v3953_v4 = vand.u32 2147483648, %v13471_v31  ;;  %v3968_v31 = vand.u32 2147483648, %v13489_v14 }
 0x557   : > { %v3976_v37 = vadd.f32 %v10011_v9, %v3975_v45 }
 0x558   : > { %v3954_v38 = vor.u32 1.1754944e-38, %v3953_v4  ;;  %v3969_v4 = vor.u32 1.1754944e-38, %v3968_v31 }
 0x559   : > { %v13526_v30 = vpop.f32.mrf.mxu2 }
 0x55a   : > { %9211 = vmatmul.msk.f32.gmra.mxu0 %vm914_vm1, %v13526_v30  ;;  %v13542_v53 = vsel %vm3952_vm4, %v3954_v38, %v3950_v12  ;;  %v13551_v3 = vsel %vm3967_vm9, %v3969_v4, %v3965_v39  ;;  %v3983_v12 = vand.u32 2147483648, %v13508_v62  ;;  %v3980_v38 = vsel %vm3979_vm13, %v10011_v9, %v3976_v37 }
 0x55b   : > { %v4613_v14 = vmul.f32 %v11617_v43, %v13551_v3  ;;  %v4615_v62 = vmul.f32 %v11672_v47, %v12512_v13  ;;  %v4617_v47 = vmul.f32 %v11718_v19, %v12647_v17  ;;  %v4619_v19 = vmul.f32 %v11746_v7, %v12803_v54 }
 0x55c   : > { %v4621_v7 = vmul.f32 %v11760_v61, %v12920_v28  ;;  %v4623_v61 = vmul.f32 %v11771_v22, %v13045_v52  ;;  %v4625_v22 = vmul.f32 %v11787_v8, %v13093_v35  ;;  %v4627_v8 = vmul.f32 %v11805_v15, %v13143_v57  ;;  %v16494_v15 = vld [vmem:[#allocation46_spill] sm:$0xff] }
 0x55e   : > { %9034 = vmatmul.msk.f32.gmra.mxu2 %vm4711_vm12, %v4611_v51  ;;  %v4612_v51 = vmul.f32 %v4382_v48, %v13542_v53  ;;  %v3984_v48 = vor.u32 1.1754944e-38, %v3983_v12 }
 0x560   : > { %v13563_v34 = vsel %vm3982_vm14, %v3984_v48, %v3980_v38 }
 0x561   : > { %v13538_v10 = vpop.f32.mrf.mxu2  ;;  %v4614_v43 = vmul.f32 %v11641_v42, %v13563_v34  ;;  %v4616_v42 = vmul.f32 %v11697_v63, %v12569_v32  ;;  %v4618_v63 = vmul.f32 %v11737_v59, %v12738_v26  ;;  %v4620_v59 = vmul.f32 %v11753_v21, %v12855_v44 }
 0x562   : > { %9212 = vmatmul.msk.f32.gmra.mxu0 %vm914_vm1, %v13538_v10  ;;  %v4622_v21 = vmul.f32 %v11767_v60, %v12936_v58  ;;  %v4624_v60 = vmul.f32 %v11775_v36, %v13070_v50  ;;  %v4626_v36 = vmul.f32 %v11795_v56, %v13118_v49  ;;  %v16492_v56 = vld [vmem:[#allocation44_spill] sm:$0xff] }
 0x566   : > { %9035 = vmatmul.msk.f32.gmra.mxu2 %vm4711_vm12, %v4612_v51 }
 0x569   : > { %v13549_v24 = vpop.f32.mrf.mxu2 }
 0x56a   : > { %9213 = vmatmul.msk.f32.gmra.mxu0 %vm914_vm1, %v13549_v24 }
 0x56e   : > { %9036 = vmatmul.msk.f32.gmra.mxu2 %vm4711_vm12, %v4613_v14 }
 0x571   : > { %v13561_v11 = vpop.f32.mrf.mxu2 }
 0x572   : > { %9214 = vmatmul.msk.f32.gmra.mxu0 %vm914_vm1, %v13561_v11 }
 0x576   : > { %9037 = vmatmul.msk.f32.gmra.mxu2 %vm4711_vm12, %v4614_v43 }
 0x579   : > { %v13570_v31 = vpop.f32.mrf.mxu2 }
 0x57a   : > { %9215 = vmatmul.msk.f32.gmra.mxu0 %vm914_vm1, %v13570_v31 }
 0x57e   : > { %9038 = vmatmul.msk.f32.gmra.mxu2 %vm4711_vm12, %v4615_v62 }
 0x57f   : > { %v13577_v9 = vpop.f32.mrf.mxu0 }
 0x580   : > { %16479 = vst [vmem:[#allocation43_spill] sm:$0xff] %v13577_v9 }
 0x581   : > { %v13579_v51 = vpop.f32.mrf.mxu2 }
 0x582   : > { %9216 = vmatmul.msk.f32.gmra.mxu0 %vm914_vm1, %v13579_v51 }
 0x586   : > { %9039 = vmatmul.msk.f32.gmra.mxu2 %vm4711_vm12, %v4616_v42 }
 0x587   : > { %v13586_v25 = vpop.f32.mrf.mxu0 }
 0x588   : > { %16480 = vst [vmem:[#allocation45_spill] sm:$0xff] %v13586_v25  ;;  %v16525_v25 = vld [vmem:[#allocation78_spill] sm:$0xff] }
 0x589   : > { %v13588_v39 = vpop.f32.mrf.mxu2 }
 0x58a   : > { %9217 = vmatmul.msk.f32.gmra.mxu0 %vm914_vm1, %v13588_v39 }
 0x58e   : > { %9040 = vmatmul.msk.f32.gmra.mxu2 %vm4711_vm12, %v4617_v47 }
 0x58f   : > { %v13595_v13 = vpop.f32.mrf.mxu0 }
 0x590   : > { %16481 = vst [vmem:[#allocation47_spill] sm:$0xff] %v13595_v13  ;;  %v16519_v13 = vld [vmem:[#allocation75_spill] sm:$0xff] }
 0x591   : > { %v13597_v45 = vpop.f32.mrf.mxu2 }
 0x592   : > { %9218 = vmatmul.msk.f32.gmra.mxu0 %vm914_vm1, %v13597_v45 }
 0x596   : > { %9041 = vmatmul.msk.f32.gmra.mxu2 %vm4711_vm12, %v4618_v63 }
 0x597   : > { %v13604_v32 = vpop.f32.mrf.mxu0 }
 0x598   : > { %16482 = vst [vmem:[#allocation49_spill] sm:$0xff] %v13604_v32  ;;  %v16516_v32 = vld [vmem:[#allocation73_spill] sm:$0xff] }
 0x599   : > { %v13606_v4 = vpop.f32.mrf.mxu2 }
 0x59a   : > { %9219 = vmatmul.msk.f32.gmra.mxu0 %vm914_vm1, %v13606_v4 }
 0x59e   : > { %9042 = vmatmul.msk.f32.gmra.mxu2 %vm4711_vm12, %v4619_v19 }
 0x59f   : > { %v13613_v17 = vpop.f32.mrf.mxu0 }
 0x5a0   : > { %16483 = vst [vmem:[#allocation51_spill] sm:$0xff] %v13613_v17  ;;  %v16513_v17 = vld [vmem:[#allocation72_spill] sm:$0xff] }
 0x5a1   : > { %v13615_v37 = vpop.f32.mrf.mxu2 }
 0x5a2   : > { %9220 = vmatmul.msk.f32.gmra.mxu0 %vm914_vm1, %v13615_v37 }
 0x5a6   : > { %9043 = vmatmul.msk.f32.gmra.mxu2 %vm4711_vm12, %v4620_v59  ;;  %v4628_v59 = vmul.f32 %v16492_v56, %v13168_v23 }
 0x5a7   : > { %v13622_v26 = vpop.f32.mrf.mxu0 }
 0x5a8   : > { %16484 = vst [vmem:[#allocation82_spill] sm:$0xff] %v13622_v26  ;;  %v16510_v26 = vld [vmem:[#allocation71_spill] sm:$0xff] }
 0x5a9   : > { %v13624_v12 = vpop.f32.mrf.mxu2 }
 0x5aa   : > { %9221 = vmatmul.msk.f32.gmra.mxu0 %vm914_vm1, %v13624_v12 }
 0x5ae   : > { %9044 = vmatmul.msk.f32.gmra.mxu2 %vm4711_vm12, %v4621_v7 }
 0x5af   : > { %v13631_v54 = vpop.f32.mrf.mxu0 }
 0x5b0   : > { %16485 = vst [vmem:[#allocation83_spill] sm:$0xff] %v13631_v54  ;;  %v16507_v54 = vld [vmem:[#allocation70_spill] sm:$0xff] }
 0x5b1   : > { %v13633_v14 = vpop.f32.mrf.mxu2 }
 0x5b2   : > { %9222 = vmatmul.msk.f32.gmra.mxu0 %vm914_vm1, %v13633_v14 }
 0x5b6   : > { %9045 = vmatmul.msk.f32.gmra.mxu2 %vm4711_vm12, %v4622_v21 }
 0x5b7   : > { %v13640_v44 = vpop.f32.mrf.mxu0 }
 0x5b8   : > { %16486 = vst [vmem:[#allocation84_spill] sm:$0xff] %v13640_v44 }
 0x5b9   : > { %v13642_v40 = vpop.f32.mrf.mxu2 }
 0x5ba   : > { %9223 = vmatmul.msk.f32.gmra.mxu0 %vm914_vm1, %v13642_v40 }
 0x5be   : > { %9046 = vmatmul.msk.f32.gmra.mxu2 %vm4711_vm12, %v4623_v61  ;;  %v4629_v61 = vmul.f32 %v16494_v15, %v13193_v46  ;;  %v16499_v15 = vld [vmem:[#allocation67_spill] sm:$0xff] }
 0x5bf   : > { %v13649_v28 = vpop.f32.mrf.mxu0 }
 0x5c0   : > { %16487 = vst [vmem:[#allocation85_spill] sm:$0xff] %v13649_v28  ;;  %v16502_v28 = vld [vmem:[#allocation68_spill] sm:$0xff] }
 0x5c1   : > { %v13651_v38 = vpop.f32.mrf.mxu2 }
 0x5c2   : > { %9224 = vmatmul.msk.f32.gmra.mxu0 %vm914_vm1, %v13651_v38 }
 0x5c6   : > { %9047 = vmatmul.msk.f32.gmra.mxu2 %vm4711_vm12, %v4624_v60 }
 0x5c7   : > { %v13658_v58 = vpop.f32.mrf.mxu0 }
 0x5c8   : > { %16488 = vst [vmem:[#allocation86_spill] sm:$0xff] %v13658_v58 }
 0x5c9   : > { %v13660_v48 = vpop.f32.mrf.mxu2 }
 0x5ca   : > { %9225 = vmatmul.msk.f32.gmra.mxu0 %vm914_vm1, %v13660_v48 }
 0x5ce   : > { %9048 = vmatmul.msk.f32.gmra.mxu2 %vm4711_vm12, %v4625_v22 }
 0x5cf   : > { %v13667_v43 = vpop.f32.mrf.mxu0 }
 0x5d0   : > { %16489 = vst [vmem:[#allocation87_spill] sm:$0xff] %v13667_v43  ;;  %v5305_v43 = vmul.f32 %v13267_v29, %v13267_v29  ;;  %v5306_v29 = vmul.f32 %v13294_v20, %v13294_v20  ;;  %v5307_v20 = vmul.f32 %v13319_v41, %v13319_v41  ;;  %v5308_v41 = vmul.f32 %v13344_v18, %v13344_v18 }
 0x5d1   : > { %v13669_v62 = vpop.f32.mrf.mxu2  ;;  %v5309_v18 = vmul.f32 %v13369_v6, %v13369_v6  ;;  %v5310_v6 = vmul.f32 %v13393_v2, %v13393_v2  ;;  %v5311_v2 = vmul.f32 %v13417_v5, %v13417_v5  ;;  %v5312_v5 = vmul.f32 %v13443_v0, %v13443_v0 }
 0x5d2   : > { %9226 = vmatmul.msk.f32.gmra.mxu0 %vm914_vm1, %v13669_v62  ;;  %v5313_v0 = vmul.f32 %v13467_v1, %v13467_v1 }
 0x5d6   : > { %9049 = vmatmul.msk.f32.gmra.mxu2 %vm4711_vm12, %v4626_v36  ;;  %v16496_v36 = vld [vmem:[#allocation28_spill] sm:$0xff] }
 0x5d7   : > { %v13676_v42 = vpop.f32.mrf.mxu0 }
 0x5d8   : > { %16490 = vst [vmem:[#allocation88_spill] sm:$0xff] %v13676_v42 }
 0x5d9   : > { %v13678_v47 = vpop.f32.mrf.mxu2 }
 0x5da   : > { %9227 = vmatmul.msk.f32.gmra.mxu0 %vm914_vm1, %v13678_v47 }
 0x5de   : > { %9050 = vmatmul.msk.f32.gmra.mxu2 %vm4711_vm12, %v4627_v8  ;;  %v16497_v8 = vld [vmem:[#allocation66_spill] sm:$0xff] }
 0x5df   : > { %v13685_v63 = vpop.f32.mrf.mxu0  ;;  %v4630_v56 = vmul.f32 %v16497_v8, %v16496_v36 }
 0x5e0   : > { %16491 = vst [vmem:[#allocation89_spill] sm:$0xff] %v13685_v63 }
 0x5e1   : > { %v13687_v19 = vpop.f32.mrf.mxu2 }
 0x5e2   : > { %9228 = vmatmul.msk.f32.gmra.mxu0 %vm914_vm1, %v13687_v19 }
 0x5e6   : > { %9051 = vmatmul.msk.f32.gmra.mxu2 %vm4711_vm12, %v4628_v59 }
 0x5e7   : > { %v13694_v7 = vpop.f32.mrf.mxu0 }
 0x5e8   : > { %16493 = vst [vmem:[#allocation44_spill] sm:$0xff] %v13694_v7 }
 0x5e9   : > { %v13696_v21 = vpop.f32.mrf.mxu2 }
 0x5ea   : > { %9229 = vmatmul.msk.f32.gmra.mxu0 %vm914_vm1, %v13696_v21 }
 0x5ee   : > { %9052 = vmatmul.msk.f32.gmra.mxu2 %vm4711_vm12, %v4629_v61  ;;  %v4631_v61 = vmul.f32 %v16499_v15, %v13248_v55 }
 0x5ef   : > { %v13703_v60 = vpop.f32.mrf.mxu0 }
 0x5f0   : > { %16495 = vst [vmem:[#allocation46_spill] sm:$0xff] %v13703_v60 }
 0x5f1   : > { %v13705_v22 = vpop.f32.mrf.mxu2 }
 0x5f2   : > { %9230 = vmatmul.msk.f32.gmra.mxu0 %vm914_vm1, %v13705_v22 }
 0x5f6   : > { %9053 = vmatmul.msk.f32.gmra.mxu2 %vm4711_vm12, %v4630_v56  ;;  %v16501_v56 = vld [vmem:[#allocation12_spill] sm:$0xff] }
 0x5f7   : > { %v13712_v59 = vpop.f32.mrf.mxu0  ;;  %v4632_v44 = vmul.f32 %v16502_v28, %v16501_v56 }
 0x5f8   : > { %16498 = vst [vmem:[#allocation28_spill] sm:$0xff] %v13712_v59  ;;  %v5401_v59 = vsel %vm914_vm1, %v5305_v43, 0.0  ;;  %v5406_v43 = vsel %vm914_vm1, %v5306_v29, 0.0  ;;  %v5411_v29 = vsel %vm914_vm1, %v5307_v20, 0.0  ;;  %v5416_v20 = vsel %vm914_vm1, %v5308_v41, 0.0 }
 0x5f9   : > { %v13714_v7 = vpop.f32.mrf.mxu2  ;;  %v5421_v41 = vsel %vm914_vm1, %v5309_v18, 0.0  ;;  %v5426_v18 = vsel %vm914_vm1, %v5310_v6, 0.0  ;;  %v5431_v6 = vsel %vm914_vm1, %v5311_v2, 0.0  ;;  %v5436_v2 = vsel %vm914_vm1, %v5312_v5, 0.0 }
 0x5fa   : > { %9231 = vmatmul.msk.f32.gmra.mxu0 %vm914_vm1, %v13714_v7  ;;  %v5441_v5 = vsel %vm914_vm1, %v5313_v0, 0.0 }
 0x5fe   : > { %9054 = vmatmul.msk.f32.gmra.mxu2 %vm4711_vm12, %v4631_v61 }
 0x5ff   : > { %v13721_v42 = vpop.f32.mrf.mxu0 }
 0x600   : > { %16500 = vst [vmem:[#allocation66_spill] sm:$0xff] %v13721_v42 }
 0x601   : > { %v5113_v8 = vpop.f32.mrf.mxu2 }
 0x602   : > { %v5337_v58 = vmul.f32 %v5113_v8, %v5113_v8  ;;  %9232 = vmatmul.msk.f32.gmra.mxu0 %vm914_vm1, %v5113_v8  ;;  %v16504_v8 = vld [vmem:[#allocation69_spill] sm:$0xff] }
 0x603   : > { %v4633_v28 = vmul.f32 %v16504_v8, %v13302_v16 }
 0x604   : > { %v5402_v63 = vsel %vm914_vm1, %v5337_v58, 0.0 }
 0x605   : > { %v13730_v60 = vadd.f32 %v5402_v63, %v5401_v59 }
 0x606   : > { %9055 = vmatmul.msk.f32.gmra.mxu2 %vm4711_vm12, %v4632_v44 }
 0x607   : > { %v13733_v15 = vpop.f32.mrf.mxu0 }
 0x608   : > { %16503 = vst [vmem:[#allocation67_spill] sm:$0xff] %v13733_v15 }
 0x609   : > { %v5116_v61 = vpop.f32.mrf.mxu2 }
 0x60a   : > { %v5338_v42 = vmul.f32 %v5116_v61, %v5116_v61  ;;  %9233 = vmatmul.msk.f32.gmra.mxu0 %vm914_vm1, %v5116_v61  ;;  %v16506_v61 = vld [vmem:[#allocation30_spill] sm:$0xff] }
 0x60b   : > { %v4634_v8 = vmul.f32 %v16507_v54, %v16506_v61 }
 0x60c   : > { %v5407_v58 = vsel %vm914_vm1, %v5338_v42, 0.0 }
 0x60d   : > { %v13742_v63 = vadd.f32 %v5407_v58, %v5406_v43 }
 0x60e   : > { %9056 = vmatmul.msk.f32.gmra.mxu2 %vm4711_vm12, %v4633_v28 }
 0x60f   : > { %v13745_v44 = vpop.f32.mrf.mxu0 }
 0x610   : > { %16505 = vst [vmem:[#allocation12_spill] sm:$0xff] %v13745_v44 }
 0x611   : > { %v5119_v59 = vpop.f32.mrf.mxu2 }
 0x612   : > { %v5339_v15 = vmul.f32 %v5119_v59, %v5119_v59  ;;  %9234 = vmatmul.msk.f32.gmra.mxu0 %vm914_vm1, %v5119_v59  ;;  %v16509_v59 = vld [vmem:[#allocation24_spill] sm:$0xff] }
 0x613   : > { %v4635_v54 = vmul.f32 %v16510_v26, %v16509_v59 }
 0x614   : > { %v5412_v42 = vsel %vm914_vm1, %v5339_v15, 0.0 }
 0x615   : > { %v13754_v43 = vadd.f32 %v5412_v42, %v5411_v29 }
 0x616   : > { %9057 = vmatmul.msk.f32.gmra.mxu2 %vm4711_vm12, %v4634_v8 }
 0x617   : > { %v13757_v28 = vpop.f32.mrf.mxu0 }
 0x618   : > { %16508 = vst [vmem:[#allocation68_spill] sm:$0xff] %v13757_v28 }
 0x619   : > { %v5122_v58 = vpop.f32.mrf.mxu2 }
 0x61a   : > { %v5340_v44 = vmul.f32 %v5122_v58, %v5122_v58  ;;  %9235 = vmatmul.msk.f32.gmra.mxu0 %vm914_vm1, %v5122_v58  ;;  %v16512_v58 = vld [vmem:[#allocation31_spill] sm:$0xff] }
 0x61b   : > { %v4636_v26 = vmul.f32 %v16513_v17, %v16512_v58 }
 0x61c   : > { %v5417_v15 = vsel %vm914_vm1, %v5340_v44, 0.0 }
 0x61d   : > { %v13766_v29 = vadd.f32 %v5417_v15, %v5416_v20 }
 0x61e   : > { %9058 = vmatmul.msk.f32.gmra.mxu2 %vm4711_vm12, %v4635_v54 }
 0x61f   : > { %v13769_v8 = vpop.f32.mrf.mxu0 }
 0x620   : > { %16511 = vst [vmem:[#allocation69_spill] sm:$0xff] %v13769_v8 }
 0x621   : > { %v5125_v42 = vpop.f32.mrf.mxu2 }
 0x622   : > { %v5341_v28 = vmul.f32 %v5125_v42, %v5125_v42  ;;  %9236 = vmatmul.msk.f32.gmra.mxu0 %vm914_vm1, %v5125_v42  ;;  %v16515_v42 = vld [vmem:[#allocation14_spill] sm:$0xff] }
 0x623   : > { %v4637_v17 = vmul.f32 %v16516_v32, %v16515_v42 }
 0x624   : > { %v5422_v44 = vsel %vm914_vm1, %v5341_v28, 0.0 }
 0x625   : > { %v13778_v20 = vadd.f32 %v5422_v44, %v5421_v41 }
 0x626   : > { %9059 = vmatmul.msk.f32.gmra.mxu2 %vm4711_vm12, %v4636_v26 }
 0x627   : > { %v13781_v54 = vpop.f32.mrf.mxu0 }
 0x628   : > { %16514 = vst [vmem:[#allocation30_spill] sm:$0xff] %v13781_v54 }
 0x629   : > { %v5128_v15 = vpop.f32.mrf.mxu2 }
 0x62a   : > { %v5342_v8 = vmul.f32 %v5128_v15, %v5128_v15  ;;  %9237 = vmatmul.msk.f32.gmra.mxu0 %vm914_vm1, %v5128_v15  ;;  %v16518_v15 = vld [vmem:[#allocation33_spill] sm:$0xff] }
 0x62b   : > { %v4638_v32 = vmul.f32 %v16519_v13, %v16518_v15 }
 0x62c   : > { %v5427_v28 = vsel %vm914_vm1, %v5342_v8, 0.0 }
 0x62d   : > { %v13790_v41 = vadd.f32 %v5427_v28, %v5426_v18 }
 0x62e   : > { %9060 = vmatmul.msk.f32.gmra.mxu2 %vm4711_vm12, %v4637_v17 }
 0x62f   : > { %v13793_v26 = vpop.f32.mrf.mxu0 }
 0x630   : > { %16517 = vst [vmem:[#allocation70_spill] sm:$0xff] %v13793_v26 }
 0x631   : > { %v5131_v44 = vpop.f32.mrf.mxu2 }
 0x632   : > { %v5343_v54 = vmul.f32 %v5131_v44, %v5131_v44  ;;  %9238 = vmatmul.msk.f32.gmra.mxu0 %vm914_vm1, %v5131_v44  ;;  %v16521_v44 = vld [vmem:[#allocation6_spill] sm:$0xff] }
 0x633   : > { %v4639_v13 = vmul.f32 %v16521_v44, %v13449_v33 }
 0x634   : > { %v5432_v8 = vsel %vm914_vm1, %v5343_v54, 0.0 }
 0x635   : > { %v13802_v18 = vadd.f32 %v5432_v8, %v5431_v6 }
 0x636   : > { %9061 = vmatmul.msk.f32.gmra.mxu2 %vm4711_vm12, %v4638_v32 }
 0x637   : > { %v13805_v17 = vpop.f32.mrf.mxu0 }
 0x638   : > { %16520 = vst [vmem:[#allocation24_spill] sm:$0xff] %v13805_v17 }
 0x639   : > { %v5134_v28 = vpop.f32.mrf.mxu2 }
 0x63a   : > { %v5344_v26 = vmul.f32 %v5134_v28, %v5134_v28  ;;  %9239 = vmatmul.msk.f32.gmra.mxu0 %vm914_vm1, %v5134_v28  ;;  %v16524_v28 = vld [vmem:[#allocation27_spill] sm:$0xff] }
 0x63b   : > { %v4640_v44 = vmul.f32 %v16525_v25, %v16524_v28  ;;  %v16534_v28 = vld [vmem:[#allocation9_spill] sm:$0xff] }
 0x63c   : > { %v5437_v54 = vsel %vm914_vm1, %v5344_v26, 0.0 }
 0x63d   : > { %v13814_v6 = vadd.f32 %v5437_v54, %v5436_v2  ;;  %v16528_v54 = vld [vmem:[#allocation35_spill] sm:$0xff] }
 0x63e   : > { %9062 = vmatmul.msk.f32.gmra.mxu2 %vm4711_vm12, %v4639_v13  ;;  %v5314_v1 = vmul.f32 %v16528_v54, %v16528_v54 }
 0x63f   : > { %16522 = vst [vmem:[#allocation71_spill] sm:$0xff] %v13814_v6  ;;  %v13817_v32 = vpop.f32.mrf.mxu0  ;;  %v16530_v6 = vld [vmem:[#allocation8_spill] sm:$0xff] }
 0x640   : > { %16523 = vst [vmem:[#allocation31_spill] sm:$0xff] %v13817_v32  ;;  %v5446_v0 = vsel %vm914_vm1, %v5314_v1, 0.0 }
 0x641   : > { %v5137_v8 = vpop.f32.mrf.mxu2 }
 0x642   : > { %v5345_v17 = vmul.f32 %v5137_v8, %v5137_v8  ;;  %9240 = vmatmul.msk.f32.gmra.mxu0 %vm914_vm1, %v5137_v8  ;;  %v16529_v8 = vld [vmem:[#allocation37_spill] sm:$0xff] }
 0x643   : > { %v4641_v25 = vmul.f32 %v16530_v6, %v16529_v8 }
 0x644   : > { %v5442_v26 = vsel %vm914_vm1, %v5345_v17, 0.0 }
 0x645   : > { %v13826_v2 = vadd.f32 %v5442_v26, %v5441_v5  ;;  %v16532_v26 = vld [vmem:[#allocation39_spill] sm:$0xff] }
 0x646   : > { %9063 = vmatmul.msk.f32.gmra.mxu2 %vm4711_vm12, %v4640_v44  ;;  %v5315_v54 = vmul.f32 %v16532_v26, %v16532_v26 }
 0x647   : > { %16526 = vst [vmem:[#allocation72_spill] sm:$0xff] %v13826_v2  ;;  %v13829_v13 = vpop.f32.mrf.mxu0 }
 0x648   : > { %16527 = vst [vmem:[#allocation14_spill] sm:$0xff] %v13829_v13  ;;  %v5451_v1 = vsel %vm914_vm1, %v5315_v54, 0.0 }
 0x649   : > { %v5140_v32 = vpop.f32.mrf.mxu2 }
 0x64a   : > { %v5346_v9 = vmul.f32 %v5140_v32, %v5140_v32  ;;  %9241 = vmatmul.msk.f32.gmra.mxu0 %vm914_vm1, %v5140_v32  ;;  %v16533_v32 = vld [vmem:[#allocation41_spill] sm:$0xff] }
 0x64b   : > { %v4642_v6 = vmul.f32 %v16534_v28, %v16533_v32 }
 0x64c   : > { %v5447_v17 = vsel %vm914_vm1, %v5346_v9, 0.0 }
 0x64d   : > { %v13838_v5 = vadd.f32 %v5447_v17, %v5446_v0  ;;  %v5316_v17 = vmul.f32 %v13526_v30, %v13526_v30  ;;  %v5317_v30 = vmul.f32 %v13538_v10, %v13538_v10  ;;  %v5318_v10 = vmul.f32 %v13549_v24, %v13549_v24 }
 0x64e   : > { %9064 = vmatmul.msk.f32.gmra.mxu2 %vm4711_vm12, %v4641_v25  ;;  %v5319_v24 = vmul.f32 %v13561_v11, %v13561_v11  ;;  %v5320_v11 = vmul.f32 %v13570_v31, %v13570_v31 }
 0x64f   : > { %v13841_v44 = vpop.f32.mrf.mxu0  ;;  %v5456_v54 = vsel %vm914_vm1, %v5316_v17, 0.0  ;;  %v5461_v17 = vsel %vm914_vm1, %v5317_v30, 0.0  ;;  %v16540_v30 = vld [vmem:[#allocation81_spill] sm:$0xff] }
 0x650   : > { %16531 = vst [vmem:[#allocation73_spill] sm:$0xff] %v13841_v44 }
 0x651   : > { %v5143_v13 = vpop.f32.mrf.mxu2 }
 0x652   : > { %v5347_v2 = vmul.f32 %v5143_v13, %v5143_v13  ;;  %9242 = vmatmul.msk.f32.gmra.mxu0 %vm914_vm1, %v5143_v13  ;;  %v16536_v13 = vld [vmem:[#allocation13_spill] sm:$0xff] }
 0x653   : > { %v4643_v28 = vmul.f32 %v16536_v13, %v13530_v27 }
 0x654   : > { %v5452_v9 = vsel %vm914_vm1, %v5347_v2, 0.0 }
 0x655   : > { %v13850_v0 = vadd.f32 %v5452_v9, %v5451_v1 }
 0x656   : > { %9065 = vmatmul.msk.f32.gmra.mxu2 %vm4711_vm12, %v4642_v6 }
 0x657   : > { %v13853_v25 = vpop.f32.mrf.mxu0 }
 0x658   : > { %16535 = vst [vmem:[#allocation33_spill] sm:$0xff] %v13853_v25 }
 0x659   : > { %v5146_v26 = vpop.f32.mrf.mxu2 }
 0x65a   : > { %v5348_v44 = vmul.f32 %v5146_v26, %v5146_v26  ;;  %9243 = vmatmul.msk.f32.gmra.mxu0 %vm914_vm1, %v5146_v26  ;;  %v16538_v26 = vld [vmem:[#allocation15_spill] sm:$0xff] }
 0x65b   : > { %v4644_v13 = vmul.f32 %v16538_v26, %v13542_v53 }
 0x65c   : > { %v5457_v2 = vsel %vm914_vm1, %v5348_v44, 0.0 }
 0x65d   : > { %v13862_v1 = vadd.f32 %v5457_v2, %v5456_v54 }
 0x65e   : > { %9066 = vmatmul.msk.f32.gmra.mxu2 %vm4711_vm12, %v4643_v28 }
 0x65f   : > { %v13865_v6 = vpop.f32.mrf.mxu0 }
 0x660   : > { %16537 = vst [vmem:[#allocation75_spill] sm:$0xff] %v13865_v6 }
 0x661   : > { %v5149_v9 = vpop.f32.mrf.mxu2 }
 0x662   : > { %v5349_v25 = vmul.f32 %v5149_v9, %v5149_v9  ;;  %9244 = vmatmul.msk.f32.gmra.mxu0 %vm914_vm1, %v5149_v9  ;;  %v5466_v9 = vsel %vm914_vm1, %v5318_v10, 0.0  ;;  %v5471_v10 = vsel %vm914_vm1, %v5319_v24, 0.0  ;;  %v5476_v24 = vsel %vm914_vm1, %v5320_v11, 0.0 }
 0x664   : > { %v5462_v44 = vsel %vm914_vm1, %v5349_v25, 0.0  ;;  %v4645_v25 = vmul.f32 %v16540_v30, %v13551_v3 }
 0x665   : > { %v13874_v54 = vadd.f32 %v5462_v44, %v5461_v17 }
 0x666   : > { %9067 = vmatmul.msk.f32.gmra.mxu2 %vm4711_vm12, %v4644_v13 }
 0x667   : > { %v13877_v28 = vpop.f32.mrf.mxu0 }
 0x668   : > { %16539 = vst [vmem:[#allocation6_spill] sm:$0xff] %v13877_v28 }
 0x669   : > { %v5152_v2 = vpop.f32.mrf.mxu2 }
 0x66a   : > { %v5350_v6 = vmul.f32 %v5152_v2, %v5152_v2  ;;  %9245 = vmatmul.msk.f32.gmra.mxu0 %vm914_vm1, %v5152_v2  ;;  %v16542_v2 = vld [vmem:[#allocation59_spill] sm:$0xff] }
 0x66b   : > { %v4646_v30 = vmul.f32 %v16542_v2, %v13563_v34  ;;  %v16544_v2 = vld [vmem:[#allocation19_spill] sm:$0xff] }
 0x66c   : > { %v5467_v26 = vsel %vm914_vm1, %v5350_v6, 0.0 }
 0x66d   : > { %v13886_v17 = vadd.f32 %v5467_v26, %v5466_v9 }
 0x66e   : > { %9068 = vmatmul.msk.f32.gmra.mxu2 %vm4711_vm12, %v4645_v25 }
 0x66f   : > { %v13889_v13 = vpop.f32.mrf.mxu0 }
 0x670   : > { %16541 = vst [vmem:[#allocation78_spill] sm:$0xff] %v13889_v13 }
 0x671   : > { %v5155_v44 = vpop.f32.mrf.mxu2 }
 0x672   : > { %v5351_v28 = vmul.f32 %v5155_v44, %v5155_v44  ;;  %9246 = vmatmul.msk.f32.gmra.mxu0 %vm914_vm1, %v5155_v44 }
 0x674   : > { %v5472_v6 = vsel %vm914_vm1, %v5351_v28, 0.0 }
 0x675   : > { %v13898_v9 = vadd.f32 %v5472_v6, %v5471_v10  ;;  %v5321_v6 = vmul.f32 %v13579_v51, %v13579_v51 }
 0x676   : > { %9069 = vmatmul.msk.f32.gmra.mxu2 %vm4711_vm12, %v4646_v30 }
 0x677   : > { %v13901_v26 = vpop.f32.mrf.mxu0 }
 0x678   : > { %16543 = vst [vmem:[#allocation35_spill] sm:$0xff] %v13901_v26 }
 0x679   : > { %v5158_v25 = vpop.f32.mrf.mxu2 }
 0x67a   : > { %v5352_v13 = vmul.f32 %v5158_v25, %v5158_v25  ;;  %9247 = vmatmul.msk.f32.gmra.mxu0 %vm914_vm1, %v5158_v25  ;;  %v5481_v25 = vsel %vm914_vm1, %v5321_v6, 0.0 }
 0x67c   : > { %v5477_v28 = vsel %vm914_vm1, %v5352_v13, 0.0  ;;  %v16546_v13 = vld [vmem:[#allocation62_spill] sm:$0xff] }
 0x67d   : > { %v13908_v44 = vadd.f32 %v5477_v28, %v5476_v24  ;;  %v5322_v28 = vmul.f32 %v13588_v39, %v13588_v39 }
 0x67e   : > { %9070 = vmatmul.msk.f32.gmra.mxu2 %vm4711_vm12, %v16544_v2 }
 0x67f   : > { %v13912_v10 = vpop.f32.mrf.mxu0 }
 0x680   : > { %16545 = vst [vmem:[#allocation37_spill] sm:$0xff] %v13912_v10  ;;  %v4511_v10 = vpop.f32.mrf.mxu3 }
 0x681   : > { %v5161_v30 = vpop.f32.mrf.mxu2 }
 0x682   : > { %v5353_v31 = vmul.f32 %v5161_v30, %v5161_v30  ;;  %9248 = vmatmul.msk.f32.gmra.mxu0 %vm914_vm1, %v5161_v30  ;;  %v5486_v30 = vsel %vm914_vm1, %v5322_v28, 0.0 }
 0x684   : > { %v5482_v11 = vsel %vm914_vm1, %v5353_v31, 0.0 }
 0x685   : > { %v13919_v26 = vadd.f32 %v5482_v11, %v5481_v25  ;;  %v16549_v25 = vld [vmem:[#allocation63_spill] sm:$0xff] }
 0x686   : > { %9071 = vmatmul.msk.f32.gmra.mxu2 %vm4711_vm12, %v16546_v13  ;;  %v5323_v13 = vmul.f32 %v13597_v45, %v13597_v45 }
 0x687   : > { %v13923_v24 = vpop.f32.mrf.mxu0 }
 0x688   : > { %16547 = vst [vmem:[#allocation8_spill] sm:$0xff] %v13923_v24 }
 0x689   : > { %v5164_v2 = vpop.f32.mrf.mxu2 }
 0x68a   : > { %v5354_v51 = vmul.f32 %v5164_v2, %v5164_v2  ;;  %9249 = vmatmul.msk.f32.gmra.mxu0 %vm914_vm1, %v5164_v2  ;;  %v5491_v2 = vsel %vm914_vm1, %v5323_v13, 0.0 }
 0x68c   : > { %v5487_v6 = vsel %vm914_vm1, %v5354_v51, 0.0 }
 0x68d   : > { %v13930_v31 = vadd.f32 %v5487_v6, %v5486_v30  ;;  %v16552_v30 = vld [vmem:[#allocation65_spill] sm:$0xff]  ;;  %v4514_v6 = vpop.f32.mrf.mxu3 }
 0x68e   : > { %9072 = vmatmul.msk.f32.gmra.mxu2 %vm4711_vm12, %v16549_v25 }
 0x68f   : > { %16548 = vst [vmem:[#allocation39_spill] sm:$0xff] %v13930_v31  ;;  %v13934_v11 = vpop.f32.mrf.mxu0 }
 0x690   : > { %16550 = vst [vmem:[#allocation41_spill] sm:$0xff] %v13934_v11  ;;  %v5324_v11 = vmul.f32 %v13606_v4, %v13606_v4 }
 0x691   : > { %v5167_v39 = vpop.f32.mrf.mxu2 }
 0x692   : > { %v5355_v24 = vmul.f32 %v5167_v39, %v5167_v39  ;;  %9250 = vmatmul.msk.f32.gmra.mxu0 %vm914_vm1, %v5167_v39  ;;  %v5496_v39 = vsel %vm914_vm1, %v5324_v11, 0.0 }
 0x694   : > { %v5492_v28 = vsel %vm914_vm1, %v5355_v24, 0.0 }
 0x695   : > { %v13941_v51 = vadd.f32 %v5492_v28, %v5491_v2  ;;  %v16555_v2 = vld [vmem:[#allocation25_spill] sm:$0xff] }
 0x696   : > { %9073 = vmatmul.msk.f32.gmra.mxu2 %vm4711_vm12, %v16552_v30  ;;  %v5325_v30 = vmul.f32 %v13615_v37, %v13615_v37 }
 0x697   : > { %16551 = vst [vmem:[#allocation9_spill] sm:$0xff] %v13941_v51  ;;  %v13945_v25 = vpop.f32.mrf.mxu0 }
 0x698   : > { %16553 = vst [vmem:[#allocation13_spill] sm:$0xff] %v13945_v25  ;;  %v4517_v25 = vpop.f32.mrf.mxu3 }
 0x699   : > { %v5170_v45 = vpop.f32.mrf.mxu2 }
 0x69a   : > { %v5356_v31 = vmul.f32 %v5170_v45, %v5170_v45  ;;  %9251 = vmatmul.msk.f32.gmra.mxu0 %vm914_vm1, %v5170_v45  ;;  %v5501_v45 = vsel %vm914_vm1, %v5325_v30, 0.0 }
 0x69c   : > { %v5497_v13 = vsel %vm914_vm1, %v5356_v31, 0.0 }
 0x69d   : > { %v13952_v24 = vadd.f32 %v5497_v13, %v5496_v39  ;;  %v16558_v39 = vld [vmem:[#allocation36_spill] sm:$0xff] }
 0x69e   : > { %9074 = vmatmul.msk.f32.gmra.mxu2 %vm4711_vm12, %v16555_v2  ;;  %v5326_v2 = vmul.f32 %v13624_v12, %v13624_v12 }
 0x69f   : > { %16554 = vst [vmem:[#allocation15_spill] sm:$0xff] %v13952_v24  ;;  %v13956_v28 = vpop.f32.mrf.mxu0 }
 0x6a0   : > { %16556 = vst [vmem:[#allocation81_spill] sm:$0xff] %v13956_v28  ;;  %v4520_v24 = vpop.f32.mrf.mxu3 }
 0x6a1   : > { %v5173_v4 = vpop.f32.mrf.mxu2 }
 0x6a2   : > { %v5357_v51 = vmul.f32 %v5173_v4, %v5173_v4  ;;  %9252 = vmatmul.msk.f32.gmra.mxu0 %vm914_vm1, %v5173_v4  ;;  %v5506_v4 = vsel %vm914_vm1, %v5326_v2, 0.0 }
 0x6a4   : > { %v5502_v11 = vsel %vm914_vm1, %v5357_v51, 0.0 }
 0x6a5   : > { %v13963_v31 = vadd.f32 %v5502_v11, %v5501_v45  ;;  %v16560_v45 = vld [vmem:[#allocation26_spill] sm:$0xff]  ;;  %v5327_v11 = vmul.f32 %v13633_v14, %v13633_v14 }
 0x6a6   : > { %9075 = vmatmul.msk.f32.gmra.mxu2 %vm4711_vm12, %v16558_v39 }
 0x6a7   : > { %16557 = vst [vmem:[#allocation59_spill] sm:$0xff] %v13963_v31  ;;  %v13967_v13 = vpop.f32.mrf.mxu0 }
 0x6a8   : > { %16559 = vst [vmem:[#allocation19_spill] sm:$0xff] %v13967_v13  ;;  %v4523_v31 = vpop.f32.mrf.mxu3 }
 0x6a9   : > { %v5176_v37 = vpop.f32.mrf.mxu2 }
 0x6aa   : > { %v5358_v28 = vmul.f32 %v5176_v37, %v5176_v37  ;;  %9253 = vmatmul.msk.f32.gmra.mxu0 %vm914_vm1, %v5176_v37  ;;  %v5511_v37 = vsel %vm914_vm1, %v5327_v11, 0.0 }
 0x6ac   : > { %v5507_v30 = vsel %vm914_vm1, %v5358_v28, 0.0 }
 0x6ad   : > { %v13974_v51 = vadd.f32 %v5507_v30, %v5506_v4  ;;  %v16563_v4 = vld [vmem:[#allocation10_spill] sm:$0xff]  ;;  %v5328_v30 = vmul.f32 %v13642_v40, %v13642_v40  ;;  %v5329_v40 = vmul.f32 %v13651_v38, %v13651_v38 }
 0x6ae   : > { %9076 = vmatmul.msk.f32.gmra.mxu2 %vm4711_vm12, %v16560_v45 }
 0x6af   : > { %v13980_v39 = vpop.f32.mrf.mxu0  ;;  %v5516_v11 = vsel %vm914_vm1, %v5328_v30, 0.0 }
 0x6b0   : > { %16561 = vst [vmem:[#allocation62_spill] sm:$0xff] %v13980_v39 }
 0x6b1   : > { %v5179_v12 = vpop.f32.mrf.mxu2 }
 0x6b2   : > { %v5359_v13 = vmul.f32 %v5179_v12, %v5179_v12  ;;  %9254 = vmatmul.msk.f32.gmra.mxu0 %vm914_vm1, %v5179_v12  ;;  %v4655_v12 = vmul.f32 %v4511_v10, %v13045_v52  ;;  %v5521_v52 = vsel %vm914_vm1, %v5329_v40, 0.0 }
 0x6b4   : > { %v5512_v2 = vsel %vm914_vm1, %v5359_v13, 0.0 }
 0x6b5   : > { %v13985_v28 = vadd.f32 %v5512_v2, %v5511_v37  ;;  %v4526_v2 = vpop.f32.mrf.mxu3 }
 0x6b6   : > { %9077 = vmatmul.msk.f32.gmra.mxu2 %vm4711_vm12, %v16563_v4 }
 0x6b7   : > { %16562 = vst [vmem:[#allocation63_spill] sm:$0xff] %v13985_v28  ;;  %v13991_v45 = vpop.f32.mrf.mxu0 }
 0x6b9   : > { %v5182_v14 = vpop.f32.mrf.mxu2 }
 0x6ba   : > { %v5360_v39 = vmul.f32 %v5182_v14, %v5182_v14  ;;  %9255 = vmatmul.msk.f32.gmra.mxu0 %vm914_vm1, %v5182_v14  ;;  %v4656_v14 = vmul.f32 %v4514_v6, %v13070_v50  ;;  %v4657_v50 = vmul.f32 %v4517_v25, %v13093_v35  ;;  %v4658_v35 = vmul.f32 %v4520_v24, %v13118_v49 }
 0x6bc   : > { %v5517_v13 = vsel %vm914_vm1, %v5360_v39, 0.0 }
 0x6bd   : > { %v13997_v37 = vadd.f32 %v5517_v13, %v5516_v11  ;;  %v4529_v38 = vpop.f32.mrf.mxu3 }
 0x6be   : > { %9078 = vmatmul.msk.f32.gmra.mxu2 %vm4711_vm12, %v4655_v12  ;;  %v5330_v12 = vmul.f32 %v13660_v48, %v13660_v48  ;;  %v5331_v48 = vmul.f32 %v13669_v62, %v13669_v62 }
 0x6bf   : > { %v14005_v10 = vpop.f32.mrf.mxu0 }
 0x6c0   : > { %v5526_v6 = vsel %vm914_vm1, %v5330_v12, 0.0  ;;  %v5531_v25 = vsel %vm914_vm1, %v5331_v48, 0.0 }
 0x6c1   : > { %v5185_v4 = vpop.f32.mrf.mxu2 }
 0x6c2   : > { %v5361_v28 = vmul.f32 %v5185_v4, %v5185_v4  ;;  %9256 = vmatmul.msk.f32.gmra.mxu0 %vm914_vm1, %v5185_v4 }
 0x6c4   : > { %v5522_v39 = vsel %vm914_vm1, %v5361_v28, 0.0 }
 0x6c5   : > { %v14008_v30 = vadd.f32 %v5522_v39, %v5521_v52  ;;  %v4532_v39 = vpop.f32.mrf.mxu3 }
 0x6c6   : > { %9079 = vmatmul.msk.f32.gmra.mxu2 %vm4711_vm12, %v4656_v14 }
 0x6c7   : > { %v14019_v28 = vpop.f32.mrf.mxu0 }
 0x6c9   : > { %v5188_v11 = vpop.f32.mrf.mxu2 }
 0x6ca   : > { %v5362_v13 = vmul.f32 %v5188_v11, %v5188_v11  ;;  %9257 = vmatmul.msk.f32.gmra.mxu0 %vm914_vm1, %v5188_v11 }
 0x6cc   : > { %v5527_v40 = vsel %vm914_vm1, %v5362_v13, 0.0  ;;  %v5332_v13 = vmul.f32 %v13678_v47, %v13678_v47  ;;  %v5333_v47 = vmul.f32 %v13687_v19, %v13687_v19  ;;  %v5334_v19 = vmul.f32 %v13696_v21, %v13696_v21 }
 0x6cd   : > { %v14017_v4 = vadd.f32 %v5527_v40, %v5526_v6  ;;  %v4659_v40 = vmul.f32 %v4523_v31, %v13143_v57  ;;  %v4535_v48 = vpop.f32.mrf.mxu3  ;;  %v4660_v57 = vmul.f32 %v4526_v2, %v13168_v23 }
 0x6ce   : > { %9080 = vmatmul.msk.f32.gmra.mxu2 %vm4711_vm12, %v4657_v50  ;;  %v5536_v49 = vsel %vm914_vm1, %v5332_v13, 0.0  ;;  %v5541_v31 = vsel %vm914_vm1, %v5333_v47, 0.0  ;;  %v5546_v23 = vsel %vm914_vm1, %v5334_v19, 0.0 }
 0x6cf   : > { %v14033_v50 = vpop.f32.mrf.mxu0 }
 0x6d1   : > { %v5191_v14 = vpop.f32.mrf.mxu2 }
 0x6d2   : > { %v5363_v52 = vmul.f32 %v5191_v14, %v5191_v14  ;;  %9258 = vmatmul.msk.f32.gmra.mxu0 %vm914_vm1, %v5191_v14 }
 0x6d4   : > { %v5532_v12 = vsel %vm914_vm1, %v5363_v52, 0.0 }
 0x6d5   : > { %v14028_v11 = vadd.f32 %v5532_v12, %v5531_v25 }
 0x6d6   : > { %9081 = vmatmul.msk.f32.gmra.mxu2 %vm4711_vm12, %v4658_v35 }
 0x6d7   : > { %v14044_v35 = vpop.f32.mrf.mxu0 }
 0x6d9   : > { %v5194_v62 = vpop.f32.mrf.mxu2 }
 0x6da   : > { %v5364_v6 = vmul.f32 %v5194_v62, %v5194_v62  ;;  %9259 = vmatmul.msk.f32.gmra.mxu0 %vm914_vm1, %v5194_v62  ;;  %v4538_v62 = vpop.f32.mrf.mxu3 }
 0x6dc   : > { %v5537_v24 = vsel %vm914_vm1, %v5364_v6, 0.0 }
 0x6dd   : > { %v14039_v14 = vadd.f32 %v5537_v24, %v5536_v49  ;;  %v4661_v49 = vmul.f32 %v4529_v38, %v13193_v46  ;;  %v4662_v46 = vmul.f32 %v4532_v39, %v16496_v36 }
 0x6de   : > { %9082 = vmatmul.msk.f32.gmra.mxu2 %vm4711_vm12, %v4659_v40 }
 0x6df   : > { %v14058_v2 = vpop.f32.mrf.mxu0 }
 0x6e1   : > { %v5197_v52 = vpop.f32.mrf.mxu2 }
 0x6e2   : > { %v5365_v25 = vmul.f32 %v5197_v52, %v5197_v52  ;;  %9260 = vmatmul.msk.f32.gmra.mxu0 %vm914_vm1, %v5197_v52  ;;  %v5335_v52 = vmul.f32 %v13705_v22, %v13705_v22  ;;  %v4541_v21 = vpop.f32.mrf.mxu3 }
 0x6e4   : > { %v5542_v12 = vsel %vm914_vm1, %v5365_v25, 0.0  ;;  %v5551_v38 = vsel %vm914_vm1, %v5335_v52, 0.0 }
 0x6e5   : > { %v14050_v13 = vadd.f32 %v5542_v12, %v5541_v31 }
 0x6e6   : > { %9083 = vmatmul.msk.f32.gmra.mxu2 %vm4711_vm12, %v4660_v57 }
 0x6e7   : > { %v14072_v19 = vpop.f32.mrf.mxu0 }
 0x6e9   : > { %v5200_v6 = vpop.f32.mrf.mxu2 }
 0x6ea   : > { %v5366_v40 = vmul.f32 %v5200_v6, %v5200_v6  ;;  %9261 = vmatmul.msk.f32.gmra.mxu0 %vm914_vm1, %v5200_v6  ;;  %v4544_v22 = vpop.f32.mrf.mxu3 }
 0x6ec   : > { %v5547_v24 = vsel %vm914_vm1, %v5366_v40, 0.0  ;;  %v4663_v40 = vmul.f32 %v4535_v48, %v13248_v55 }
 0x6ed   : > { %v14061_v47 = vadd.f32 %v5547_v24, %v5546_v23  ;;  %v4664_v23 = vmul.f32 %v4538_v62, %v16501_v56 }
 0x6ee   : > { %9084 = vmatmul.msk.f32.gmra.mxu2 %vm4711_vm12, %v4661_v49 }
 0x6ef   : > { %v14081_v36 = vpop.f32.mrf.mxu0 }
 0x6f1   : > { %v5203_v25 = vpop.f32.mrf.mxu2 }
 0x6f2   : > { %v5367_v57 = vmul.f32 %v5203_v25, %v5203_v25  ;;  %9262 = vmatmul.msk.f32.gmra.mxu0 %vm914_vm1, %v5203_v25  ;;  %v4547_v52 = vpop.f32.mrf.mxu3 }
 0x6f4   : > { %v5552_v31 = vsel %vm914_vm1, %v5367_v57, 0.0 }
 0x6f5   : > { %v14070_v12 = vadd.f32 %v5552_v31, %v5551_v38 }
 0x6f6   : > { %9085 = vmatmul.msk.f32.gmra.mxu2 %vm4711_vm12, %v4662_v46  ;;  %v4665_v46 = vmul.f32 %v4541_v21, %v13302_v16 }
 0x6f7   : > { %v14088_v55 = vpop.f32.mrf.mxu0 }
 0x6f8   : > { %16564 = vst [vmem:[#allocation65_spill] sm:$0xff] %v14088_v55 }
 0x6f9   : > { %v14075_v6 = vpop.f32.mrf.mxu2 }
 0x6fa   : > { %9263 = vmatmul.msk.f32.gmra.mxu0 %vm914_vm1, %v14075_v6 }
 0x6fe   : > { %9086 = vmatmul.msk.f32.gmra.mxu2 %vm4711_vm12, %v4663_v40 }
 0x701   : > { %v5209_v39 = vpop.f32.mrf.mxu2 }
 0x702   : > { %v5369_v49 = vmul.f32 %v5209_v39, %v5209_v39  ;;  %9264 = vmatmul.msk.f32.gmra.mxu0 %vm914_vm1, %v5209_v39 }
 0x704   : > { %v5404_v24 = vsel %vm914_vm1, %v5369_v49, 0.0 }
 0x705   : > { %v5405_v25 = vadd.f32 %v5404_v24, %v13730_v60  ;;  %v4550_v60 = vpop.f32.mrf.mxu3  ;;  %v4666_v24 = vmul.f32 %v4544_v22, %v16506_v61 }
 0x706   : > { %9087 = vmatmul.msk.f32.gmra.mxu2 %vm4711_vm12, %v4664_v23 }
 0x707   : > { %10012 = vrsqrt.f32 %v5405_v25  ;;  %vm5568_vm15 = vcmp.eq.f32.partialorder %v5405_v25, inf  ;;  %v5571_v61 = vand.u32 2147483648, %v5405_v25  ;;  %vm5570_vm2 = vcmp.eq.f32.partialorder %v5405_v25, 0.0 }
 0x709   : > { %v5212_v57 = vpop.f32.mrf.mxu2 }
 0x70a   : > { %v5370_v48 = vmul.f32 %v5212_v57, %v5212_v57  ;;  %9265 = vmatmul.msk.f32.gmra.mxu0 %vm914_vm1, %v5212_v57  ;;  %v14097_v57 = vpop.f32.mrf.mxu0 }
 0x70b   : > { %16565 = vst [vmem:[#allocation25_spill] sm:$0xff] %v14097_v57 }
 0x70c   : > { %v5409_v38 = vsel %vm914_vm1, %v5370_v48, 0.0 }
 0x70d   : > { %v10013_v31 = vpop.eup %10012  ;;  %v5410_v56 = vadd.f32 %v5409_v38, %v13742_v63 }
 0x70e   : > { %9088 = vmatmul.msk.f32.gmra.mxu2 %vm4711_vm12, %v4665_v46  ;;  %v5562_v62 = vmul.f32 %v10013_v31, %v5405_v25 }
 0x70f   : > { %10014 = vrsqrt.f32 %v5410_v56  ;;  %vm5580_vm3 = vcmp.eq.f32.partialorder %v5410_v56, inf  ;;  %vm5582_vm4 = vcmp.eq.f32.partialorder %v5410_v56, 0.0 }
 0x710   : > { %v5563_v40 = vmul.f32 %v10013_v31, %v5562_v62 }
 0x711   : > { %v5215_v39 = vpop.f32.mrf.mxu2 }
 0x712   : > { %v5371_v49 = vmul.f32 %v5215_v39, %v5215_v39  ;;  %9266 = vmatmul.msk.f32.gmra.mxu0 %vm914_vm1, %v5215_v39  ;;  %v5564_v23 = vmul.f32 0.5, %v5563_v40  ;;  %v4553_v40 = vpop.f32.mrf.mxu3 }
 0x714   : > { %v5414_v16 = vsel %vm914_vm1, %v5371_v49, 0.0  ;;  %v5565_v21 = vsub.f32 1.5, %v5564_v23 }
 0x715   : > { %v10015_v48 = vpop.eup %10014  ;;  %v14101_v63 = vadd.f32 %v5414_v16, %v13754_v43  ;;  %v4667_v16 = vmul.f32 %v4547_v52, %v16509_v59 }
 0x716   : > { %9089 = vmatmul.msk.f32.gmra.mxu2 %vm4711_vm12, %v4666_v24  ;;  %v5566_v46 = vmul.f32 %v10013_v31, %v5565_v21  ;;  %v5574_v38 = vmul.f32 %v10015_v48, %v5410_v56 }
 0x717   : > { %10016 = vrsqrt.f32 %v14101_v63  ;;  %vm5592_vm5 = vcmp.eq.f32.partialorder %v14101_v63, inf  ;;  %vm5594_vm7 = vcmp.eq.f32.partialorder %v14101_v63, 0.0 }
 0x718   : > { %v5567_v62 = vmul.f32 %v5566_v46, %v5405_v25  ;;  %v5575_v39 = vmul.f32 %v10015_v48, %v5574_v38  ;;  %v14111_v38 = vpop.f32.mrf.mxu0 }
 0x719   : > { %v5218_v55 = vpop.f32.mrf.mxu2  ;;  %16566 = vst [vmem:[#allocation36_spill] sm:$0xff] %v14111_v38 }
 0x71a   : > { %v5372_v22 = vmul.f32 %v5218_v55, %v5218_v55  ;;  %9267 = vmatmul.msk.f32.gmra.mxu0 %vm914_vm1, %v5218_v55  ;;  %v5569_v49 = vsel %vm5568_vm15, %v5405_v25, %v5567_v62  ;;  %v5576_v23 = vmul.f32 0.5, %v5575_v39  ;;  %v5583_v39 = vand.u32 2147483648, %v5410_v56 }
 0x71b   : > { %v5572_v43 = vsel %vm5570_vm2, %v5571_v61, %v5569_v49  ;;  %v4556_v49 = vpop.f32.mrf.mxu3 }
 0x71c   : > { %v5419_v31 = vsel %vm914_vm1, %v5372_v22, 0.0  ;;  %v5945_v24 = vadd.f32 1e-08, %v5572_v43  ;;  %v5577_v21 = vsub.f32 1.5, %v5576_v23  ;;  %v4668_v43 = vmul.f32 %v4550_v60, %v16512_v58 }
 0x71d   : > { %v10017_v57 = vpop.eup %10016  ;;  %v14109_v46 = vadd.f32 %v5419_v31, %v13766_v29 }
 0x71e   : > { %9090 = vmatmul.msk.f32.gmra.mxu2 %vm4711_vm12, %v4667_v16  ;;  %6009 = vrot.lane.b32.xlu2 %v5945_v24, %s10281_s13  ;;  %v5578_v25 = vmul.f32 %v10015_v48, %v5577_v21  ;;  %v5586_v55 = vmul.f32 %v10017_v57, %v14101_v63 }
 0x71f   : > { %10018 = vrsqrt.f32 %v14109_v46  ;;  %vm5604_vm8 = vcmp.eq.f32.partialorder %v14109_v46, inf  ;;  %vm5606_vm9 = vcmp.eq.f32.partialorder %v14109_v46, 0.0 }
 0x720   : > { %v5579_v59 = vmul.f32 %v5578_v25, %v5410_v56  ;;  %v5587_v52 = vmul.f32 %v10017_v57, %v5586_v55  ;;  %v14127_v55 = vpop.f32.mrf.mxu0 }
 0x721   : > { %v5221_v62 = vpop.f32.mrf.mxu2  ;;  %16567 = vst [vmem:[#allocation26_spill] sm:$0xff] %v14127_v55 }
 0x722   : > { %v5373_v61 = vmul.f32 %v5221_v62, %v5221_v62  ;;  %9268 = vmatmul.msk.f32.gmra.mxu0 %vm914_vm1, %v5221_v62  ;;  %v5581_v29 = vsel %vm5580_vm3, %v5410_v56, %v5579_v59  ;;  %v5588_v22 = vmul.f32 0.5, %v5587_v52  ;;  %v5368_v59 = vmul.f32 %v14075_v6, %v14075_v6 }
 0x723   : > { %v5584_v23 = vsel %vm5582_vm4, %v5583_v39, %v5581_v29 }
 0x724   : > { %v5424_v48 = vsel %vm914_vm1, %v5373_v61, 0.0  ;;  %v5946_v16 = vadd.f32 1e-08, %v5584_v23  ;;  %v5589_v31 = vsub.f32 1.5, %v5588_v22  ;;  %v5336_v61 = vmul.f32 %v13714_v7, %v13714_v7 }
 0x725   : > { %v10019_v24 = vpop.eup %10018  ;;  %v14121_v21 = vadd.f32 %v5424_v48, %v13778_v20  ;;  %v5595_v20 = vand.u32 2147483648, %v14101_v63  ;;  %v4669_v22 = vmul.f32 %v4553_v40, %v16515_v42 }
 0x726   : > { %9091 = vmatmul.msk.f32.gmra.mxu2 %vm4711_vm12, %v4668_v43  ;;  %6011 = vrot.lane.b32.xlu0 %v5946_v16, %s10281_s13  ;;  %v5590_v25 = vmul.f32 %v10017_v57, %v5589_v31  ;;  %v5598_v56 = vmul.f32 %v10019_v24, %v14109_v46  ;;  %v4559_v16 = vpop.f32.mrf.mxu3  ;;  %v5557_v31 = vsel %vm914_vm1, %v5368_v59, 0.0  ;;  %v5556_v42 = vsel %vm914_vm1, %v5336_v61, 0.0 }
 0x727   : > { %10020 = vrsqrt.f32 %v14121_v21  ;;  %vm5616_vm10 = vcmp.eq.f32.partialorder %v14121_v21, inf  ;;  %vm5618_vm11 = vcmp.eq.f32.partialorder %v14121_v21, 0.0 }
 0x728   : > { %v5591_v58 = vmul.f32 %v5590_v25, %v14101_v63  ;;  %v5599_v60 = vmul.f32 %v10019_v24, %v5598_v56  ;;  %v14155_v59 = vpop.f32.mrf.mxu0 }
 0x729   : > { %v5224_v52 = vpop.f32.mrf.mxu2  ;;  %16568 = vst [vmem:[#allocation10_spill] sm:$0xff] %v14155_v59 }
 0x72a   : > { %v5374_v62 = vmul.f32 %v5224_v52, %v5224_v52  ;;  %9269 = vmatmul.msk.f32.gmra.mxu0 %vm914_vm1, %v5224_v52  ;;  %v5593_v57 = vsel %vm5592_vm5, %v14101_v63, %v5591_v58  ;;  %v5600_v39 = vmul.f32 0.5, %v5599_v60  ;;  %v14151_v58 = vadd.f32 %v5557_v31, %v5556_v42 }
 0x72b   : > { %v5596_v29 = vsel %vm5594_vm7, %v5595_v20, %v5593_v57  ;;  %v4670_v57 = vmul.f32 %v4556_v49, %v16518_v15 }
 0x72c   : > { %v5429_v6 = vsel %vm914_vm1, %v5374_v62, 0.0  ;;  %v5947_v23 = vadd.f32 1e-08, %v5596_v29  ;;  %v5601_v43 = vsub.f32 1.5, %v5600_v39 }
 0x72d   : > { %v10021_v48 = vpop.eup %10020  ;;  %v14143_v25 = vadd.f32 %v5429_v6, %v13790_v41  ;;  %v5607_v41 = vand.u32 2147483648, %v14109_v46 }
 0x72e   : > { %9092 = vmatmul.msk.f32.gmra.mxu2 %vm4711_vm12, %v4669_v22  ;;  %6013 = vrot.lane.b32.xlu1 %v5947_v23, %s10281_s13  ;;  %v5602_v63 = vmul.f32 %v10019_v24, %v5601_v43  ;;  %v5610_v7 = vmul.f32 %v10021_v48, %v14121_v21 }
 0x72f   : > { %10022 = vrsqrt.f32 %v14143_v25  ;;  %vm5628_vm13 = vcmp.eq.f32.partialorder %v14143_v25, inf  ;;  %vm5630_vm14 = vcmp.eq.f32.partialorder %v14143_v25, 0.0 }
 0x730   : > { %v5603_v40 = vmul.f32 %v5602_v63, %v14109_v46  ;;  %v5611_v56 = vmul.f32 %v10021_v48, %v5610_v7  ;;  %v5619_v63 = vand.u32 2147483648, %v14121_v21 }
 0x731   : > { %v5227_v60 = vpop.f32.mrf.mxu2 }
 0x732   : > { %v5375_v52 = vmul.f32 %v5227_v60, %v5227_v60  ;;  %9270 = vmatmul.msk.f32.gmra.mxu0 %vm914_vm1, %v5227_v60  ;;  %v5605_v24 = vsel %vm5604_vm8, %v14109_v46, %v5603_v40  ;;  %v5612_v20 = vmul.f32 0.5, %v5611_v56  ;;  %v4562_v46 = vpop.f32.mrf.mxu3  ;;  %v4671_v40 = vmul.f32 %v4559_v16, %v13449_v33  ;;  %v14176_v56 = vpop.f32.mrf.mxu0 }
 0x733   : > { %v5608_v62 = vsel %vm5606_vm9, %v5607_v41, %v5605_v24  ;;  %16569 = vst [vmem:[#allocation90_spill] sm:$0xff] %v14176_v56 }
 0x734   : > { %v5434_v39 = vsel %vm914_vm1, %v5375_v52, 0.0  ;;  %v5948_v61 = vadd.f32 1e-08, %v5608_v62  ;;  %v5613_v29 = vsub.f32 1.5, %v5612_v20  ;;  %v16570_v20 = vld [vmem:[#allocation71_spill] sm:$0xff] }
 0x735   : > { %v10023_v22 = vpop.eup %10022  ;;  %v14163_v6 = vadd.f32 %v5434_v39, %v13802_v18 }
 0x736   : > { %9093 = vmatmul.msk.f32.gmra.mxu2 %vm4711_vm12, %v4670_v57  ;;  %6015 = vrot.lane.b32.xlu2 %v5948_v61, %s10281_s13  ;;  %v5614_v23 = vmul.f32 %v10021_v48, %v5613_v29  ;;  %v5622_v43 = vmul.f32 %v10023_v22, %v14143_v25  ;;  %v5631_v29 = vand.u32 2147483648, %v14143_v25 }
 0x737   : > { %10024 = vrsqrt.f32 %v14163_v6  ;;  %vm5640_vm15 = vcmp.eq.f32.partialorder %v14163_v6, inf  ;;  %vm5642_vm2 = vcmp.eq.f32.partialorder %v14163_v6, 0.0 }
 0x738   : > { %v5615_v15 = vmul.f32 %v5614_v23, %v14121_v21  ;;  %v5623_v49 = vmul.f32 %v10023_v22, %v5622_v43 }
 0x739   : > { %v5230_v31 = vpop.f32.mrf.mxu2 }
 0x73a   : > { %v5376_v18 = vmul.f32 %v5230_v31, %v5230_v31  ;;  %9271 = vmatmul.msk.f32.gmra.mxu0 %vm914_vm1, %v5230_v31  ;;  %v5617_v7 = vsel %vm5616_vm10, %v14121_v21, %v5615_v15  ;;  %v5624_v48 = vmul.f32 0.5, %v5623_v49  ;;  %v4565_v39 = vpop.f32.mrf.mxu3  ;;  %v16571_v49 = vld [vmem:[#allocation27_spill] sm:$0xff] }
 0x73b   : > { %v5620_v42 = vsel %vm5618_vm11, %v5619_v63, %v5617_v7  ;;  %v4672_v31 = vmul.f32 %v4562_v46, %v16571_v49 }
 0x73c   : > { %v5439_v60 = vsel %vm914_vm1, %v5376_v18, 0.0  ;;  %v5949_v41 = vadd.f32 1e-08, %v5620_v42  ;;  %v5625_v52 = vsub.f32 1.5, %v5624_v48  ;;  %v16572_v42 = vld [vmem:[#allocation72_spill] sm:$0xff] }
 0x73d   : > { %v10025_v24 = vpop.eup %10024  ;;  %v14180_v62 = vadd.f32 %v5439_v60, %v16570_v20  ;;  %v14197_v60 = vpop.f32.mrf.mxu0 }
 0x73e   : > { %9094 = vmatmul.msk.f32.gmra.mxu2 %vm4711_vm12, %v4671_v40  ;;  %6017 = vrot.lane.b32.xlu0 %v5949_v41, %s10281_s13  ;;  %v5626_v57 = vmul.f32 %v10023_v22, %v5625_v52  ;;  %v5634_v21 = vmul.f32 %v10025_v24, %v14163_v6  ;;  %16573 = vst [vmem:[#allocation71_spill] sm:$0xff] %v14197_v60 }
 0x73f   : > { %10026 = vrsqrt.f32 %v14180_v62  ;;  %vm5652_vm3 = vcmp.eq.f32.partialorder %v14180_v62, inf  ;;  %vm5654_vm4 = vcmp.eq.f32.partialorder %v14180_v62, 0.0 }
 0x740   : > { %v5627_v33 = vmul.f32 %v5626_v57, %v14143_v25  ;;  %v5635_v16 = vmul.f32 %v10025_v24, %v5634_v21  ;;  %v5643_v57 = vand.u32 2147483648, %v14163_v6 }
 0x741   : > { %v5233_v61 = vpop.f32.mrf.mxu2 }
 0x742   : > { %v5377_v23 = vmul.f32 %v5233_v61, %v5233_v61  ;;  %9272 = vmatmul.msk.f32.gmra.mxu0 %vm914_vm1, %v5233_v61  ;;  %v5629_v43 = vsel %vm5628_vm13, %v14143_v25, %v5627_v33  ;;  %v5636_v22 = vmul.f32 0.5, %v5635_v16  ;;  %v4568_v16 = vpop.f32.mrf.mxu3 }
 0x743   : > { %v5632_v15 = vsel %vm5630_vm14, %v5631_v29, %v5629_v43  ;;  %v4673_v29 = vmul.f32 %v4565_v39, %v16529_v8  ;;  %vm6138_vm14 = vcmask 220160  }
 0x744   : > { %v5444_v63 = vsel %vm914_vm1, %v5377_v23, 0.0  ;;  %v5950_v18 = vadd.f32 1e-08, %v5632_v15  ;;  %v5637_v7 = vsub.f32 1.5, %v5636_v22 }
 0x745   : > { %v10027_v48 = vpop.eup %10026  ;;  %v14195_v40 = vadd.f32 %v5444_v63, %v16572_v42  ;;  %v14218_v63 = vpop.f32.mrf.mxu0 }
 0x746   : > { %9095 = vmatmul.msk.f32.gmra.mxu2 %vm4711_vm12, %v4672_v31  ;;  %6019 = vrot.lane.b32.xlu1 %v5950_v18, %s10281_s13  ;;  %v5638_v41 = vmul.f32 %v10025_v24, %v5637_v7  ;;  %v5646_v25 = vmul.f32 %v10027_v48, %v14180_v62 }
 0x747   : > { %10028 = vrsqrt.f32 %v14195_v40  ;;  %vm5664_vm5 = vcmp.eq.f32.partialorder %v14195_v40, inf }
 0x748   : > { %v5639_v46 = vmul.f32 %v5638_v41, %v14163_v6  ;;  %v5647_v52 = vmul.f32 %v10027_v48, %v5646_v25  ;;  %v4674_v25 = vmul.f32 %v4568_v16, %v16533_v32  ;;  %v773_v16 = vld [vmem:[%s16061_s4 + $0x40] sm:$0xff] }
 0x749   : > { %v5236_v20 = vpop.f32.mrf.mxu2 }
 0x74a   : > { %v5378_v21 = vmul.f32 %v5236_v20, %v5236_v20  ;;  %9273 = vmatmul.msk.f32.gmra.mxu0 %vm914_vm1, %v5236_v20  ;;  %v5641_v33 = vsel %vm5640_vm15, %v14163_v6, %v5639_v46  ;;  %v5648_v24 = vmul.f32 0.5, %v5647_v52 }
 0x74b   : > { %v5644_v61 = vsel %vm5642_vm2, %v5643_v57, %v5641_v33 }
 0x74c   : > { %v5449_v23 = vsel %vm914_vm1, %v5378_v21, 0.0  ;;  %v5951_v43 = vadd.f32 1e-08, %v5644_v61  ;;  %v5649_v22 = vsub.f32 1.5, %v5648_v24  ;;  %v4571_v21 = vpop.f32.mrf.mxu3  ;;  %v774_v24 = vld [vmem:[%s16061_s4 + $0x48] sm:$0x7] }
 0x74d   : > { %v10029_v15 = vpop.eup %10028  ;;  %v14212_v49 = vadd.f32 %v5449_v23, %v13838_v5  ;;  %v5655_v5 = vand.u32 2147483648, %v14180_v62  ;;  %9102 = vmatpush.msk.msra.mxu1 %vm1203_vm0, %v774_v24  ;;  %vm5666_vm0 = vcmp.eq.f32.partialorder %v14195_v40, 0.0 }
 0x74e   : > { %9096 = vmatmul.msk.f32.gmra.mxu2 %vm4711_vm12, %v4673_v29  ;;  %6021 = vrot.lane.b32.xlu2 %v5951_v43, %s10281_s13  ;;  %v5650_v31 = vmul.f32 %v10027_v48, %v5649_v22  ;;  %v5658_v6 = vmul.f32 %v10029_v15, %v14195_v40  ;;  %v772_v29 = vld [vmem:[%s16061_s4 + $0x38] sm:$0xff]  ;;  %v5667_v43 = vand.u32 2147483648, %v14195_v40  ;;  %v14248_v22 = vpop.f32.mrf.mxu0 }
 0x74f   : > { %10030 = vrsqrt.f32 %v14212_v49  ;;  %6251 = vmatpush.msra.mxu1 %v773_v16  ;;  %vm5676_vm7 = vcmp.eq.f32.partialorder %v14212_v49, inf  ;;  %vm5678_vm8 = vcmp.eq.f32.partialorder %v14212_v49, 0.0 }
 0x750   : > { %v5651_v8 = vmul.f32 %v5650_v31, %v14180_v62  ;;  %v5659_v39 = vmul.f32 %v10029_v15, %v5658_v6 }
 0x751   : > { %v5239_v18 = vpop.f32.mrf.mxu2  ;;  %6252 = vmatpush.msra.mxu1 %v772_v29 }
 0x752   : > { %v5379_v7 = vmul.f32 %v5239_v18, %v5239_v18  ;;  %9274 = vmatmul.msk.f32.gmra.mxu0 %vm914_vm1, %v5239_v18  ;;  %v5653_v42 = vsel %vm5652_vm3, %v14180_v62, %v5651_v8  ;;  %v5660_v48 = vmul.f32 0.5, %v5659_v39  ;;  %v4675_v39 = vmul.f32 %v4571_v21, %v13530_v27 }
 0x753   : > { %v5656_v41 = vsel %vm5654_vm4, %v5655_v5, %v5653_v42 }
 0x754   : > { %v5454_v46 = vsel %vm914_vm1, %v5379_v7, 0.0  ;;  %v5952_v52 = vadd.f32 1e-08, %v5656_v41  ;;  %v5661_v20 = vsub.f32 1.5, %v5660_v48  ;;  %v771_v41 = vld [vmem:[%s16061_s4 + $0x30] sm:$0xff]  ;;  %v4574_v27 = vpop.f32.mrf.mxu3 }
 0x755   : > { %v10031_v57 = vpop.eup %10030  ;;  %v14229_v33 = vadd.f32 %v5454_v46, %v13850_v0  ;;  %6253 = vmatpush.msra.mxu1 %v771_v41 }
 0x756   : > { %9097 = vmatmul.msk.f32.gmra.mxu2 %vm4711_vm12, %v4674_v25  ;;  %6023 = vrot.lane.b32.xlu0 %v5952_v52, %s10281_s13  ;;  %v5662_v62 = vmul.f32 %v10029_v15, %v5661_v20  ;;  %v5670_v32 = vmul.f32 %v10031_v57, %v14212_v49  ;;  %v5679_v20 = vand.u32 2147483648, %v14212_v49  ;;  %v14272_v16 = vpop.f32.mrf.mxu0 }
 0x757   : > { %10032 = vrsqrt.f32 %v14229_v33  ;;  %vm5688_vm9 = vcmp.eq.f32.partialorder %v14229_v33, inf  ;;  %vm5690_vm10 = vcmp.eq.f32.partialorder %v14229_v33, 0.0 }
 0x758   : > { %v5663_v0 = vmul.f32 %v5662_v62, %v14195_v40  ;;  %v5671_v61 = vmul.f32 %v10031_v57, %v5670_v32  ;;  %v4676_v32 = vmul.f32 %v4574_v27, %v13542_v53 }
 0x759   : > { %v5242_v23 = vpop.f32.mrf.mxu2 }
 0x75a   : > { %v5380_v15 = vmul.f32 %v5242_v23, %v5242_v23  ;;  %9275 = vmatmul.msk.f32.gmra.mxu0 %vm914_vm1, %v5242_v23  ;;  %v5665_v31 = vsel %vm5664_vm5, %v14195_v40, %v5663_v0  ;;  %v5672_v6 = vmul.f32 0.5, %v5671_v61 }
 0x75b   : > { %v5668_v8 = vsel %vm5666_vm0, %v5667_v43, %v5665_v31 }
 0x75c   : > { %v5459_v18 = vsel %vm914_vm1, %v5380_v15, 0.0  ;;  %v5953_v5 = vadd.f32 1e-08, %v5668_v8  ;;  %v5673_v7 = vsub.f32 1.5, %v5672_v6  ;;  %v4577_v6 = vpop.f32.mrf.mxu3 }
 0x75d   : > { %v10033_v42 = vpop.eup %10032  ;;  %v14256_v48 = vadd.f32 %v5459_v18, %v13862_v1  ;;  %v4677_v41 = vmul.f32 %v4577_v6, %v13551_v3  ;;  %v16574_v6 = vld [vmem:[#allocation29_spill] sm:$0xff] }
 0x75e   : > { %9098 = vmatmul.msk.f32.gmra.mxu2 %vm4711_vm12, %v4675_v39  ;;  %6025 = vrot.lane.b32.xlu1 %v5953_v5, %s10281_s13  ;;  %v5674_v40 = vmul.f32 %v10031_v57, %v5673_v7  ;;  %v5682_v25 = vmul.f32 %v10033_v42, %v14229_v33  ;;  %v5691_v39 = vand.u32 2147483648, %v14229_v33 }
 0x75f   : > { %10034 = vrsqrt.f32 %v14256_v48  ;;  %vm5700_vm11 = vcmp.eq.f32.partialorder %v14256_v48, inf  ;;  %vm5702_vm13 = vcmp.eq.f32.partialorder %v14256_v48, 0.0 }
 0x760   : > { %v5675_v46 = vmul.f32 %v5674_v40, %v14212_v49  ;;  %v5683_v52 = vmul.f32 %v10033_v42, %v5682_v25 }
 0x761   : > { %v5245_v1 = vpop.f32.mrf.mxu2 }
 0x762   : > { %v5381_v21 = vmul.f32 %v5245_v1, %v5245_v1  ;;  %9276 = vmatmul.msk.f32.gmra.mxu0 %vm914_vm1, %v5245_v1  ;;  %v5677_v24 = vsel %vm5676_vm7, %v14212_v49, %v5675_v46  ;;  %v5684_v57 = vmul.f32 0.5, %v5683_v52  ;;  %v14293_v52 = vpop.f32.mrf.mxu0 }
 0x763   : > { %v5680_v62 = vsel %vm5678_vm8, %v5679_v20, %v5677_v24 }
 0x764   : > { %v5464_v0 = vsel %vm914_vm1, %v5381_v21, 0.0  ;;  %v5954_v61 = vadd.f32 1e-08, %v5680_v62  ;;  %v5685_v29 = vsub.f32 1.5, %v5684_v57 }
 0x765   : > { %v10035_v23 = vpop.eup %10034  ;;  %v14276_v43 = vadd.f32 %v5464_v0, %v13874_v54 }
 0x766   : > { %9099 = vmatmul.msk.f32.gmra.mxu2 %vm4711_vm12, %v4676_v32  ;;  %6027 = vrot.lane.b32.xlu2 %v5954_v61, %s10281_s13  ;;  %v5686_v15 = vmul.f32 %v10033_v42, %v5685_v29  ;;  %v5694_v49 = vmul.f32 %v10035_v23, %v14256_v48  ;;  %v4580_v32 = vpop.f32.mrf.mxu3 }
 0x767   : > { %10036 = vrsqrt.f32 %v14276_v43  ;;  %v4678_v29 = vmul.f32 %v4580_v32, %v13563_v34  ;;  %vm5714_vm15 = vcmp.eq.f32.partialorder %v14276_v43, 0.0 }
 0x768   : > { %v5687_v53 = vmul.f32 %v5686_v15, %v14229_v33  ;;  %v5695_v31 = vmul.f32 %v10035_v23, %v5694_v49 }
 0x769   : > { %v5248_v8 = vpop.f32.mrf.mxu2 }
 0x76a   : > { %v5382_v54 = vmul.f32 %v5248_v8, %v5248_v8  ;;  %9277 = vmatmul.msk.f32.gmra.mxu0 %vm914_vm1, %v5248_v8  ;;  %v5689_v18 = vsel %vm5688_vm9, %v14229_v33, %v5687_v53  ;;  %v5696_v5 = vmul.f32 0.5, %v5695_v31  ;;  %v4679_v8 = vmax.f32 %v16574_v6, 0.0 }
 0x76b   : > { %v5692_v7 = vsel %vm5690_vm10, %v5691_v39, %v5689_v18  ;;  %v14315_v39 = vpop.f32.mrf.mxu0 }
 0x76c   : > { %v5469_v42 = vsel %vm914_vm1, %v5382_v54, 0.0  ;;  %v5955_v40 = vadd.f32 1e-08, %v5692_v7  ;;  %v5697_v25 = vsub.f32 1.5, %v5696_v5  ;;  %v5715_v7 = vand.u32 2147483648, %v14276_v43 }
 0x76d   : > { %v10037_v27 = vpop.eup %10036  ;;  %v14291_v46 = vadd.f32 %v5469_v42, %v13886_v17  ;;  %v5703_v17 = vand.u32 2147483648, %v14256_v48 }
 0x76e   : > { %9100 = vmatmul.msk.f32.gmra.mxu2 %vm4711_vm12, %v4677_v41  ;;  %6029 = vrot.lane.b32.xlu0 %v5955_v40, %s10281_s13  ;;  %v5698_v1 = vmul.f32 %v10035_v23, %v5697_v25  ;;  %v5706_v33 = vmul.f32 %v10037_v27, %v14276_v43 }
 0x76f   : > { %10038 = vrsqrt.f32 %v14291_v46  ;;  %vm5724_vm2 = vcmp.eq.f32.partialorder %v14291_v46, inf  ;;  %vm5726_vm3 = vcmp.eq.f32.partialorder %v14291_v46, 0.0 }
 0x770   : > { %v5699_v20 = vmul.f32 %v5698_v1, %v14256_v48  ;;  %v5707_v3 = vmul.f32 %v10037_v27, %v5706_v33 }
 0x771   : > { %v5251_v21 = vpop.f32.mrf.mxu2 }
 0x772   : > { %v5383_v24 = vmul.f32 %v5251_v21, %v5251_v21  ;;  %9278 = vmatmul.msk.f32.gmra.mxu0 %vm914_vm1, %v5251_v21  ;;  %v5701_v57 = vsel %vm5700_vm11, %v14256_v48, %v5699_v20  ;;  %v5708_v62 = vmul.f32 0.5, %v5707_v3 }
 0x773   : > { %v5704_v0 = vsel %vm5702_vm13, %v5703_v17, %v5701_v57  ;;  %v14332_v32 = vpop.f32.mrf.mxu0 }
 0x774   : > { %v5474_v61 = vsel %vm914_vm1, %v5383_v24, 0.0  ;;  %v5956_v23 = vadd.f32 1e-08, %v5704_v0  ;;  %v5709_v15 = vsub.f32 1.5, %v5708_v62 }
 0x775   : > { %v10039_v49 = vpop.eup %10038  ;;  %v14308_v53 = vadd.f32 %v5474_v61, %v13898_v9 }
 0x776   : > { %9101 = vmatmul.msk.f32.gmra.mxu2 %vm4711_vm12, %v4678_v29  ;;  %6031 = vrot.lane.b32.xlu1 %v5956_v23, %s10281_s13  ;;  %v5710_v31 = vmul.f32 %v10037_v27, %v5709_v15  ;;  %v5718_v48 = vmul.f32 %v10039_v49, %v14291_v46  ;;  %vm5712_vm12 = vcmp.eq.f32.partialorder %v14276_v43, inf }
 0x777   : > { %10040 = vrsqrt.f32 %v14308_v53  ;;  %vm5736_vm4 = vcmp.eq.f32.partialorder %v14308_v53, inf  ;;  %vm5738_vm5 = vcmp.eq.f32.partialorder %v14308_v53, 0.0 }
 0x778   : > { %v6010_v34 = vpop.permute.xlu2 %6009  ;;  %v5711_v54 = vmul.f32 %v5710_v31, %v14276_v43  ;;  %v5719_v18 = vmul.f32 %v10039_v49, %v5718_v48 }
 0x779   : > { %v6105_v9 = vsel %vm3169_vm6, %v4679_v8, %v6010_v34  ;;  %v5254_v5 = vpop.f32.mrf.mxu2 }
 0x77a   : > { %v5384_v42 = vmul.f32 %v5254_v5, %v5254_v5  ;;  %9103 = vmatmul.msk.f32.vlgmr.msra.gmra.mxu1 %vm6138_vm14, %v6105_v9  ;;  %9279 = vmatmul.msk.f32.gmra.mxu0 %vm914_vm1, %v5254_v5  ;;  %v5713_v41 = vsel %vm5712_vm12, %v14276_v43, %v5711_v54  ;;  %v5720_v40 = vmul.f32 0.5, %v5719_v18  ;;  %v5727_v43 = vand.u32 2147483648, %v14291_v46 }
 0x77b   : > { %v5716_v25 = vsel %vm5714_vm15, %v5715_v7, %v5713_v41  ;;  %v5739_v18 = vand.u32 2147483648, %v14308_v53 }
 0x77c   : > { %v5479_v27 = vsel %vm914_vm1, %v5384_v42, 0.0  ;;  %v5957_v1 = vadd.f32 1e-08, %v5716_v25  ;;  %v5721_v33 = vsub.f32 1.5, %v5720_v40  ;;  %v14349_v42 = vpop.f32.mrf.mxu0 }
 0x77d   : > { %v10041_v20 = vpop.eup %10040  ;;  %v5480_v3 = vadd.f32 %v5479_v27, %v13908_v44 }
 0x77e   : > { %6033 = vrot.lane.b32.xlu2 %v5957_v1, %s10281_s13  ;;  %v5722_v21 = vmul.f32 %v10039_v49, %v5721_v33  ;;  %v5730_v17 = vmul.f32 %v10041_v20, %v14308_v53  ;;  %v16575_v1 = vld [vmem:[#allocation39_spill] sm:$0xff] }
 0x77f   : > { %10042 = vrsqrt.f32 %v5480_v3  ;;  %vm5748_vm0 = vcmp.eq.f32.partialorder %v5480_v3, inf  ;;  %vm5750_vm7 = vcmp.eq.f32.partialorder %v5480_v3, 0.0 }
 0x780   : > { %v5723_v24 = vmul.f32 %v5722_v21, %v14291_v46  ;;  %v5731_v57 = vmul.f32 %v10041_v20, %v5730_v17 }
 0x781   : > { %v5257_v62 = vpop.f32.mrf.mxu2 }
 0x782   : > { %v5385_v0 = vmul.f32 %v5257_v62, %v5257_v62  ;;  %9280 = vmatmul.msk.f32.gmra.mxu0 %vm914_vm1, %v5257_v62  ;;  %v5725_v44 = vsel %vm5724_vm2, %v14291_v46, %v5723_v24  ;;  %v5732_v61 = vmul.f32 0.5, %v5731_v57  ;;  %v5751_v57 = vand.u32 2147483648, %v5480_v3 }
 0x783   : > { %v5728_v29 = vsel %vm5726_vm3, %v5727_v43, %v5725_v44 }
 0x784   : > { %v5484_v23 = vsel %vm914_vm1, %v5385_v0, 0.0  ;;  %v5958_v15 = vadd.f32 1e-08, %v5728_v29  ;;  %v5733_v49 = vsub.f32 1.5, %v5732_v61 }
 0x785   : > { %v10043_v31 = vpop.eup %10042  ;;  %v14339_v48 = vadd.f32 %v5484_v23, %v13919_v26 }
 0x786   : > { %6035 = vrot.lane.b32.xlu0 %v5958_v15, %s10281_s13  ;;  %v5734_v6 = vmul.f32 %v10041_v20, %v5733_v49  ;;  %v5742_v8 = vmul.f32 %v10043_v31, %v5480_v3  ;;  %v16576_v49 = vld [vmem:[#allocation9_spill] sm:$0xff] }
 0x787   : > { %10044 = vrsqrt.f32 %v14339_v48  ;;  %vm5760_vm8 = vcmp.eq.f32.partialorder %v14339_v48, inf  ;;  %vm5762_vm9 = vcmp.eq.f32.partialorder %v14339_v48, 0.0 }
 0x788   : > { %v5735_v34 = vmul.f32 %v5734_v6, %v14308_v53  ;;  %v5743_v54 = vmul.f32 %v10043_v31, %v5742_v8  ;;  %v14363_v6 = vpop.f32.mrf.mxu0 }
 0x789   : > { %v5260_v46 = vpop.f32.mrf.mxu2  ;;  %16577 = vst [vmem:[#allocation27_spill] sm:$0xff] %v14363_v6 }
 0x78a   : > { %v5386_v9 = vmul.f32 %v5260_v46, %v5260_v46  ;;  %9281 = vmatmul.msk.f32.gmra.mxu0 %vm914_vm1, %v5260_v46  ;;  %v5737_v26 = vsel %vm5736_vm4, %v14308_v53, %v5735_v34  ;;  %v5744_v5 = vmul.f32 0.5, %v5743_v54  ;;  %v16578_v54 = vld [vmem:[#allocation42_spill] sm:$0xff] }
 0x78b   : > { %v5740_v7 = vsel %vm5738_vm5, %v5739_v18, %v5737_v26  ;;  %v4680_v46 = vmax.f32 %v16578_v54, 0.0 }
 0x78c   : > { %v5489_v41 = vsel %vm914_vm1, %v5386_v9, 0.0  ;;  %v5959_v40 = vadd.f32 1e-08, %v5740_v7  ;;  %v5745_v25 = vsub.f32 1.5, %v5744_v5  ;;  %v5763_v7 = vand.u32 2147483648, %v14339_v48 }
 0x78d   : > { %v10045_v27 = vpop.eup %10044  ;;  %v14353_v33 = vadd.f32 %v5489_v41, %v16575_v1 }
 0x78e   : > { %6037 = vrot.lane.b32.xlu1 %v5959_v40, %s10281_s13  ;;  %v5746_v20 = vmul.f32 %v10043_v31, %v5745_v25  ;;  %v5754_v21 = vmul.f32 %v10045_v27, %v14339_v48 }
 0x78f   : > { %10046 = vrsqrt.f32 %v14353_v33  ;;  %vm5772_vm10 = vcmp.eq.f32.partialorder %v14353_v33, inf  ;;  %vm5774_vm11 = vcmp.eq.f32.partialorder %v14353_v33, 0.0 }
 0x790   : > { %v5747_v53 = vmul.f32 %v5746_v20, %v5480_v3  ;;  %v5755_v17 = vmul.f32 %v10045_v27, %v5754_v21 }
 0x791   : > { %v5263_v24 = vpop.f32.mrf.mxu2 }
 0x792   : > { %v5387_v62 = vmul.f32 %v5263_v24, %v5263_v24  ;;  %9282 = vmatmul.msk.f32.gmra.mxu0 %vm914_vm1, %v5263_v24  ;;  %v5749_v43 = vsel %vm5748_vm0, %v5480_v3, %v5747_v53  ;;  %v5756_v0 = vmul.f32 0.5, %v5755_v17  ;;  %v16579_v17 = vld [vmem:[#allocation15_spill] sm:$0xff] }
 0x793   : > { %v5752_v44 = vsel %vm5750_vm7, %v5751_v57, %v5749_v43  ;;  %v16580_v43 = vld [vmem:[#allocation32_spill] sm:$0xff] }
 0x794   : > { %v5494_v61 = vsel %vm914_vm1, %v5387_v62, 0.0  ;;  %v5960_v29 = vadd.f32 1e-08, %v5752_v44  ;;  %v5757_v23 = vsub.f32 1.5, %v5756_v0  ;;  %v4681_v0 = vmax.f32 %v16580_v43, 0.0 }
 0x795   : > { %v10047_v15 = vpop.eup %10046  ;;  %v14361_v31 = vadd.f32 %v5494_v61, %v16576_v49 }
 0x796   : > { %6039 = vrot.lane.b32.xlu2 %v5960_v29, %s10281_s13  ;;  %v5758_v8 = vmul.f32 %v10045_v27, %v5757_v23  ;;  %v5766_v34 = vmul.f32 %v10047_v15, %v14353_v33 }
 0x797   : > { %10048 = vrsqrt.f32 %v14361_v31  ;;  %vm5784_vm13 = vcmp.eq.f32.partialorder %v14361_v31, inf  ;;  %vm5786_vm12 = vcmp.eq.f32.partialorder %v14361_v31, 0.0 }
 0x798   : > { %v6012_v3 = vpop.permute.xlu0 %6011  ;;  %v5759_v18 = vmul.f32 %v5758_v8, %v14339_v48  ;;  %v5767_v9 = vmul.f32 %v10047_v15, %v5766_v34  ;;  %v5775_v8 = vand.u32 2147483648, %v14353_v33 }
 0x799   : > { %v6106_v26 = vsel %vm3169_vm6, %v4680_v46, %v6012_v3  ;;  %v5266_v5 = vpop.f32.mrf.mxu2 }
 0x79a   : > { %v5388_v41 = vmul.f32 %v5266_v5, %v5266_v5  ;;  %9104 = vmatmul.msk.f32.gmra.mxu1 %vm6138_vm14, %v6106_v26  ;;  %9283 = vmatmul.msk.f32.gmra.mxu0 %vm914_vm1, %v5266_v5  ;;  %v5761_v40 = vsel %vm5760_vm8, %v14339_v48, %v5759_v18  ;;  %v5768_v25 = vmul.f32 0.5, %v5767_v9  ;;  %v14385_v48 = vpop.f32.mrf.mxu0  ;;  %v16582_v5 = vld [vmem:[#allocation59_spill] sm:$0xff] }
 0x79b   : > { %v5764_v27 = vsel %vm5762_vm9, %v5763_v7, %v5761_v40  ;;  %16581 = vst [vmem:[#allocation72_spill] sm:$0xff] %v14385_v48 }
 0x79c   : > { %v5499_v1 = vsel %vm914_vm1, %v5388_v41, 0.0  ;;  %v5961_v20 = vadd.f32 1e-08, %v5764_v27  ;;  %v5769_v21 = vsub.f32 1.5, %v5768_v25  ;;  %v6016_v41 = vpop.permute.xlu2 %6015  ;;  %v16583_v27 = vld [vmem:[#allocation34_spill] sm:$0xff] }
 0x79d   : > { %v10049_v53 = vpop.eup %10048  ;;  %v14379_v24 = vadd.f32 %v5499_v1, %v16579_v17  ;;  %v4682_v1 = vmax.f32 %v16583_v27, 0.0 }
 0x79e   : > { %6041 = vrot.lane.b32.xlu0 %v5961_v20, %s10281_s13  ;;  %v5770_v57 = vmul.f32 %v10047_v15, %v5769_v21  ;;  %v5778_v62 = vmul.f32 %v10049_v53, %v14361_v31 }
 0x79f   : > { %10050 = vrsqrt.f32 %v14379_v24  ;;  %v6108_v21 = vsel %vm3169_vm6, %v4682_v1, %v6016_v41  ;;  %vm5796_vm15 = vcmp.eq.f32.partialorder %v14379_v24, inf  ;;  %vm5798_vm2 = vcmp.eq.f32.partialorder %v14379_v24, 0.0 }
 0x7a0   : > { %v6014_v44 = vpop.permute.xlu1 %6013  ;;  %v5771_v61 = vmul.f32 %v5770_v57, %v14353_v33  ;;  %v5779_v29 = vmul.f32 %v10049_v53, %v5778_v62  ;;  %v5787_v57 = vand.u32 2147483648, %v14361_v31 }
 0x7a1   : > { %v6107_v23 = vsel %vm3169_vm6, %v4681_v0, %v6014_v44  ;;  %v5269_v49 = vpop.f32.mrf.mxu2 }
 0x7a2   : > { %v5389_v15 = vmul.f32 %v5269_v49, %v5269_v49  ;;  %9105 = vmatmul.msk.f32.gmra.mxu1 %vm6138_vm14, %v6107_v23  ;;  %9284 = vmatmul.msk.f32.gmra.mxu0 %vm914_vm1, %v5269_v49  ;;  %v5773_v34 = vsel %vm5772_vm10, %v14353_v33, %v5771_v61  ;;  %v5780_v54 = vmul.f32 0.5, %v5779_v29  ;;  %v14407_v62 = vpop.f32.mrf.mxu0 }
 0x7a3   : > { %v5776_v46 = vsel %vm5774_vm11, %v5775_v8, %v5773_v34  ;;  %16584 = vst [vmem:[#allocation29_spill] sm:$0xff] %v14407_v62 }
 0x7a4   : > { %v5504_v3 = vsel %vm914_vm1, %v5389_v15, 0.0  ;;  %v5962_v18 = vadd.f32 1e-08, %v5776_v46  ;;  %v5781_v9 = vsub.f32 1.5, %v5780_v54  ;;  %v16585_v54 = vld [vmem:[#allocation38_spill] sm:$0xff] }
 0x7a5   : > { %v10051_v26 = vpop.eup %10050  ;;  %v14397_v7 = vadd.f32 %v5504_v3, %v16582_v5  ;;  %v4683_v46 = vmax.f32 %v16585_v54, 0.0 }
 0x7a6   : > { %6043 = vrot.lane.b32.xlu1 %v5962_v18, %s10281_s13  ;;  %v5782_v40 = vmul.f32 %v10049_v53, %v5781_v9  ;;  %v5790_v25 = vmul.f32 %v10051_v26, %v14379_v24 }
 0x7a7   : > { %10052 = vrsqrt.f32 %v14397_v7  ;;  %vm5808_vm3 = vcmp.eq.f32.partialorder %v14397_v7, inf  ;;  %vm5810_vm4 = vcmp.eq.f32.partialorder %v14397_v7, 0.0 }
 0x7a8   : > { %v5783_v33 = vmul.f32 %v5782_v40, %v14361_v31  ;;  %v5791_v20 = vmul.f32 %v10051_v26, %v5790_v25 }
 0x7a9   : > { %v5272_v17 = vpop.f32.mrf.mxu2 }
 0x7aa   : > { %v5390_v43 = vmul.f32 %v5272_v17, %v5272_v17  ;;  %9106 = vmatmul.msk.f32.gmra.mxu1 %vm6138_vm14, %v6108_v21  ;;  %9285 = vmatmul.msk.f32.gmra.mxu0 %vm914_vm1, %v5272_v17  ;;  %v5785_v53 = vsel %vm5784_vm13, %v14361_v31, %v5783_v33  ;;  %v5792_v0 = vmul.f32 0.5, %v5791_v20  ;;  %v14429_v27 = vpop.f32.mrf.mxu0  ;;  %v16587_v17 = vld [vmem:[#allocation63_spill] sm:$0xff] }
 0x7ab   : > { %v5788_v44 = vsel %vm5786_vm12, %v5787_v57, %v5785_v53  ;;  %16586 = vst [vmem:[#allocation39_spill] sm:$0xff] %v14429_v27 }
 0x7ac   : > { %v5509_v61 = vsel %vm914_vm1, %v5390_v43, 0.0  ;;  %v5963_v29 = vadd.f32 1e-08, %v5788_v44  ;;  %v5793_v23 = vsub.f32 1.5, %v5792_v0  ;;  %v16588_v0 = vld [vmem:[#allocation40_spill] sm:$0xff] }
 0x7ad   : > { %v10053_v49 = vpop.eup %10052  ;;  %v14415_v8 = vadd.f32 %v5509_v61, %v13974_v51  ;;  %v5799_v51 = vand.u32 2147483648, %v14379_v24  ;;  %v4684_v44 = vmax.f32 %v16588_v0, 0.0 }
 0x7ae   : > { %6045 = vrot.lane.b32.xlu2 %v5963_v29, %s10281_s13  ;;  %v5794_v15 = vmul.f32 %v10051_v26, %v5793_v23  ;;  %v5802_v34 = vmul.f32 %v10053_v49, %v14397_v7 }
 0x7af   : > { %10054 = vrsqrt.f32 %v14415_v8  ;;  %vm5820_vm5 = vcmp.eq.f32.partialorder %v14415_v8, inf  ;;  %vm5822_vm0 = vcmp.eq.f32.partialorder %v14415_v8, 0.0 }
 0x7b0   : > { %v6018_v31 = vpop.permute.xlu0 %6017  ;;  %v5795_v3 = vmul.f32 %v5794_v15, %v14379_v24  ;;  %v5803_v18 = vmul.f32 %v10053_v49, %v5802_v34  ;;  %v5811_v34 = vand.u32 2147483648, %v14397_v7 }
 0x7b1   : > { %v6109_v9 = vsel %vm3169_vm6, %v4683_v46, %v6018_v31  ;;  %v5275_v5 = vpop.f32.mrf.mxu2 }
 0x7b2   : > { %v5391_v41 = vmul.f32 %v5275_v5, %v5275_v5  ;;  %9107 = vmatmul.msk.f32.gmra.mxu1 %vm6138_vm14, %v6109_v9  ;;  %9286 = vmatmul.msk.f32.gmra.mxu0 %vm914_vm1, %v5275_v5  ;;  %v5797_v26 = vsel %vm5796_vm15, %v14379_v24, %v5795_v3  ;;  %v5804_v40 = vmul.f32 0.5, %v5803_v18 }
 0x7b3   : > { %v5800_v25 = vsel %vm5798_vm2, %v5799_v51, %v5797_v26  ;;  %v6022_v26 = vpop.permute.xlu2 %6021 }
 0x7b4   : > { %v5514_v1 = vsel %vm914_vm1, %v5391_v41, 0.0  ;;  %v5964_v33 = vadd.f32 1e-08, %v5800_v25  ;;  %v5805_v20 = vsub.f32 1.5, %v5804_v40  ;;  %v14451_v41 = vpop.f32.mrf.mxu0 }
 0x7b5   : > { %v10055_v21 = vpop.eup %10054  ;;  %v14433_v57 = vadd.f32 %v5514_v1, %v16587_v17  ;;  %16589 = vst [vmem:[#allocation9_spill] sm:$0xff] %v14451_v41  ;;  %v16590_v1 = vld [vmem:[#allocation48_spill] sm:$0xff] }
 0x7b6   : > { %6047 = vrot.lane.b32.xlu0 %v5964_v33, %s10281_s13  ;;  %v5806_v43 = vmul.f32 %v10053_v49, %v5805_v20  ;;  %v5814_v53 = vmul.f32 %v10055_v21, %v14415_v8 }
 0x7b7   : > { %10056 = vrsqrt.f32 %v14433_v57  ;;  %vm5832_vm7 = vcmp.eq.f32.partialorder %v14433_v57, inf  ;;  %vm5834_vm8 = vcmp.eq.f32.partialorder %v14433_v57, 0.0 }
 0x7b8   : > { %v6020_v24 = vpop.permute.xlu1 %6019  ;;  %v5807_v61 = vmul.f32 %v5806_v43, %v14397_v7  ;;  %v5815_v29 = vmul.f32 %v10055_v21, %v5814_v53 }
 0x7b9   : > { %v6110_v23 = vsel %vm3169_vm6, %v4684_v44, %v6020_v24  ;;  %v5278_v15 = vpop.f32.mrf.mxu2 }
 0x7ba   : > { %v5392_v54 = vmul.f32 %v5278_v15, %v5278_v15  ;;  %9108 = vmatmul.msk.f32.gmra.mxu1 %vm6138_vm14, %v6110_v23  ;;  %9287 = vmatmul.msk.f32.gmra.mxu0 %vm914_vm1, %v5278_v15  ;;  %v5809_v49 = vsel %vm5808_vm3, %v14397_v7, %v5807_v61  ;;  %v5816_v46 = vmul.f32 0.5, %v5815_v29  ;;  %v4685_v7 = vmax.f32 %v16590_v1, 0.0 }
 0x7bb   : > { %v5812_v31 = vsel %vm5810_vm4, %v5811_v34, %v5809_v49  ;;  %v16591_v49 = vld [vmem:[#allocation50_spill] sm:$0xff] }
 0x7bc   : > { %v5519_v3 = vsel %vm914_vm1, %v5392_v54, 0.0  ;;  %v5965_v18 = vadd.f32 1e-08, %v5812_v31  ;;  %v5817_v9 = vsub.f32 1.5, %v5816_v46  ;;  %v6111_v17 = vsel %vm3169_vm6, %v4685_v7, %v6022_v26 }
 0x7bd   : > { %v10057_v5 = vpop.eup %10056  ;;  %v14449_v51 = vadd.f32 %v5519_v3, %v13997_v37  ;;  %v5823_v37 = vand.u32 2147483648, %v14415_v8  ;;  %v4686_v46 = vmax.f32 %v16591_v49, 0.0 }
 0x7be   : > { %6049 = vrot.lane.b32.xlu1 %v5965_v18, %s10281_s13  ;;  %v5818_v40 = vmul.f32 %v10055_v21, %v5817_v9  ;;  %v5826_v25 = vmul.f32 %v10057_v5, %v14433_v57 }
 0x7bf   : > { %10058 = vrsqrt.f32 %v14449_v51  ;;  %vm5844_vm9 = vcmp.eq.f32.partialorder %v14449_v51, inf  ;;  %vm5846_vm10 = vcmp.eq.f32.partialorder %v14449_v51, 0.0 }
 0x7c0   : > { %v5819_v33 = vmul.f32 %v5818_v40, %v14415_v8  ;;  %v5827_v20 = vmul.f32 %v10057_v5, %v5826_v25 }
 0x7c1   : > { %v5281_v43 = vpop.f32.mrf.mxu2 }
 0x7c2   : > { %v5393_v53 = vmul.f32 %v5281_v43, %v5281_v43  ;;  %9109 = vmatmul.msk.f32.gmra.mxu1 %vm6138_vm14, %v6111_v17  ;;  %9288 = vmatmul.msk.f32.gmra.mxu0 %vm914_vm1, %v5281_v43  ;;  %v5821_v21 = vsel %vm5820_vm5, %v14415_v8, %v5819_v33  ;;  %v5828_v0 = vmul.f32 0.5, %v5827_v20  ;;  %v14473_v8 = vpop.f32.mrf.mxu0 }
 0x7c3   : > { %v5824_v44 = vsel %vm5822_vm0, %v5823_v37, %v5821_v21  ;;  %v16592_v21 = vld [vmem:[#allocation52_spill] sm:$0xff] }
 0x7c4   : > { %v5524_v24 = vsel %vm914_vm1, %v5393_v53, 0.0  ;;  %v5966_v61 = vadd.f32 1e-08, %v5824_v44  ;;  %v5829_v29 = vsub.f32 1.5, %v5828_v0  ;;  %v4687_v0 = vmax.f32 %v16592_v21, 0.0 }
 0x7c5   : > { %v10059_v23 = vpop.eup %10058  ;;  %v14467_v15 = vadd.f32 %v5524_v24, %v14008_v30  ;;  %v5835_v30 = vand.u32 2147483648, %v14433_v57 }
 0x7c6   : > { %6051 = vrot.lane.b32.xlu2 %v5966_v61, %s10281_s13  ;;  %v5830_v34 = vmul.f32 %v10057_v5, %v5829_v29  ;;  %v5838_v54 = vmul.f32 %v10059_v23, %v14449_v51 }
 0x7c7   : > { %10060 = vrsqrt.f32 %v14467_v15  ;;  %vm5856_vm11 = vcmp.eq.f32.partialorder %v14467_v15, inf  ;;  %vm5858_vm13 = vcmp.eq.f32.partialorder %v14467_v15, 0.0 }
 0x7c8   : > { %v6024_v31 = vpop.permute.xlu0 %6023  ;;  %v5831_v3 = vmul.f32 %v5830_v34, %v14433_v57  ;;  %v5839_v18 = vmul.f32 %v10059_v23, %v5838_v54 }
 0x7c9   : > { %v6112_v9 = vsel %vm3169_vm6, %v4686_v46, %v6024_v31  ;;  %v5284_v26 = vpop.f32.mrf.mxu2 }
 0x7ca   : > { %v5394_v5 = vmul.f32 %v5284_v26, %v5284_v26  ;;  %9110 = vmatmul.msk.f32.gmra.mxu1 %vm6138_vm14, %v6112_v9  ;;  %9289 = vmatmul.msk.f32.gmra.mxu0 %vm914_vm1, %v5284_v26  ;;  %v5833_v40 = vsel %vm5832_vm7, %v14433_v57, %v5831_v3  ;;  %v5840_v25 = vmul.f32 0.5, %v5839_v18  ;;  %v14495_v34 = vpop.f32.mrf.mxu0 }
 0x7cb   : > { %v5836_v1 = vsel %vm5834_vm8, %v5835_v30, %v5833_v40  ;;  %v6028_v30 = vpop.permute.xlu2 %6027 }
 0x7cc   : > { %v5529_v7 = vsel %vm914_vm1, %v5394_v5, 0.0  ;;  %v5967_v33 = vadd.f32 1e-08, %v5836_v1  ;;  %v5841_v20 = vsub.f32 1.5, %v5840_v25  ;;  %v16593_v25 = vld [vmem:[#allocation53_spill] sm:$0xff] }
 0x7cd   : > { %v10061_v17 = vpop.eup %10060  ;;  %v14485_v43 = vadd.f32 %v5529_v7, %v14017_v4  ;;  %v5847_v4 = vand.u32 2147483648, %v14449_v51  ;;  %v4688_v1 = vmax.f32 %v16593_v25, 0.0 }
 0x7ce   : > { %6053 = vrot.lane.b32.xlu0 %v5967_v33, %s10281_s13  ;;  %v5842_v37 = vmul.f32 %v10059_v23, %v5841_v20  ;;  %v5850_v53 = vmul.f32 %v10061_v17, %v14467_v15 }
 0x7cf   : > { %10062 = vrsqrt.f32 %v14485_v43  ;;  %v6114_v33 = vsel %vm3169_vm6, %v4688_v1, %v6028_v30  ;;  %vm5868_vm12 = vcmp.eq.f32.partialorder %v14485_v43, inf  ;;  %vm5870_vm15 = vcmp.eq.f32.partialorder %v14485_v43, 0.0 }
 0x7d0   : > { %v6026_v57 = vpop.permute.xlu1 %6025  ;;  %v5843_v44 = vmul.f32 %v5842_v37, %v14449_v51  ;;  %v5851_v24 = vmul.f32 %v10061_v17, %v5850_v53 }
 0x7d1   : > { %v6113_v61 = vsel %vm3169_vm6, %v4687_v0, %v6026_v57  ;;  %v5287_v29 = vpop.f32.mrf.mxu2 }
 0x7d2   : > { %v5395_v23 = vmul.f32 %v5287_v29, %v5287_v29  ;;  %9111 = vmatmul.msk.f32.gmra.mxu1 %vm6138_vm14, %v6113_v61  ;;  %9290 = vmatmul.msk.f32.gmra.mxu0 %vm914_vm1, %v5287_v29  ;;  %v5845_v54 = vsel %vm5844_vm9, %v14449_v51, %v5843_v44  ;;  %v5852_v49 = vmul.f32 0.5, %v5851_v24  ;;  %v14517_v0 = vpop.f32.mrf.mxu0 }
 0x7d3   : > { %v5848_v46 = vsel %vm5846_vm10, %v5847_v4, %v5845_v54  ;;  %v16594_v54 = vld [vmem:[#allocation54_spill] sm:$0xff] }
 0x7d4   : > { %v5534_v31 = vsel %vm914_vm1, %v5395_v23, 0.0  ;;  %v5968_v3 = vadd.f32 1e-08, %v5848_v46  ;;  %v5853_v18 = vsub.f32 1.5, %v5852_v49  ;;  %v4689_v49 = vmax.f32 %v16594_v54, 0.0 }
 0x7d5   : > { %v10063_v9 = vpop.eup %10062  ;;  %v14503_v26 = vadd.f32 %v5534_v31, %v14028_v11  ;;  %v5859_v11 = vand.u32 2147483648, %v14467_v15 }
 0x7d6   : > { %6055 = vrot.lane.b32.xlu1 %v5968_v3, %s10281_s13  ;;  %v5854_v5 = vmul.f32 %v10061_v17, %v5853_v18  ;;  %v5862_v40 = vmul.f32 %v10063_v9, %v14485_v43 }
 0x7d7   : > { %10064 = vrsqrt.f32 %v14503_v26  ;;  %vm5880_vm2 = vcmp.eq.f32.partialorder %v14503_v26, inf  ;;  %vm5882_vm3 = vcmp.eq.f32.partialorder %v14503_v26, 0.0 }
 0x7d8   : > { %v5855_v51 = vmul.f32 %v5854_v5, %v14467_v15  ;;  %v5863_v7 = vmul.f32 %v10063_v9, %v5862_v40 }
 0x7d9   : > { %v5290_v20 = vpop.f32.mrf.mxu2 }
 0x7da   : > { %v5396_v37 = vmul.f32 %v5290_v20, %v5290_v20  ;;  %9112 = vmatmul.msk.f32.gmra.mxu1 %vm6138_vm14, %v6114_v33  ;;  %9291 = vmatmul.msk.f32.gmra.mxu0 %vm914_vm1, %v5290_v20  ;;  %v5857_v17 = vsel %vm5856_vm11, %v14467_v15, %v5855_v51  ;;  %v5864_v53 = vmul.f32 0.5, %v5863_v7  ;;  %v14539_v20 = vpop.f32.mrf.mxu0 }
 0x7db   : > { %v5860_v21 = vsel %vm5858_vm13, %v5859_v11, %v5857_v17  ;;  %v16595_v17 = vld [vmem:[#allocation55_spill] sm:$0xff] }
 0x7dc   : > { %v5539_v57 = vsel %vm914_vm1, %v5396_v37, 0.0  ;;  %v5969_v44 = vadd.f32 1e-08, %v5860_v21  ;;  %v5865_v24 = vsub.f32 1.5, %v5864_v53  ;;  %v4690_v53 = vmax.f32 %v16595_v17, 0.0 }
 0x7dd   : > { %v10065_v61 = vpop.eup %10064  ;;  %v14521_v29 = vadd.f32 %v5539_v57, %v14039_v14  ;;  %v5871_v14 = vand.u32 2147483648, %v14485_v43 }
 0x7de   : > { %6057 = vrot.lane.b32.xlu2 %v5969_v44, %s10281_s13  ;;  %v5866_v4 = vmul.f32 %v10063_v9, %v5865_v24  ;;  %v5874_v23 = vmul.f32 %v10065_v61, %v14503_v26 }
 0x7df   : > { %10066 = vrsqrt.f32 %v14521_v29  ;;  %vm5892_vm4 = vcmp.eq.f32.partialorder %v14521_v29, inf  ;;  %vm5894_vm5 = vcmp.eq.f32.partialorder %v14521_v29, 0.0 }
 0x7e0   : > { %v6030_v15 = vpop.permute.xlu0 %6029  ;;  %v5867_v46 = vmul.f32 %v5866_v4, %v14485_v43  ;;  %v5875_v31 = vmul.f32 %v10065_v61, %v5874_v23 }
 0x7e1   : > { %v6115_v3 = vsel %vm3169_vm6, %v4689_v49, %v6030_v15  ;;  %v5293_v18 = vpop.f32.mrf.mxu2 }
 0x7e2   : > { %v5397_v30 = vmul.f32 %v5293_v18, %v5293_v18  ;;  %9113 = vmatmul.msk.f32.gmra.mxu1 %vm6138_vm14, %v6115_v3  ;;  %9292 = vmatmul.msk.f32.gmra.mxu0 %vm914_vm1, %v5293_v18  ;;  %v5869_v9 = vsel %vm5868_vm12, %v14485_v43, %v5867_v46  ;;  %v5876_v5 = vmul.f32 0.5, %v5875_v31  ;;  %v6034_v18 = vpop.permute.xlu2 %6033 }
 0x7e3   : > { %v5872_v40 = vsel %vm5870_vm15, %v5871_v14, %v5869_v9  ;;  %v16596_v9 = vld [vmem:[#allocation56_spill] sm:$0xff] }
 0x7e4   : > { %v5544_v25 = vsel %vm914_vm1, %v5397_v30, 0.0  ;;  %v5970_v1 = vadd.f32 1e-08, %v5872_v40  ;;  %v5877_v51 = vsub.f32 1.5, %v5876_v5  ;;  %v4691_v5 = vmax.f32 %v16596_v9, 0.0 }
 0x7e5   : > { %v10067_v7 = vpop.eup %10066  ;;  %v14537_v33 = vadd.f32 %v5544_v25, %v14050_v13  ;;  %v5883_v13 = vand.u32 2147483648, %v14503_v26 }
 0x7e6   : > { %6059 = vrot.lane.b32.xlu0 %v5970_v1, %s10281_s13  ;;  %v5878_v11 = vmul.f32 %v10065_v61, %v5877_v51  ;;  %v5886_v37 = vmul.f32 %v10067_v7, %v14521_v29  ;;  %v6117_v1 = vsel %vm3169_vm6, %v4691_v5, %v6034_v18 }
 0x7e7   : > { %10068 = vrsqrt.f32 %v14537_v33  ;;  %vm5904_vm0 = vcmp.eq.f32.partialorder %v14537_v33, inf  ;;  %vm5906_vm7 = vcmp.eq.f32.partialorder %v14537_v33, 0.0 }
 0x7e8   : > { %v6032_v43 = vpop.permute.xlu1 %6031  ;;  %v5879_v21 = vmul.f32 %v5878_v11, %v14503_v26  ;;  %v5887_v57 = vmul.f32 %v10067_v7, %v5886_v37 }
 0x7e9   : > { %v6116_v44 = vsel %vm3169_vm6, %v4690_v53, %v6032_v43  ;;  %v5296_v24 = vpop.f32.mrf.mxu2 }
 0x7ea   : > { %v5398_v4 = vmul.f32 %v5296_v24, %v5296_v24  ;;  %9114 = vmatmul.msk.f32.gmra.mxu1 %vm6138_vm14, %v6116_v44  ;;  %9293 = vmatmul.msk.f32.gmra.mxu0 %vm914_vm1, %v5296_v24  ;;  %v5881_v61 = vsel %vm5880_vm2, %v14503_v26, %v5879_v21  ;;  %v5888_v23 = vmul.f32 0.5, %v5887_v57  ;;  %v14561_v26 = vpop.f32.mrf.mxu0 }
 0x7eb   : > { %v5884_v54 = vsel %vm5882_vm3, %v5883_v13, %v5881_v61 }
 0x7ec   : > { %v5549_v49 = vsel %vm914_vm1, %v5398_v4, 0.0  ;;  %v5971_v15 = vadd.f32 1e-08, %v5884_v54  ;;  %v5889_v46 = vsub.f32 1.5, %v5888_v23  ;;  %v16597_v4 = vld [vmem:[#allocation57_spill] sm:$0xff] }
 0x7ed   : > { %v10069_v31 = vpop.eup %10068  ;;  %v14555_v3 = vadd.f32 %v5549_v49, %v14061_v47  ;;  %v5895_v47 = vand.u32 2147483648, %v14521_v29  ;;  %v4692_v61 = vmax.f32 %v16597_v4, 0.0 }
 0x7ee   : > { %6061 = vrot.lane.b32.xlu1 %v5971_v15, %s10281_s13  ;;  %v5890_v14 = vmul.f32 %v10067_v7, %v5889_v46  ;;  %v5898_v30 = vmul.f32 %v10069_v31, %v14537_v33  ;;  %v5907_v46 = vand.u32 2147483648, %v14537_v33 }
 0x7ef   : > { %10070 = vrsqrt.f32 %v14555_v3  ;;  %vm5918_vm8 = vcmp.eq.f32.partialorder %v14555_v3, 0.0 }
 0x7f0   : > { %v5891_v40 = vmul.f32 %v5890_v14, %v14521_v29  ;;  %v5899_v25 = vmul.f32 %v10069_v31, %v5898_v30 }
 0x7f1   : > { %v5299_v51 = vpop.f32.mrf.mxu2 }
 0x7f2   : > { %v5399_v11 = vmul.f32 %v5299_v51, %v5299_v51  ;;  %9115 = vmatmul.msk.f32.gmra.mxu1 %vm6138_vm14, %v6117_v1  ;;  %9294 = vmatmul.msk.f32.gmra.mxu0 %vm914_vm1, %v5299_v51  ;;  %v5893_v7 = vsel %vm5892_vm4, %v14521_v29, %v5891_v40  ;;  %v5900_v37 = vmul.f32 0.5, %v5899_v25 }
 0x7f3   : > { %v5896_v17 = vsel %vm5894_vm5, %v5895_v47, %v5893_v7 }
 0x7f4   : > { %v5554_v53 = vsel %vm914_vm1, %v5399_v11, 0.0  ;;  %v5972_v43 = vadd.f32 1e-08, %v5896_v17  ;;  %v5901_v21 = vsub.f32 1.5, %v5900_v37  ;;  %v16598_v11 = vld [vmem:[#allocation58_spill] sm:$0xff] }
 0x7f5   : > { %v10071_v57 = vpop.eup %10070  ;;  %v5555_v44 = vadd.f32 %v5554_v53, %v14070_v12  ;;  %v14580_v12 = vpop.f32.mrf.mxu0  ;;  %v4693_v7 = vmax.f32 %v16598_v11, 0.0 }
 0x7f6   : > { %6063 = vrot.lane.b32.xlu2 %v5972_v43, %s10281_s13  ;;  %v5902_v24 = vmul.f32 %v10069_v31, %v5901_v21  ;;  %v5910_v13 = vmul.f32 %v10071_v57, %v14555_v3  ;;  %v5919_v43 = vand.u32 2147483648, %v14555_v3 }
 0x7f7   : > { %10072 = vrsqrt.f32 %v5555_v44  ;;  %vm5928_vm9 = vcmp.eq.f32.partialorder %v5555_v44, inf  ;;  %vm5930_vm10 = vcmp.eq.f32.partialorder %v5555_v44, 0.0 }
 0x7f8   : > { %v6036_v23 = vpop.permute.xlu0 %6035  ;;  %v5903_v29 = vmul.f32 %v5902_v24, %v14537_v33  ;;  %v5911_v54 = vmul.f32 %v10071_v57, %v5910_v13 }
 0x7f9   : > { %v6118_v49 = vsel %vm3169_vm6, %v4692_v61, %v6036_v23  ;;  %v5302_v15 = vpop.f32.mrf.mxu2  ;;  %v6040_v61 = vpop.permute.xlu2 %6039 }
 0x7fa   : > { %v5400_v18 = vmul.f32 %v5302_v15, %v5302_v15  ;;  %9116 = vmatmul.msk.f32.gmra.mxu1 %vm6138_vm14, %v6118_v49  ;;  %9295 = vmatmul.msk.f32.gmra.mxu0 %vm914_vm1, %v5302_v15  ;;  %v5905_v31 = vsel %vm5904_vm0, %v14537_v33, %v5903_v29  ;;  %v5912_v14 = vmul.f32 0.5, %v5911_v54  ;;  %v16599_v54 = vld [vmem:[#allocation74_spill] sm:$0xff] }
 0x7fb   : > { %v5908_v30 = vsel %vm5906_vm7, %v5907_v46, %v5905_v31  ;;  %v4694_v49 = vmax.f32 %v16599_v54, 0.0  ;;  %v5931_v31 = vand.u32 2147483648, %v5555_v44 }
 0x7fc   : > { %v5559_v9 = vsel %vm914_vm1, %v5400_v18, 0.0  ;;  %v5973_v5 = vadd.f32 1e-08, %v5908_v30  ;;  %v5913_v40 = vsub.f32 1.5, %v5912_v14  ;;  %vm5916_vm1 = vcmp.eq.f32.partialorder %v14555_v3, inf }
 0x7fd   : > { %v10073_v25 = vpop.eup %10072  ;;  %v5560_v1 = vadd.f32 %v5559_v9, %v14151_v58  ;;  %v6120_v18 = vsel %vm3169_vm6, %v4694_v49, %v6040_v61 }
 0x7fe   : > { %6065 = vrot.lane.b32.xlu0 %v5973_v5, %s10281_s13  ;;  %v5914_v51 = vmul.f32 %v10071_v57, %v5913_v40  ;;  %v5922_v47 = vmul.f32 %v10073_v25, %v5555_v44 }
 0x7ff   : > { %10074 = vrsqrt.f32 %v5560_v1  ;;  %vm5940_vm11 = vcmp.eq.f32.partialorder %v5560_v1, inf  ;;  %vm5942_vm13 = vcmp.eq.f32.partialorder %v5560_v1, 0.0 }
 0x800   : > { %v6038_v37 = vpop.permute.xlu1 %6037  ;;  %v5915_v17 = vmul.f32 %v5914_v51, %v14555_v3  ;;  %v5923_v33 = vmul.f32 %v10073_v25, %v5922_v47  ;;  %v14603_v47 = vpop.f32.mrf.mxu1 }
 0x801   : > { %v6119_v53 = vsel %vm3169_vm6, %v4693_v7, %v6038_v37 }
 0x802   : > { %9117 = vmatmul.msk.f32.gmra.mxu1 %vm6138_vm14, %v6119_v53  ;;  %v5917_v58 = vsel %vm5916_vm1, %v14555_v3, %v5915_v17  ;;  %v5924_v21 = vmul.f32 0.5, %v5923_v33  ;;  %v5943_v17 = vand.u32 2147483648, %v5560_v1 }
 0x803   : > { %v5920_v57 = vsel %vm5918_vm8, %v5919_v43, %v5917_v58  ;;  %v16601_v43 = vld [vmem:[#allocation77_spill] sm:$0xff] }
 0x804   : > { %v5974_v24 = vadd.f32 1e-08, %v5920_v57  ;;  %v5925_v13 = vsub.f32 1.5, %v5924_v21  ;;  %v4696_v58 = vmax.f32 %v16601_v43, 0.0 }
 0x805   : > { %v10075_v4 = vpop.eup %10074 }
 0x806   : > { %6067 = vrot.lane.b32.xlu1 %v5974_v24, %s10281_s13  ;;  %v5926_v23 = vmul.f32 %v10073_v25, %v5925_v13  ;;  %v5934_v29 = vmul.f32 %v10075_v4, %v5560_v1  ;;  %v16600_v25 = vld [vmem:[#allocation76_spill] sm:$0xff] }
 0x807   : > { %v4695_v51 = vmax.f32 %v16600_v25, 0.0 }
 0x808   : > { %v5927_v15 = vmul.f32 %v5926_v23, %v5555_v44  ;;  %v5935_v46 = vmul.f32 %v10075_v4, %v5934_v29  ;;  %v6046_v13 = vpop.permute.xlu2 %6045  ;;  %v16603_v29 = vld [vmem:[#allocation11_spill] sm:$0xff] }
 0x809   : > { %v4698_v54 = vmax.f32 %v16603_v29, 0.0  ;;  %v16609_v29 = vld [vmem:[#allocation60_spill] sm:$0xff] }
 0x80a   : > { %9118 = vmatmul.msk.f32.gmra.mxu1 %vm6138_vm14, %v6120_v18  ;;  %v5929_v3 = vsel %vm5928_vm9, %v5555_v44, %v5927_v15  ;;  %v5936_v14 = vmul.f32 0.5, %v5935_v46  ;;  %v16604_v18 = vld [vmem:[#allocation79_spill] sm:$0xff] }
 0x80b   : > { %v5932_v30 = vsel %vm5930_vm10, %v5931_v31, %v5929_v3  ;;  %v4699_v31 = vmax.f32 %v16604_v18, 0.0 }
 0x80c   : > { %v5975_v9 = vadd.f32 1e-08, %v5932_v30  ;;  %v5937_v5 = vsub.f32 1.5, %v5936_v14 }
 0x80e   : > { %6069 = vrot.lane.b32.xlu2 %v5975_v9, %s10281_s13  ;;  %v5938_v40 = vmul.f32 %v10075_v4, %v5937_v5  ;;  %v16602_v4 = vld [vmem:[#allocation7_spill] sm:$0xff]  ;;  %v16605_v5 = vld [vmem:[#allocation80_spill] sm:$0xff] }
 0x80f   : > { %v4697_v61 = vmax.f32 %v16602_v4, 0.0 }
 0x810   : > { %v6042_v11 = vpop.permute.xlu0 %6041  ;;  %v5939_v7 = vmul.f32 %v5938_v40, %v5560_v1  ;;  %v4700_v40 = vmax.f32 %v16605_v5, 0.0 }
 0x811   : > { %v6121_v37 = vsel %vm3169_vm6, %v4695_v51, %v6042_v11  ;;  %v16606_v11 = vld [vmem:[#allocation16_spill] sm:$0xff] }
 0x812   : > { %9119 = vmatmul.msk.f32.gmra.mxu1 %vm6138_vm14, %v6121_v37  ;;  %v5941_v44 = vsel %vm5940_vm11, %v5560_v1, %v5939_v7  ;;  %v6123_v1 = vsel %vm3169_vm6, %v4697_v61, %v6046_v13  ;;  %v4701_v7 = vmax.f32 %v16606_v11, 0.0  ;;  %v16608_v13 = vld [vmem:[#allocation18_spill] sm:$0xff] }
 0x813   : > { %v5944_v33 = vsel %vm5942_vm13, %v5943_v17, %v5941_v44  ;;  %v4703_v4 = vmax.f32 %v16608_v13, 0.0 }
 0x814   : > { %v5976_v53 = vadd.f32 1e-08, %v5944_v33  ;;  %v16607_v33 = vld [vmem:[#allocation17_spill] sm:$0xff] }
 0x816   : > { %6071 = vrot.lane.b32.xlu0 %v5976_v53, %s10281_s13  ;;  %v4702_v53 = vmax.f32 %v16607_v33, 0.0 }
 0x817   : > { %v14609_v21 = vpop.f32.mrf.mxu1 }
 0x818   : > { %v6044_v57 = vpop.permute.xlu1 %6043 }
 0x819   : > { %v6122_v24 = vsel %vm3169_vm6, %v4696_v58, %v6044_v57 }
 0x81a   : > { %9120 = vmatmul.msk.f32.gmra.mxu1 %vm6138_vm14, %v6122_v24 }
 0x81f   : > { %v14614_v23 = vpop.f32.mrf.mxu1 }
 0x820   : > { %v6052_v9 = vpop.permute.xlu2 %6051 }
 0x821   : > { %v6126_v51 = vsel %vm3169_vm6, %v4700_v40, %v6052_v9 }
 0x822   : > { %9121 = vmatmul.msk.f32.gmra.mxu1 %vm6138_vm14, %v6123_v1 }
 0x827   : > { %v14619_v49 = vpop.f32.mrf.mxu1 }
 0x828   : > { %v6048_v15 = vpop.permute.xlu0 %6047 }
 0x829   : > { %v6124_v46 = vsel %vm3169_vm6, %v4698_v54, %v6048_v15  ;;  %v4704_v54 = vmax.f32 %v16609_v29, 0.0 }
 0x82a   : > { %9122 = vmatmul.msk.f32.gmra.mxu1 %vm6138_vm14, %v6124_v46 }
 0x82f   : > { %v14624_v3 = vpop.f32.mrf.mxu1 }
 0x830   : > { %v6050_v14 = vpop.permute.xlu1 %6049 }
 0x831   : > { %v6125_v30 = vsel %vm3169_vm6, %v4699_v31, %v6050_v14  ;;  %v16610_v31 = vld [vmem:[#allocation20_spill] sm:$0xff] }
 0x832   : > { %9123 = vmatmul.msk.f32.gmra.mxu1 %vm6138_vm14, %v6125_v30  ;;  %v4705_v14 = vmax.f32 %v16610_v31, 0.0  ;;  %v16614_v31 = vld [vmem:[#allocation61_spill] sm:$0xff] }
 0x837   : > { %v14629_v25 = vpop.f32.mrf.mxu1 }
 0x838   : > { %v6058_v24 = vpop.permute.xlu2 %6057 }
 0x839   : > { %v6129_v1 = vsel %vm3169_vm6, %v4703_v4, %v6058_v24  ;;  %v783_v24 = vld [vmem:[%s16062_s5 + $0x38] sm:$0xff]  ;;  %v16613_v4 = vld [vmem:[#allocation23_spill] sm:$0xff] }
 0x83a   : > { %9124 = vmatmul.msk.f32.gmra.mxu1 %vm6138_vm14, %v6126_v51  ;;  %v16611_v51 = vld [vmem:[#allocation21_spill] sm:$0xff] }
 0x83b   : > { %v4706_v11 = vmax.f32 %v16611_v51, 0.0 }
 0x83f   : > { %v14634_v37 = vpop.f32.mrf.mxu1 }
 0x840   : > { %v6054_v17 = vpop.permute.xlu0 %6053 }
 0x841   : > { %v6127_v44 = vsel %vm3169_vm6, %v4701_v7, %v6054_v17 }
 0x842   : > { %9125 = vmatmul.msk.f32.gmra.mxu1 %vm6138_vm14, %v6127_v44  ;;  %v16612_v44 = vld [vmem:[#allocation64_spill] sm:$0xff] }
 0x843   : > { %v4707_v33 = vmax.f32 %v16612_v44, 0.0 }
 0x847   : > { %v14639_v43 = vpop.f32.mrf.mxu1 }
 0x848   : > { %v6056_v58 = vpop.permute.xlu1 %6055 }
 0x849   : > { %v6128_v57 = vsel %vm3169_vm6, %v4702_v53, %v6056_v58 }
 0x84a   : > { %9126 = vmatmul.msk.f32.gmra.mxu1 %vm6138_vm14, %v6128_v57  ;;  %v784_v57 = vld [vmem:[%s16062_s5 + $0x40] sm:$0xff] }
 0x84b   : > { %6462 = vmatpush.msrb.mxu1 %v784_v57 }
 0x84d   : > { %6463 = vmatpush.msrb.mxu1 %v783_v24 }
 0x84f   : > { %v14644_v61 = vpop.f32.mrf.mxu1 }
 0x850   : > { %v6064_v40 = vpop.permute.xlu2 %6063 }
 0x851   : > { %v6132_v17 = vsel %vm3169_vm6, %v4706_v11, %v6064_v40  ;;  %v16615_v40 = vld [vmem:[#allocation22_spill] sm:$0xff] }
 0x852   : > { %9127 = vmatmul.msk.f32.gmra.mxu1 %vm6138_vm14, %v6129_v1  ;;  %v4708_v1 = vmax.f32 %v16613_v4, 0.0  ;;  %v4710_v51 = vmax.f32 %v16615_v40, 0.0 }
 0x857   : > { %v14649_v15 = vpop.f32.mrf.mxu1 }
 0x858   : > { %v6060_v46 = vpop.permute.xlu0 %6059 }
 0x859   : > { %v6130_v18 = vsel %vm3169_vm6, %v4704_v54, %v6060_v46 }
 0x85a   : > { %9128 = vmatmul.msk.f32.gmra.mxu1 %vm6138_vm14, %v6130_v18 }
 0x85f   : > { %v14654_v30 = vpop.f32.mrf.mxu1 }
 0x860   : > { %v6062_v9 = vpop.permute.xlu1 %6061 }
 0x861   : > { %v6131_v5 = vsel %vm3169_vm6, %v4705_v14, %v6062_v9  ;;  %v4709_v14 = vmax.f32 %v16614_v31, 0.0 }
 0x862   : > { %9129 = vmatmul.msk.f32.gmra.mxu1 %vm6138_vm14, %v6131_v5 }
 0x867   : > { %v6288_v7 = vpop.f32.mrf.mxu1 }
 0x868   : > { %v6070_v18 = vpop.permute.xlu2 %6069 }
 0x869   : > { %v6135_v5 = vsel %vm3169_vm6, %v4709_v14, %v6070_v18 }
 0x86a   : > { %9130 = vmatmul.msk.f32.gmra.mxu1 %vm6138_vm14, %v6132_v17 }
 0x86f   : > { %v6291_v53 = vpop.f32.mrf.mxu1 }
 0x870   : > { %v6066_v58 = vpop.permute.xlu0 %6065 }
 0x871   : > { %v6133_v13 = vsel %vm3169_vm6, %v4707_v33, %v6066_v58  ;;  %v14682_v33 = vld [vmem:[%s16061_s4 + $0x50] ss:$0 sm:$0xff] }
 0x872   : > { %9131 = vmatmul.msk.f32.gmra.mxu1 %vm6138_vm14, %v6133_v13  ;;  %v14686_v57 = vadd.f32 %v14682_v33, %v14603_v47  ;;  %v14692_v13 = vadd.f32 %v14682_v33, %v14609_v21  ;;  %v14722_v18 = vadd.f32 %v14682_v33, %v14629_v25  ;;  %v14730_v31 = vadd.f32 %v14682_v33, %v14634_v37 }
 0x873   : > { %v14738_v14 = vadd.f32 %v14682_v33, %v14639_v43  ;;  %v14754_v40 = vadd.f32 %v14682_v33, %v14649_v15 }
 0x874   : > { %16616 = vst [vmem:[#allocation42_spill] sm:$0xff] %v14686_v57 }
 0x875   : > { %16617 = vst [vmem:[#allocation15_spill] sm:$0xff] %v14692_v13 }
 0x876   : > { %16618 = vst [vmem:[#allocation32_spill] sm:$0xff] %v14730_v31 }
 0x877   : > { %v6294_v29 = vpop.f32.mrf.mxu1  ;;  %16619 = vst [vmem:[#allocation59_spill] sm:$0xff] %v14738_v14 }
 0x878   : > { %v6068_v54 = vpop.permute.xlu1 %6067  ;;  %16621 = vst [vmem:[#allocation38_spill] sm:$0xff] %v14754_v40 }
 0x879   : > { %v6134_v46 = vsel %vm3169_vm6, %v4708_v1, %v6068_v54  ;;  %v14698_v1 = vadd.f32 %v14682_v33, %v14614_v23  ;;  %v14706_v54 = vadd.f32 %v14682_v33, %v14619_v49 }
 0x87a   : > { %9132 = vmatmul.msk.f32.gmra.mxu1 %vm6138_vm14, %v6134_v46  ;;  %v14714_v46 = vadd.f32 %v14682_v33, %v14624_v3 }
 0x87f   : > { %v6297_v9 = vpop.f32.mrf.mxu1 }
 0x882   : > { %9133 = vmatmul.msk.f32.gmra.mxu1 %vm6138_vm14, %v6135_v5  ;;  %v14746_v5 = vadd.f32 %v14682_v33, %v14644_v61 }
 0x884   : > { %16620 = vst [vmem:[#allocation34_spill] sm:$0xff] %v14746_v5 }
 0x887   : > { %v6300_v11 = vpop.f32.mrf.mxu1 }
 0x888   : > { %v6072_v17 = vpop.permute.xlu0 %6071 }
 0x889   : > { %v6136_v44 = vsel %vm3169_vm6, %v4710_v51, %v6072_v17  ;;  %v14762_v51 = vadd.f32 %v14682_v33, %v14654_v30  ;;  %v14769_v17 = vadd.f32 %v14682_v33, %v6288_v7 }
 0x88a   : > { %9134 = vmatmul.msk.f32.gmra.mxu1 %vm6138_vm14, %v6136_v44  ;;  %v14776_v44 = vadd.f32 %v14682_v33, %v6291_v53 }
 0x88b   : > { %16622 = vst [vmem:[#allocation63_spill] sm:$0xff] %v14762_v51 }
 0x88c   : > { %16623 = vst [vmem:[#allocation40_spill] sm:$0xff] %v14769_v17 }
 0x88f   : > { %v6303_v58 = vpop.f32.mrf.mxu1 }
 0x892   : > { %9135 = vmatmul.msk.f32.vlgmr.msrb.gmra.mxu1 %vm3169_vm6, %v14686_v57  ;;  %v14783_v57 = vadd.f32 %v14682_v33, %v6294_v29  ;;  %v14804_v29 = vld [vmem:[%s16062_s5 + $0x48] ss:$0 sm:$0xff] }
 0x894   : > { %16624 = vst [vmem:[#allocation48_spill] sm:$0xff] %v14783_v57 }
 0x897   : > { %v6306_v24 = vpop.f32.mrf.mxu1 }
 0x89a   : > { %9136 = vmatmul.msk.f32.gmra.mxu1 %vm3169_vm6, %v14692_v13  ;;  %v14790_v13 = vadd.f32 %v14682_v33, %v6297_v9  ;;  %v14807_v9 = vadd.f32 %v14682_v33, %v6303_v58 }
 0x89c   : > { %16625 = vst [vmem:[#allocation50_spill] sm:$0xff] %v14790_v13 }
 0x89d   : > { %16626 = vst [vmem:[#allocation52_spill] sm:$0xff] %v14807_v9 }
 0x89f   : > { %v6309_v4 = vpop.f32.mrf.mxu1 }
 0x8a2   : > { %9137 = vmatmul.msk.f32.gmra.mxu1 %vm3169_vm6, %v14698_v1 }
 0x8a7   : > { %v14702_v47 = vpop.f32.mrf.mxu1 }
 0x8aa   : > { %9138 = vmatmul.msk.f32.gmra.mxu1 %vm3169_vm6, %v14706_v54 }
 0x8af   : > { %v14710_v21 = vpop.f32.mrf.mxu1 }
 0x8b2   : > { %9139 = vmatmul.msk.f32.gmra.mxu1 %vm3169_vm6, %v14714_v46 }
 0x8b7   : > { %v14718_v23 = vpop.f32.mrf.mxu1 }
 0x8ba   : > { %9140 = vmatmul.msk.f32.gmra.mxu1 %vm3169_vm6, %v14722_v18 }
 0x8bf   : > { %v14726_v49 = vpop.f32.mrf.mxu1 }
 0x8c2   : > { %9141 = vmatmul.msk.f32.gmra.mxu1 %vm3169_vm6, %v14730_v31 }
 0x8c7   : > { %v14734_v3 = vpop.f32.mrf.mxu1 }
 0x8ca   : > { %9142 = vmatmul.msk.f32.gmra.mxu1 %vm3169_vm6, %v14738_v14 }
 0x8cf   : > { %v14742_v25 = vpop.f32.mrf.mxu1 }
 0x8d2   : > { %9143 = vmatmul.msk.f32.gmra.mxu1 %vm3169_vm6, %v14746_v5 }
 0x8d7   : > { %v14750_v37 = vpop.f32.mrf.mxu1 }
 0x8da   : > { %9144 = vmatmul.msk.f32.gmra.mxu1 %vm3169_vm6, %v14754_v40  ;;  %v14813_v40 = vadd.f32 %v14682_v33, %v6306_v24 }
 0x8dc   : > { %16627 = vst [vmem:[#allocation53_spill] sm:$0xff] %v14813_v40 }
 0x8df   : > { %v14758_v43 = vpop.f32.mrf.mxu1 }
 0x8e2   : > { %9145 = vmatmul.msk.f32.gmra.mxu1 %vm3169_vm6, %v14762_v51  ;;  %v14797_v51 = vadd.f32 %v14682_v33, %v6300_v11 }
 0x8e7   : > { %v14766_v61 = vpop.f32.mrf.mxu1 }
 0x8ea   : > { %9146 = vmatmul.msk.f32.gmra.mxu1 %vm3169_vm6, %v14769_v17 }
 0x8ef   : > { %v14773_v15 = vpop.f32.mrf.mxu1 }
 0x8f2   : > { %9147 = vmatmul.msk.f32.gmra.mxu1 %vm3169_vm6, %v14776_v44 }
 0x8f7   : > { %v14780_v30 = vpop.f32.mrf.mxu1 }
 0x8fa   : > { %9148 = vmatmul.msk.f32.gmra.mxu1 %vm3169_vm6, %v14783_v57 }
 0x8ff   : > { %v14787_v7 = vpop.f32.mrf.mxu1 }
 0x902   : > { %9149 = vmatmul.msk.f32.gmra.mxu1 %vm3169_vm6, %v14790_v13 }
 0x907   : > { %v14794_v53 = vpop.f32.mrf.mxu1 }
 0x90a   : > { %9150 = vmatmul.msk.f32.gmra.mxu1 %vm3169_vm6, %v14797_v51 }
 0x90f   : > { %v6465_v5 = vpop.f32.mrf.mxu1 }
 0x910   : > { %v6466_v17 = vadd.f32 %v14804_v29, %v6465_v5 }
 0x912   : > { %v9167_v14 = vmul.f32 -1.442695, %v6466_v17  ;;  %9151 = vmatmul.msk.f32.gmra.mxu1 %vm3169_vm6, %v14807_v9  ;;  %v14819_v17 = vadd.f32 %v14682_v33, %v6309_v4 }
 0x914   : > { %10076 = vpow2.f32 %v9167_v14  ;;  %16628 = vst [vmem:[#allocation54_spill] sm:$0xff] %v14819_v17 }
 0x917   : > { %v6468_v11 = vpop.f32.mrf.mxu1 }
 0x918   : > { %v6469_v57 = vadd.f32 %v14804_v29, %v6468_v11 }
 0x91a   : > { %v10077_v27 = vpop.eup %10076  ;;  %v9168_v41 = vmul.f32 -1.442695, %v6469_v57  ;;  %9152 = vmatmul.msk.f32.gmra.mxu1 %vm3169_vm6, %v14813_v40 }
 0x91b   : > { %v6657_v58 = vadd.f32 1.0, %v10077_v27  ;;  %v14826_v27 = vadd.f32 %v14682_v33, %v14702_v47 }
 0x91c   : > { %10078 = vpow2.f32 %v9168_v41 }
 0x91d   : > { %10080 = vrcp.f32 %v6657_v58  ;;  %16629 = vst [vmem:[#allocation55_spill] sm:$0xff] %v14826_v27  ;;  %vm6694_vm12 = vweird.f32 %v6657_v58 }
 0x91f   : > { %v6471_v5 = vpop.f32.mrf.mxu1 }
 0x920   : > { %v6472_v14 = vadd.f32 %v14804_v29, %v6471_v5 }
 0x922   : > { %v10079_v9 = vpop.eup %10078  ;;  %v9169_v38 = vmul.f32 -1.442695, %v6472_v14  ;;  %9153 = vmatmul.msk.f32.gmra.mxu1 %vm3169_vm6, %v14819_v17 }
 0x923   : > { %v10081_v24 = vpop.eup %10080  ;;  %v6658_v11 = vadd.f32 1.0, %v10079_v9 }
 0x924   : > { %10082 = vpow2.f32 %v9169_v38  ;;  %v6690_v57 = vmul.f32 %v10081_v24, %v6657_v58  ;;  %v14836_v38 = vadd.f32 %v14682_v33, %v14710_v21  ;;  %vm6695_vm14 = vweird.f32 %v10081_v24 }
 0x925   : > { %10084 = vrcp.f32 %v6658_v11  ;;  %v6713_v48 = vand.u32 2147483647, %v6658_v11  ;;  %vm6696_vm2 = vmor %vm6694_vm12, %vm6695_vm14  ;;  %vm6709_vm3 = vweird.f32 %v6658_v11  ;;  %v6715_v13 = vand.u32 2147483648, %v6658_v11 }
 0x926   : > { %v6691_v62 = vsub.f32 1.0, %v6690_v57  ;;  %16630 = vst [vmem:[#allocation56_spill] sm:$0xff] %v14836_v38  ;;  %v6698_v57 = vand.u32 2147483647, %v6657_v58 }
 0x927   : > { %v6474_v40 = vpop.f32.mrf.mxu1  ;;  %vm6714_vm0 = vcmp.eq.f32.partialorder %v6713_v48, 8.507059e+37 }
 0x928   : > { %v6475_v41 = vadd.f32 %v14804_v29, %v6474_v40  ;;  %v6692_v59 = vmul.f32 %v10081_v24, %v6691_v62  ;;  %vm6699_vm4 = vcmp.eq.f32.partialorder %v6698_v57, 8.507059e+37 }
 0x92a   : > { %v10083_v4 = vpop.eup %10082  ;;  %v9170_v5 = vmul.f32 -1.442695, %v6475_v41  ;;  %9154 = vmatmul.msk.f32.gmra.mxu1 %vm3169_vm6, %v14826_v27  ;;  %v6700_v41 = vand.u32 2147483648, %v6657_v58 }
 0x92b   : > { %v10085_v14 = vpop.eup %10084  ;;  %v14831_v17 = vadd.f32 1.0, %v10083_v4  ;;  %v6693_v4 = vadd.f32 %v10081_v24, %v6692_v59  ;;  %v6716_v59 = vor.u32 1.1754944e-38, %v6715_v13 }
 0x92c   : > { %v6705_v9 = vmul.f32 %v10085_v14, %v6658_v11  ;;  %10086 = vpow2.f32 %v9170_v5  ;;  %vm6710_vm15 = vweird.f32 %v10085_v14  ;;  %v6701_v5 = vor.u32 1.1754944e-38, %v6700_v41 }
 0x92d   : > { %10088 = vrcp.f32 %v14831_v17  ;;  %v6697_v62 = vsel %vm6696_vm2, %v10081_v24, %v6693_v4  ;;  %vm6711_vm5 = vmor %vm6709_vm3, %vm6710_vm15  ;;  %v14853_v41 = vadd.f32 %v14682_v33, %v14718_v23  ;;  %v14864_v23 = vadd.f32 %v14682_v33, %v14726_v49 }
 0x92e   : > { %v6706_v47 = vsub.f32 1.0, %v6705_v9  ;;  %v14841_v60 = vsel %vm6699_vm4, %v6701_v5, %v6697_v62  ;;  %vm6724_vm1 = vweird.f32 %v14831_v17 }
 0x92f   : > { %v6477_v40 = vpop.f32.mrf.mxu1  ;;  %16631 = vst [vmem:[#allocation57_spill] sm:$0xff] %v14841_v60 }
 0x930   : > { %v6478_v27 = vadd.f32 %v14804_v29, %v6477_v40  ;;  %v6707_v55 = vmul.f32 %v10085_v14, %v6706_v47  ;;  %v16633_v40 = vld [vmem:[#allocation43_spill] sm:$0xff]  ;;  %16635 = vst [vmem:[#allocation74_spill] sm:$0xff] %v14853_v41 }
 0x931   : > { %v7765_v24 = vmul.f32 %v16633_v40, %v14841_v60  ;;  %16636 = vst [vmem:[#allocation76_spill] sm:$0xff] %v14864_v23  ;;  %v6728_v40 = vand.u32 2147483647, %v14831_v17 }
 0x932   : > { %v10087_v31 = vpop.eup %10086  ;;  %v9171_v21 = vmul.f32 -1.442695, %v6478_v27  ;;  %9155 = vmatmul.msk.f32.gmra.mxu1 %vm3169_vm6, %v14836_v38  ;;  %v6708_v9 = vadd.f32 %v10085_v14, %v6707_v55  ;;  %v16634_v55 = vld [vmem:[#allocation45_spill] sm:$0xff] }
 0x933   : > { %v10089_v6 = vpop.eup %10088  ;;  %v6660_v58 = vadd.f32 1.0, %v10087_v31  ;;  %vm6729_vm11 = vcmp.eq.f32.partialorder %v6728_v40, 8.507059e+37 }
 0x934   : > { %10090 = vpow2.f32 %v9171_v21  ;;  %v6712_v47 = vsel %vm6711_vm5, %v10085_v14, %v6708_v9  ;;  %v6720_v27 = vmul.f32 %v10089_v6, %v14831_v17  ;;  %vm6725_vm7 = vweird.f32 %v10089_v6 }
 0x935   : > { %10092 = vrcp.f32 %v6660_v58  ;;  %v14844_v11 = vsel %vm6714_vm0, %v6716_v59, %v6712_v47  ;;  %vm6726_vm9 = vmor %vm6724_vm1, %vm6725_vm7  ;;  %vm6739_vm10 = vweird.f32 %v6660_v58 }
 0x936   : > { %16632 = vst [vmem:[#allocation58_spill] sm:$0xff] %v14844_v11  ;;  %v7766_v57 = vmul.f32 %v16634_v55, %v14844_v11  ;;  %v6721_v4 = vsub.f32 1.0, %v6720_v27 }
 0x937   : > { %v6480_v31 = vpop.f32.mrf.mxu1 }
 0x938   : > { %v6481_v13 = vadd.f32 %v14804_v29, %v6480_v31  ;;  %v9448_v14 = vpack.i.bf16 %v7766_v57, %v7765_v24  ;;  %v6722_v47 = vmul.f32 %v10089_v6, %v6721_v4  ;;  %v6730_v24 = vand.u32 2147483648, %v14831_v17 }
 0x93a   : > { %v10091_v48 = vpop.eup %10090  ;;  %v9172_v5 = vmul.f32 -1.442695, %v6481_v13  ;;  %9156 = vmatmul.msk.f32.gmra.mxu1 %vm3169_vm6, %v14853_v41  ;;  %9449 = vrot.lane.b32.xlu1 %v9448_v14, %s10281_s13  ;;  %v6723_v57 = vadd.f32 %v10089_v6, %v6722_v47  ;;  %v6743_v13 = vand.u32 2147483647, %v6660_v58  ;;  %v14870_v14 = vpop.f32.mrf.mxu0  ;;  %v6731_v49 = vor.u32 1.1754944e-38, %v6730_v24 }
 0x93b   : > { %v10093_v21 = vpop.eup %10092  ;;  %v14859_v62 = vadd.f32 1.0, %v10091_v48  ;;  %v6745_v48 = vand.u32 2147483648, %v6660_v58 }
 0x93c   : > { %v6735_v9 = vmul.f32 %v10093_v21, %v6660_v58  ;;  %10094 = vpow2.f32 %v9172_v5  ;;  %vm6740_vm8 = vweird.f32 %v10093_v21  ;;  %vm6744_vm14 = vcmp.eq.f32.partialorder %v6743_v13, 8.507059e+37 }
 0x93d   : > { %10096 = vrcp.f32 %v14859_v62  ;;  %vm6741_vm13 = vmor %vm6739_vm10, %vm6740_vm8  ;;  %v14893_v13 = vadd.f32 %v14682_v33, %v14734_v3  ;;  %vm6754_vm15 = vweird.f32 %v14859_v62 }
 0x93e   : > { %v6736_v59 = vsub.f32 1.0, %v6735_v9  ;;  %v6727_v9 = vsel %vm6726_vm9, %v10089_v6, %v6723_v57  ;;  %v16637_v6 = vld [vmem:[#allocation41_spill] sm:$0xff] }
 0x93f   : > { %v6483_v27 = vpop.f32.mrf.mxu1  ;;  %v14876_v47 = vsel %vm6729_vm11, %v6731_v49, %v6727_v9  ;;  %16641 = vst [vmem:[#allocation77_spill] sm:$0xff] %v14893_v13 }
 0x940   : > { %v6484_v55 = vadd.f32 %v14804_v29, %v6483_v27  ;;  %v6737_v31 = vmul.f32 %v10093_v21, %v6736_v59  ;;  %v6746_v59 = vor.u32 1.1754944e-38, %v6745_v48  ;;  %v7799_v40 = vmul.f32 %v16637_v6, %v14876_v47  ;;  %v16640_v48 = vld [vmem:[#allocation49_spill] sm:$0xff] }
 0x942   : > { %v10095_v4 = vpop.eup %10094  ;;  %v9173_v5 = vmul.f32 -1.442695, %v6484_v55  ;;  %9157 = vmatmul.msk.f32.gmra.mxu1 %vm3169_vm6, %v14864_v23  ;;  %v6738_v17 = vadd.f32 %v10093_v21, %v6737_v31  ;;  %v16638_v55 = vld [vmem:[#allocation13_spill] sm:$0xff]  ;;  %v16639_v31 = vld [vmem:[#allocation47_spill] sm:$0xff] }
 0x943   : > { %v10097_v38 = vpop.eup %10096  ;;  %v14874_v41 = vadd.f32 1.0, %v10095_v4  ;;  %v7767_v49 = vmul.f32 %v16639_v31, %v14876_v47  ;;  %v14899_v31 = vpop.f32.mrf.mxu0 }
 0x944   : > { %10098 = vpow2.f32 %v9173_v5  ;;  %v6742_v27 = vsel %vm6741_vm13, %v10093_v21, %v6738_v17  ;;  %v6750_v58 = vmul.f32 %v10097_v38, %v14859_v62  ;;  %vm6755_vm12 = vweird.f32 %v10097_v38 }
 0x945   : > { %10100 = vrcp.f32 %v14874_v41  ;;  %v14881_v24 = vsel %vm6744_vm14, %v6746_v59, %v6742_v27  ;;  %vm6756_vm3 = vmor %vm6754_vm15, %vm6755_vm12  ;;  %vm6769_vm4 = vweird.f32 %v14874_v41 }
 0x946   : > { %v7800_v57 = vmul.f32 %v16638_v55, %v14881_v24  ;;  %v7768_v4 = vmul.f32 %v16640_v48, %v14881_v24  ;;  %v6751_v27 = vsub.f32 1.0, %v6750_v58  ;;  %v14908_v58 = vadd.f32 %v14682_v33, %v14742_v25 }
 0x947   : > { %v6486_v21 = vpop.f32.mrf.mxu1 }
 0x948   : > { %v6487_v5 = vadd.f32 %v14804_v29, %v6486_v21  ;;  %v9458_v9 = vpack.i.bf16 %v7800_v57, %v7799_v40  ;;  %v9453_v17 = vpack.i.bf16 %v7768_v4, %v7767_v49  ;;  %16642 = vst [vmem:[#allocation7_spill] sm:$0xff] %v14908_v58  ;;  %v6752_v57 = vmul.f32 %v10097_v38, %v6751_v27 }
 0x949   : > { %v6758_v4 = vand.u32 2147483647, %v14859_v62  ;;  %v6760_v21 = vand.u32 2147483648, %v14859_v62  ;;  %v6775_v27 = vand.u32 2147483648, %v14874_v41 }
 0x94a   : > { %v10099_v59 = vpop.eup %10098  ;;  %v9174_v6 = vmul.f32 -1.442695, %v6487_v5  ;;  %9158 = vmatmul.msk.f32.gmra.mxu1 %vm3169_vm6, %v14893_v13  ;;  %9459 = vrot.lane.b32.xlu0 %v9458_v9, %s10282_s14  ;;  %v6753_v9 = vadd.f32 %v10097_v38, %v6752_v57 }
 0x94b   : > { %v10101_v55 = vpop.eup %10100  ;;  %v14901_v48 = vadd.f32 1.0, %v10099_v59  ;;  %9454 = vrot.lane.b32.xlu2 %v9453_v17, %s10281_s13  ;;  %v6773_v59 = vand.u32 2147483647, %v14874_v41  ;;  %v6761_v25 = vor.u32 1.1754944e-38, %v6760_v21  ;;  %vm6759_vm5 = vcmp.eq.f32.partialorder %v6758_v4, 8.507059e+37  ;;  %v16643_v4 = vld [vmem:[#allocation51_spill] sm:$0xff] }
 0x94c   : > { %v6765_v3 = vmul.f32 %v10101_v55, %v14874_v41  ;;  %10102 = vpow2.f32 %v9174_v6  ;;  %vm6770_vm2 = vweird.f32 %v10101_v55  ;;  %v6757_v23 = vsel %vm6756_vm3, %v10097_v38, %v6753_v9  ;;  %v14924_v41 = vpop.f32.mrf.mxu0 }
 0x94d   : > { %10104 = vrcp.f32 %v14901_v48  ;;  %vm6771_vm0 = vmor %vm6769_vm4, %vm6770_vm2  ;;  %vm6774_vm7 = vcmp.eq.f32.partialorder %v6773_v59, 8.507059e+37  ;;  %vm6784_vm8 = vweird.f32 %v14901_v48 }
 0x94e   : > { %v6766_v40 = vsub.f32 1.0, %v6765_v3 }
 0x94f   : > { %v6489_v49 = vpop.f32.mrf.mxu1 }
 0x950   : > { %v6490_v5 = vadd.f32 %v14804_v29, %v6489_v49  ;;  %v6767_v17 = vmul.f32 %v10101_v55, %v6766_v40  ;;  %v6762_v40 = vsel %vm6759_vm5, %v6761_v25, %v6757_v23  ;;  %v6776_v49 = vor.u32 1.1754944e-38, %v6775_v27  ;;  %v16646_v25 = vld [vmem:[#allocation19_spill] sm:$0xff] }
 0x951   : > { %v7769_v9 = vmul.f32 %v16643_v4, %v6762_v40 }
 0x952   : > { %v10103_v6 = vpop.eup %10102  ;;  %v9175_v3 = vmul.f32 -1.442695, %v6490_v5  ;;  %9159 = vmatmul.msk.f32.gmra.mxu1 %vm3169_vm6, %v14908_v58  ;;  %v6768_v62 = vadd.f32 %v10101_v55, %v6767_v17  ;;  %v16644_v17 = vld [vmem:[#allocation82_spill] sm:$0xff]  ;;  %v16645_v58 = vld [vmem:[#allocation81_spill] sm:$0xff] }
 0x953   : > { %v14919_v13 = vpop.eup %10104  ;;  %v14921_v57 = vadd.f32 1.0, %v10103_v6  ;;  %v7801_v23 = vmul.f32 %v16645_v58, %v6762_v40 }
 0x954   : > { %10106 = vpow2.f32 %v9175_v3  ;;  %v6772_v21 = vsel %vm6771_vm0, %v10101_v55, %v6768_v62  ;;  %v6780_v5 = vmul.f32 %v14919_v13, %v14901_v48  ;;  %v14935_v55 = vadd.f32 %v14682_v33, %v14750_v37 }
 0x955   : > { %10108 = vrcp.f32 %v14921_v57  ;;  %v6777_v38 = vsel %vm6774_vm7, %v6776_v49, %v6772_v21  ;;  %vm6785_vm1 = vweird.f32 %v14919_v13  ;;  %vm6799_vm11 = vweird.f32 %v14921_v57 }
 0x956   : > { %v7770_v6 = vmul.f32 %v16644_v17, %v6777_v38  ;;  %v7802_v60 = vmul.f32 %v16646_v25, %v6777_v38  ;;  %16647 = vst [vmem:[#allocation11_spill] sm:$0xff] %v14935_v55  ;;  %v6781_v56 = vsub.f32 1.0, %v6780_v5  ;;  %v7834_v58 = vmul.f32 %v14539_v20, %v6777_v38  ;;  %vm6786_vm10 = vmor %vm6784_vm8, %vm6785_vm1 }
 0x957   : > { %v6492_v27 = vpop.f32.mrf.mxu1  ;;  %v14949_v5 = vadd.f32 %v14682_v33, %v14758_v43  ;;  %v6803_v25 = vand.u32 2147483647, %v14921_v57 }
 0x958   : > { %v6493_v59 = vadd.f32 %v14804_v29, %v6492_v27  ;;  %v9463_v3 = vpack.i.bf16 %v7770_v6, %v7769_v9  ;;  %v9468_v62 = vpack.i.bf16 %v7802_v60, %v7801_v23  ;;  %v7833_v60 = vmul.f32 %v14517_v0, %v6762_v40 }
 0x959   : > { %16648 = vst [vmem:[#allocation79_spill] sm:$0xff] %v14949_v5  ;;  %v6782_v20 = vmul.f32 %v14919_v13, %v6781_v56  ;;  %v6788_v6 = vand.u32 2147483647, %v14901_v48  ;;  %v6790_v0 = vand.u32 2147483648, %v14901_v48  ;;  %v6805_v27 = vand.u32 2147483648, %v14921_v57 }
 0x95a   : > { %v10107_v11 = vpop.eup %10106  ;;  %v9176_v49 = vmul.f32 -1.442695, %v6493_v59  ;;  %9160 = vmatmul.msk.f32.gmra.mxu1 %vm3169_vm6, %v14935_v55  ;;  %9464 = vrot.lane.b32.xlu0 %v9463_v3, %s10281_s13  ;;  %v9473_v17 = vpack.i.bf16 %v7834_v58, %v7833_v60  ;;  %vm6804_vm12 = vcmp.eq.f32.partialorder %v6803_v25, 8.507059e+37 }
 0x95b   : > { %v10109_v21 = vpop.eup %10108  ;;  %v14942_v4 = vadd.f32 1.0, %v10107_v11  ;;  %9469 = vrot.lane.b32.xlu1 %v9468_v62, %s10282_s14  ;;  %v14954_v11 = vpop.f32.mrf.mxu0  ;;  %v6783_v40 = vadd.f32 %v14919_v13, %v6782_v20  ;;  %v6791_v56 = vor.u32 1.1754944e-38, %v6790_v0  ;;  %vm6789_vm13 = vcmp.eq.f32.partialorder %v6788_v6, 8.507059e+37 }
 0x95c   : > { %v6795_v37 = vmul.f32 %v10109_v21, %v14921_v57  ;;  %10110 = vpow2.f32 %v9176_v49  ;;  %vm6800_vm9 = vweird.f32 %v10109_v21  ;;  %v6806_v57 = vor.u32 1.1754944e-38, %v6805_v27 }
 0x95d   : > { %10112 = vrcp.f32 %v14942_v4  ;;  %v6787_v48 = vsel %vm6786_vm10, %v14919_v13, %v6783_v40  ;;  %vm6801_vm14 = vmor %vm6799_vm11, %vm6800_vm9  ;;  %v16649_v13 = vld [vmem:[#allocation62_spill] sm:$0xff]  ;;  %vm6814_vm2 = vweird.f32 %v14942_v4 }
 0x95e   : > { %v6796_v9 = vsub.f32 1.0, %v6795_v37  ;;  %v14970_v37 = vsel %vm6789_vm13, %v6791_v56, %v6787_v48 }
 0x95f   : > { %v6495_v38 = vpop.f32.mrf.mxu1  ;;  %v7803_v20 = vmul.f32 %v16649_v13, %v14970_v37  ;;  %v7835_v6 = vmul.f32 %v14561_v26, %v14970_v37 }
 0x960   : > { %v6496_v43 = vadd.f32 %v14804_v29, %v6495_v38  ;;  %v6797_v23 = vmul.f32 %v10109_v21, %v6796_v9 }
 0x962   : > { %v10111_v59 = vpop.eup %10110  ;;  %v9177_v3 = vmul.f32 -1.442695, %v6496_v43  ;;  %9161 = vmatmul.msk.f32.gmra.mxu1 %vm3169_vm6, %v14949_v5  ;;  %9474 = vrot.lane.b32.xlu0 %v9473_v17, %s10283_s15  ;;  %v6798_v62 = vadd.f32 %v10109_v21, %v6797_v23  ;;  %v14987_v43 = vadd.f32 %v14682_v33, %v14766_v61 }
 0x963   : > { %v10113_v49 = vpop.eup %10112  ;;  %v14968_v58 = vadd.f32 1.0, %v10111_v59  ;;  %v14990_v56 = vpop.f32.mrf.mxu0 }
 0x964   : > { %10114 = vpow2.f32 %v9177_v3  ;;  %v6802_v60 = vsel %vm6801_vm14, %v10109_v21, %v6798_v62  ;;  %v6810_v9 = vmul.f32 %v10113_v49, %v14942_v4  ;;  %16650 = vst [vmem:[#allocation80_spill] sm:$0xff] %v14987_v43  ;;  %v15002_v3 = vadd.f32 %v14682_v33, %v14773_v15 }
 0x965   : > { %10116 = vrcp.f32 %v14968_v58  ;;  %v14975_v17 = vsel %vm6804_vm12, %v6806_v57, %v6802_v60  ;;  %vm6815_vm15 = vweird.f32 %v10113_v49  ;;  %v6818_v60 = vand.u32 2147483647, %v14942_v4 }
 0x966   : > { %v7804_v38 = vmul.f32 %v13991_v45, %v14975_v17  ;;  %v7836_v0 = vmul.f32 %v14580_v12, %v14975_v17  ;;  %v6811_v59 = vsub.f32 1.0, %v6810_v9  ;;  %16651 = vst [vmem:[#allocation16_spill] sm:$0xff] %v15002_v3  ;;  %v6820_v9 = vand.u32 2147483648, %v14942_v4  ;;  %vm6816_vm4 = vmor %vm6814_vm2, %vm6815_vm15 }
 0x967   : > { %v6498_v21 = vpop.f32.mrf.mxu1  ;;  %vm6829_vm5 = vweird.f32 %v14968_v58  ;;  %vm6819_vm0 = vcmp.eq.f32.partialorder %v6818_v60, 8.507059e+37 }
 0x968   : > { %v6499_v40 = vadd.f32 %v14804_v29, %v6498_v21  ;;  %v9478_v23 = vpack.i.bf16 %v7804_v38, %v7803_v20  ;;  %v9483_v25 = vpack.i.bf16 %v7836_v0, %v7835_v6  ;;  %v6812_v62 = vmul.f32 %v10113_v49, %v6811_v59 }
 0x969   : > { %v6833_v6 = vand.u32 2147483647, %v14968_v58  ;;  %v6821_v15 = vor.u32 1.1754944e-38, %v6820_v9  ;;  %v6835_v0 = vand.u32 2147483648, %v14968_v58  ;;  %v15037_v9 = vadd.f32 %v14682_v33, %v14780_v30 }
 0x96a   : > { %v10115_v27 = vpop.eup %10114  ;;  %v9178_v45 = vmul.f32 -1.442695, %v6499_v40  ;;  %9162 = vmatmul.msk.f32.gmra.mxu1 %vm3169_vm6, %v14987_v43  ;;  %9479 = vrot.lane.b32.xlu2 %v9478_v23, %s10282_s14  ;;  %v6813_v20 = vadd.f32 %v10113_v49, %v6812_v62 }
 0x96b   : > { %v10117_v26 = vpop.eup %10116  ;;  %v14995_v12 = vadd.f32 1.0, %v10115_v27  ;;  %9484 = vrot.lane.b32.xlu1 %v9483_v25, %s10283_s15  ;;  %v15015_v27 = vpop.f32.mrf.mxu0  ;;  %vm6834_vm1 = vcmp.eq.f32.partialorder %v6833_v6, 8.507059e+37  ;;  %16652 = vst [vmem:[#allocation17_spill] sm:$0xff] %v15037_v9 }
 0x96c   : > { %v6825_v61 = vmul.f32 %v10117_v26, %v14968_v58  ;;  %10118 = vpow2.f32 %v9178_v45  ;;  %vm6830_vm3 = vweird.f32 %v10117_v26  ;;  %v6817_v23 = vsel %vm6816_vm4, %v10113_v49, %v6813_v20 }
 0x96d   : > { %10120 = vrcp.f32 %v14995_v12  ;;  %v15019_v45 = vsel %vm6819_vm0, %v6821_v15, %v6817_v23  ;;  %vm6831_vm7 = vmor %vm6829_vm5, %vm6830_vm3  ;;  %v15041_v20 = vmul.f32 %v14473_v8, %v14876_v47  ;;  %vm6844_vm9 = vweird.f32 %v14995_v12 }
 0x96e   : > { %v6826_v48 = vsub.f32 1.0, %v6825_v61  ;;  %v6836_v61 = vor.u32 1.1754944e-38, %v6835_v0  ;;  %v7805_v62 = vmul.f32 %v14005_v10, %v15019_v45  ;;  %v7837_v60 = vmul.f32 %v14870_v14, %v15019_v45 }
 0x96f   : > { %v6501_v57 = vpop.f32.mrf.mxu1  ;;  %16653 = vst [vmem:[#allocation18_spill] sm:$0xff] %v15041_v20 }
 0x970   : > { %v6502_v13 = vadd.f32 %v14804_v29, %v6501_v57  ;;  %v6827_v38 = vmul.f32 %v10117_v26, %v6826_v48 }
 0x972   : > { %v10119_v21 = vpop.eup %10118  ;;  %v9179_v40 = vmul.f32 -1.442695, %v6502_v13  ;;  %9163 = vmatmul.msk.f32.gmra.mxu1 %vm3169_vm6, %v15002_v3  ;;  %v6828_v4 = vadd.f32 %v10117_v26, %v6827_v38  ;;  %v16671_v3 = vld [vmem:[#allocation84_spill] sm:$0xff] }
 0x973   : > { %v15013_v25 = vpop.eup %10120  ;;  %v15017_v59 = vadd.f32 1.0, %v10119_v21 }
 0x974   : > { %10122 = vpow2.f32 %v9179_v40  ;;  %v6832_v58 = vsel %vm6831_vm7, %v10117_v26, %v6828_v4  ;;  %v6840_v48 = vmul.f32 %v15013_v25, %v14995_v12  ;;  %vm6845_vm8 = vweird.f32 %v15013_v25 }
 0x975   : > { %10124 = vrcp.f32 %v15017_v59  ;;  %v15025_v49 = vsel %vm6834_vm1, %v6836_v61, %v6832_v58  ;;  %v6848_v4 = vand.u32 2147483647, %v14995_v12  ;;  %v6850_v61 = vand.u32 2147483648, %v14995_v12  ;;  %vm6846_vm11 = vmor %vm6844_vm9, %vm6845_vm8 }
 0x976   : > { %v7806_v57 = vmul.f32 %v14019_v28, %v15025_v49  ;;  %v7838_v26 = vmul.f32 %v14899_v31, %v15025_v49  ;;  %v15046_v28 = vmul.f32 %v14495_v34, %v14881_v24  ;;  %v6841_v15 = vsub.f32 1.0, %v6840_v48  ;;  %v15057_v34 = vpop.f32.mrf.mxu0 }
 0x977   : > { %v6504_v13 = vpop.f32.mrf.mxu1  ;;  %v15062_v24 = vadd.f32 %v14682_v33, %v14787_v7  ;;  %v6863_v7 = vand.u32 2147483647, %v15017_v59  ;;  %vm6859_vm13 = vweird.f32 %v15017_v59  ;;  %vm6849_vm14 = vcmp.eq.f32.partialorder %v6848_v4, 8.507059e+37 }
 0x978   : > { %v6505_v10 = vadd.f32 %v14804_v29, %v6504_v13  ;;  %v9488_v38 = vpack.i.bf16 %v7806_v57, %v7805_v62  ;;  %v9493_v6 = vpack.i.bf16 %v7838_v26, %v7837_v60  ;;  %16654 = vst [vmem:[#allocation60_spill] sm:$0xff] %v15046_v28  ;;  %v6842_v40 = vmul.f32 %v15013_v25, %v6841_v15 }
 0x979   : > { %16655 = vst [vmem:[#allocation20_spill] sm:$0xff] %v15062_v24  ;;  %v6851_v57 = vor.u32 1.1754944e-38, %v6850_v61  ;;  %v6865_v60 = vand.u32 2147483648, %v15017_v59  ;;  %vm6864_vm15 = vcmp.eq.f32.partialorder %v6863_v7, 8.507059e+37 }
 0x97a   : > { %v10123_v14 = vpop.eup %10122  ;;  %v9180_v31 = vmul.f32 -1.442695, %v6505_v10  ;;  %9164 = vmatmul.msk.f32.gmra.mxu1 %vm3169_vm6, %v15037_v9  ;;  %9489 = vrot.lane.b32.xlu0 %v9488_v38, %s10282_s14  ;;  %v6843_v48 = vadd.f32 %v15013_v25, %v6842_v40  ;;  %v15275_v9 = vmul.f32 %v16671_v3, %v14975_v17 }
 0x97b   : > { %v10125_v30 = vpop.eup %10124  ;;  %v15053_v47 = vadd.f32 1.0, %v10123_v14  ;;  %9494 = vrot.lane.b32.xlu2 %v9493_v6, %s10283_s15  ;;  %v6866_v15 = vor.u32 1.1754944e-38, %v6865_v60 }
 0x97c   : > { %v6855_v0 = vmul.f32 %v10125_v30, %v15017_v59  ;;  %10126 = vpow2.f32 %v9180_v31  ;;  %vm6860_vm10 = vweird.f32 %v10125_v30  ;;  %v6847_v12 = vsel %vm6846_vm11, %v15013_v25, %v6843_v48 }
 0x97d   : > { %10128 = vrcp.f32 %v15053_v47  ;;  %v15077_v14 = vsel %vm6849_vm14, %v6851_v57, %v6847_v12  ;;  %vm6861_vm12 = vmor %vm6859_vm13, %vm6860_vm10  ;;  %vm6874_vm3 = vweird.f32 %v15053_v47 }
 0x97e   : > { %v6856_v21 = vsub.f32 1.0, %v6855_v0  ;;  %v7807_v25 = vmul.f32 %v14033_v50, %v15077_v14  ;;  %v7839_v40 = vmul.f32 %v14924_v41, %v15077_v14  ;;  %v15091_v4 = vpop.f32.mrf.mxu0 }
 0x97f   : > { %v6507_v23 = vpop.f32.mrf.mxu1 }
 0x980   : > { %v6508_v58 = vadd.f32 %v14804_v29, %v6507_v23  ;;  %v6857_v62 = vmul.f32 %v10125_v30, %v6856_v21 }
 0x982   : > { %v10127_v26 = vpop.eup %10126  ;;  %v9181_v13 = vmul.f32 -1.442695, %v6508_v58  ;;  %9165 = vmatmul.msk.f32.gmra.mxu1 %vm3169_vm6, %v15062_v24  ;;  %v6858_v10 = vadd.f32 %v10125_v30, %v6857_v62  ;;  %v15096_v62 = vadd.f32 %v14682_v33, %v14794_v53  ;;  %v6878_v53 = vand.u32 2147483647, %v15053_v47 }
 0x983   : > { %v10129_v38 = vpop.eup %10128  ;;  %v6670_v6 = vadd.f32 1.0, %v10127_v26 }
 0x984   : > { %10130 = vpow2.f32 %v9181_v13  ;;  %v6862_v31 = vsel %vm6861_vm12, %v10125_v30, %v6858_v10  ;;  %v6870_v59 = vmul.f32 %v10129_v38, %v15053_v47  ;;  %16656 = vst [vmem:[#allocation21_spill] sm:$0xff] %v15096_v62  ;;  %vm6875_vm2 = vweird.f32 %v10129_v38 }
 0x985   : > { %10132 = vrcp.f32 %v6670_v6  ;;  %v15081_v0 = vsel %vm6864_vm15, %v6866_v15, %v6862_v31  ;;  %v6880_v13 = vand.u32 2147483648, %v15053_v47  ;;  %v6893_v15 = vand.u32 2147483647, %v6670_v6  ;;  %vm6876_vm5 = vmor %vm6874_vm3, %vm6875_vm2 }
 0x986   : > { %v7808_v21 = vmul.f32 %v14044_v35, %v15081_v0  ;;  %v7840_v23 = vmul.f32 %v14954_v11, %v15081_v0  ;;  %v6871_v7 = vsub.f32 1.0, %v6870_v59  ;;  %v15107_v31 = vpop.f32.mrf.mxu0  ;;  %vm6879_vm0 = vcmp.eq.f32.partialorder %v6878_v53, 8.507059e+37 }
 0x987   : > { %v6510_v30 = vpop.f32.mrf.mxu1  ;;  %v6881_v59 = vor.u32 1.1754944e-38, %v6880_v13  ;;  %vm6889_vm7 = vweird.f32 %v6670_v6  ;;  %vm6894_vm8 = vcmp.eq.f32.partialorder %v6893_v15, 8.507059e+37  ;;  %vm8277_vm3 = vcmask 195584  }
 0x988   : > { %v6511_v61 = vadd.f32 %v14804_v29, %v6510_v30  ;;  %v9498_v58 = vpack.i.bf16 %v7808_v21, %v7807_v25  ;;  %v9503_v48 = vpack.i.bf16 %v7840_v23, %v7839_v40  ;;  %v6872_v26 = vmul.f32 %v10129_v38, %v6871_v7 }
 0x989   : > { %v6895_v25 = vand.u32 2147483648, %v6670_v6 }
 0x98a   : > { %v10131_v50 = vpop.eup %10130  ;;  %v9182_v35 = vmul.f32 -1.442695, %v6511_v61  ;;  %9499 = vrot.lane.b32.xlu0 %v9498_v58, %s10282_s14  ;;  %9504 = vrot.lane.b32.xlu2 %v9503_v48, %s10283_s15  ;;  %v6873_v12 = vadd.f32 %v10129_v38, %v6872_v26 }
 0x98b   : > { %v10133_v41 = vpop.eup %10132  ;;  %v6671_v11 = vadd.f32 1.0, %v10131_v50  ;;  %9166 = vmatmul.msk.f32.gmra.mxu1 %vm3169_vm6, %v15096_v62  ;;  %v6896_v48 = vor.u32 1.1754944e-38, %v6895_v25 }
 0x98c   : > { %v6885_v57 = vmul.f32 %v10133_v41, %v6670_v6  ;;  %10134 = vpow2.f32 %v9182_v35  ;;  %vm6890_vm4 = vweird.f32 %v10133_v41  ;;  %v6877_v40 = vsel %vm6876_vm5, %v10129_v38, %v6873_v12 }
 0x98d   : > { %10136 = vrcp.f32 %v6671_v11  ;;  %v6882_v58 = vsel %vm6879_vm0, %v6881_v59, %v6877_v40  ;;  %vm6891_vm1 = vmor %vm6889_vm7, %vm6890_vm4  ;;  %v6910_v53 = vand.u32 2147483648, %v6671_v11  ;;  %vm6904_vm10 = vweird.f32 %v6671_v11  ;;  %v16657_v40 = vld [vmem:[#allocation83_spill] sm:$0xff] }
 0x98e   : > { %v6886_v60 = vsub.f32 1.0, %v6885_v57  ;;  %v7809_v35 = vmul.f32 %v14058_v2, %v6882_v58  ;;  %v15121_v15 = vpop.f32.mrf.mxu0  ;;  %vm8310_vm4 = vcmask 261120  }
 0x98f   : > { %v15102_v33 = vpop.f32.mrf.mxu1 }
 0x990   : > { %v6887_v10 = vmul.f32 %v10133_v41, %v6886_v60  ;;  %v7841_v60 = vmul.f32 %v14990_v56, %v6882_v58  ;;  %v6911_v56 = vor.u32 1.1754944e-38, %v6910_v53 }
 0x992   : > { %v10135_v21 = vpop.eup %10134  ;;  %v6888_v23 = vadd.f32 %v10133_v41, %v6887_v10  ;;  %v6908_v10 = vand.u32 2147483647, %v6671_v11 }
 0x993   : > { %v10137_v30 = vpop.eup %10136  ;;  %v6672_v61 = vadd.f32 1.0, %v10135_v21 }
 0x994   : > { %v6900_v47 = vmul.f32 %v10137_v30, %v6671_v11  ;;  %v6892_v50 = vsel %vm6891_vm1, %v10133_v41, %v6888_v23  ;;  %vm6905_vm9 = vweird.f32 %v10137_v30  ;;  %vm6909_vm13 = vcmp.eq.f32.partialorder %v6908_v10, 8.507059e+37 }
 0x995   : > { %10138 = vrcp.f32 %v6672_v61  ;;  %v15109_v7 = vsel %vm6894_vm8, %v6896_v48, %v6892_v50  ;;  %vm6906_vm11 = vmor %vm6904_vm10, %vm6905_vm9  ;;  %v7771_v23 = vmul.f32 %v16657_v40, %v14970_v37  ;;  %v16658_v48 = vld [vmem:[#allocation46_spill] sm:$0xff]  ;;  %v6923_v11 = vand.u32 2147483647, %v6672_v61 }
 0x996   : > { %v6901_v57 = vsub.f32 1.0, %v6900_v47  ;;  %v7810_v38 = vmul.f32 %v14072_v19, %v15109_v7  ;;  %v7842_v6 = vmul.f32 %v15015_v27, %v15109_v7  ;;  %vm6919_vm12 = vweird.f32 %v6672_v61  ;;  %v15127_v53 = vpop.f32.mrf.mxu0 }
 0x997   : > { %v15117_v26 = vpop.f32.mrf.mxu1  ;;  %vm6924_vm2 = vcmp.eq.f32.partialorder %v6923_v11, 8.507059e+37 }
 0x998   : > { %v9508_v41 = vpack.i.bf16 %v7810_v38, %v7809_v35  ;;  %v9513_v13 = vpack.i.bf16 %v7842_v6, %v7841_v60  ;;  %v6902_v12 = vmul.f32 %v10137_v30, %v6901_v57  ;;  %v6925_v35 = vand.u32 2147483648, %v6672_v61 }
 0x99a   : > { %9509 = vrot.lane.b32.xlu0 %v9508_v41, %s10282_s14  ;;  %9514 = vrot.lane.b32.xlu2 %v9513_v13, %s10283_s15  ;;  %v6903_v2 = vadd.f32 %v10137_v30, %v6902_v12  ;;  %v16659_v13 = vld [vmem:[#allocation65_spill] sm:$0xff] }
 0x99b   : > { %v10139_v19 = vpop.eup %10138 }
 0x99c   : > { %v6915_v27 = vmul.f32 %v10139_v19, %v6672_v61  ;;  %v6907_v59 = vsel %vm6906_vm11, %v10137_v30, %v6903_v2  ;;  %vm6920_vm14 = vweird.f32 %v10139_v19  ;;  %v6926_v30 = vor.u32 1.1754944e-38, %v6925_v35  ;;  %v16660_v2 = vld [vmem:[#allocation89_spill] sm:$0xff] }
 0x99d   : > { %v6912_v25 = vsel %vm6909_vm13, %v6911_v56, %v6907_v59  ;;  %vm6921_vm15 = vmor %vm6919_vm12, %vm6920_vm14  ;;  %v7777_v56 = vmul.f32 %v16660_v2, %v6882_v58 }
 0x99e   : > { %v6916_v21 = vsub.f32 1.0, %v6915_v27  ;;  %v7779_v47 = vmul.f32 %v16658_v48, %v6912_v25  ;;  %v7811_v37 = vmul.f32 %v14081_v36, %v6912_v25  ;;  %v16661_v27 = vld [vmem:[#allocation28_spill] sm:$0xff]  ;;  %v15138_v36 = vpop.f32.mrf.mxu0 }
 0x99f   : > { %v6519_v50 = vpop.f32.mrf.mxu1 }
 0x9a0   : > { %v9518_v57 = vpack.i.bf16 %v7779_v47, %v7771_v23  ;;  %v6917_v38 = vmul.f32 %v10139_v19, %v6916_v21  ;;  %v7843_v21 = vmul.f32 %v15057_v34, %v6912_v25 }
 0x9a2   : > { %9519 = vrot.lane.b32.xlu1 %v9518_v57, %s10281_s13  ;;  %v6918_v60 = vadd.f32 %v10139_v19, %v6917_v38 }
 0x9a4   : > { %v6922_v6 = vsel %vm6921_vm15, %v10139_v19, %v6918_v60 }
 0x9a5   : > { %v6927_v41 = vsel %vm6924_vm2, %v6926_v30, %v6922_v6  ;;  %v9455_v47 = vpop.permute.xlu2 %9454 }
 0x9a6   : > { %v7812_v12 = vmul.f32 %v16659_v13, %v6927_v41  ;;  %v7780_v59 = vmul.f32 %v16661_v27, %v6927_v41  ;;  %v7844_v61 = vmul.f32 %v15091_v4, %v6927_v41  ;;  %v15140_v35 = vpop.f32.mrf.mxu0  ;;  %v9457_v57 = vunpack.i.h.bf16 %v9455_v47 }
 0x9a7   : > { %v6522_v10 = vpop.f32.mrf.mxu1  ;;  %v9456_v34 = vunpack.i.l.bf16 %v9455_v47  ;;  %v6514_v13 = vadd.f32 %v14804_v29, %v15102_v33 }
 0x9a8   : > { %v9528_v40 = vpack.i.bf16 %v7812_v12, %v7811_v37  ;;  %v9523_v23 = vpack.i.bf16 %v7777_v56, %v7780_v59  ;;  %v9533_v19 = vpack.i.bf16 %v7844_v61, %v7843_v21  ;;  %v8248_v11 = vsel %vm3169_vm6, %v14706_v54, %v9457_v57 }
 0x9a9   : > { %v8247_v60 = vsel %vm3169_vm6, %v14698_v1, %v9456_v34  ;;  %v6517_v12 = vadd.f32 %v14804_v29, %v15117_v26  ;;  %v6520_v1 = vadd.f32 %v14804_v29, %v6519_v50  ;;  %v9183_v56 = vmul.f32 -1.442695, %v6514_v13 }
 0x9aa   : > { %9529 = vrot.lane.b32.xlu0 %v9528_v40, %s10282_s14  ;;  %9524 = vrot.lane.b32.xlu2 %v9523_v23, %s10281_s13  ;;  %v6523_v33 = vadd.f32 %v14804_v29, %v6522_v10 }
 0x9ab   : > { %9534 = vrot.lane.b32.xlu1 %v9533_v19, %s10283_s15  ;;  %v9184_v59 = vmul.f32 -1.442695, %v6517_v12  ;;  %v9185_v21 = vmul.f32 -1.442695, %v6520_v1 }
 0x9ac   : > { %v15160_v27 = vpop.permute.xlu1 %9449  ;;  %v9186_v57 = vmul.f32 -1.442695, %v6523_v33 }
 0x9ad   : > { %16664 = vst [vmem:[#allocation61_spill] sm:$0xff] %v15160_v27 }
 0x9ae   : > { %v15157_v54 = vpop.f32.mrf.mxu0 }
 0x9af   : > { %v6525_v48 = vpop.f32.mrf.mxu1 }
 0x9b6   : > { %v15166_v47 = vpop.f32.mrf.mxu0 }
 0x9b7   : > { %v6528_v58 = vpop.f32.mrf.mxu1 }
 0x9bc   : > { %v9460_v4 = vpop.permute.xlu0 %9459 }
 0x9bd   : > { %v9462_v25 = vunpack.i.h.bf16 %v9460_v4  ;;  %v9461_v38 = vunpack.i.l.bf16 %v9460_v4 }
 0x9bf   : > { %v15147_v30 = vsel %vm8277_vm3, %v8247_v60, %v9461_v38  ;;  %v15150_v6 = vsel %vm8277_vm3, %v8248_v11, %v9462_v25  ;;  %v6531_v41 = vpop.f32.mrf.mxu1  ;;  %v6526_v38 = vadd.f32 %v14804_v29, %v6525_v48 }
 0x9c0   : > { %16662 = vst [vmem:[#allocation64_spill] sm:$0xff] %v15147_v30  ;;  %v6532_v37 = vadd.f32 %v14804_v29, %v6531_v41 }
 0x9c1   : > { %16663 = vst [vmem:[#allocation23_spill] sm:$0xff] %v15150_v6 }
 0x9c2   : > { %v9189_v2 = vmul.f32 -1.442695, %v6532_v37 }
 0x9c4   : > { %10140 = vpow2.f32 %v9189_v2 }
 0x9c5   : > { %10142 = vpow2.f32 %v9183_v56  ;;  %v15179_v56 = vld [vmem:[%s16062_s5 + $0x48] ss:$0 sm:$0xff] }
 0x9c6   : > { %10144 = vpow2.f32 %v9184_v59 }
 0x9c7   : > { %v6534_v61 = vpop.f32.mrf.mxu1  ;;  %10146 = vpow2.f32 %v9185_v21 }
 0x9c8   : > { %v6535_v40 = vadd.f32 %v14804_v29, %v6534_v61 }
 0x9ca   : > { %v10141_v23 = vpop.eup %10140  ;;  %v9190_v26 = vmul.f32 -1.442695, %v6535_v40 }
 0x9cb   : > { %v15164_v19 = vadd.f32 1.0, %v10141_v23  ;;  %v10143_v60 = vpop.eup %10142 }
 0x9cc   : > { %10148 = vpow2.f32 %v9190_v26  ;;  %v9465_v50 = vpop.permute.xlu0 %9464  ;;  %v10145_v12 = vpop.eup %10144  ;;  %v15187_v33 = vadd.f32 1.0, %v10143_v60 }
 0x9cd   : > { %10150 = vrcp.f32 %v15164_v19  ;;  %v9467_v34 = vunpack.i.h.bf16 %v9465_v50  ;;  %v9466_v4 = vunpack.i.l.bf16 %v9465_v50  ;;  %v9470_v25 = vpop.permute.xlu1 %9469  ;;  %v10147_v48 = vpop.eup %10146  ;;  %v15189_v26 = vadd.f32 1.0, %v10145_v12 }
 0x9ce   : > { %v9472_v11 = vunpack.i.h.bf16 %v9470_v25  ;;  %v9471_v10 = vunpack.i.l.bf16 %v9470_v25  ;;  %10152 = vpow2.f32 %v9186_v57  ;;  %v15196_v25 = vpop.f32.mrf.mxu0  ;;  %vm7024_vm0 = vweird.f32 %v15164_v19 }
 0x9cf   : > { %v8250_v41 = vsel %vm3169_vm6, %v14722_v18, %v9467_v34  ;;  %v8249_v37 = vsel %vm3169_vm6, %v14714_v46, %v9466_v4  ;;  %v6537_v13 = vpop.f32.mrf.mxu1  ;;  %v9187_v18 = vmul.f32 -1.442695, %v6526_v38  ;;  %v6529_v46 = vadd.f32 %v15179_v56, %v6528_v58 }
 0x9d0   : > { %v8283_v2 = vsel %vm8277_vm3, %v8250_v41, %v9472_v11  ;;  %v8282_v1 = vsel %vm8277_vm3, %v8249_v37, %v9471_v10  ;;  %v6538_v29 = vadd.f32 %v15179_v56, %v6537_v13  ;;  %v15192_v34 = vadd.f32 1.0, %v10147_v48 }
 0x9d1   : > { %v9188_v38 = vmul.f32 -1.442695, %v6529_v46 }
 0x9d2   : > { %v10149_v59 = vpop.eup %10148  ;;  %v9191_v21 = vmul.f32 -1.442695, %v6538_v29 }
 0x9d3   : > { %v15182_v61 = vpop.eup %10150  ;;  %v15185_v40 = vadd.f32 1.0, %v10149_v59 }
 0x9d4   : > { %10154 = vpow2.f32 %v9191_v21  ;;  %v9475_v23 = vpop.permute.xlu0 %9474  ;;  %v7020_v4 = vmul.f32 %v15182_v61, %v15164_v19  ;;  %v10153_v58 = vpop.eup %10152  ;;  %vm7025_vm5 = vweird.f32 %v15182_v61 }
 0x9d5   : > { %10156 = vrcp.f32 %v15185_v40  ;;  %v9477_v50 = vunpack.i.h.bf16 %v9475_v23  ;;  %v9476_v57 = vunpack.i.l.bf16 %v9475_v23  ;;  %v15208_v13 = vadd.f32 1.0, %v10153_v58  ;;  %vm15232_vm7 = vmor %vm7024_vm0, %vm7025_vm5 }
 0x9d6   : > { %10158 = vpow2.f32 %v9187_v18  ;;  %v7021_v12 = vsub.f32 1.0, %v7020_v4  ;;  %v7028_v4 = vand.u32 2147483647, %v15164_v19  ;;  %v7030_v58 = vand.u32 2147483648, %v15164_v19 }
 0x9d7   : > { %v15199_v11 = vsel %vm8310_vm4, %v8282_v1, %v9476_v57  ;;  %v15202_v10 = vsel %vm8310_vm4, %v8283_v2, %v9477_v50  ;;  %v6540_v60 = vpop.f32.mrf.mxu1  ;;  %10160 = vrcp.f32 %v15187_v33  ;;  %vm7039_vm1 = vweird.f32 %v15185_v40 }
 0x9d8   : > { %16665 = vst [vmem:[#allocation22_spill] sm:$0xff] %v15199_v11  ;;  %v6541_v41 = vadd.f32 %v15179_v56, %v6540_v60  ;;  %10162 = vrcp.f32 %v15189_v26  ;;  %v7022_v46 = vmul.f32 %v15182_v61, %v7021_v12  ;;  %v7043_v8 = vand.u32 2147483647, %v15185_v40 }
 0x9d9   : > { %16666 = vst [vmem:[#allocation43_spill] sm:$0xff] %v15202_v10  ;;  %10164 = vrcp.f32 %v15192_v34  ;;  %vm7029_vm9 = vcmp.eq.f32.partialorder %v7028_v4, 8.507059e+37 }
 0x9da   : > { %v10155_v37 = vpop.eup %10154  ;;  %v9192_v29 = vmul.f32 -1.442695, %v6541_v41  ;;  %10166 = vpow2.f32 %v9188_v38  ;;  %v7023_v41 = vadd.f32 %v15182_v61, %v7022_v46  ;;  %v7045_v46 = vand.u32 2147483648, %v15185_v40 }
 0x9db   : > { %v10157_v48 = vpop.eup %10156  ;;  %v15210_v1 = vadd.f32 1.0, %v10155_v37  ;;  %vm7044_vm11 = vcmp.eq.f32.partialorder %v7043_v8, 8.507059e+37 }
 0x9dc   : > { %v10159_v2 = vpop.eup %10158  ;;  %v7035_v59 = vmul.f32 %v10157_v48, %v15185_v40  ;;  %10168 = vpow2.f32 %v9192_v29  ;;  %v15230_v29 = vpop.f32.mrf.mxu0  ;;  %vm7040_vm8 = vweird.f32 %v10157_v48  ;;  %v7027_v19 = vsel %vm15232_vm7, %v15182_v61, %v7023_v41 }
 0x9dd   : > { %10170 = vrcp.f32 %v15210_v1  ;;  %v15214_v18 = vpop.eup %10160  ;;  %v15220_v50 = vadd.f32 1.0, %v10159_v2  ;;  %vm7041_vm10 = vmor %vm7039_vm1, %vm7040_vm8  ;;  %v7046_v43 = vor.u32 1.1754944e-38, %v7045_v46  ;;  %v15253_v41 = vpop.permute.xlu2 %9479  ;;  %v16669_v2 = vld [vmem:[#allocation70_spill] sm:$0xff]  ;;  %vm7054_vm14 = vweird.f32 %v15210_v1 }
 0x9de   : > { %10172 = vrcp.f32 %v15208_v13  ;;  %v7036_v21 = vsub.f32 1.0, %v7035_v59  ;;  %v15218_v23 = vpop.eup %10162  ;;  %v7031_v59 = vor.u32 1.1754944e-38, %v7030_v58  ;;  %v15251_v61 = vmul.f32 %v15214_v18, %v15187_v33 }
 0x9df   : > { %v6543_v57 = vpop.f32.mrf.mxu1  ;;  %v15225_v38 = vpop.eup %10164  ;;  %10174 = vrcp.f32 %v15220_v50 }
 0x9e0   : > { %v6544_v60 = vadd.f32 %v15179_v56, %v6543_v57  ;;  %v7037_v37 = vmul.f32 %v10157_v48, %v7036_v21  ;;  %v10167_v12 = vpop.eup %10166  ;;  %v7032_v62 = vsel %vm7029_vm9, %v7031_v59, %v7027_v19  ;;  %v15270_v8 = vmul.f32 %v15225_v38, %v15192_v34 }
 0x9e1   : > { %v15260_v40 = vadd.f32 1.0, %v10167_v12  ;;  %v7787_v59 = vmul.f32 %v16669_v2, %v7032_v62 }
 0x9e2   : > { %v10169_v27 = vpop.eup %10168  ;;  %v9193_v57 = vmul.f32 -1.442695, %v6544_v60  ;;  %v7038_v21 = vadd.f32 %v10157_v48, %v7037_v37 }
 0x9e3   : > { %v15242_v5 = vpop.eup %10170  ;;  %v15245_v55 = vadd.f32 1.0, %v10169_v27  ;;  %v15258_v27 = vmul.f32 %v15218_v23, %v15189_v26 }
 0x9e4   : > { %v15247_v58 = vpop.eup %10172  ;;  %10176 = vpow2.f32 %v9193_v57  ;;  %v7042_v60 = vsel %vm7041_vm10, %v10157_v48, %v7038_v21  ;;  %v7050_v4 = vmul.f32 %v15242_v5, %v15210_v1  ;;  %v16670_v57 = vld [vmem:[#allocation24_spill] sm:$0xff]  ;;  %v7819_v21 = vmul.f32 %v14218_v63, %v7032_v62  ;;  %v15289_v6 = vpop.f32.mrf.mxu0 }
 0x9e5   : > { %10178 = vrcp.f32 %v15245_v55  ;;  %v7047_v48 = vsel %vm7044_vm11, %v7046_v43, %v7042_v60  ;;  %v15277_v43 = vpop.eup %10174  ;;  %v15281_v60 = vmul.f32 %v15247_v58, %v15208_v13  ;;  %vm7055_vm13 = vweird.f32 %v15242_v5 }
 0x9e6   : > { %v7788_v19 = vmul.f32 %v16670_v57, %v7047_v48  ;;  %v7820_v46 = vmul.f32 %v14248_v22, %v7047_v48  ;;  %v16672_v22 = vld [vmem:[#allocation85_spill] sm:$0xff]  ;;  %10180 = vrcp.f32 %v15260_v40  ;;  %vm7056_vm15 = vmor %vm7054_vm14, %vm7055_vm13  ;;  %vm7069_vm2 = vweird.f32 %v15245_v55 }
 0x9e7   : > { %v6546_v37 = vpop.f32.mrf.mxu1  ;;  %v15285_v57 = vmul.f32 %v16672_v22, %v15019_v45  ;;  %v16673_v45 = vld [vmem:[#allocation86_spill] sm:$0xff]  ;;  %vm6995_vm11 = vweird.f32 %v15277_v43  ;;  %vm6994_vm13 = vweird.f32 %v15220_v50 }
 0x9e8   : > { %v6547_v12 = vadd.f32 %v15179_v56, %v6546_v37  ;;  %v9538_v2 = vpack.i.bf16 %v7788_v19, %v7787_v59  ;;  %v9543_v63 = vpack.i.bf16 %v7820_v46, %v7819_v21  ;;  %v7051_v37 = vsub.f32 1.0, %v7050_v4  ;;  %v16674_v19 = vld [vmem:[#allocation87_spill] sm:$0xff] }
 0x9e9   : > { %v15298_v59 = vmul.f32 %v16673_v45, %v15025_v49  ;;  %v15302_v21 = vmul.f32 %v16674_v19, %v15077_v14  ;;  %v15315_v49 = vpop.permute.xlu2 %9494  ;;  %v7852_v14 = vmul.f32 %v15196_v25, %v7047_v48  ;;  %v7851_v45 = vmul.f32 %v15166_v47, %v7032_v62 }
 0x9ea   : > { %v10177_v24 = vpop.eup %10176  ;;  %v9194_v17 = vmul.f32 -1.442695, %v6547_v12  ;;  %9539 = vrot.lane.b32.xlu2 %v9538_v2, %s10281_s13  ;;  %9544 = vrot.lane.b32.xlu1 %v9543_v63, %s10282_s14  ;;  %v15313_v63 = vmul.f32 %v15277_v43, %v15220_v50  ;;  %16676 = vst [vmem:[#allocation45_spill] sm:$0xff] %v15315_v49  ;;  %v7058_v19 = vand.u32 2147483647, %v15210_v1 }
 0x9eb   : > { %v10179_v3 = vpop.eup %10178  ;;  %v15292_v11 = vadd.f32 1.0, %v10177_v24  ;;  %v16675_v24 = vld [vmem:[#allocation88_spill] sm:$0xff]  ;;  %v7073_v62 = vand.u32 2147483647, %v15245_v55  ;;  %v9548_v47 = vpack.i.bf16 %v7852_v14, %v7851_v45 }
 0x9ec   : > { %v7065_v46 = vmul.f32 %v10179_v3, %v15245_v55  ;;  %10182 = vpow2.f32 %v9194_v17  ;;  %v15308_v12 = vmul.f32 %v16675_v24, %v15081_v0  ;;  %v7052_v17 = vmul.f32 %v15242_v5, %v7051_v37  ;;  %v15325_v10 = vpop.eup %10180 }
 0x9ed   : > { %10184 = vrcp.f32 %v15292_v11  ;;  %v7060_v24 = vand.u32 2147483648, %v15210_v1  ;;  %vm7070_vm12 = vweird.f32 %v10179_v3  ;;  %vm7059_vm5 = vcmp.eq.f32.partialorder %v7058_v19, 8.507059e+37 }
 0x9ee   : > { %v7066_v22 = vsub.f32 1.0, %v7065_v46  ;;  %v7053_v25 = vadd.f32 %v15242_v5, %v7052_v17  ;;  %v7075_v46 = vand.u32 2147483648, %v15245_v55  ;;  %v15335_v17 = vmul.f32 %v15325_v10, %v15260_v40  ;;  %vm7071_vm0 = vmor %vm7069_vm2, %vm7070_vm12 }
 0x9ef   : > { %v6549_v0 = vpop.f32.mrf.mxu1  ;;  %v7061_v37 = vor.u32 1.1754944e-38, %v7060_v24  ;;  %vm7074_vm7 = vcmp.eq.f32.partialorder %v7073_v62, 8.507059e+37  ;;  %v16678_v24 = vld [vmem:[#allocation31_spill] sm:$0xff]  ;;  %vm7084_vm8 = vweird.f32 %v15292_v11  ;;  %vm15401_vm12 = vmor %vm6994_vm13, %vm6995_vm11  ;;  %vm6964_vm13 = vweird.f32 %v15192_v34 }
 0x9f0   : > { %v6550_v30 = vadd.f32 %v15179_v56, %v6549_v0  ;;  %v7067_v48 = vmul.f32 %v10179_v3, %v7066_v22  ;;  %v7057_v1 = vsel %vm7056_vm15, %v15242_v5, %v7053_v25  ;;  %v7076_v45 = vor.u32 1.1754944e-38, %v7075_v46  ;;  %v15342_v5 = vpop.f32.mrf.mxu0 }
 0x9f1   : > { %v7062_v14 = vsel %vm7059_vm5, %v7061_v37, %v7057_v1  ;;  %v6991_v0 = vsub.f32 1.0, %v15313_v63  ;;  %v15345_v19 = vpop.permute.xlu2 %9504  ;;  %v16680_v63 = vld [vmem:[#allocation44_spill] sm:$0xff] }
 0x9f2   : > { %v10183_v2 = vpop.eup %10182  ;;  %v9195_v4 = vmul.f32 -1.442695, %v6550_v30  ;;  %v7068_v49 = vadd.f32 %v10179_v3, %v7067_v48  ;;  %9549 = vrot.lane.b32.xlu2 %v9548_v47, %s10283_s15  ;;  %16677 = vst [vmem:[#allocation41_spill] sm:$0xff] %v15345_v19  ;;  %v7789_v25 = vmul.f32 %v16678_v24, %v7062_v14  ;;  %v16679_v47 = vld [vmem:[#allocation14_spill] sm:$0xff]  ;;  %v7821_v46 = vmul.f32 %v14272_v16, %v7062_v14 }
 0x9f3   : > { %v10185_v20 = vpop.eup %10184  ;;  %v15337_v22 = vadd.f32 1.0, %v10183_v2  ;;  %v15356_v1 = vmul.f32 %v16680_v63, %v15109_v7  ;;  %v7090_v16 = vand.u32 2147483648, %v15292_v11  ;;  %v6992_v7 = vmul.f32 %v15277_v43, %v6991_v0 }
 0x9f4   : > { %v7080_v55 = vmul.f32 %v10185_v20, %v15292_v11  ;;  %10186 = vpow2.f32 %v9195_v4  ;;  %v7072_v30 = vsel %vm7071_vm0, %v10179_v3, %v7068_v49  ;;  %vm7085_vm1 = vweird.f32 %v10185_v20 }
 0x9f5   : > { %10188 = vrcp.f32 %v15337_v22  ;;  %v7077_v2 = vsel %vm7074_vm7, %v7076_v45, %v7072_v30  ;;  %v6970_v3 = vand.u32 2147483648, %v15192_v34  ;;  %vm7086_vm9 = vmor %vm7084_vm8, %vm7085_vm1  ;;  %vm7099_vm15 = vweird.f32 %v15337_v22 }
 0x9f6   : > { %v7081_v48 = vsub.f32 1.0, %v7080_v55  ;;  %v7790_v37 = vmul.f32 %v16679_v47, %v7077_v2  ;;  %v7822_v4 = vmul.f32 %v14293_v52, %v7077_v2  ;;  %v7088_v47 = vand.u32 2147483647, %v15292_v11 }
 0x9f7   : > { %v6552_v62 = vpop.f32.mrf.mxu1  ;;  %vm7010_vm7 = vweird.f32 %v15325_v10  ;;  %vm6965_vm1 = vweird.f32 %v15225_v38 }
 0x9f8   : > { %v6553_v45 = vadd.f32 %v15179_v56, %v6552_v62  ;;  %v9553_v30 = vpack.i.bf16 %v7790_v37, %v7789_v25  ;;  %v9558_v55 = vpack.i.bf16 %v7822_v4, %v7821_v46  ;;  %v7082_v24 = vmul.f32 %v10185_v20, %v7081_v48 }
 0x9f9   : > { %v7854_v48 = vmul.f32 %v15289_v6, %v7077_v2  ;;  %v7091_v46 = vor.u32 1.1754944e-38, %v7090_v16  ;;  %v16681_v4 = vsub.f32 1.0, %v15270_v8  ;;  %vm7089_vm10 = vcmp.eq.f32.partialorder %v7088_v47, 8.507059e+37  ;;  %v15378_v0 = vpop.permute.xlu2 %9514  ;;  %v16683_v8 = vld [vmem:[#allocation73_spill] sm:$0xff] }
 0x9fa   : > { %v10187_v49 = vpop.eup %10186  ;;  %v9196_v19 = vmul.f32 -1.442695, %v6553_v45  ;;  %9554 = vrot.lane.b32.xlu0 %v9553_v30, %s10281_s13  ;;  %v7083_v28 = vadd.f32 %v10185_v20, %v7082_v24  ;;  %9559 = vrot.lane.b32.xlu2 %v9558_v55, %s10282_s14  ;;  %v15375_v45 = vpop.permute.xlu0 %9489  ;;  %v7853_v6 = vmul.f32 %v15230_v29, %v7062_v14  ;;  %v15385_v24 = vadd.f32 %v15277_v43, %v6992_v7 }
 0x9fb   : > { %v10189_v25 = vpop.eup %10188  ;;  %v15366_v37 = vadd.f32 1.0, %v10187_v49  ;;  %v6962_v62 = vmul.f32 %v15225_v38, %v16681_v4  ;;  %16682 = vst [vmem:[#allocation13_spill] sm:$0xff] %v15375_v45  ;;  %v15381_v49 = vor.u32 1.1754944e-38, %v6970_v3  ;;  %v7000_v47 = vand.u32 2147483648, %v15220_v50 }
 0x9fc   : > { %v7095_v63 = vmul.f32 %v10189_v25, %v15337_v22  ;;  %10190 = vpow2.f32 %v9196_v19  ;;  %v7087_v11 = vsel %vm7086_vm9, %v10185_v20, %v7083_v28  ;;  %v7750_v19 = vpop.f32.mrf.mxu0  ;;  %v6998_v28 = vand.u32 2147483647, %v15220_v50 }
 0x9fd   : > { %10192 = vrcp.f32 %v15366_v37  ;;  %v7092_v2 = vsel %vm7089_vm10, %v7091_v46, %v7087_v11  ;;  %v15392_v29 = vadd.f32 %v15225_v38, %v6962_v62  ;;  %v9563_v3 = vpack.i.bf16 %v7854_v48, %v7853_v6 }
 0x9fe   : > { %v7096_v30 = vsub.f32 1.0, %v7095_v63  ;;  %v7791_v55 = vmul.f32 %v16683_v8, %v7092_v2  ;;  %vm7100_vm14 = vweird.f32 %v10189_v25  ;;  %v7103_v4 = vand.u32 2147483647, %v15337_v22 }
 0x9ff   : > { %v6555_v20 = vpop.f32.mrf.mxu1  ;;  %v7105_v63 = vand.u32 2147483648, %v15337_v22  ;;  %vm7101_vm2 = vmor %vm7099_vm15, %vm7100_vm14  ;;  %v7118_v52 = vand.u32 2147483647, %v15366_v37  ;;  %vm15420_vm0 = vcmp.eq.f32.partialorder %v6998_v28, 8.507059e+37  ;;  %v7855_v28 = vmul.f32 %v15342_v5, %v7092_v2 }
 0xa00   : > { %v6556_v14 = vadd.f32 %v15179_v56, %v6555_v20  ;;  %v9568_v16 = vpack.i.bf16 %v7791_v55, %v15298_v59  ;;  %v7097_v7 = vmul.f32 %v10189_v25, %v7096_v30  ;;  %v7001_v55 = vor.u32 1.1754944e-38, %v7000_v47 }
 0xa01   : > { %v7106_v8 = vor.u32 1.1754944e-38, %v7105_v63  ;;  %vm7104_vm5 = vcmp.eq.f32.partialorder %v7103_v4, 8.507059e+37  ;;  %v7015_v47 = vand.u32 2147483648, %v15260_v40  ;;  %v7823_v20 = vmul.f32 %v14315_v39, %v7092_v2 }
 0xa02   : > { %v10191_v62 = vpop.eup %10190  ;;  %v9197_v11 = vmul.f32 -1.442695, %v6556_v14  ;;  %9564 = vrot.lane.b32.xlu0 %v9563_v3, %s10283_s15  ;;  %9569 = vrot.lane.b32.xlu1 %v9568_v16, %s10281_s13  ;;  %v7098_v59 = vadd.f32 %v10189_v25, %v7097_v7  ;;  %v15416_v3 = vpop.permute.xlu0 %9499  ;;  %vm7009_vm9 = vweird.f32 %v15260_v40  ;;  %vm7114_vm10 = vweird.f32 %v15366_v37 }
 0xa03   : > { %v10193_v6 = vpop.eup %10192  ;;  %v15412_v30 = vadd.f32 1.0, %v10191_v62  ;;  %16686 = vst [vmem:[#allocation47_spill] sm:$0xff] %v15416_v3  ;;  %vm15436_vm11 = vcmp.eq.f32.partialorder %v7118_v52, 8.507059e+37 }
 0xa04   : > { %v7110_v14 = vmul.f32 %v10193_v6, %v15366_v37  ;;  %10194 = vpow2.f32 %v9197_v11  ;;  %v7102_v16 = vsel %vm7101_vm2, %v10189_v25, %v7098_v59  ;;  %v9525_v22 = vpop.permute.xlu2 %9524  ;;  %v7120_v25 = vand.u32 2147483648, %v15366_v37  ;;  %v16689_v59 = vld [vmem:[#allocation33_spill] sm:$0xff]  ;;  %v7753_v39 = vpop.f32.mrf.mxu0 }
 0xa05   : > { %10196 = vrcp.f32 %v15412_v30  ;;  %v7107_v7 = vsel %vm7104_vm5, %v7106_v8, %v7102_v16  ;;  %v9527_v4 = vunpack.i.h.bf16 %v9525_v22  ;;  %v9526_v11 = vunpack.i.l.bf16 %v9525_v22 }
 0xa06   : > { %v7111_v63 = vsub.f32 1.0, %v7110_v14  ;;  %v7824_v46 = vmul.f32 %v14332_v32, %v7107_v7  ;;  %v7792_v8 = vmul.f32 %v16689_v59, %v7107_v7  ;;  %v7856_v3 = vmul.f32 %v7750_v19, %v7107_v7 }
 0xa07   : > { %vm7115_vm8 = vweird.f32 %v10193_v6  ;;  %v7121_v19 = vor.u32 1.1754944e-38, %v7120_v25  ;;  %vm7129_vm14 = vweird.f32 %v15412_v30  ;;  %v15450_v52 = vsel %vm3169_vm6, %v14797_v51, %v9526_v11 }
 0xa08   : > { %v6558_v16 = vpop.f32.mrf.mxu1  ;;  %v9578_v48 = vpack.i.bf16 %v7824_v46, %v7823_v20  ;;  %v7112_v14 = vmul.f32 %v10193_v6, %v7111_v63  ;;  %v9573_v45 = vpack.i.bf16 %v15275_v9, %v7792_v8  ;;  %v7133_v46 = vand.u32 2147483647, %v15412_v30  ;;  %vm7116_vm15 = vmor %vm7114_vm10, %vm7115_vm8 }
 0xa09   : > { %v6559_v32 = vadd.f32 %v15179_v56, %v6558_v16  ;;  %v8257_v9 = vsel %vm3169_vm6, %v14776_v44, %v9527_v4  ;;  %v9583_v59 = vpack.i.bf16 %v7856_v3, %v7855_v28  ;;  %v16692_v44 = vsub.f32 1.0, %v15335_v17  ;;  %v16696_v28 = vld [vmem:[#allocation75_spill] sm:$0xff]  ;;  %vm15505_vm10 = vmor %vm6964_vm13, %vm6965_vm1 }
 0xa0a   : > { %v10195_v5 = vpop.eup %10194  ;;  %9579 = vrot.lane.b32.xlu0 %v9578_v48, %s10282_s14  ;;  %v7113_v2 = vadd.f32 %v10193_v6, %v7112_v14  ;;  %9574 = vrot.lane.b32.xlu1 %v9573_v45, %s10281_s13  ;;  %v15456_v48 = vpop.permute.xlu1 %9484  ;;  %v7135_v4 = vand.u32 2147483648, %v15412_v30  ;;  %vm15469_vm2 = vcmp.eq.f32.partialorder %v7133_v46, 8.507059e+37  ;;  %v16695_v17 = vsel %vm15401_vm12, %v15277_v43, %v15385_v24  ;;  %vm7011_vm12 = vmor %vm7009_vm9, %vm7010_vm7 }
 0xa0b   : > { %v10197_v56 = vpop.eup %10196  ;;  %v15444_v20 = vadd.f32 1.0, %v10195_v5  ;;  %v9198_v7 = vmul.f32 -1.442695, %v6559_v32  ;;  %v7007_v51 = vmul.f32 %v15325_v10, %v16692_v44  ;;  %v16697_v22 = vunpack.i.l.bf16 %v15378_v0 }
 0xa0c   : > { %v7125_v63 = vmul.f32 %v10197_v56, %v15412_v30  ;;  %v15459_v25 = vpop.permute.xlu0 %9509  ;;  %v7117_v8 = vsel %vm7116_vm15, %v10193_v6, %v7113_v2  ;;  %v15480_v6 = vsel %vm15420_vm0, %v7001_v55, %v16695_v17  ;;  %vm7130_vm5 = vweird.f32 %v10197_v56 }
 0xa0d   : > { %10198 = vrcp.f32 %v15444_v20  ;;  %v9511_v45 = vunpack.i.l.bf16 %v15459_v25  ;;  %v7122_v37 = vsel %vm15436_vm11, %v7121_v19, %v7117_v8  ;;  %v7148_v32 = vand.u32 2147483647, %v15444_v20  ;;  %v7756_v8 = vpop.f32.mrf.mxu0  ;;  %vm15519_vm9 = vmor %vm7129_vm14, %vm7130_vm5 }
 0xa0e   : > { %v7126_v11 = vsub.f32 1.0, %v7125_v63  ;;  %10200 = vpow2.f32 %v9198_v7  ;;  %v7793_v14 = vmul.f32 %v16696_v28, %v7122_v37  ;;  %v7150_v2 = vand.u32 2147483648, %v15444_v20 }
 0xa0f   : > { %v8290_v3 = vsel %vm8277_vm3, %v8257_v9, %v9511_v45  ;;  %v7008_v43 = vadd.f32 %v15325_v10, %v7007_v51  ;;  %v7136_v24 = vor.u32 1.1754944e-38, %v7135_v4  ;;  %v7825_v55 = vmul.f32 %v14349_v42, %v7122_v37 }
 0xa10   : > { %v15488_v5 = vsel %vm8310_vm4, %v8290_v3, %v16697_v22  ;;  %v7127_v50 = vmul.f32 %v10197_v56, %v7126_v11  ;;  %v7857_v62 = vmul.f32 %v7753_v39, %v7122_v37  ;;  %v7016_v19 = vor.u32 1.1754944e-38, %v7015_v47 }
 0xa11   : > { %vm7144_vm0 = vweird.f32 %v15444_v20  ;;  %v7012_v9 = vsel %vm7011_vm12, %v15325_v10, %v7008_v43  ;;  %v16698_v7 = vand.u32 2147483647, %v15260_v40  ;;  %v16701_v39 = vand.u32 2147483647, %v15192_v34  ;;  %v16706_v34 = vld [vmem:[#allocation90_spill] sm:$0xff] }
 0xa12   : > { %v7128_v46 = vadd.f32 %v10197_v56, %v7127_v50  ;;  %9584 = vrot.lane.b32.xlu1 %v9583_v59, %s10283_s15  ;;  %v9588_v40 = vpack.i.bf16 %v7793_v14, %v15308_v12  ;;  %v7151_v44 = vor.u32 1.1754944e-38, %v7150_v2  ;;  %v15528_v45 = vmul.f32 %v16706_v34, %v15480_v6  ;;  %v16709_v12 = vld [vmem:[#allocation71_spill] sm:$0xff]  ;;  %v16715_v10 = vld [vmem:[#allocation50_spill] sm:$0xff] }
 0xa13   : > { %vm7014_vm8 = vcmp.eq.f32.partialorder %v16698_v7, 8.507059e+37  ;;  %vm15511_vm7 = vcmp.eq.f32.partialorder %v16701_v39, 8.507059e+37  ;;  %v10199_v63 = vpop.eup %10198  ;;  %vm15533_vm1 = vcmp.eq.f32.partialorder %v7148_v32, 8.507059e+37  ;;  %v6967_v3 = vsel %vm15505_vm10, %v15225_v38, %v15392_v29  ;;  %v16710_v50 = vld [vmem:[#allocation27_spill] sm:$0xff] }
 0xa14   : > { %v15524_v51 = vsel %vm7014_vm8, %v7016_v19, %v7012_v9  ;;  %v10201_v37 = vpop.eup %10200  ;;  %v7140_v4 = vmul.f32 %v10199_v63, %v15444_v20  ;;  %v9520_v59 = vpop.permute.xlu1 %9519  ;;  %v7132_v30 = vsel %vm15519_vm9, %v10197_v56, %v7128_v46  ;;  %v16711_v19 = vld [vmem:[#allocation6_spill] sm:$0xff]  ;;  %vm8376_vm11 = vcmask 334848   ;;  %v16712_v9 = vld [vmem:[#allocation32_spill] sm:$0xff] }
 0xa15   : > { %v15539_v17 = vmul.f32 %v16709_v12, %v15524_v51  ;;  %v15545_v28 = vadd.f32 1.0, %v10201_v37  ;;  %v9522_v14 = vunpack.i.h.bf16 %v9520_v59  ;;  %v9521_v22 = vunpack.i.l.bf16 %v9520_v59  ;;  %v16717_v12 = vld [vmem:[#allocation30_spill] sm:$0xff] }
 0xa16   : > { %v7137_v56 = vsel %vm15469_vm2, %v7136_v24, %v7132_v30  ;;  %v7141_v32 = vsub.f32 1.0, %v7140_v4  ;;  %vm7145_vm13 = vweird.f32 %v10199_v63  ;;  %v16713_v29 = vsub.f32 1.0, %v15281_v60  ;;  %v16716_v60 = vld [vmem:[#allocation69_spill] sm:$0xff] }
 0xa17   : > { %v7826_v2 = vmul.f32 %v16710_v50, %v7137_v56  ;;  %v7858_v43 = vmul.f32 %v7756_v8, %v7137_v56  ;;  %v15551_v46 = vmul.f32 %v16711_v19, %v7137_v56  ;;  %10202 = vrcp.f32 %v15545_v28  ;;  %vm15586_vm15 = vmor %vm7144_vm0, %vm7145_vm13 }
 0xa18   : > { %v8251_v38 = vsel %vm3169_vm6, %v16712_v9, %v9521_v22  ;;  %v6977_v7 = vmul.f32 %v15247_v58, %v16713_v29  ;;  %vm8343_vm14 = vcmask 326656   ;;  %v16714_v16 = vunpack.i.l.bf16 %v15253_v41 }
 0xa19   : > { %v9598_v42 = vpack.i.bf16 %v7826_v2, %v7825_v55  ;;  %v9603_v39 = vpack.i.bf16 %v7858_v43, %v7857_v62  ;;  %v7142_v8 = vmul.f32 %v10199_v63, %v7141_v32  ;;  %v8259_v34 = vsel %vm3169_vm6, %v16715_v10, %v9522_v14 }
 0xa1a   : > { %v15562_v24 = vsel %vm8277_vm3, %v8251_v38, %v16714_v16  ;;  %v7165_v37 = vand.u32 2147483648, %v15545_v28  ;;  %v9638_v4 = vpack.i.bf16 %v15539_v17, %v15528_v45  ;;  %v15571_v59 = vmul.f32 %v16716_v60, %v15480_v6  ;;  %9589 = vrot.lane.b32.xlu1 %v9588_v40, %s10281_s13  ;;  %v16749_v45 = vld [vmem:[#allocation9_spill] sm:$0xff] }
 0xa1b   : > { %9599 = vrot.lane.b32.xlu0 %v9598_v42, %s10282_s14  ;;  %9604 = vrot.lane.b32.xlu2 %v9603_v39, %s10283_s15  ;;  %v7143_v30 = vadd.f32 %v10199_v63, %v7142_v8  ;;  %v9593_v55 = vpack.i.bf16 %v15285_v57, %v15551_v46  ;;  %v7163_v62 = vand.u32 2147483647, %v15545_v28  ;;  %v15580_v14 = vmul.f32 %v16717_v12, %v15524_v51  ;;  %v16727_v12 = vld [vmem:[#allocation72_spill] sm:$0xff] }
 0xa1c   : > { %v6972_v56 = vsel %vm15511_vm7, %v15381_v49, %v6967_v3  ;;  %v6978_v57 = vadd.f32 %v15247_v58, %v6977_v7  ;;  %vm6979_vm2 = vweird.f32 %v15208_v13  ;;  %vm6980_vm5 = vweird.f32 %v15247_v58  ;;  %v9530_v32 = vpop.permute.xlu0 %9529  ;;  %v7759_v49 = vpop.f32.mrf.mxu0  ;;  %v16720_v7 = vld [vmem:[#allocation78_spill] sm:$0xff]  ;;  %vm15632_vm7 = vmpackc.low %vm8376_vm11, %vm8376_vm11 }
 0xa1d   : > { %v7147_v40 = vsel %vm15586_vm15, %v10199_v63, %v7143_v30  ;;  %vm7159_vm12 = vweird.f32 %v15545_v28  ;;  %v7166_v20 = vor.u32 1.1754944e-38, %v7165_v37  ;;  %v9618_v50 = vpack.i.bf16 %v15580_v14, %v15571_v59  ;;  %v10203_v47 = vpop.eup %10202  ;;  %v9535_v19 = vpop.permute.xlu1 %9534  ;;  %vm15615_vm8 = vmor %vm6979_vm2, %vm6980_vm5  ;;  %v16751_v14 = vld [vmem:[#allocation22_spill] sm:$0xff] }
 0xa1e   : > { %v6983_v2 = vand.u32 2147483647, %v15208_v13  ;;  %v9532_v3 = vunpack.i.h.bf16 %v9530_v32  ;;  %v9531_v43 = vunpack.i.l.bf16 %v9530_v32  ;;  %v7152_v46 = vsel %vm15533_vm1, %v7151_v44, %v7147_v40 }
 0xa1f   : > { %v6985_v9 = vand.u32 2147483648, %v15208_v13  ;;  %v7155_v63 = vmul.f32 %v10203_v47, %v15545_v28  ;;  %v9537_v38 = vunpack.i.h.bf16 %v9535_v19  ;;  %v9536_v29 = vunpack.i.l.bf16 %v9535_v19 }
 0xa20   : > { %v7795_v16 = vmul.f32 %v16720_v7, %v7152_v46  ;;  %vm15607_vm0 = vcmp.eq.f32.partialorder %v7163_v62, 8.507059e+37  ;;  %v8292_v44 = vsel %vm8277_vm3, %v8259_v34, %v9531_v43  ;;  %v8293_v11 = vsel %vm8277_vm3, %v15450_v52, %v9532_v3  ;;  %v16729_v43 = vld [vmem:[#allocation26_spill] sm:$0xff] }
 0xa21   : > { %vm7160_vm10 = vweird.f32 %v10203_v47  ;;  %v6982_v8 = vsel %vm15615_vm8, %v15247_v58, %v6978_v57  ;;  %v7156_v10 = vsub.f32 1.0, %v7155_v63  ;;  %v8326_v37 = vsel %vm8310_vm4, %v8293_v11, %v9537_v38  ;;  %v16732_v63 = vld [vmem:[#allocation10_spill] sm:$0xff]  ;;  %v16733_v11 = vld [vmem:[#allocation29_spill] sm:$0xff] }
 0xa22   : > { %v8325_v60 = vsel %vm8310_vm4, %v8292_v44, %v9536_v29  ;;  %v9608_v13 = vpack.i.bf16 %v7795_v16, %v15356_v1  ;;  %v8359_v30 = vsel %vm8343_vm14, %v8326_v37, 1.0  ;;  %v7859_v34 = vmul.f32 %v7759_v49, %v7152_v46  ;;  %9594 = vrot.lane.b32.xlu1 %v9593_v55, %s10281_s13  ;;  %v16728_v1 = vld [vmem:[#allocation12_spill] sm:$0xff]  ;;  %vm7161_vm1 = vmor %vm7159_vm12, %vm7160_vm10 }
 0xa23   : > { %v8358_v62 = vsel %vm8343_vm14, %v8325_v60, 1.0  ;;  %v7827_v58 = vmul.f32 %v16727_v12, %v7152_v46  ;;  %v7157_v57 = vmul.f32 %v10203_v47, %v7156_v10  ;;  %vm6984_vm9 = vcmp.eq.f32.partialorder %v6983_v2, 8.507059e+37 }
 0xa24   : > { %v9313_v22 = vpack.c.bf16 %v8359_v30, %v8358_v62  ;;  %9609 = vrot.lane.b32.xlu2 %v9608_v13, %s10281_s13  ;;  %v6986_v32 = vor.u32 1.1754944e-38, %v6985_v9  ;;  %v15640_v40 = vmul.f32 %v16728_v1, %v6972_v56  ;;  %v15644_v3 = vmul.f32 %v15140_v35, %v15480_v6 }
 0xa25   : > { %v15648_v49 = vmul.f32 %v15157_v54, %v15524_v51  ;;  %v15651_v19 = vmul.f32 %v16729_v43, %v6972_v56  ;;  %v7158_v2 = vadd.f32 %v10203_v47, %v7157_v57  ;;  %v15656_v55 = vmul.f32 %v15127_v53, %v6972_v56  ;;  %v16731_v54 = vld [vmem:[#allocation68_spill] sm:$0xff]  ;;  %v16740_v43 = vld [vmem:[#allocation66_spill] sm:$0xff] }
 0xa26   : > { %9314 = vmatpush.bf16.msk.msra.mxu3 %vm15632_vm7, %v9313_v22  ;;  %v6987_v46 = vsel %vm6984_vm9, %v6986_v32, %v6982_v8  ;;  %v16730_v9 = vsub.f32 1.0, %v15251_v61  ;;  %vm6934_vm11 = vweird.f32 %v15187_v33  ;;  %vm6935_vm13 = vweird.f32 %v15214_v18  ;;  %v7762_v61 = vpop.f32.mrf.mxu0 }
 0xa27   : > { %v7784_v6 = vmul.f32 %v16731_v54, %v6987_v46  ;;  %v9643_v51 = vpack.i.bf16 %v15648_v49, %v15644_v3  ;;  %v7816_v38 = vmul.f32 %v16732_v63, %v6987_v46  ;;  %v7848_v29 = vmul.f32 %v15138_v36, %v6987_v46  ;;  %vm15679_vm15 = vmor %vm6934_vm11, %vm6935_vm13  ;;  %v16739_v3 = vld [vmem:[#allocation36_spill] sm:$0xff]  ;;  %v16743_v54 = vld [vmem:[#allocation18_spill] sm:$0xff] }
 0xa28   : > { %v6932_v35 = vmul.f32 %v15214_v18, %v16730_v9  ;;  %v7162_v7 = vsel %vm7161_vm1, %v10203_v47, %v7158_v2  ;;  %v16734_v47 = vld [vmem:[#allocation35_spill] sm:$0xff]  ;;  %v6938_v37 = vand.u32 2147483647, %v15187_v33  ;;  %v6940_v42 = vand.u32 2147483648, %v15187_v33 }
 0xa29   : > { %v7167_v28 = vsel %vm15607_vm0, %v7166_v20, %v7162_v7  ;;  %v9653_v56 = vpack.i.bf16 %v7784_v6, %v15640_v40  ;;  %v9663_v16 = vpack.i.bf16 %v7816_v38, %v15651_v19  ;;  %v9668_v39 = vpack.i.bf16 %v7848_v29, %v15656_v55  ;;  %v16741_v2 = vld [vmem:[#allocation67_spill] sm:$0xff]  ;;  %v16747_v38 = vld [vmem:[#allocation57_spill] sm:$0xff] }
 0xa2a   : > { %v6933_v53 = vadd.f32 %v15214_v18, %v6932_v35  ;;  %v7860_v44 = vmul.f32 %v7762_v61, %v7167_v28  ;;  %v7828_v36 = vmul.f32 %v16733_v11, %v7167_v28  ;;  %v7796_v8 = vmul.f32 %v16734_v47, %v7167_v28  ;;  %v16748_v29 = vld [vmem:[#allocation37_spill] sm:$0xff]  ;;  %v16752_v61 = vld [vmem:[#allocation43_spill] sm:$0xff] }
 0xa2b   : > { %v16737_v60 = vsub.f32 1.0, %v15258_v27  ;;  %vm6949_vm2 = vweird.f32 %v15189_v26  ;;  %vm6950_vm5 = vweird.f32 %v15218_v23  ;;  %v6941_v22 = vor.u32 1.1754944e-38, %v6940_v42 }
 0xa2c   : > { %v6937_v20 = vsel %vm15679_vm15, %v15214_v18, %v6933_v53  ;;  %v9628_v30 = vpack.i.bf16 %v7860_v44, %v7859_v34  ;;  %v9623_v62 = vpack.i.bf16 %v7828_v36, %v7827_v58  ;;  %v9613_v12 = vpack.i.bf16 %v15302_v21, %v7796_v8  ;;  %vm6951_vm0 = vmor %vm6949_vm2, %vm6950_vm5  ;;  %v16738_v58 = vld [vmem:[#allocation25_spill] sm:$0xff] }
 0xa2d   : > { %v6947_v13 = vmul.f32 %v15218_v23, %v16737_v60  ;;  %v6953_v32 = vand.u32 2147483647, %v15189_v26  ;;  %v6955_v18 = vand.u32 2147483648, %v15189_v26  ;;  %vm6939_vm12 = vcmp.eq.f32.partialorder %v6938_v37, 8.507059e+37  ;;  %v16753_v37 = vld [vmem:[#allocation77_spill] sm:$0xff] }
 0xa2e   : > { %9629 = vrot.lane.b32.xlu2 %v9628_v30, %s10283_s15  ;;  %9624 = vrot.lane.b32.xlu0 %v9623_v62, %s10282_s14  ;;  %v6942_v33 = vsel %vm6939_vm12, %v6941_v22, %v6937_v20  ;;  %v7797_v7 = vmul.f32 %v16748_v29, %v16747_v38  ;;  %v15736_v28 = vsel %vm8343_vm14, %v16752_v61, 1.0  ;;  %v16754_v20 = vld [vmem:[#allocation76_spill] sm:$0xff] }
 0xa2f   : > { %v6948_v57 = vadd.f32 %v15218_v23, %v6947_v13  ;;  %9614 = vrot.lane.b32.xlu1 %v9613_v12, %s10281_s13  ;;  %v6956_v21 = vor.u32 1.1754944e-38, %v6955_v18  ;;  %vm6954_vm8 = vcmp.eq.f32.partialorder %v6953_v32, 8.507059e+37  ;;  %v7813_v1 = vmul.f32 %v16738_v58, %v6942_v33 }
 0xa30   : > { %v7845_v40 = vmul.f32 %v15107_v31, %v6942_v33  ;;  %v7781_v19 = vmul.f32 %v16740_v43, %v6942_v33  ;;  %v16745_v31 = vld [vmem:[#allocation58_spill] sm:$0xff]  ;;  %v9512_v58 = vunpack.i.h.bf16 %v15459_v25 }
 0xa31   : > { %v6952_v27 = vsel %vm6951_vm0, %v15218_v23, %v6948_v57  ;;  %v16742_v23 = vld [vmem:[#allocation60_spill] sm:$0xff]  ;;  %v7830_v17 = vmul.f32 %v16749_v45, %v16745_v31 }
 0xa32   : > { %v6957_v34 = vsel %vm6954_vm8, %v6956_v21, %v6952_v27  ;;  %v16744_v6 = vpack.i.bf16 %v16742_v23, %v16743_v54 }
 0xa33   : > { %v7814_v26 = vmul.f32 %v16739_v3, %v6957_v34  ;;  %v7846_v49 = vmul.f32 %v15121_v15, %v6957_v34  ;;  %v7782_v46 = vmul.f32 %v16741_v2, %v6957_v34  ;;  %v16746_v15 = vld [vmem:[#allocation8_spill] sm:$0xff] }
 0xa34   : > { %v7798_v63 = vmul.f32 %v16746_v15, %v16745_v31  ;;  %v16758_v15 = vld [vmem:[#allocation45_spill] sm:$0xff] }
 0xa35   : > { %v9678_v55 = vpack.i.bf16 %v7814_v26, %v7813_v1  ;;  %v9683_v9 = vpack.i.bf16 %v7846_v49, %v7845_v40  ;;  %v9673_v35 = vpack.i.bf16 %v7782_v46, %v7781_v19  ;;  %v9517_v1 = vunpack.i.h.bf16 %v15378_v0  ;;  %v16755_v40 = vld [vmem:[#allocation48_spill] sm:$0xff]  ;;  %v16756_v0 = vld [vmem:[#allocation38_spill] sm:$0xff] }
 0xa36   : > { %9634 = vrot.lane.b32.xlu2 %v16744_v6, %s10283_s15  ;;  %9639 = vrot.lane.b32.xlu0 %v9638_v4, %s10282_s14  ;;  %v9648_v53 = vpack.i.bf16 %v7798_v63, %v7797_v7  ;;  %v16750_v4 = vld [vmem:[#allocation39_spill] sm:$0xff]  ;;  %v8356_v19 = vsel %vm8343_vm14, %v15488_v5, 1.0  ;;  %v9486_v46 = vunpack.i.l.bf16 %v15456_v48  ;;  %v9497_v63 = vunpack.i.h.bf16 %v16758_v15 }
 0xa37   : > { %9619 = vrot.lane.b32.xlu1 %v9618_v50, %s10281_s13  ;;  %v7829_v59 = vmul.f32 %v16750_v4, %v16747_v38  ;;  %v15732_v50 = vsel %vm8343_vm14, %v16751_v14, 1.0  ;;  %v16759_v7 = vld [vmem:[#allocation59_spill] sm:$0xff] }
 0xa38   : > { %v8317_v5 = vsel %vm8310_vm4, %v15562_v24, %v9486_v46  ;;  %v16760_v14 = vld [vmem:[#allocation47_spill] sm:$0xff] }
 0xa39   : > { %v9658_v44 = vpack.i.bf16 %v7830_v17, %v7829_v59  ;;  %v9482_v17 = vunpack.i.h.bf16 %v15253_v41  ;;  %v9502_v61 = vunpack.i.h.bf16 %v16760_v14  ;;  %v9501_v46 = vunpack.i.l.bf16 %v16760_v14  ;;  %v16766_v14 = vld [vmem:[#allocation20_spill] sm:$0xff] }
 0xa3e   : > { %9649 = vrot.lane.b32.xlu2 %v9648_v53, %s10282_s14  ;;  %9654 = vrot.lane.b32.xlu0 %v9653_v56, %s10281_s13 }
 0xa3f   : > { %9644 = vrot.lane.b32.xlu1 %v9643_v51, %s10283_s15  ;;  %v9328_v51 = vpack.c.bf16 %v15736_v28, %v15732_v50 }
 0xa44   : > { %v9540_v56 = vpop.permute.xlu2 %9539 }
 0xa45   : > { %v9542_v11 = vunpack.i.h.bf16 %v9540_v56  ;;  %v9541_v36 = vunpack.i.l.bf16 %v9540_v56 }
 0xa46   : > { %9664 = vrot.lane.b32.xlu2 %v9663_v16, %s10282_s14  ;;  %9669 = vrot.lane.b32.xlu0 %v9668_v39, %s10283_s15 }
 0xa47   : > { %9659 = vrot.lane.b32.xlu1 %v9658_v44, %s10283_s15  ;;  %v8268_v39 = vsel %vm3169_vm6, %v16753_v37, %v9542_v11  ;;  %v8267_v42 = vsel %vm3169_vm6, %v16754_v20, %v9541_v36  ;;  %v16761_v44 = vld [vmem:[#allocation41_spill] sm:$0xff]  ;;  %v16762_v36 = vld [vmem:[#allocation40_spill] sm:$0xff]  ;;  %v15816_v20 = vsel %vm8343_vm14, %v8317_v5, 1.0 }
 0xa48   : > { %v9507_v56 = vunpack.i.h.bf16 %v16761_v44 }
 0xa4c   : > { %v9550_v47 = vpop.permute.xlu2 %9549 }
 0xa4d   : > { %v9552_v60 = vunpack.i.h.bf16 %v9550_v47  ;;  %v9551_v13 = vunpack.i.l.bf16 %v9550_v47 }
 0xa4e   : > { %9679 = vrot.lane.b32.xlu2 %v9678_v55, %s10282_s14  ;;  %9684 = vrot.lane.b32.xlu0 %v9683_v9, %s10283_s15 }
 0xa4f   : > { %9674 = vrot.lane.b32.xlu1 %v9673_v35, %s10281_s13  ;;  %v16757_v35 = vld [vmem:[#allocation13_spill] sm:$0xff] }
 0xa50   : > { %v9492_v23 = vunpack.i.h.bf16 %v16757_v35 }
 0xa54   : > { %v15758_v57 = vpop.permute.xlu2 %9559 }
 0xa5c   : > { %v9545_v8 = vpop.permute.xlu1 %9544 }
 0xa5d   : > { %v9547_v10 = vunpack.i.h.bf16 %v9545_v8  ;;  %v9546_v16 = vunpack.i.l.bf16 %v9545_v8  ;;  %v9487_v8 = vunpack.i.h.bf16 %v15456_v48 }
 0xa5f   : > { %v8301_v30 = vsel %vm8277_vm3, %v8268_v39, %v9547_v10  ;;  %v8300_v62 = vsel %vm8277_vm3, %v8267_v42, %v9546_v16 }
 0xa60   : > { %v15753_v12 = vsel %vm8310_vm4, %v8301_v30, %v9552_v60  ;;  %v15756_v22 = vsel %vm8310_vm4, %v8300_v62, %v9551_v13  ;;  %v16763_v60 = vld [vmem:[#allocation23_spill] sm:$0xff]  ;;  %v16764_v30 = vld [vmem:[#allocation64_spill] sm:$0xff] }
 0xa6c   : > { %v15764_v33 = vpop.permute.xlu0 %9554 }
 0xa74   : > { %v15762_v18 = vpop.permute.xlu1 %9569  ;;  %v15782_v25 = vpop.permute.xlu0 %9564 }
 0xa75   : > { %v15760_v32 = vpop.permute.xlu2 %9604  ;;  %v9571_v26 = vunpack.i.l.bf16 %v15762_v18 }
 0xa77   : > { %v8254_v9 = vsel %vm3169_vm6, %v16756_v0, %v9571_v26 }
 0xa78   : > { %v8287_v31 = vsel %vm8277_vm3, %v8254_v9, %v9492_v23  ;;  %v9556_v9 = vunpack.i.l.bf16 %v15764_v33 }
 0xa79   : > { %v8320_v29 = vsel %vm8310_vm4, %v8287_v31, %v9497_v63 }
 0xa7c   : > { %v15769_v34 = vpop.permute.xlu1 %9574  ;;  %v15802_v4 = vpop.permute.xlu0 %9579 }
 0xa7d   : > { %v9577_v38 = vunpack.i.h.bf16 %v15769_v34 }
 0xa7e   : > { %v15766_v27 = vpop.permute.xlu2 %9609 }
 0xa7f   : > { %v9611_v21 = vunpack.i.l.bf16 %v15766_v27  ;;  %v8252_v53 = vsel %vm3169_vm6, %v16759_v7, %v9577_v38  ;;  %v15854_v38 = vsel %vm8343_vm14, %v15756_v22, 1.0 }
 0xa80   : > { %v8285_v11 = vsel %vm8277_vm3, %v8252_v53, %v9482_v17  ;;  %v15861_v53 = vsel %vm8343_vm14, %v15753_v12, 1.0  ;;  %v9572_v17 = vunpack.i.h.bf16 %v15762_v18 }
 0xa81   : > { %v8258_v3 = vsel %vm3169_vm6, %v16755_v40, %v9611_v21  ;;  %v8318_v39 = vsel %vm8310_vm4, %v8285_v11, %v9487_v8  ;;  %v9491_v40 = vunpack.i.l.bf16 %v16757_v35  ;;  %v9612_v35 = vunpack.i.h.bf16 %v15766_v27  ;;  %v16768_v8 = vld [vmem:[#allocation16_spill] sm:$0xff] }
 0xa82   : > { %v8291_v49 = vsel %vm8277_vm3, %v8258_v3, %v9512_v58  ;;  %v15819_v42 = vsel %vm8343_vm14, %v8318_v39, 1.0  ;;  %v9496_v3 = vunpack.i.l.bf16 %v16758_v15  ;;  %v15848_v15 = vsel %vm8343_vm14, %v8320_v29, 1.0 }
 0xa83   : > { %v8324_v43 = vsel %vm8310_vm4, %v8291_v49, %v9517_v1  ;;  %v9325_v21 = vpack.c.bf16 %v15819_v42, %v15816_v20  ;;  %v9606_v29 = vunpack.i.l.bf16 %v15760_v32  ;;  %v9357_v22 = vpack.c.bf16 %v15861_v53, %v15854_v38 }
 0xa84   : > { %v8357_v2 = vsel %vm8343_vm14, %v8324_v43, 1.0  ;;  %v15787_v54 = vpop.permute.xlu1 %9584  ;;  %v16765_v43 = vld [vmem:[#allocation34_spill] sm:$0xff] }
 0xa85   : > { %v9316_v55 = vpack.c.bf16 %v8357_v2, %v8356_v19  ;;  %v9506_v2 = vunpack.i.l.bf16 %v16761_v44  ;;  %v16767_v44 = vld [vmem:[#allocation17_spill] sm:$0xff] }
 0xa87   : > { %9317 = vmatpush.bf16.msk.msra.mxu3 %vm15632_vm7, %v9316_v55  ;;  %v9557_v55 = vunpack.i.h.bf16 %v15764_v33  ;;  %v9607_v33 = vunpack.i.h.bf16 %v15760_v32 }
 0xa88   : > { %v15793_v6 = vpop.permute.xlu2 %9629 }
 0xa8c   : > { %v9590_v45 = vpop.permute.xlu1 %9589 }
 0xa8d   : > { %v9591_v59 = vunpack.i.l.bf16 %v9590_v45  ;;  %v9600_v58 = vpop.permute.xlu0 %9599  ;;  %v9592_v7 = vunpack.i.h.bf16 %v9590_v45  ;;  %v9581_v45 = vunpack.i.l.bf16 %v15802_v4 }
 0xa8e   : > { %v9602_v11 = vunpack.i.h.bf16 %v9600_v58  ;;  %v9601_v32 = vunpack.i.l.bf16 %v9600_v58  ;;  %v16770_v58 = vld [vmem:[#allocation63_spill] sm:$0xff] }
 0xa8f   : > { %v8256_v47 = vsel %vm3169_vm6, %v16762_v36, %v9591_v59  ;;  %v9576_v59 = vunpack.i.l.bf16 %v15769_v34  ;;  %v9631_v34 = vunpack.i.l.bf16 %v15793_v6 }
 0xa90   : > { %v9635_v24 = vpop.permute.xlu2 %9634  ;;  %v8289_v10 = vsel %vm8277_vm3, %v8256_v47, %v9502_v61  ;;  %v8275_v61 = vsel %vm3169_vm6, %v16766_v14, %v9612_v35 }
 0xa91   : > { %v9637_v16 = vunpack.i.h.bf16 %v9635_v24  ;;  %v9636_v37 = vunpack.i.l.bf16 %v9635_v24  ;;  %v15812_v41 = vsel %vm8310_vm4, %v8289_v10, %v9507_v56  ;;  %v9582_v24 = vunpack.i.h.bf16 %v15802_v4  ;;  %v16769_v4 = vld [vmem:[#allocation80_spill] sm:$0xff] }
 0xa92   : > { %v8273_v10 = vsel %vm3169_vm6, %v16768_v8, %v9592_v7  ;;  %v8272_v39 = vsel %vm3169_vm6, %v16769_v4, %v9576_v59  ;;  %v16772_v59 = vld [vmem:[#allocation11_spill] sm:$0xff]  ;;  %v9566_v8 = vunpack.i.l.bf16 %v15782_v25 }
 0xa93   : > { %v8314_v13 = vsel %vm8310_vm4, %v16763_v60, %v9637_v16  ;;  %v8313_v48 = vsel %vm8310_vm4, %v16764_v30, %v9636_v37  ;;  %v9587_v60 = vunpack.i.h.bf16 %v15787_v54  ;;  %v8270_v14 = vsel %vm3169_vm6, %v16772_v59, %v9557_v55 }
 0xa94   : > { %v9595_v62 = vpop.permute.xlu1 %9594  ;;  %v15830_v26 = vsel %vm8343_vm14, %v8314_v13, 1.0  ;;  %v15833_v49 = vsel %vm8343_vm14, %v8313_v48, 1.0  ;;  %v9632_v48 = vunpack.i.h.bf16 %v15793_v6 }
 0xa95   : > { %v9597_v1 = vunpack.i.h.bf16 %v9595_v62  ;;  %v9596_v23 = vunpack.i.l.bf16 %v9595_v62  ;;  %v9331_v63 = vpack.c.bf16 %v15830_v26, %v15833_v49 }
 0xa97   : > { %v8253_v19 = vsel %vm3169_vm6, %v16765_v43, %v9597_v1  ;;  %v8274_v12 = vsel %vm3169_vm6, %v16767_v44, %v9596_v23  ;;  %v8306_v43 = vsel %vm8277_vm3, %v8273_v10, %v9601_v32  ;;  %v9586_v23 = vunpack.i.l.bf16 %v15787_v54 }
 0xa98   : > { %v8286_v0 = vsel %vm8277_vm3, %v8253_v19, %v9491_v40  ;;  %v8307_v13 = vsel %vm8277_vm3, %v8274_v12, %v9602_v11  ;;  %v16771_v40 = vld [vmem:[#allocation21_spill] sm:$0xff]  ;;  %v16773_v12 = vld [vmem:[#allocation79_spill] sm:$0xff] }
 0xa99   : > { %v8319_v5 = vsel %vm8310_vm4, %v8286_v0, %v9496_v3  ;;  %v8340_v7 = vsel %vm8310_vm4, %v8307_v13, %v9607_v33 }
 0xa9a   : > { %v15845_v31 = vsel %vm8343_vm14, %v8319_v5, 1.0 }
 0xa9b   : > { %v9322_v27 = vpack.c.bf16 %v15848_v15, %v15845_v31 }
 0xaa0   : > { %v9625_v56 = vpop.permute.xlu0 %9624 }
 0xaa1   : > { %v9627_v36 = vunpack.i.h.bf16 %v9625_v56  ;;  %v9626_v18 = vunpack.i.l.bf16 %v9625_v56  ;;  %v9615_v47 = vpop.permute.xlu1 %9614  ;;  %v8271_v56 = vsel %vm3169_vm6, %v16773_v12, %v9572_v17 }
 0xaa2   : > { %v9617_v16 = vunpack.i.h.bf16 %v9615_v47  ;;  %v9616_v37 = vunpack.i.l.bf16 %v9615_v47  ;;  %v8304_v55 = vsel %vm8277_vm3, %v8271_v56, %v9581_v45  ;;  %v16778_v56 = vld [vmem:[#allocation15_spill] sm:$0xff] }
 0xaa3   : > { %v8308_v30 = vsel %vm8277_vm3, %v8275_v61, %v9626_v18  ;;  %v8305_v18 = vsel %vm8277_vm3, %v8272_v39, %v9582_v24  ;;  %v8337_v17 = vsel %vm8310_vm4, %v8304_v55, %v9586_v23  ;;  %v15920_v24 = vpop.permute.xlu2 %9649  ;;  %v16777_v23 = vld [vmem:[#allocation56_spill] sm:$0xff]  ;;  %v16780_v55 = vld [vmem:[#allocation55_spill] sm:$0xff] }
 0xaa4   : > { %v8341_v62 = vsel %vm8310_vm4, %v8308_v30, %v9631_v34  ;;  %v8255_v1 = vsel %vm3169_vm6, %v16770_v58, %v9617_v16  ;;  %v8276_v3 = vsel %vm3169_vm6, %v16771_v40, %v9616_v37  ;;  %v8373_v34 = vsel %vm8343_vm14, %v8340_v7, 1.0 }
 0xaa5   : > { %v8374_v19 = vsel %vm8343_vm14, %v8341_v62, 1.0  ;;  %v8288_v0 = vsel %vm8277_vm3, %v8255_v1, %v9501_v46  ;;  %v8309_v35 = vsel %vm8277_vm3, %v8276_v3, %v9627_v36  ;;  %v8355_v46 = vsel %vm8343_vm14, %v15812_v41, 1.0  ;;  %v16774_v36 = vld [vmem:[#allocation7_spill] sm:$0xff] }
 0xaa6   : > { %v8342_v6 = vsel %vm8310_vm4, %v8309_v35, %v9632_v48  ;;  %v8321_v5 = vsel %vm8310_vm4, %v8288_v0, %v9506_v2  ;;  %v8339_v2 = vsel %vm8310_vm4, %v8306_v43, %v9606_v29  ;;  %v8269_v33 = vsel %vm3169_vm6, %v16774_v36, %v9556_v9  ;;  %v16776_v35 = vld [vmem:[#allocation74_spill] sm:$0xff] }
 0xaa7   : > { %v8375_v61 = vsel %vm8343_vm14, %v8342_v6, 1.0  ;;  %v8354_v44 = vsel %vm8343_vm14, %v8321_v5, 1.0  ;;  %v9567_v41 = vunpack.i.h.bf16 %v15782_v25  ;;  %v8338_v10 = vsel %vm8310_vm4, %v8305_v18, %v9587_v60 }
 0xaa8   : > { %v9640_v54 = vpop.permute.xlu0 %9639  ;;  %v9319_v11 = vpack.c.bf16 %v8355_v46, %v8354_v44  ;;  %v9345_v32 = vpack.c.bf16 %v8375_v61, %v8374_v19  ;;  %v9562_v9 = vunpack.i.h.bf16 %v15758_v57  ;;  %v9561_v29 = vunpack.i.l.bf16 %v15758_v57  ;;  %v16775_v57 = vld [vmem:[#allocation61_spill] sm:$0xff]  ;;  %v8425_v46 = vld [vmem:[%s10572_s28] sm:$0xff] }
 0xaa9   : > { %v9620_v47 = vpop.permute.xlu1 %9619  ;;  %v8372_v45 = vsel %vm8343_vm14, %v8339_v2, 1.0  ;;  %v8370_v4 = vsel %vm8343_vm14, %v8337_v17, 1.0  ;;  %v8371_v39 = vsel %vm8343_vm14, %v8338_v10, 1.0  ;;  %v9452_v62 = vunpack.i.h.bf16 %v16775_v57 }
 0xaaa   : > { %9320 = vmatpush.bf16.msk.msra.mxu3 %vm15632_vm7, %v9319_v11  ;;  %9346 = vmatpush.bf16.msk.msra.mxu1 %vm15632_vm7, %v9345_v32  ;;  %v9348_v16 = vpack.c.bf16 %v8373_v34, %v8372_v45  ;;  %v8302_v25 = vsel %vm8277_vm3, %v8269_v33, %v9561_v29  ;;  %v8303_v37 = vsel %vm8277_vm3, %v8270_v14, %v9562_v9  ;;  %v9622_v30 = vunpack.i.h.bf16 %v9620_v47 }
 0xaab   : > { %v8335_v60 = vsel %vm8310_vm4, %v8302_v25, %v9566_v8  ;;  %v8336_v13 = vsel %vm8310_vm4, %v8303_v37, %v9567_v41  ;;  %v9621_v48 = vunpack.i.l.bf16 %v9620_v47  ;;  %v9451_v58 = vunpack.i.l.bf16 %v16775_v57  ;;  %v9665_v11 = vpop.permute.xlu2 %9664  ;;  %v16781_v47 = vld [vmem:[#allocation54_spill] sm:$0xff] }
 0xaac   : > { %v9351_v40 = vpack.c.bf16 %v8371_v39, %v8370_v4  ;;  %v8427_v3 = vlaneseq  ;;  %v8368_v43 = vsel %vm8343_vm14, %v8335_v60, 1.0  ;;  %v8369_v19 = vsel %vm8343_vm14, %v8336_v13, 1.0 }
 0xaad   : > { %v9642_v0 = vunpack.i.h.bf16 %v9640_v54  ;;  %v9641_v31 = vunpack.i.l.bf16 %v9640_v54  ;;  %v8265_v6 = vsel %vm3169_vm6, %v16777_v23, %v9621_v48  ;;  %v9652_v61 = vunpack.i.h.bf16 %v15920_v24  ;;  %v16782_v23 = vld [vmem:[#allocation53_spill] sm:$0xff] }
 0xaae   : > { %9323 = vmatpush.bf16.msk.msra.mxu3 %vm15632_vm7, %v9322_v27  ;;  %9349 = vmatpush.bf16.msk.msra.mxu1 %vm15632_vm7, %v9348_v16  ;;  %v8266_v27 = vsel %vm3169_vm6, %v16776_v35, %v9622_v30  ;;  %v9354_v44 = vpack.c.bf16 %v8369_v19, %v8368_v43  ;;  %v15953_v12 = vshrl.u32 %v8427_v3, 7  ;;  %v8246_v54 = vsel %vm3169_vm6, %v16778_v56, %v9452_v62 }
 0xaaf   : > { %v8298_v20 = vsel %vm8277_vm3, %v8265_v6, %v9641_v31  ;;  %v8299_v42 = vsel %vm8277_vm3, %v8266_v27, %v9642_v0  ;;  %v9651_v33 = vunpack.i.l.bf16 %v15920_v24  ;;  %v15975_v41 = vperm.slane %v8425_v46, 0 }
 0xab0   : > { %v9655_v1 = vpop.permute.xlu0 %9654  ;;  %v8279_v8 = vsel %vm8277_vm3, %v8246_v54, %v9652_v61  ;;  %v9667_v17 = vunpack.i.h.bf16 %v9665_v11  ;;  %v9666_v50 = vunpack.i.l.bf16 %v9665_v11  ;;  %v10284_v31 = vmov 1.0|1.0  }
 0xab1   : > { %v9645_v15 = vpop.permute.xlu1 %9644  ;;  %v9657_v59 = vunpack.i.h.bf16 %v9655_v1  ;;  %v9656_v14 = vunpack.i.l.bf16 %v9655_v1  ;;  %vm8438_vm10 = vcmp.eq.s32.totalorder %v15953_v12, %v15975_v41  ;;  %v8430_v11 = vadd.s32 16, %v15953_v12 }
 0xab2   : > { %v9647_v5 = vunpack.i.h.bf16 %v9645_v15  ;;  %v9646_v7 = vunpack.i.l.bf16 %v9645_v15  ;;  %9326 = vmatpush.bf16.msk.msra.mxu3 %vm15632_vm7, %v9325_v21  ;;  %9352 = vmatpush.bf16.msk.msra.mxu1 %vm15632_vm7, %v9351_v40  ;;  %v16779_v21 = vld [vmem:[#allocation42_spill] sm:$0xff]  ;;  %v8434_v52 = vadd.s32 48, %v15953_v12 }
 0xab3   : > { %v8245_v32 = vsel %vm3169_vm6, %v16779_v21, %v9451_v58  ;;  %v8264_v18 = vsel %vm3169_vm6, %v16780_v55, %v9657_v59  ;;  %v8263_v34 = vsel %vm3169_vm6, %v16781_v47, %v9656_v14  ;;  %v9680_v57 = vpop.permute.xlu2 %9679  ;;  %v8426_v58 = vld [vmem:[%s10572_s28 + $0x8] sm:$0xff]  ;;  %v8433_v21 = vadd.s32 40, %v15953_v12  ;;  %s10285_s28 = smov [#allocation3]  }
 0xab4   : > { %v8331_v2 = vsel %vm8310_vm4, %v8298_v20, %v9646_v7  ;;  %v8332_v36 = vsel %vm8310_vm4, %v8299_v42, %v9647_v5  ;;  %v8296_v16 = vsel %vm8277_vm3, %v8263_v34, %v9666_v50  ;;  %v8297_v25 = vsel %vm8277_vm3, %v8264_v18, %v9667_v17  ;;  %v16783_v5 = vld [vmem:[#allocation52_spill] sm:$0xff]  ;;  %s8584_s13 = sshll.u32 %s10285_s28, 4  ;;  %s8585_s13 = int_to_ptr.vmem [resolvable:$true] %s8584_s13 }
 0xab5   : > { %v8364_v10 = vsel %vm8343_vm14, %v8331_v2, 1.0  ;;  %v8365_v9 = vsel %vm8343_vm14, %v8332_v36, 1.0  ;;  %v8278_v39 = vsel %vm8277_vm3, %v8245_v32, %v9651_v33  ;;  %v9682_v19 = vunpack.i.h.bf16 %v9680_v57  ;;  %v8494_v36 = vld [vmem:[#allocation3] sm:$0xff] }
 0xab6   : > { %9329 = vmatpush.bf16.msk.msra.mxu3 %vm15632_vm7, %v9328_v51  ;;  %9355 = vmatpush.bf16.msk.msra.mxu1 %vm15632_vm7, %v9354_v44  ;;  %v8429_v51 = vadd.s32 8, %v15953_v12  ;;  %v9681_v0 = vunpack.i.l.bf16 %v9680_v57  ;;  %v8437_v15 = vperm.slane %v8426_v58, 0  ;;  %v8431_v20 = vadd.s32 24, %v15953_v12  ;;  %v8501_v58 = vld [vmem:[#allocation3 + $0x38] sm:$0xff] }
 0xab7   : > { %v8432_v42 = vadd.s32 32, %v15953_v12  ;;  %v8435_v32 = vadd.s32 56, %v15953_v12 }
 0xab8   : > { %v9670_v28 = vpop.permute.xlu0 %9669  ;;  %vm8440_vm9 = vcmp.eq.s32.totalorder %v8429_v51, %v15975_v41  ;;  %vm8439_vm11 = vcmp.eq.s32.totalorder %v15953_v12, %v8437_v15  ;;  %vm8441_vm13 = vcmp.eq.s32.totalorder %v8429_v51, %v8437_v15  ;;  %vm8445_vm2 = vcmp.eq.s32.totalorder %v8431_v20, %v8437_v15  ;;  %v8495_v12 = vld [vmem:[#allocation3 + $0x8] sm:$0xff] }
 0xab9   : > { %v9672_v29 = vunpack.i.h.bf16 %v9670_v28  ;;  %v9671_v24 = vunpack.i.l.bf16 %v9670_v28  ;;  %v9660_v45 = vpop.permute.xlu1 %9659  ;;  %vm9336_vm1 = vmpackc.low %vm8440_vm9, %vm8438_vm10  ;;  %vm8446_vm12 = vcmp.eq.s32.totalorder %v8432_v42, %v15975_v41  ;;  %vm8447_vm8 = vcmp.eq.s32.totalorder %v8432_v42, %v8437_v15 }
 0xaba   : > { %v9662_v37 = vunpack.i.h.bf16 %v9660_v45  ;;  %v9661_v4 = vunpack.i.l.bf16 %v9660_v45  ;;  %9332 = vmatpush.bf16.msk.msra.mxu3 %vm15632_vm7, %v9331_v63  ;;  %9358 = vmatpush.bf16.msk.msra.mxu1 %vm15632_vm7, %v9357_v22  ;;  %v9360_v63 = vpack.c.bf16 %v8365_v9, %v8364_v10  ;;  %vm8449_vm10 = vcmp.eq.s32.totalorder %v8433_v21, %v8437_v15 }
 0xabb   : > { %v8329_v60 = vsel %vm8310_vm4, %v8296_v16, %v9671_v24  ;;  %v8330_v13 = vsel %vm8310_vm4, %v8297_v25, %v9672_v29  ;;  %vm9372_vm9 = vmpackc.low %vm8449_vm10, %vm8447_vm8  ;;  %v8497_v29 = vld [vmem:[#allocation3 + $0x18] sm:$0xff] }
 0xabc   : > { %v8312_v26 = vsel %vm8310_vm4, %v8279_v8, %v9662_v37  ;;  %v8311_v49 = vsel %vm8310_vm4, %v8278_v39, %v9661_v4  ;;  %v8362_v38 = vsel %vm8343_vm14, %v8329_v60, 1.0  ;;  %v8363_v53 = vsel %vm8343_vm14, %v8330_v13, 1.0  ;;  %v8498_v37 = vld [vmem:[#allocation3 + $0x20] sm:$0xff] }
 0xabd   : > { %v8345_v22 = vsel %vm8343_vm14, %v8312_v26, 1.0  ;;  %v8344_v30 = vsel %vm8343_vm14, %v8311_v49, 1.0  ;;  %v9363_v62 = vpack.c.bf16 %v8363_v53, %v8362_v38  ;;  %v8499_v26 = vld [vmem:[#allocation3 + $0x28] sm:$0xff] }
 0xabe   : > { %9361 = vmatpush.bf16.msk.msra.mxu1 %vm15632_vm7, %v9360_v63  ;;  %v9334_v48 = vpack.c.bf16 %v8345_v22, %v8344_v30  ;;  %v8500_v22 = vld [vmem:[#allocation3 + $0x30] sm:$0xff] }
 0xac0   : > { %9335 = vmatpush.bf16.msk.msra.mxu3 %vm15632_vm7, %v9334_v48  ;;  %v9685_v1 = vpop.permute.xlu0 %9684 }
 0xac1   : > { %v9675_v40 = vpop.permute.xlu1 %9674  ;;  %v9687_v35 = vunpack.i.h.bf16 %v9685_v1  ;;  %v9686_v27 = vunpack.i.l.bf16 %v9685_v1 }
 0xac2   : > { %v9677_v3 = vunpack.i.h.bf16 %v9675_v40  ;;  %v9676_v43 = vunpack.i.l.bf16 %v9675_v40  ;;  %9364 = vmatpush.bf16.msk.msra.mxu1 %vm15632_vm7, %v9363_v62 }
 0xac3   : > { %9337 = vmatmul.msk.bf16.vlgmr.msra.gmra.mxu3 %vm9336_vm1, %v10284_v31  ;;  %vm8450_vm1 = vcmp.eq.s32.totalorder %v8434_v52, %v15975_v41 }
 0xac4   : > { %v8262_v6 = vsel %vm3169_vm6, %v16782_v23, %v9677_v3  ;;  %v8261_v7 = vsel %vm3169_vm6, %v16783_v5, %v9676_v43  ;;  %vm9368_vm6 = vmpackc.low %vm8441_vm13, %vm8439_vm11  ;;  %vm8452_vm11 = vcmp.eq.s32.totalorder %v8435_v32, %v15975_v41 }
 0xac5   : > { %v8295_v59 = vsel %vm8277_vm3, %v8262_v6, %v9682_v19  ;;  %v8294_v14 = vsel %vm8277_vm3, %v8261_v7, %v9681_v0  ;;  %vm8442_vm3 = vcmp.eq.s32.totalorder %v8430_v11, %v15975_v41  ;;  %vm9342_vm13 = vmpackc.low %vm8452_vm11, %vm8450_vm1 }
 0xac6   : > { %v8327_v61 = vsel %vm8310_vm4, %v8294_v14, %v9686_v27  ;;  %v8328_v44 = vsel %vm8310_vm4, %v8295_v59, %v9687_v35  ;;  %vm8444_vm4 = vcmp.eq.s32.totalorder %v8431_v20, %v15975_v41 }
 0xac7   : > { %v8360_v46 = vsel %vm8343_vm14, %v8327_v61, 1.0  ;;  %v8361_v56 = vsel %vm8343_vm14, %v8328_v44, 1.0  ;;  %vm9338_vm15 = vmpackc.low %vm8444_vm4, %vm8442_vm3  ;;  %vm8443_vm14 = vcmp.eq.s32.totalorder %v8430_v11, %v8437_v15  ;;  %vm8453_vm3 = vcmp.eq.s32.totalorder %v8435_v32, %v8437_v15 }
 0xac8   : > { %v9366_v54 = vpack.c.bf16 %v8361_v56, %v8360_v46  ;;  %vm9370_vm5 = vmpackc.low %vm8445_vm2, %vm8443_vm14 }
 0xaca   : > { %9367 = vmatpush.bf16.msk.msra.mxu1 %vm15632_vm7, %v9366_v54  ;;  %vm8448_vm7 = vcmp.eq.s32.totalorder %v8433_v21, %v15975_v41  ;;  %v8496_v41 = vld [vmem:[#allocation3 + $0x10] sm:$0xff] }
 0xacb   : > { %vm9340_vm0 = vmpackc.low %vm8448_vm7, %vm8446_vm12 }
 0xacd   : > { %9369 = vmatmul.msk.bf16.vlgmr.msra.gmra.mxu1 %vm9368_vm6, %v10284_v31  ;;  %vm8451_vm6 = vcmp.eq.s32.totalorder %v8434_v52, %v8437_v15 }
 0xace   : > { %vm9374_vm4 = vmpackc.low %vm8453_vm3, %vm8451_vm6 }
 0xad3   : > { %9339 = vmatmul.msk.bf16.gmra.mxu3 %vm9338_vm15, %v10284_v31 }
 0xadd   : > { %9371 = vmatmul.msk.bf16.gmra.mxu1 %vm9370_vm5, %v10284_v31 }
 0xae3   : > { %9341 = vmatmul.msk.bf16.gmra.mxu3 %vm9340_vm0, %v10284_v31 }
 0xaed   : > { %9373 = vmatmul.msk.bf16.gmra.mxu1 %vm9372_vm9, %v10284_v31 }
 0xaf3   : > { %9343 = vmatmul.msk.bf16.gmra.mxu3 %vm9342_vm13, %v10284_v31 }
 0xafd   : > { %9375 = vmatmul.msk.bf16.gmra.mxu1 %vm9374_vm4, %v10284_v31 }
 0xb46   : > { %v8511_v2 = vpop.f32.mrf.mxu3 }
 0xb4a   : > { %v8540_v33 = vpop.f32.mrf.mxu1 }
 0xb4b   : > { %v8541_v55 = vadd.f32 %v8540_v33, %v8511_v2 }
 0xb4d   : > { %v8560_v18 = vadd.f32 %v8541_v55, %v8494_v36 }
 0xb4e   : > { %v8513_v47 = vpop.f32.mrf.mxu3 }
 0xb4f   : > { %8568 = vst [vmem:[#allocation3] sm:$0xff] %v8560_v18 }
 0xb52   : > { %v8542_v34 = vpop.f32.mrf.mxu1 }
 0xb53   : > { %v8543_v8 = vadd.f32 %v8542_v34, %v8513_v47 }
 0xb55   : > { %v8561_v17 = vadd.f32 %v8543_v8, %v8495_v12 }
 0xb56   : > { %v8516_v50 = vpop.f32.mrf.mxu3 }
 0xb57   : > { %8569 = vst [vmem:[#allocation3 + $0x8] sm:$0xff] %v8561_v17 }
 0xb5a   : > { %v8545_v28 = vpop.f32.mrf.mxu1 }
 0xb5b   : > { %v8546_v51 = vadd.f32 %v8545_v28, %v8516_v50 }
 0xb5d   : > { %v8562_v10 = vadd.f32 %v8546_v51, %v8496_v41 }
 0xb5e   : > { %v8518_v9 = vpop.f32.mrf.mxu3 }
 0xb5f   : > { %8570 = vst [vmem:[#allocation3 + $0x10] sm:$0xff] %v8562_v10 }
 0xb62   : > { %v8547_v24 = vpop.f32.mrf.mxu1 }
 0xb63   : > { %v8548_v45 = vadd.f32 %v8547_v24, %v8518_v9 }
 0xb65   : > { %v8563_v16 = vadd.f32 %v8548_v45, %v8497_v29 }
 0xb66   : > { %v8521_v25 = vpop.f32.mrf.mxu3 }
 0xb67   : > { %8571 = vst [vmem:[#allocation3 + $0x18] sm:$0xff] %v8563_v16 }
 0xb6a   : > { %v8550_v4 = vpop.f32.mrf.mxu1 }
 0xb6b   : > { %v8551_v39 = vadd.f32 %v8550_v4, %v8521_v25 }
 0xb6d   : > { %v8564_v60 = vadd.f32 %v8551_v39, %v8498_v37 }
 0xb6e   : > { %v8523_v13 = vpop.f32.mrf.mxu3 }
 0xb6f   : > { %8572 = vst [vmem:[#allocation3 + $0x20] sm:$0xff] %v8564_v60 }
 0xb72   : > { %v8552_v49 = vpop.f32.mrf.mxu1 }
 0xb73   : > { %v8553_v63 = vadd.f32 %v8552_v49, %v8523_v13 }
 0xb75   : > { %v8565_v38 = vadd.f32 %v8553_v63, %v8499_v26 }
 0xb76   : > { %v8526_v53 = vpop.f32.mrf.mxu3 }
 0xb77   : > { %8573 = vst [vmem:[#allocation3 + $0x28] sm:$0xff] %v8565_v38 }
 0xb7a   : > { %v8555_v30 = vpop.f32.mrf.mxu1 }
 0xb7b   : > { %v8556_v48 = vadd.f32 %v8555_v30, %v8526_v53 }
 0xb7d   : > { %v8566_v57 = vadd.f32 %v8556_v48, %v8500_v22 }
 0xb7e   : > { %v8528_v62 = vpop.f32.mrf.mxu3 }
 0xb7f   : > { %8574 = vst [vmem:[#allocation3 + $0x30] sm:$0xff] %v8566_v57 }
 0xb82   : > { %v8557_v1 = vpop.f32.mrf.mxu1 }
 0xb83   : > { %v8558_v40 = vadd.f32 %v8557_v1, %v8528_v62 }
 0xb85   : > { %v8567_v3 = vadd.f32 %v8558_v40, %v8501_v58 }
 0xb87   : > { %8575 = vst [vmem:[#allocation3 + $0x38] sm:$0xff] %v8567_v3 }
 0xb88   : > { %9394 = dma.vmem_to_hbm [thread:$0]  (%p9397_p12), %s8585_s13, 1024, %s8587_s19, [#allocation4], %s10286_s20, %s10286_s20, %s10287_s29  }
 0xb89   : > { %10256 = dma.done.wait (%p9397_p12), [#allocation4], 1024  }
 0xb8a   : > { %10258 = vsyncadd (%p9397_p12), [#allocation4], 4294966272 }
 0xb8b PF: > { %s17_s25 = sadd.s32 1, %s10277_s25   ;;  %s16784_s21 = smov %s10265_s22 }
 0xb8c   : > { %p14_p13 = scmp.ge.s32.totalorder %s17_s25, 6   ;;  %s16785_s22 = smov %s10359_s30 }
 0xb8d   : > { %s16786_s23 = smov %s10273_s24  ;;  %s16787_s24 = smov %s16789_s27 }
 0xb8e   :  { %16 = sbr.rel (!%p14_p13) target bundleno = 3 (0x3), region = 125 }
 0xb93   :  { %8603 = vsyncpa [#allocation4], 1 }
 0xb94   :  { %8605 = vsyncpa [#allocation4 + $0x1], 1 }

</bundles_post_ra>
